<compile_context>
chip_gen: v7x
topology: tpu7x:2x2x1
jax: 0.10.0
libtpu: 0.0.40
codegen_flags: <defaults>
</compile_context>

<pallas_src>
import functools

import jax
import jax.numpy as jnp
from jax.experimental import pallas as pl
from jax.experimental.pallas import tpu as pltpu


def _round_up(x, m):
    return (x + m - 1) // m * m


# ----------------------------------------------------------------------------
# Pallas kernel: fused im2col + conv3x3-as-one-matmul + (folded-BN) bias + ReLU
# ----------------------------------------------------------------------------
def _decoder_kernel(lo_ref, hi_ref, w_ref, bias_ref, o_ref, col_ref, *,
                    TH, W, C_lo, C_hi, C_lo_pad, C_hi_pad, Cout_pad):
    # lo_ref:   (1, H+2, W+2, C_lo)   bf16, spatially pre-padded, resident per batch
    # hi_ref:   (1, H+2, W+2, C_hi)   bf16, spatially pre-padded, resident per batch
    # w_ref:    (9*Cslot, Cout_pad)   bf16, tap-major, BN scale folded, zero pad rows
    # bias_ref: (1, Cout_pad)         f32, beta + scale*(conv_b - mean), 0 on pad
    # o_ref:    (1, TH, W, Cout_pad)  f32 output row tile
    # col_ref:  (TH, W, 9*Cslot)      bf16 VMEM im2col scratch
    Cslot = C_lo_pad + C_hi_pad
    pad_lo = C_lo_pad - C_lo
    pad_hi = C_hi_pad - C_hi
    h0 = pl.multiple_of(pl.program_id(1) * TH, TH)

    # Hoisted zero fillers for the lane-padding of each tap slot (kept out of
    # the loop: JAX does not CSE broadcast_in_dim).
    zeros_lo = jnp.zeros((TH, W, pad_lo), jnp.bfloat16) if pad_lo else None
    zeros_hi = jnp.zeros((TH, W, pad_hi), jnp.bfloat16) if pad_hi else None

    # im2col: every tap-slot base (tap*Cslot and tap*Cslot + C_lo_pad) is a
    # multiple of 128 -> lane-aligned stores.  One VMEM load per (dy, source);
    # the three dx windows are sliced from the in-register band.
    for dy in range(3):
        lo_band = lo_ref[0, pl.ds(h0 + dy, TH), :, :]      # (TH, W+2, C_lo)
        hi_band = hi_ref[0, pl.ds(h0 + dy, TH), :, :]      # (TH, W+2, C_hi)
        for dx in range(3):
            base = (dy * 3 + dx) * Cslot
            col_ref[:, :, base:base + C_lo] = lo_band[:, dx:dx + W, :]
            if pad_lo:
                col_ref[:, :, base + C_lo:base + C_lo_pad] = zeros_lo
            col_ref[:, :, base + C_lo_pad:base + C_lo_pad + C_hi] = \
                hi_band[:, dx:dx + W, :]
            if pad_hi:
                col_ref[:, :, base + C_lo_pad + C_hi:base + Cslot] = zeros_hi

    # Single big-K MXU matmul with f32 accumulation, then bias + ReLU epilogue
    # (BN scale already folded into the weight columns at prep time).
    lhs = col_ref[...].reshape(TH * W, 9 * Cslot)                    # bf16
    acc = jnp.dot(lhs, w_ref[...], preferred_element_type=jnp.float32)
    y = jnp.maximum(acc + bias_ref[...], 0.0)
    o_ref[...] = y.reshape(1, TH, W, Cout_pad).astype(o_ref.dtype)


def _pick_row_tile(H, W, k_total):
    """Largest divisor TH of H with matmul M = TH*W <= 512 rows and the bf16
    im2col scratch under ~6 MiB (leaves VMEM headroom, incl. on v7x)."""
    budget = 6 * 1024 * 1024
    best = 1
    for th in range(2, H + 1):
        if H % th:
            continue
        if th * W > 512:
            continue
        if th * W * k_total * 2 > budget:
            continue
        best = th
    return best


def _vmem_limit_bytes():
    # 64 MiB is comfortable on v5e/v6e (128 MiB physical); keep headroom on
    # v7x (64 MiB physical) by capping at ~3/4 of the reported capacity.
    try:
        cap = int(pltpu.get_tpu_info().vmem_capacity_bytes)
    except Exception:
        cap = 128 * 1024 * 1024
    return int(min(64 * 1024 * 1024, cap * 3 // 4))


def conv_bn_relu_pallas(low_nhwc, high_nhwc, params):
    """low/high: (N,H,W,C*) f32 NHWC.  Returns (N, H, W, Cout_pad) f32."""
    N, H, W, C_lo = low_nhwc.shape
    C_hi = high_nhwc.shape[-1]
    assert C_lo == params["c_lo"] and C_hi == params["c_hi"]
    C_lo_pad, C_hi_pad = params["c_lo_pad"], params["c_hi_pad"]
    Cslot = C_lo_pad + C_hi_pad
    Cout_pad = params["cout_pad"]

    # bf16 activations (MXU-native, half the HBM/VMEM bytes); the cast and the
    # conv zero-pad fuse into a single XLA pass per input.  No fused
    # low||high tensor is ever materialized in HBM.
    lo_pad = jnp.pad(low_nhwc.astype(jnp.bfloat16),
                     ((0, 0), (1, 1), (1, 1), (0, 0)))
    hi_pad = jnp.pad(high_nhwc.astype(jnp.bfloat16),
                     ((0, 0), (1, 1), (1, 1), (0, 0)))
    bias2 = params["bias"].reshape(1, Cout_pad).astype(jnp.float32)
    w2d = params["w2d"]

    TH = _pick_row_tile(H, W, 9 * Cslot)
    grid = (N, H // TH)

    kernel = functools.partial(
        _decoder_kernel, TH=TH, W=W, C_lo=C_lo, C_hi=C_hi,
        C_lo_pad=C_lo_pad, C_hi_pad=C_hi_pad, Cout_pad=Cout_pad)

    return pl.pallas_call(
        kernel,
        out_shape=jax.ShapeDtypeStruct((N, H, W, Cout_pad), jnp.float32),
        grid_spec=pltpu.PrefetchScalarGridSpec(
            num_scalar_prefetch=0,
            grid=grid,
            in_specs=[
                # Padded images stay resident across the row-tile axis (index
                # map ignores h -> one DMA per batch).  For very large images
                # on v7x (64 MiB VMEM) switch to halo row tiles / manual DMA.
                pl.BlockSpec((1, H + 2, W + 2, C_lo), lambda n, h: (n, 0, 0, 0)),
                pl.BlockSpec((1, H + 2, W + 2, C_hi), lambda n, h: (n, 0, 0, 0)),
                pl.BlockSpec((9 * Cslot, Cout_pad), lambda n, h: (0, 0)),
                pl.BlockSpec((1, Cout_pad), lambda n, h: (0, 0)),
            ],
            out_specs=pl.BlockSpec((1, TH, W, Cout_pad),
                                   lambda n, h: (n, h, 0, 0)),
            scratch_shapes=[pltpu.VMEM((TH, W, 9 * Cslot), jnp.bfloat16)],
        ),
        compiler_params=pltpu.CompilerParams(
            dimension_semantics=("parallel", "parallel"),
            vmem_limit_bytes=_vmem_limit_bytes(),
        ),
    )(lo_pad, hi_pad, w2d, bias2)


# ----------------------------------------------------------------------------
# Glue (NHWC end-to-end): bilinear 2x upsample, matches
# F.interpolate(scale_factor=2, mode='bilinear', align_corners=False)
# ----------------------------------------------------------------------------
def _nchw_to_nhwc(x):
    return jnp.transpose(x, (0, 2, 3, 1))


def _nhwc_to_nchw(x):
    return jnp.transpose(x, (0, 3, 1, 2))


def upsample2x_bilinear_nhwc(x):
    N, H, W, C = x.shape

    def idx(out_size, in_size):
        o = jnp.arange(out_size, dtype=jnp.float32)
        real = (o + 0.5) * (in_size / out_size) - 0.5
        real = jnp.maximum(real, 0.0)
        i0 = jnp.minimum(jnp.floor(real).astype(jnp.int32), in_size - 1)
        frac = real - i0.astype(jnp.float32)
        i1 = jnp.minimum(i0 + 1, in_size - 1)
        return i0, i1, frac

    h0, h1, fh = idx(2 * H, H)
    w0, w1, fw = idx(2 * W, W)
    fh = fh[None, :, None, None]
    fw = fw[None, None, :, None]
    top = x[:, h0, :, :] * (1.0 - fh) + x[:, h1, :, :] * fh
    return top[:, :, w0, :] * (1.0 - fw) + top[:, :, w1, :] * fw


# ----------------------------------------------------------------------------
# Decoder params (deterministic synthetic, PyTorch-style init) + forward
# ----------------------------------------------------------------------------
def make_decoder_params(in_channel_high, in_channel_low, out_channel, key):
    c_lo, c_hi, cout = in_channel_low, in_channel_high, out_channel
    cin = c_lo + c_hi
    c_lo_pad = _round_up(c_lo, 128)
    c_hi_pad = _round_up(c_hi, 128)
    cout_pad = _round_up(cout, 128)
    cslot = c_lo_pad + c_hi_pad

    k_w, k_b = jax.random.split(key)
    fan_in = cin * 9
    bound = float(fan_in) ** -0.5
    # PyTorch Conv2d layout (Cout, Cin, 3, 3)
    w_oihw = jax.random.uniform(k_w, (cout, cin, 3, 3), jnp.float32,
                                -bound, bound)
    conv_b = jax.random.uniform(k_b, (cout,), jnp.float32, -bound, bound)

    # BatchNorm2d eval-mode defaults.  Fold gamma/sqrt(var+eps) into the conv
    # weights and (conv_b - mean) into a single bias -> kernel epilogue is
    # just add + ReLU.
    gamma = jnp.ones((cout,), jnp.float32)
    beta = jnp.zeros((cout,), jnp.float32)
    run_mean = jnp.zeros((cout,), jnp.float32)
    run_var = jnp.ones((cout,), jnp.float32)
    eps = 1e-5
    scale = gamma / jnp.sqrt(run_var + eps)
    bias = beta + scale * (conv_b - run_mean)

    w_hwio = jnp.transpose(w_oihw * scale[:, None, None, None], (2, 3, 1, 0))
    # Per-tap K slot layout: [low | 0-pad to 128k | high | 0-pad to 128k] so
    # every im2col store base inside the kernel is 128-lane aligned; zero rows
    # contribute nothing to the matmul.  Cout is also padded to 128 lanes.
    w_lo = jnp.pad(w_hwio[:, :, :c_lo, :],
                   ((0, 0), (0, 0), (0, c_lo_pad - c_lo), (0, cout_pad - cout)))
    w_hi = jnp.pad(w_hwio[:, :, c_lo:, :],
                   ((0, 0), (0, 0), (0, c_hi_pad - c_hi), (0, cout_pad - cout)))
    w_slot = jnp.concatenate([w_lo, w_hi], axis=2)      # (3, 3, Cslot, Cout_pad)
    w2d = w_slot.reshape(9 * cslot, cout_pad).astype(jnp.bfloat16)

    bias = jnp.pad(bias, (0, cout_pad - cout))          # 0 on pad -> relu(0)=0

    return {"w2d": w2d, "bias": bias, "out_channel": cout, "cout_pad": cout_pad,
            "c_lo": c_lo, "c_hi": c_hi, "c_lo_pad": c_lo_pad,
            "c_hi_pad": c_hi_pad, "cslot": cslot}


def decoder_forward(low, high, params):
    """low, high: NCHW float32 (like the PyTorch module).  Returns NCHW f32."""
    low = _nchw_to_nhwc(low)
    high = _nchw_to_nhwc(high)
    # TODO(synk): fusing the 2x bilinear upsample + pad + bf16 cast into the
    # Pallas kernel (reading `low` at native resolution while building the
    # im2col columns) would remove ~4-5x of the `low` HBM traffic; kept as a
    # fused XLA pass here for robustness.
    while low.shape[1] != high.shape[1]:
        low = upsample2x_bilinear_nhwc(low)
    assert low.shape[2] == high.shape[2], "W mismatch after upsampling"

    out = conv_bn_relu_pallas(low, high, params)
    # Channel-slice + NCHW transpose fuse into a single XLA copy.
    out = out[..., :params["out_channel"]]
    # TODO(synk): dropout(p=0.1) is identity in eval mode; training-mode RNG
    # dropout is not replicated.
    return _nhwc_to_nchw(out)


# ----------------------------------------------------------------------------
# Pure-JAX reference for self-check (same bf16 weight/activation quantization)
# ----------------------------------------------------------------------------
def decoder_forward_ref(low, high, params):
    low = _nchw_to_nhwc(low)
    high = _nchw_to_nhwc(high)
    while low.shape[1] != high.shape[1]:
        low = upsample2x_bilinear_nhwc(low)
    fusion = jnp.concatenate([low, high], axis=-1)
    fusion_q = fusion.astype(jnp.bfloat16).astype(jnp.float32)

    c_lo, c_hi = params["c_lo"], params["c_hi"]
    c_lo_pad = params["c_lo_pad"]
    cslot, cout, cout_pad = params["cslot"], params["out_channel"], params["cout_pad"]
    w_slot = params["w2d"].astype(jnp.float32).reshape(3, 3, cslot, cout_pad)
    w_hwio = jnp.concatenate(
        [w_slot[:, :, :c_lo, :cout],
         w_slot[:, :, c_lo_pad:c_lo_pad + c_hi, :cout]], axis=2)
    conv = jax.lax.conv_general_dilated(
        fusion_q, w_hwio, window_strides=(1, 1), padding=((1, 1), (1, 1)),
        dimension_numbers=("NHWC", "HWIO", "NHWC"))
    y = jnp.maximum(conv + params["bias"][:cout], 0.0)
    return _nhwc_to_nchw(y)


if __name__ == "__main__":
    in_channel_high, in_channel_low, out_channel = 4, 4, 8
    key = jax.random.PRNGKey(0)
    k_low, k_high, k_param = jax.random.split(key, 3)
    low = jax.random.normal(k_low, (2, in_channel_low, 8, 8), jnp.float32)
    high = jax.random.normal(k_high, (2, in_channel_high, 16, 16), jnp.float32)

    params = make_decoder_params(in_channel_high, in_channel_low, out_channel,
                                 k_param)

    out = decoder_forward(low, high, params)
    jax.block_until_ready(out)
    assert out.shape == (2, out_channel, 16, 16), out.shape

    ref = decoder_forward_ref(low, high, params)
    err = float(jnp.max(jnp.abs(out - ref)))
    assert err < 2e-3, f"max abs err {err}"

    print("KERNEL_OK")
</pallas_src>

<mosaic_0001>
module attributes {stable_mosaic.version = 11 : i64} {
  func.func @_decoder_kernel(%arg0: i32, %arg1: i32, %arg2: memref<1x18x18x4xbf16, #tpu.memory_space<vmem>>, %arg3: memref<1x18x18x4xbf16, #tpu.memory_space<vmem>>, %arg4: memref<2304x128xbf16, #tpu.memory_space<vmem>>, %arg5: memref<1x128xf32, #tpu.memory_space<vmem>>, %arg6: memref<1x16x16x128xf32, #tpu.memory_space<vmem>>, %arg7: memref<16x16x2304xbf16, #tpu.memory_space<vmem>>) attributes {dimension_semantics = [#tpu.dimension_semantics<parallel>, #tpu.dimension_semantics<parallel>], iteration_bounds = array<i64: 2, 1>, scalar_prefetch = 0 : i64, scratch_operands = 1 : i64, tpu.core_type = #tpu.core_type<tc>, window_params = [{transform_indices = @transform_0, window_bounds = array<i64: 1, 18, 18, 4>}, {transform_indices = @transform_1, window_bounds = array<i64: 1, 18, 18, 4>}, {pipeline_mode = #tpu.pipeline_mode<synchronous>, transform_indices = @transform_2, window_bounds = array<i64: 2304, 128>}, {pipeline_mode = #tpu.pipeline_mode<synchronous>, transform_indices = @transform_3, window_bounds = array<i64: 1, 128>}, {transform_indices = @transform_4, window_bounds = array<i64: 1, 16, 16, 128>}]} {
    %c16_i32 = arith.constant 16 : i32
    %0 = arith.muli %arg1, %c16_i32 : i32
    %1 = tpu.assume_multiple %0, 16 : i32
    %cst = arith.constant 0.000000e+00 : bf16
    %2 = vector.broadcast %cst : bf16 to vector<16x16x124xbf16>
    %cst_0 = arith.constant 0.000000e+00 : bf16
    %3 = vector.broadcast %cst_0 : bf16 to vector<16x16x124xbf16>
    %c0_i32 = arith.constant 0 : i32
    %4 = arith.addi %1, %c0_i32 : i32
    %c0 = arith.constant 0 : index
    %5 = arith.index_cast %4 : i32 to index
    %c0_1 = arith.constant 0 : index
    %c0_2 = arith.constant 0 : index
    %6 = vector.load %arg2[%c0, %5, %c0_1, %c0_2] : memref<1x18x18x4xbf16, #tpu.memory_space<vmem>>, vector<1x16x18x4xbf16>
    %7 = vector.shape_cast %6 : vector<1x16x18x4xbf16> to vector<16x18x4xbf16>
    %c0_i32_3 = arith.constant 0 : i32
    %8 = arith.addi %1, %c0_i32_3 : i32
    %c0_4 = arith.constant 0 : index
    %9 = arith.index_cast %8 : i32 to index
    %c0_5 = arith.constant 0 : index
    %c0_6 = arith.constant 0 : index
    %10 = vector.load %arg3[%c0_4, %9, %c0_5, %c0_6] : memref<1x18x18x4xbf16, #tpu.memory_space<vmem>>, vector<1x16x18x4xbf16>
    %11 = vector.shape_cast %10 : vector<1x16x18x4xbf16> to vector<16x18x4xbf16>
    %12 = vector.extract_strided_slice %7 {offsets = [0, 0, 0], sizes = [16, 16, 4], strides = [1, 1, 1]} : vector<16x18x4xbf16> to vector<16x16x4xbf16>
    %c0_7 = arith.constant 0 : index
    %c0_8 = arith.constant 0 : index
    %c0_9 = arith.constant 0 : index
    %13 = vector.load %arg7[%c0_7, %c0_8, %c0_9] : memref<16x16x2304xbf16, #tpu.memory_space<vmem>>, vector<16x16x4xbf16>
    tpu.vector_store %arg7[%c0_7, %c0_8, %c0_9], %12 {strides = array<i32>} : memref<16x16x2304xbf16, #tpu.memory_space<vmem>>, vector<16x16x4xbf16>,
    %c0_10 = arith.constant 0 : index
    %c0_11 = arith.constant 0 : index
    %c4 = arith.constant 4 : index
    %14 = vector.load %arg7[%c0_10, %c0_11, %c4] : memref<16x16x2304xbf16, #tpu.memory_space<vmem>>, vector<16x16x124xbf16>
    tpu.vector_store %arg7[%c0_10, %c0_11, %c4], %2 {strides = array<i32>} : memref<16x16x2304xbf16, #tpu.memory_space<vmem>>, vector<16x16x124xbf16>,
    %15 = vector.extract_strided_slice %11 {offsets = [0, 0, 0], sizes = [16, 16, 4], strides = [1, 1, 1]} : vector<16x18x4xbf16> to vector<16x16x4xbf16>
    %c0_12 = arith.constant 0 : index
    %c0_13 = arith.constant 0 : index
    %c128 = arith.constant 128 : index
    %16 = vector.load %arg7[%c0_12, %c0_13, %c128] : memref<16x16x2304xbf16, #tpu.memory_space<vmem>>, vector<16x16x4xbf16>
    tpu.vector_store %arg7[%c0_12, %c0_13, %c128], %15 {strides = array<i32>} : memref<16x16x2304xbf16, #tpu.memory_space<vmem>>, vector<16x16x4xbf16>,
    %c0_14 = arith.constant 0 : index
    %c0_15 = arith.constant 0 : index
    %c132 = arith.constant 132 : index
    %17 = vector.load %arg7[%c0_14, %c0_15, %c132] : memref<16x16x2304xbf16, #tpu.memory_space<vmem>>, vector<16x16x124xbf16>
    tpu.vector_store %arg7[%c0_14, %c0_15, %c132], %3 {strides = array<i32>} : memref<16x16x2304xbf16, #tpu.memory_space<vmem>>, vector<16x16x124xbf16>,
    %18 = vector.extract_strided_slice %7 {offsets = [0, 1, 0], sizes = [16, 16, 4], strides = [1, 1, 1]} : vector<16x18x4xbf16> to vector<16x16x4xbf16>
    %c0_16 = arith.constant 0 : index
    %c0_17 = arith.constant 0 : index
    %c256 = arith.constant 256 : index
    %19 = vector.load %arg7[%c0_16, %c0_17, %c256] : memref<16x16x2304xbf16, #tpu.memory_space<vmem>>, vector<16x16x4xbf16>
    tpu.vector_store %arg7[%c0_16, %c0_17, %c256], %18 {strides = array<i32>} : memref<16x16x2304xbf16, #tpu.memory_space<vmem>>, vector<16x16x4xbf16>,
    %c0_18 = arith.constant 0 : index
    %c0_19 = arith.constant 0 : index
    %c260 = arith.constant 260 : index
    %20 = vector.load %arg7[%c0_18, %c0_19, %c260] : memref<16x16x2304xbf16, #tpu.memory_space<vmem>>, vector<16x16x124xbf16>
    tpu.vector_store %arg7[%c0_18, %c0_19, %c260], %2 {strides = array<i32>} : memref<16x16x2304xbf16, #tpu.memory_space<vmem>>, vector<16x16x124xbf16>,
    %21 = vector.extract_strided_slice %11 {offsets = [0, 1, 0], sizes = [16, 16, 4], strides = [1, 1, 1]} : vector<16x18x4xbf16> to vector<16x16x4xbf16>
    %c0_20 = arith.constant 0 : index
    %c0_21 = arith.constant 0 : index
    %c384 = arith.constant 384 : index
    %22 = vector.load %arg7[%c0_20, %c0_21, %c384] : memref<16x16x2304xbf16, #tpu.memory_space<vmem>>, vector<16x16x4xbf16>
    tpu.vector_store %arg7[%c0_20, %c0_21, %c384], %21 {strides = array<i32>} : memref<16x16x2304xbf16, #tpu.memory_space<vmem>>, vector<16x16x4xbf16>,
    %c0_22 = arith.constant 0 : index
    %c0_23 = arith.constant 0 : index
    %c388 = arith.constant 388 : index
    %23 = vector.load %arg7[%c0_22, %c0_23, %c388] : memref<16x16x2304xbf16, #tpu.memory_space<vmem>>, vector<16x16x124xbf16>
    tpu.vector_store %arg7[%c0_22, %c0_23, %c388], %3 {strides = array<i32>} : memref<16x16x2304xbf16, #tpu.memory_space<vmem>>, vector<16x16x124xbf16>,
    %24 = vector.extract_strided_slice %7 {offsets = [0, 2, 0], sizes = [16, 16, 4], strides = [1, 1, 1]} : vector<16x18x4xbf16> to vector<16x16x4xbf16>
    %c0_24 = arith.constant 0 : index
    %c0_25 = arith.constant 0 : index
    %c512 = arith.constant 512 : index
    %25 = vector.load %arg7[%c0_24, %c0_25, %c512] : memref<16x16x2304xbf16, #tpu.memory_space<vmem>>, vector<16x16x4xbf16>
    tpu.vector_store %arg7[%c0_24, %c0_25, %c512], %24 {strides = array<i32>} : memref<16x16x2304xbf16, #tpu.memory_space<vmem>>, vector<16x16x4xbf16>,
    %c0_26 = arith.constant 0 : index
    %c0_27 = arith.constant 0 : index
    %c516 = arith.constant 516 : index
    %26 = vector.load %arg7[%c0_26, %c0_27, %c516] : memref<16x16x2304xbf16, #tpu.memory_space<vmem>>, vector<16x16x124xbf16>
    tpu.vector_store %arg7[%c0_26, %c0_27, %c516], %2 {strides = array<i32>} : memref<16x16x2304xbf16, #tpu.memory_space<vmem>>, vector<16x16x124xbf16>,
    %27 = vector.extract_strided_slice %11 {offsets = [0, 2, 0], sizes = [16, 16, 4], strides = [1, 1, 1]} : vector<16x18x4xbf16> to vector<16x16x4xbf16>
    %c0_28 = arith.constant 0 : index
    %c0_29 = arith.constant 0 : index
    %c640 = arith.constant 640 : index
    %28 = vector.load %arg7[%c0_28, %c0_29, %c640] : memref<16x16x2304xbf16, #tpu.memory_space<vmem>>, vector<16x16x4xbf16>
    tpu.vector_store %arg7[%c0_28, %c0_29, %c640], %27 {strides = array<i32>} : memref<16x16x2304xbf16, #tpu.memory_space<vmem>>, vector<16x16x4xbf16>,
    %c0_30 = arith.constant 0 : index
    %c0_31 = arith.constant 0 : index
    %c644 = arith.constant 644 : index
    %29 = vector.load %arg7[%c0_30, %c0_31, %c644] : memref<16x16x2304xbf16, #tpu.memory_space<vmem>>, vector<16x16x124xbf16>
    tpu.vector_store %arg7[%c0_30, %c0_31, %c644], %3 {strides = array<i32>} : memref<16x16x2304xbf16, #tpu.memory_space<vmem>>, vector<16x16x124xbf16>,
    %c1_i32 = arith.constant 1 : i32
    %30 = arith.addi %1, %c1_i32 : i32
    %c0_32 = arith.constant 0 : index
    %31 = arith.index_cast %30 : i32 to index
    %c0_33 = arith.constant 0 : index
    %c0_34 = arith.constant 0 : index
    %32 = vector.load %arg2[%c0_32, %31, %c0_33, %c0_34] : memref<1x18x18x4xbf16, #tpu.memory_space<vmem>>, vector<1x16x18x4xbf16>
    %33 = vector.shape_cast %32 : vector<1x16x18x4xbf16> to vector<16x18x4xbf16>
    %c1_i32_35 = arith.constant 1 : i32
    %34 = arith.addi %1, %c1_i32_35 : i32
    %c0_36 = arith.constant 0 : index
    %35 = arith.index_cast %34 : i32 to index
    %c0_37 = arith.constant 0 : index
    %c0_38 = arith.constant 0 : index
    %36 = vector.load %arg3[%c0_36, %35, %c0_37, %c0_38] : memref<1x18x18x4xbf16, #tpu.memory_space<vmem>>, vector<1x16x18x4xbf16>
    %37 = vector.shape_cast %36 : vector<1x16x18x4xbf16> to vector<16x18x4xbf16>
    %38 = vector.extract_strided_slice %33 {offsets = [0, 0, 0], sizes = [16, 16, 4], strides = [1, 1, 1]} : vector<16x18x4xbf16> to vector<16x16x4xbf16>
    %c0_39 = arith.constant 0 : index
    %c0_40 = arith.constant 0 : index
    %c768 = arith.constant 768 : index
    %39 = vector.load %arg7[%c0_39, %c0_40, %c768] : memref<16x16x2304xbf16, #tpu.memory_space<vmem>>, vector<16x16x4xbf16>
    tpu.vector_store %arg7[%c0_39, %c0_40, %c768], %38 {strides = array<i32>} : memref<16x16x2304xbf16, #tpu.memory_space<vmem>>, vector<16x16x4xbf16>,
    %c0_41 = arith.constant 0 : index
    %c0_42 = arith.constant 0 : index
    %c772 = arith.constant 772 : index
    %40 = vector.load %arg7[%c0_41, %c0_42, %c772] : memref<16x16x2304xbf16, #tpu.memory_space<vmem>>, vector<16x16x124xbf16>
    tpu.vector_store %arg7[%c0_41, %c0_42, %c772], %2 {strides = array<i32>} : memref<16x16x2304xbf16, #tpu.memory_space<vmem>>, vector<16x16x124xbf16>,
    %41 = vector.extract_strided_slice %37 {offsets = [0, 0, 0], sizes = [16, 16, 4], strides = [1, 1, 1]} : vector<16x18x4xbf16> to vector<16x16x4xbf16>
    %c0_43 = arith.constant 0 : index
    %c0_44 = arith.constant 0 : index
    %c896 = arith.constant 896 : index
    %42 = vector.load %arg7[%c0_43, %c0_44, %c896] : memref<16x16x2304xbf16, #tpu.memory_space<vmem>>, vector<16x16x4xbf16>
    tpu.vector_store %arg7[%c0_43, %c0_44, %c896], %41 {strides = array<i32>} : memref<16x16x2304xbf16, #tpu.memory_space<vmem>>, vector<16x16x4xbf16>,
    %c0_45 = arith.constant 0 : index
    %c0_46 = arith.constant 0 : index
    %c900 = arith.constant 900 : index
    %43 = vector.load %arg7[%c0_45, %c0_46, %c900] : memref<16x16x2304xbf16, #tpu.memory_space<vmem>>, vector<16x16x124xbf16>
    tpu.vector_store %arg7[%c0_45, %c0_46, %c900], %3 {strides = array<i32>} : memref<16x16x2304xbf16, #tpu.memory_space<vmem>>, vector<16x16x124xbf16>,
    %44 = vector.extract_strided_slice %33 {offsets = [0, 1, 0], sizes = [16, 16, 4], strides = [1, 1, 1]} : vector<16x18x4xbf16> to vector<16x16x4xbf16>
    %c0_47 = arith.constant 0 : index
    %c0_48 = arith.constant 0 : index
    %c1024 = arith.constant 1024 : index
    %45 = vector.load %arg7[%c0_47, %c0_48, %c1024] : memref<16x16x2304xbf16, #tpu.memory_space<vmem>>, vector<16x16x4xbf16>
    tpu.vector_store %arg7[%c0_47, %c0_48, %c1024], %44 {strides = array<i32>} : memref<16x16x2304xbf16, #tpu.memory_space<vmem>>, vector<16x16x4xbf16>,
    %c0_49 = arith.constant 0 : index
    %c0_50 = arith.constant 0 : index
    %c1028 = arith.constant 1028 : index
    %46 = vector.load %arg7[%c0_49, %c0_50, %c1028] : memref<16x16x2304xbf16, #tpu.memory_space<vmem>>, vector<16x16x124xbf16>
    tpu.vector_store %arg7[%c0_49, %c0_50, %c1028], %2 {strides = array<i32>} : memref<16x16x2304xbf16, #tpu.memory_space<vmem>>, vector<16x16x124xbf16>,
    %47 = vector.extract_strided_slice %37 {offsets = [0, 1, 0], sizes = [16, 16, 4], strides = [1, 1, 1]} : vector<16x18x4xbf16> to vector<16x16x4xbf16>
    %c0_51 = arith.constant 0 : index
    %c0_52 = arith.constant 0 : index
    %c1152 = arith.constant 1152 : index
    %48 = vector.load %arg7[%c0_51, %c0_52, %c1152] : memref<16x16x2304xbf16, #tpu.memory_space<vmem>>, vector<16x16x4xbf16>
    tpu.vector_store %arg7[%c0_51, %c0_52, %c1152], %47 {strides = array<i32>} : memref<16x16x2304xbf16, #tpu.memory_space<vmem>>, vector<16x16x4xbf16>,
    %c0_53 = arith.constant 0 : index
    %c0_54 = arith.constant 0 : index
    %c1156 = arith.constant 1156 : index
    %49 = vector.load %arg7[%c0_53, %c0_54, %c1156] : memref<16x16x2304xbf16, #tpu.memory_space<vmem>>, vector<16x16x124xbf16>
    tpu.vector_store %arg7[%c0_53, %c0_54, %c1156], %3 {strides = array<i32>} : memref<16x16x2304xbf16, #tpu.memory_space<vmem>>, vector<16x16x124xbf16>,
    %50 = vector.extract_strided_slice %33 {offsets = [0, 2, 0], sizes = [16, 16, 4], strides = [1, 1, 1]} : vector<16x18x4xbf16> to vector<16x16x4xbf16>
    %c0_55 = arith.constant 0 : index
    %c0_56 = arith.constant 0 : index
    %c1280 = arith.constant 1280 : index
    %51 = vector.load %arg7[%c0_55, %c0_56, %c1280] : memref<16x16x2304xbf16, #tpu.memory_space<vmem>>, vector<16x16x4xbf16>
    tpu.vector_store %arg7[%c0_55, %c0_56, %c1280], %50 {strides = array<i32>} : memref<16x16x2304xbf16, #tpu.memory_space<vmem>>, vector<16x16x4xbf16>,
    %c0_57 = arith.constant 0 : index
    %c0_58 = arith.constant 0 : index
    %c1284 = arith.constant 1284 : index
    %52 = vector.load %arg7[%c0_57, %c0_58, %c1284] : memref<16x16x2304xbf16, #tpu.memory_space<vmem>>, vector<16x16x124xbf16>
    tpu.vector_store %arg7[%c0_57, %c0_58, %c1284], %2 {strides = array<i32>} : memref<16x16x2304xbf16, #tpu.memory_space<vmem>>, vector<16x16x124xbf16>,
    %53 = vector.extract_strided_slice %37 {offsets = [0, 2, 0], sizes = [16, 16, 4], strides = [1, 1, 1]} : vector<16x18x4xbf16> to vector<16x16x4xbf16>
    %c0_59 = arith.constant 0 : index
    %c0_60 = arith.constant 0 : index
    %c1408 = arith.constant 1408 : index
    %54 = vector.load %arg7[%c0_59, %c0_60, %c1408] : memref<16x16x2304xbf16, #tpu.memory_space<vmem>>, vector<16x16x4xbf16>
    tpu.vector_store %arg7[%c0_59, %c0_60, %c1408], %53 {strides = array<i32>} : memref<16x16x2304xbf16, #tpu.memory_space<vmem>>, vector<16x16x4xbf16>,
    %c0_61 = arith.constant 0 : index
    %c0_62 = arith.constant 0 : index
    %c1412 = arith.constant 1412 : index
    %55 = vector.load %arg7[%c0_61, %c0_62, %c1412] : memref<16x16x2304xbf16, #tpu.memory_space<vmem>>, vector<16x16x124xbf16>
    tpu.vector_store %arg7[%c0_61, %c0_62, %c1412], %3 {strides = array<i32>} : memref<16x16x2304xbf16, #tpu.memory_space<vmem>>, vector<16x16x124xbf16>,
    %c2_i32 = arith.constant 2 : i32
    %56 = arith.addi %1, %c2_i32 : i32
    %c0_63 = arith.constant 0 : index
    %57 = arith.index_cast %56 : i32 to index
    %c0_64 = arith.constant 0 : index
    %c0_65 = arith.constant 0 : index
    %58 = vector.load %arg2[%c0_63, %57, %c0_64, %c0_65] : memref<1x18x18x4xbf16, #tpu.memory_space<vmem>>, vector<1x16x18x4xbf16>
    %59 = vector.shape_cast %58 : vector<1x16x18x4xbf16> to vector<16x18x4xbf16>
    %c2_i32_66 = arith.constant 2 : i32
    %60 = arith.addi %1, %c2_i32_66 : i32
    %c0_67 = arith.constant 0 : index
    %61 = arith.index_cast %60 : i32 to index
    %c0_68 = arith.constant 0 : index
    %c0_69 = arith.constant 0 : index
    %62 = vector.load %arg3[%c0_67, %61, %c0_68, %c0_69] : memref<1x18x18x4xbf16, #tpu.memory_space<vmem>>, vector<1x16x18x4xbf16>
    %63 = vector.shape_cast %62 : vector<1x16x18x4xbf16> to vector<16x18x4xbf16>
    %64 = vector.extract_strided_slice %59 {offsets = [0, 0, 0], sizes = [16, 16, 4], strides = [1, 1, 1]} : vector<16x18x4xbf16> to vector<16x16x4xbf16>
    %c0_70 = arith.constant 0 : index
    %c0_71 = arith.constant 0 : index
    %c1536 = arith.constant 1536 : index
    %65 = vector.load %arg7[%c0_70, %c0_71, %c1536] : memref<16x16x2304xbf16, #tpu.memory_space<vmem>>, vector<16x16x4xbf16>
    tpu.vector_store %arg7[%c0_70, %c0_71, %c1536], %64 {strides = array<i32>} : memref<16x16x2304xbf16, #tpu.memory_space<vmem>>, vector<16x16x4xbf16>,
    %c0_72 = arith.constant 0 : index
    %c0_73 = arith.constant 0 : index
    %c1540 = arith.constant 1540 : index
    %66 = vector.load %arg7[%c0_72, %c0_73, %c1540] : memref<16x16x2304xbf16, #tpu.memory_space<vmem>>, vector<16x16x124xbf16>
    tpu.vector_store %arg7[%c0_72, %c0_73, %c1540], %2 {strides = array<i32>} : memref<16x16x2304xbf16, #tpu.memory_space<vmem>>, vector<16x16x124xbf16>,
    %67 = vector.extract_strided_slice %63 {offsets = [0, 0, 0], sizes = [16, 16, 4], strides = [1, 1, 1]} : vector<16x18x4xbf16> to vector<16x16x4xbf16>
    %c0_74 = arith.constant 0 : index
    %c0_75 = arith.constant 0 : index
    %c1664 = arith.constant 1664 : index
    %68 = vector.load %arg7[%c0_74, %c0_75, %c1664] : memref<16x16x2304xbf16, #tpu.memory_space<vmem>>, vector<16x16x4xbf16>
    tpu.vector_store %arg7[%c0_74, %c0_75, %c1664], %67 {strides = array<i32>} : memref<16x16x2304xbf16, #tpu.memory_space<vmem>>, vector<16x16x4xbf16>,
    %c0_76 = arith.constant 0 : index
    %c0_77 = arith.constant 0 : index
    %c1668 = arith.constant 1668 : index
    %69 = vector.load %arg7[%c0_76, %c0_77, %c1668] : memref<16x16x2304xbf16, #tpu.memory_space<vmem>>, vector<16x16x124xbf16>
    tpu.vector_store %arg7[%c0_76, %c0_77, %c1668], %3 {strides = array<i32>} : memref<16x16x2304xbf16, #tpu.memory_space<vmem>>, vector<16x16x124xbf16>,
    %70 = vector.extract_strided_slice %59 {offsets = [0, 1, 0], sizes = [16, 16, 4], strides = [1, 1, 1]} : vector<16x18x4xbf16> to vector<16x16x4xbf16>
    %c0_78 = arith.constant 0 : index
    %c0_79 = arith.constant 0 : index
    %c1792 = arith.constant 1792 : index
    %71 = vector.load %arg7[%c0_78, %c0_79, %c1792] : memref<16x16x2304xbf16, #tpu.memory_space<vmem>>, vector<16x16x4xbf16>
    tpu.vector_store %arg7[%c0_78, %c0_79, %c1792], %70 {strides = array<i32>} : memref<16x16x2304xbf16, #tpu.memory_space<vmem>>, vector<16x16x4xbf16>,
    %c0_80 = arith.constant 0 : index
    %c0_81 = arith.constant 0 : index
    %c1796 = arith.constant 1796 : index
    %72 = vector.load %arg7[%c0_80, %c0_81, %c1796] : memref<16x16x2304xbf16, #tpu.memory_space<vmem>>, vector<16x16x124xbf16>
    tpu.vector_store %arg7[%c0_80, %c0_81, %c1796], %2 {strides = array<i32>} : memref<16x16x2304xbf16, #tpu.memory_space<vmem>>, vector<16x16x124xbf16>,
    %73 = vector.extract_strided_slice %63 {offsets = [0, 1, 0], sizes = [16, 16, 4], strides = [1, 1, 1]} : vector<16x18x4xbf16> to vector<16x16x4xbf16>
    %c0_82 = arith.constant 0 : index
    %c0_83 = arith.constant 0 : index
    %c1920 = arith.constant 1920 : index
    %74 = vector.load %arg7[%c0_82, %c0_83, %c1920] : memref<16x16x2304xbf16, #tpu.memory_space<vmem>>, vector<16x16x4xbf16>
    tpu.vector_store %arg7[%c0_82, %c0_83, %c1920], %73 {strides = array<i32>} : memref<16x16x2304xbf16, #tpu.memory_space<vmem>>, vector<16x16x4xbf16>,
    %c0_84 = arith.constant 0 : index
    %c0_85 = arith.constant 0 : index
    %c1924 = arith.constant 1924 : index
    %75 = vector.load %arg7[%c0_84, %c0_85, %c1924] : memref<16x16x2304xbf16, #tpu.memory_space<vmem>>, vector<16x16x124xbf16>
    tpu.vector_store %arg7[%c0_84, %c0_85, %c1924], %3 {strides = array<i32>} : memref<16x16x2304xbf16, #tpu.memory_space<vmem>>, vector<16x16x124xbf16>,
    %76 = vector.extract_strided_slice %59 {offsets = [0, 2, 0], sizes = [16, 16, 4], strides = [1, 1, 1]} : vector<16x18x4xbf16> to vector<16x16x4xbf16>
    %c0_86 = arith.constant 0 : index
    %c0_87 = arith.constant 0 : index
    %c2048 = arith.constant 2048 : index
    %77 = vector.load %arg7[%c0_86, %c0_87, %c2048] : memref<16x16x2304xbf16, #tpu.memory_space<vmem>>, vector<16x16x4xbf16>
    tpu.vector_store %arg7[%c0_86, %c0_87, %c2048], %76 {strides = array<i32>} : memref<16x16x2304xbf16, #tpu.memory_space<vmem>>, vector<16x16x4xbf16>,
    %c0_88 = arith.constant 0 : index
    %c0_89 = arith.constant 0 : index
    %c2052 = arith.constant 2052 : index
    %78 = vector.load %arg7[%c0_88, %c0_89, %c2052] : memref<16x16x2304xbf16, #tpu.memory_space<vmem>>, vector<16x16x124xbf16>
    tpu.vector_store %arg7[%c0_88, %c0_89, %c2052], %2 {strides = array<i32>} : memref<16x16x2304xbf16, #tpu.memory_space<vmem>>, vector<16x16x124xbf16>,
    %79 = vector.extract_strided_slice %63 {offsets = [0, 2, 0], sizes = [16, 16, 4], strides = [1, 1, 1]} : vector<16x18x4xbf16> to vector<16x16x4xbf16>
    %c0_90 = arith.constant 0 : index
    %c0_91 = arith.constant 0 : index
    %c2176 = arith.constant 2176 : index
    %80 = vector.load %arg7[%c0_90, %c0_91, %c2176] : memref<16x16x2304xbf16, #tpu.memory_space<vmem>>, vector<16x16x4xbf16>
    tpu.vector_store %arg7[%c0_90, %c0_91, %c2176], %79 {strides = array<i32>} : memref<16x16x2304xbf16, #tpu.memory_space<vmem>>, vector<16x16x4xbf16>,
    %c0_92 = arith.constant 0 : index
    %c0_93 = arith.constant 0 : index
    %c2180 = arith.constant 2180 : index
    %81 = vector.load %arg7[%c0_92, %c0_93, %c2180] : memref<16x16x2304xbf16, #tpu.memory_space<vmem>>, vector<16x16x124xbf16>
    tpu.vector_store %arg7[%c0_92, %c0_93, %c2180], %3 {strides = array<i32>} : memref<16x16x2304xbf16, #tpu.memory_space<vmem>>, vector<16x16x124xbf16>,
    %c0_94 = arith.constant 0 : index
    %c0_95 = arith.constant 0 : index
    %c0_96 = arith.constant 0 : index
    %82 = vector.load %arg7[%c0_94, %c0_95, %c0_96] : memref<16x16x2304xbf16, #tpu.memory_space<vmem>>, vector<16x16x2304xbf16>
    %83 = vector.shape_cast %82 : vector<16x16x2304xbf16> to vector<256x2304xbf16>
    %c0_97 = arith.constant 0 : index
    %c0_98 = arith.constant 0 : index
    %84 = vector.load %arg4[%c0_97, %c0_98] : memref<2304x128xbf16, #tpu.memory_space<vmem>>, vector<2304x128xbf16>
    %cst_99 = arith.constant dense<0.000000e+00> : vector<256x128xf32>
    %85 = tpu.matmul %83, %84, %cst_99 {dimension_numbers = #tpu.dot_dimension_numbers<[1], [0], [0], [1], [0, 0, 1, 1], [], []>} : vector<256x2304xbf16>, vector<2304x128xbf16>, vector<256x128xf32> -> vector<256x128xf32>
    %c0_100 = arith.constant 0 : index
    %c0_101 = arith.constant 0 : index
    %86 = vector.load %arg5[%c0_100, %c0_101] : memref<1x128xf32, #tpu.memory_space<vmem>>, vector<1x128xf32>
    %87 = vector.broadcast %86 : vector<1x128xf32> to vector<256x128xf32>
    %88 = arith.addf %85, %87 : vector<256x128xf32>
    %cst_102 = arith.constant 0.000000e+00 : f32
    %89 = vector.broadcast %cst_102 : f32 to vector<256x128xf32>
    %90 = arith.maximumf %88, %89 : vector<256x128xf32>
    %91 = vector.shape_cast %90 : vector<256x128xf32> to vector<1x16x16x128xf32>
    %c0_103 = arith.constant 0 : index
    %c0_104 = arith.constant 0 : index
    %c0_105 = arith.constant 0 : index
    %c0_106 = arith.constant 0 : index
    %92 = vector.load %arg6[%c0_103, %c0_104, %c0_105, %c0_106] : memref<1x16x16x128xf32, #tpu.memory_space<vmem>>, vector<1x16x16x128xf32>
    tpu.vector_store %arg6[%c0_103, %c0_104, %c0_105, %c0_106], %91 {strides = array<i32>} : memref<1x16x16x128xf32, #tpu.memory_space<vmem>>, vector<1x16x16x128xf32>,
    return
  }
  func.func @transform_0(%arg0: i32, %arg1: i32) -> (i32, i32, i32, i32) {
    %c0_i32 = arith.constant 0 : i32
    %c0_i32_0 = arith.constant 0 : i32
    %c0_i32_1 = arith.constant 0 : i32
    %c0_i32_2 = arith.constant 0 : i32
    return %arg0, %c0_i32, %c0_i32_0, %c0_i32_1 : i32, i32, i32, i32
  }
  func.func @transform_1(%arg0: i32, %arg1: i32) -> (i32, i32, i32, i32) {
    %c0_i32 = arith.constant 0 : i32
    %c0_i32_0 = arith.constant 0 : i32
    %c0_i32_1 = arith.constant 0 : i32
    %c0_i32_2 = arith.constant 0 : i32
    return %arg0, %c0_i32, %c0_i32_0, %c0_i32_1 : i32, i32, i32, i32
  }
  func.func @transform_2(%arg0: i32, %arg1: i32) -> (i32, i32) {
    %c0_i32 = arith.constant 0 : i32
    %c0_i32_0 = arith.constant 0 : i32
    %c0_i32_1 = arith.constant 0 : i32
    return %c0_i32, %c0_i32_0 : i32, i32
  }
  func.func @transform_3(%arg0: i32, %arg1: i32) -> (i32, i32) {
    %c0_i32 = arith.constant 0 : i32
    %c0_i32_0 = arith.constant 0 : i32
    %c0_i32_1 = arith.constant 0 : i32
    return %c0_i32, %c0_i32_0 : i32, i32
  }
  func.func @transform_4(%arg0: i32, %arg1: i32) -> (i32, i32, i32, i32) {
    %c0_i32 = arith.constant 0 : i32
    %c0_i32_0 = arith.constant 0 : i32
    %c0_i32_1 = arith.constant 0 : i32
    return %arg0, %arg1, %c0_i32, %c0_i32_0 : i32, i32, i32, i32
  }
}

</mosaic_0001>

<bundles_post_ra>
// kernel: tpu_custom_call.1
= control target key start
LH: loop header
LB: loop body
LE: loop exit
PB: predicated region body
PF: predicated region fallthrough
CT: control target
= control target key end

     0   :  { %s11973_s0 = inlined_call_operand.hbm [shape: bf16[2,18,18,4], index: 0, kind: input, shape index: {}]   ;;  %s11974_s1 = inlined_call_operand.hbm [shape: bf16[2,18,18,4], index: 1, kind: input, shape index: {}]   ;;  %s11975_s2 = inlined_call_operand.hbm [shape: bf16[2304,128], index: 2, kind: input, shape index: {}]   ;;  %s11976_s3 = inlined_call_operand.hbm [shape: f32[1,128], index: 3, kind: input, shape index: {}]   ;;  %s11977_s4 = inlined_call_operand.hbm [shape: f32[2,16,16,128], index: 4, kind: output, shape index: {}]  }
   0x1   :  { %12013 = sst [smem:[#allocation52_spill]] %s11973_s0 }
   0x2   :  { %12014 = sst [smem:[#allocation53_spill]] %s11975_s2 }
   0x3   :  { %12015 = sst [smem:[#allocation54_spill]] %s11976_s3 }
   0x4   :  { %9 = vsyncpa [#allocation4], 0 }
   0x5   :  { %11 = vsyncpa [#allocation4 + $0x1], 0 }
   0x6   :  { %12 = vsyncpa [#allocation7], 0 }
   0x7   :  { %14 = vsyncpa [#allocation7 + $0x1], 0 }
   0x8   :  { %15 = vsyncpa [#allocation10], 0 }
   0x9   :  { %16 = vsyncpa [#allocation5], 0 }
   0xa   :  { %18 = vsyncpa [#allocation5 + $0x1], 0  ;;  %s9087_s15 = smov 0   ;;  %s9089_s16 = smov 0  }
   0xb   :  { %s9091_s17 = smov 0   ;;  %s9093_s18 = smov 0  }
   0xc   :  { %s9095_s19 = smov 0   ;;  %s9097_s20 = smov 0  }
   0xd LB: > { %s9118_s21 = sadd.s32 4294967295, %s9050_s20   ;;  %s6805_s22 = sadd.s32 4294967294, %s9050_s20   ;;  %s9050_s20 = sphi %s9097_s20, %s24_s20   ;;  %s9046_s19 = sphi %s9095_s19, %s12200_s19   ;;  %s9042_s18 = sphi %s9093_s18, %s12199_s18   ;;  %s9038_s17 = sphi %s9091_s17, %s12198_s17   ;;  %s9034_s16 = sphi %s9089_s16, %s12197_s16   ;;  %s9030_s15 = sphi %s9087_s15, %s12196_s15  }
   0xe   : > { %p56_p0 = scmp.ne.s32.totalorder %s9034_s16, %s9030_s15  ;;  %p11978_p1 = scmp.eq.s32.totalorder %s9118_s21, 0 }
   0xf   : > { %p156_p3 = scmp.eq.s32.totalorder %s6805_s22, 1  ;;  %p6806_p5 = scmp.ge.s32.totalorder %s9050_s20, 1 }
  0x10   : > { %p9127_p4 = por %p11978_p1, %p56_p0  ;;  %p163_p7 = scmp.lt.s32.totalorder %s9050_s20, 3 }
  0x11   : > { %p9132_p6 = por %p156_p3, %p56_p0  ;;  %s9052_s26 = smov [#allocation8]  }
  0x12   : > { %s12016_s23 = scalar_select %p9127_p4, 1, 0 }
  0x13   : > { %s12017_s24 = scalar_select %p9132_p6, 1, 0 }
  0x14   : > { %p9137_p8 = pnand %p6806_p5, %p163_p7  ;;  %s175_s27 = sshll.u32 %s9052_s26, 4  ;;  %s9141_s27 = int_to_ptr.vmem [resolvable:$true] %s175_s27 }
  0x15   : > { %s9053_s29 = smov [#allocation9]   ;;  %s12020_s2 = sld [smem:[#allocation53_spill]] }
  0x16   : > { %p8394_p9 = pneg %p9137_p8  ;;  %s189_s30 = sshll.u32 %s9053_s29, 4  ;;  %s9152_s30 = int_to_ptr.vmem [resolvable:$true] %s189_s30 }
  0x18   : > { %p9148_p11 = pnand %p8394_p9, %p11978_p1 }
  0x1a   : > { %p8842_p13 = pneg %p9148_p11 }
  0x1b   : > { %s8840_s7 = scalar_lea.hbm %s12020_s2, 18432 }
  0x1c   : > { %p8841_p12 = scmp.ne.s32.totalorder %s12020_s2, %s8840_s7  ;;  %p8847_p5 = scmp.lt.u32.totalorder %s8840_s7, %s12020_s2 }
  0x1e   : > { %p8843_p0 = pnand %p8842_p13, %p8841_p12 }
  0x20   : > { %p8844_p3 = pneg %p8843_p0 }
  0x22   : > { %p8849_p7 = pnand %p8847_p5, %p8844_p3 }
  0x24   : > { %8852 = shalt.err (!%p8849_p7)
}
  0x25   : > { %s8853_s12 = scalar_lea.vmem %s9141_s27, 18432  ;;  %p8861_p2 = scmp.lt.s32.totalorder %s9141_s27, %s9141_s27 }
  0x26   : > { %p8854_p9 = scmp.ne.s32.totalorder %s9141_s27, %s8853_s12  ;;  %p8862_p12 = scmp.lt.s32.totalorder %s8853_s12, %s8853_s12 }
  0x28   : > { %p8856_p10 = pnand %p8854_p9, %p8842_p13  ;;  %p8863_p0 = por %p8862_p12, %p8861_p2 }
  0x2a   : > { %p8857_p1 = pneg %p8856_p10 }
  0x2c   : > { %p8864_p6 = pnand %p8863_p0, %p8857_p1 }
  0x2e   : > { %8867 = shalt.err (!%p8864_p6)
}
  0x2f   : > { %s11979_s13 = smov 64   ;;  %s9055_s14 = smov 4  }
  0x30   : > { %8397 = dma.hbm_to_vmem [thread:$0]  (!%p9148_p11), %s12020_s2, 18432, %s9141_s27, [#allocation7], %s11979_s13, %s11979_s13, %s9055_s14  }
  0x31   : > { %s12021_s3 = sld [smem:[#allocation54_spill]] }
  0x37   : > { %s8868_s6 = scalar_lea.hbm %s12021_s3, 16 }
  0x38   : > { %p8869_p1 = scmp.ne.s32.totalorder %s12021_s3, %s8868_s6  ;;  %p8875_p10 = scmp.lt.u32.totalorder %s8868_s6, %s12021_s3 }
  0x3a   : > { %p8871_p2 = pnand %p8869_p1, %p8842_p13 }
  0x3c   : > { %p8872_p6 = pneg %p8871_p2 }
  0x3e   : > { %p8877_p3 = pnand %p8875_p10, %p8872_p6 }
  0x40   : > { %8880 = shalt.err (!%p8877_p3)
}
  0x41   : > { %s8881_s27 = scalar_lea.vmem %s9152_s30, 16  ;;  %s8888_s11 = scalar_lea.vmem %s9152_s30, 32 }
  0x42   : > { %p8882_p5 = scmp.ne.s32.totalorder %s9152_s30, %s8881_s27  ;;  %p8889_p12 = scmp.lt.s32.totalorder %s9152_s30, %s9152_s30 }
  0x43   : > { %p8890_p0 = scmp.lt.s32.totalorder %s8888_s11, %s8881_s27 }
  0x44   : > { %p8884_p7 = pnand %p8882_p5, %p8842_p13 }
  0x45   : > { %p8891_p1 = por %p8890_p0, %p8889_p12 }
  0x46   : > { %p8885_p9 = pneg %p8884_p7 }
  0x48   : > { %p8892_p2 = pnand %p8891_p1, %p8885_p9 }
  0x4a   : > { %8895 = shalt.err (!%p8892_p2)
}
  0x4b   : > { %8400 = dma.hbm_to_vmem [thread:$0]  (!%p9148_p11), %s12021_s3, 16, %s9152_s30, [#allocation10]  }
  0x4c   : > { %s36_s26 = sadd.s32 1, %s9046_s19  ;;  %s43_s29 = sadd.s32 1, %s9038_s17 }
  0x4d   : > { %p38_p13 = scmp.ge.s32.totalorder %s36_s26, 2  ;;  %p50_p6 = scmp.ne.s32.totalorder %s9038_s17, %s9034_s16 }
  0x4e   : > { %p51_p10 = scmp.eq.s32.totalorder %s9050_s20, 0  ;;  %p8414_p3 = scmp.lt.s32.totalorder %s9050_s20, 2 }
  0x4f   : > { %s12202_s26 = smov (%p38_p13, %s36_s26), 0  ;;  %p12022_p7 = scmp.eq.s32.totalorder %s9118_s21, 1 }
  0x50   : > { %p52_p5 = por %p51_p10, %p50_p6  ;;  %s40_s5 = ssub.s32 %s9046_s19, %s12202_s26 }
  0x51   : > { %p9220_p9 = por %p12022_p7, %p50_p6  ;;  %s200_s6 = sand.u32 1, %s9038_s17  }
  0x52   : > { %p41_p11 = scmp.eq.s32.totalorder %s40_s5, 0  ;;  %s9227_s30 = smul.u32 216, %s200_s6 }
  0x53   : > { %s12023_s28 = scalar_select %p9220_p9, 1, 0 }
  0x54   : > { %p9229_p12 = pnand %p8414_p3, %p52_p5  ;;  %s11981_s9 = smul.u32 3456, %s9046_s19 }
  0x55   : > { %s9234_s8 = scalar_select %p41_p11, %s9038_s17, %s43_s29  }
  0x56   : > { %s204_s10 = scalar_lea.vmem [#allocation3], %s9227_s30  ;;  %s12025_s0 = sld [smem:[#allocation52_spill]] }
  0x57   : > { %s211_s27 = sshll.u32 %s204_s10, 4  ;;  %s9247_s5 = scalar_lea.sflag [#allocation4], %s200_s6  ;;  %s9245_s27 = int_to_ptr.vmem [resolvable:$true] %s211_s27 }
  0x58   : > { %p8898_p1 = pneg %p9229_p12 }
  0x5c   : > { %s9243_s22 = scalar_lea.hbm %s12025_s0, %s11981_s9  ;;  %s8901_s11 = scalar_lea.hbm %s12025_s0, 6912 }
  0x5d   : > { %s8896_s13 = scalar_lea.hbm %s9243_s22, 3456  ;;  %p8902_p6 = scmp.lt.u32.totalorder %s9243_s22, %s12025_s0 }
  0x5e   : > { %p8897_p0 = scmp.ne.s32.totalorder %s9243_s22, %s8896_s13  ;;  %p8903_p10 = scmp.lt.u32.totalorder %s8901_s11, %s8896_s13 }
  0x5f   : > { %p8905_p5 = scmp.lt.u32.totalorder %s8896_s13, %s9243_s22 }
  0x60   : > { %p8899_p2 = pnand %p8898_p1, %p8897_p0  ;;  %p8904_p3 = por %p8903_p10, %p8902_p6 }
  0x62   : > { %p8900_p13 = pneg %p8899_p2  ;;  %p8906_p7 = por %p8905_p5, %p8904_p3 }
  0x64   : > { %p8907_p11 = pnand %p8906_p7, %p8900_p13 }
  0x66   : > { %8910 = shalt.err (!%p8907_p11)
}
  0x67   : > { %s8911_s6 = scalar_lea.vmem %s9245_s27, 3456  ;;  %s9056_s29 = smov [#allocation3]  }
  0x68   : > { %p8912_p0 = scmp.ne.s32.totalorder %s9245_s27, %s8911_s6  ;;  %s8916_s10 = sshll.u32 %s9056_s29, 4  ;;  %s8917_s10 = int_to_ptr.vmem [resolvable:$false] %s8916_s10 }
  0x69   : > { %s8918_s9 = scalar_lea.vmem %s8917_s10, 6912  ;;  %p8919_p4 = scmp.lt.s32.totalorder %s9245_s27, %s8917_s10 }
  0x6a   : > { %p8914_p2 = pnand %p8912_p0, %p8898_p1  ;;  %p8920_p6 = scmp.lt.s32.totalorder %s8918_s9, %s8911_s6 }
  0x6c   : > { %p8915_p9 = pneg %p8914_p2  ;;  %p8921_p10 = por %p8920_p6, %p8919_p4 }
  0x6e   : > { %p8922_p3 = pnand %p8921_p10, %p8915_p9 }
  0x70   : > { %8925 = shalt.err (!%p8922_p3)
}
  0x71   : > { %s12026_s13 = smov 64   ;;  %s221_s11 = sand.u32 1, %s9050_s20  }
  0x72   : > { %8404 = dma.hbm_to_vmem [thread:$0]  (!%p9229_p12), %s9243_s22, 3456, %s9245_s27, %s9247_s5, %s12026_s13, %s12026_s13, %s9055_s14  }
  0x73   : > { %s12027_s12 = smul.u32 3456, %s9046_s19  ;;  %s225_s9 = scalar_lea.vmem [#allocation6], %s9227_s30 }
  0x74   : > { %s232_s0 = sshll.u32 %s225_s9, 4  ;;  %s9289_s2 = scalar_lea.sflag [#allocation7], %s221_s11  ;;  %s9287_s0 = int_to_ptr.vmem [resolvable:$true] %s232_s0 }
  0x75   : > { %s9284_s10 = scalar_lea.hbm %s11974_s1, %s12027_s12  ;;  %s8931_s5 = scalar_lea.hbm %s11974_s1, 6912 }
  0x76   : > { %s8926_s3 = scalar_lea.hbm %s9284_s10, 3456  ;;  %p8932_p5 = scmp.lt.u32.totalorder %s9284_s10, %s11974_s1 }
  0x77   : > { %p8927_p4 = scmp.ne.s32.totalorder %s9284_s10, %s8926_s3  ;;  %p8933_p7 = scmp.lt.u32.totalorder %s8931_s5, %s8926_s3 }
  0x78   : > { %p8935_p0 = scmp.lt.u32.totalorder %s8926_s3, %s9284_s10 }
  0x79   : > { %p8929_p9 = pnand %p8927_p4, %p8898_p1  ;;  %p8934_p11 = por %p8933_p7, %p8932_p5 }
  0x7b   : > { %p8930_p13 = pneg %p8929_p9  ;;  %p8936_p2 = por %p8935_p0, %p8934_p11 }
  0x7d   : > { %p8937_p6 = pnand %p8936_p2, %p8930_p13 }
  0x7f   : > { %8940 = shalt.err (!%p8937_p6)
}
  0x80   : > { %s8941_s30 = scalar_lea.vmem %s9287_s0, 3456  ;;  %s9057_s11 = smov [#allocation6]  }
  0x81   : > { %p8942_p10 = scmp.ne.s32.totalorder %s9287_s0, %s8941_s30  ;;  %s8946_s6 = sshll.u32 %s9057_s11, 4  ;;  %s8947_s6 = int_to_ptr.vmem [resolvable:$false] %s8946_s6 }
  0x82   : > { %s8948_s9 = scalar_lea.vmem %s8947_s6, 6912  ;;  %p8949_p9 = scmp.lt.s32.totalorder %s9287_s0, %s8947_s6 }
  0x83   : > { %p8944_p3 = pnand %p8942_p10, %p8898_p1  ;;  %p8950_p5 = scmp.lt.s32.totalorder %s8948_s9, %s8941_s30 }
  0x85   : > { %p8945_p4 = pneg %p8944_p3  ;;  %p8951_p7 = por %p8950_p5, %p8949_p9 }
  0x87   : > { %p8952_p11 = pnand %p8951_p7, %p8945_p4 }
  0x89   : > { %8955 = shalt.err (!%p8952_p11)
}
  0x8a   : > { %8407 = dma.hbm_to_vmem [thread:$0]  (!%p9229_p12), %s9284_s10, 3456, %s9287_s0, %s9289_s2, %s12026_s13, %s12026_s13, %s9055_s14  }
  0x8b   : > { %244 = sbr.rel (%p9137_p8) target bundleno = 1007 (0x3ef), region = 36 }
  0x92   : > { %s9321_s3 = sand.u32 1, %s9034_s16   ;;  %p12028_p1 = scmp.ne.s32.totalorder %s12016_s23, 0 }
  0x93   : > { %s8379_s27 = smul.u32 216, %s9321_s3  ;;  %s247_s22 = scalar_lea.sflag [#allocation4], %s9321_s3 }
  0x95   : > { %s9325_s5 = scalar_lea.vmem [#allocation3], %s8379_s27 }
  0x96   : > { %9009 = dma.done.wait (%p12028_p1), %s247_s22, 3456  }
  0x97   : > { %9011 = vsyncadd (%p12028_p1), %s247_s22, 4294963840  ;;  %s255_s0 = sand.u32 1, %s9118_s21   ;;  %s9332_s25 = scalar_lea.vmem [#allocation6], %s8379_s27 }
  0x98   : > { %s256_s2 = scalar_lea.sflag [#allocation7], %s255_s0 }
  0x99   : > { %9013 = dma.done.wait (%p12028_p1), %s256_s2, 3456  }
  0x9a   : > { %9015 = vsyncadd (%p12028_p1), %s256_s2, 4294963840  ;;  %p12029_p8 = scmp.eq.s32.totalorder %s9118_s21, 0 }
  0x9c   : > { %9017 = dma.done.wait (%p12029_p8), [#allocation7], 18432   ;;  %p12030_p12 = pmov %p12029_p8 }
  0x9d   : > { %p12031_p13 = pmov %p12029_p8 }
  0x9e   : > { %9019 = vsyncadd (%p12030_p12), [#allocation7], 4294948864 }
  0x9f   : > { %9021 = dma.done.wait (%p12031_p13), [#allocation10], 16   ;;  %p12032_p0 = pmov %p12029_p8 }
  0xa0   : > { %v8473_v0 = vld [vmem:[#allocation8 + $0x40] sm:$0xff]   ;;  %v8475_v2 = vld [vmem:[#allocation8 + $0x48] sm:$0xff]   ;;  %v8477_v4 = vld [vmem:[#allocation8 + $0x50] sm:$0xff]   ;;  %vm497_vm0 = vcmask 31744   ;;  %vm514_vm1 = vcmask 1047584   ;;  %v11984_v15 = vmov 0  }
  0xa1   : > { %9023 = vsyncadd (%p12032_p0), [#allocation10], 4294967280  ;;  %v8474_v1 = vld [vmem:[#allocation8] sm:$0xff]   ;;  %7351 = vmatprep.subr.bf16.mxu0 %v8473_v0  ;;  %8359 = vmatprep.subr.bf16.mxu1 %v8473_v0  ;;  %v8476_v3 = vld [vmem:[#allocation8 + $0x8] sm:$0xff]   ;;  %vm1236_vm2 = vcmask 1046528   ;;  %s6815_s21 = sshll.u32 %s9321_s3, 8 }
  0xa2   : > { %7352 = vmatpush3.bf16.msra.mxu0 %v8474_v1  ;;  %8367 = vmatpush3.bf16.msra.mxu1 %v8474_v1  ;;  %v8478_v5 = vld [vmem:[#allocation8 + $0x10] sm:$0xff]   ;;  %v8479_v6 = vld [vmem:[#allocation8 + $0x58] sm:$0xff]   ;;  %v8481_v8 = vld [vmem:[#allocation8 + $0x60] sm:$0xff]   ;;  %vm707_vm3 = vsmask.f32 7424  ;;  %s11853_s23 = scalar_lea.vmem [#allocation11], %s6815_s21 }
  0xa3   : > { %7353 = vmatprep.subr.bf16.mxu0 %v8475_v2  ;;  %8360 = vmatprep.subr.bf16.mxu1 %v8475_v2  ;;  %v8480_v7 = vld [vmem:[#allocation8 + $0x18] sm:$0xff]   ;;  %v8482_v9 = vld [vmem:[#allocation8 + $0x20] sm:$0xff]   ;;  %v8483_v10 = vld [vmem:[#allocation8 + $0x68] sm:$0xff]   ;;  %s7350_s14 = sshll.u32 %s9042_s18, 12  ;;  %s6658_s7 = sshll.u32 %s11853_s23, 4  ;;  %s11922_s7 = int_to_ptr.vmem [resolvable:$true] %s6658_s7 }
  0xa4   : > { %v9347_v11 = vld [vmem:[%s9332_s25] sm:$0xff]   ;;  %v9355_v14 = vld [vmem:[%s9325_s5] sm:$0xff]   ;;  %v9406_v41 = vld [vmem:[%s9332_s25 + $0x18] sm:$0xff]   ;;  %s11920_s12 = scalar_lea.hbm %s11977_s4, %s7350_s14  ;;  %s6642_s29 = scalar_lea.sflag [#allocation5], %s9321_s3 }
  0xa5   : > { %v8484_v12 = vld [vmem:[#allocation8 + $0x28] sm:$0xff]   ;;  %627 = vst.msk [vmem:[#allocation2 + $0x8] sm:$0xff] %vm497_vm0, %v9347_v11  ;;  %v9362_v16 = vld [vmem:[%s9325_s5 + $0x60] sm:$0xff]   ;;  %v8485_v17 = vld [vmem:[#allocation8 + $0x70] sm:$0xff]   ;;  %v999_v33 = vshll.u32 %v9347_v11, 16  ;;  %v711_v36 = vshll.u32 %v9355_v14, 16 }
  0xa6   : > { %7354 = vmatpush3.bf16.msra.mxu0 %v8476_v3  ;;  %8368 = vmatpush3.bf16.msra.mxu1 %v8476_v3  ;;  %v9350_v13 = vld [vmem:[%s9332_s25 + $0x60] sm:$0xff]   ;;  %643 = vst.msk [vmem:[#allocation2 + $0x8] sm:$0xff] %vm514_vm1, %v11984_v15  ;;  %v8487_v19 = vld [vmem:[#allocation8 + $0x78] sm:$0xff]   ;;  %v8493_v24 = vld [vmem:[#allocation8 + $0xc0] sm:$0xff]   ;;  %v997_v39 = vshrl.u32 %v9347_v11, 16  ;;  %s8956_s30 = scalar_lea.vmem %s11922_s7, 4096 }
  0xa7   : > { %7355 = vmatprep.subr.bf16.mxu0 %v8477_v4  ;;  %8361 = vmatprep.subr.bf16.mxu1 %v8477_v4  ;;  %635 = vst.msk [vmem:[#allocation2 + $0x488] sm:$0xff] %vm497_vm0, %v9350_v13  ;;  %498 = vst.msk [vmem:[#allocation2] sm:$0xff] %vm497_vm0, %v9355_v14  ;;  %v8486_v18 = vld [vmem:[#allocation8 + $0x30] sm:$0xff]   ;;  %v8488_v21 = vld [vmem:[#allocation8 + $0x38] sm:$0xff]   ;;  %v9408_v42 = vrot.slane %v999_v33, 1  ;;  %v9421_v49 = vrot.slane %v711_v36, 1  ;;  %p8957_p2 = scmp.ne.s32.totalorder %s11922_s7, %s8956_s30 }
  0xa8   : > { %651 = vst.msk [vmem:[#allocation2 + $0x488] sm:$0xff] %vm514_vm1, %v11984_v15  ;;  %515 = vst.msk [vmem:[#allocation2] sm:$0xff] %vm514_vm1, %v11984_v15  ;;  %v9375_v20 = vld [vmem:[%s9332_s25 + $0xc] sm:$0xff]   ;;  %v9387_v26 = vld [vmem:[%s9325_s5 + $0xc] sm:$0xff]   ;;  %v1095_v61 = vshll.u32 %v9350_v13, 16  ;;  %p12193_p6 = scmp.ne.s32.totalorder %s12023_s28, 0 }
  0xa9   : > { %506 = vst.msk [vmem:[#allocation2 + $0x480] sm:$0xff] %vm497_vm0, %v9362_v16  ;;  %v9378_v22 = vld [vmem:[%s9332_s25 + $0x6c] sm:$0xff]   ;;  %628 = vst.msk [vmem:[#allocation2 + $0x98] sm:$0xff] %vm497_vm0, %v9375_v20  ;;  %v9392_v28 = vld [vmem:[%s9325_s5 + $0x6c] sm:$0xff]   ;;  %v1011_v54 = vshll.u32 %v9375_v20, 16  ;;  %v723_v59 = vshll.u32 %v9387_v26, 16 }
  0xaa   : > { %7356 = vmatpush3.bf16.msra.mxu0 %v8478_v5  ;;  %8369 = vmatpush3.bf16.msra.mxu1 %v8478_v5  ;;  %523 = vst.msk [vmem:[#allocation2 + $0x480] sm:$0xff] %vm514_vm1, %v11984_v15  ;;  %644 = vst.msk [vmem:[#allocation2 + $0x98] sm:$0xff] %vm514_vm1, %v11984_v15  ;;  %v8495_v27 = vld [vmem:[#allocation8 + $0x140] sm:$0xff]   ;;  %v8501_v34 = vld [vmem:[#allocation8 + $0xc8] sm:$0xff]   ;;  %v819_v57 = vshll.u32 %v9392_v28, 16  ;;  %p8958_p10 = pnand %p8957_p2, %p12193_p6  ;;  %s9059_s18 = smov [#allocation11]  }
  0xab   : > { %7357 = vmatprep.subr.bf16.mxu0 %v8479_v6  ;;  %8362 = vmatprep.subr.bf16.mxu1 %v8479_v6  ;;  %636 = vst.msk [vmem:[#allocation2 + $0x518] sm:$0xff] %vm497_vm0, %v9378_v22  ;;  %v8494_v30 = vld [vmem:[#allocation8 + $0x80] sm:$0xff]   ;;  %499 = vst.msk [vmem:[#allocation2 + $0x90] sm:$0xff] %vm497_vm0, %v9387_v26  ;;  %v8503_v35 = vld [vmem:[#allocation8 + $0x148] sm:$0xff]   ;;  %v9446_v63 = vrot.slane %v1011_v54, 1  ;;  %v9455_v4 = vrot.slane %v723_v59, 1 }
  0xac   : > { %652 = vst.msk [vmem:[#allocation2 + $0x518] sm:$0xff] %vm514_vm1, %v11984_v15  ;;  %v8496_v31 = vld [vmem:[#allocation8 + $0x100] sm:$0xff]   ;;  %516 = vst.msk [vmem:[#allocation2 + $0x90] sm:$0xff] %vm514_vm1, %v11984_v15  ;;  %v8502_v37 = vld [vmem:[#allocation8 + $0x88] sm:$0xff]   ;;  %p8959_p3 = pneg %p8958_p10  ;;  %s8960_s11 = sshll.u32 %s9059_s18, 4  ;;  %s8961_s11 = int_to_ptr.vmem [resolvable:$false] %s8960_s11 }
  0xad   : > { %v3682_v23 = vld [vmem:[#allocation2 + $0x8] sm:$0xff]  ;;  %507 = vst.msk [vmem:[#allocation2 + $0x510] sm:$0xff] %vm497_vm0, %v9392_v28  ;;  %629 = vst.msk [vmem:[#allocation2 + $0x128] sm:$0xff] %vm497_vm0, %v9406_v41  ;;  %v9419_v48 = vld [vmem:[%s9325_s5 + $0x18] sm:$0xff]   ;;  %s8962_s6 = scalar_lea.vmem %s8961_s11, 8192  ;;  %p8963_p4 = scmp.lt.s32.totalorder %s11922_s7, %s8961_s11 }
  0xae   : > { %7358 = vmatpush3.bf16.msra.mxu0 %v8480_v7  ;;  %8370 = vmatpush3.bf16.msra.mxu1 %v8480_v7  ;;  %524 = vst.msk [vmem:[#allocation2 + $0x510] sm:$0xff] %vm514_vm1, %v11984_v15  ;;  %v8504_v38 = vld [vmem:[#allocation8 + $0x108] sm:$0xff]   ;;  %645 = vst.msk [vmem:[#allocation2 + $0x128] sm:$0xff] %vm514_vm1, %v11984_v15  ;;  %v9433_v53 = vld [vmem:[%s9325_s5 + $0x78] sm:$0xff]   ;;  %v9460_v7 = vrot.slane %v1095_v61, 1  ;;  %p8964_p9 = scmp.lt.s32.totalorder %s8962_s6, %s8956_s30 }
  0xaf   : > { %7359 = vmatprep.subr.bf16.mxu0 %v8481_v8  ;;  %8363 = vmatprep.subr.bf16.mxu1 %v8481_v8  ;;  %v3826_v25 = vld [vmem:[#allocation2 + $0x488] sm:$0xff]  ;;  %v3681_v29 = vld [vmem:[#allocation2] sm:$0xff]  ;;  %500 = vst.msk [vmem:[#allocation2 + $0x120] sm:$0xff] %vm497_vm0, %v9419_v48  ;;  %v8509_v56 = vld [vmem:[#allocation8 + $0xd0] sm:$0xff]  }
  0xb0   : > { %5160 = vmatprep.mubr.bf16.mxu0 %v3682_v23  ;;  %5224 = vmatprep.mubr.bf16.mxu1 %v3826_v25  ;;  %v9412_v45 = vld [vmem:[%s9332_s25 + $0x78] sm:$0xff]   ;;  %517 = vst.msk [vmem:[#allocation2 + $0x120] sm:$0xff] %vm514_vm1, %v11984_v15  ;;  %v8510_v58 = vld [vmem:[#allocation8 + $0x90] sm:$0xff]   ;;  %v8518_v25 = vld [vmem:[#allocation8 + $0x98] sm:$0xff]   ;;  %p8965_p5 = por %p8964_p9, %p8963_p4 }
  0xb1   : > { %v3825_v32 = vld [vmem:[#allocation2 + $0x480] sm:$0xff]  ;;  %v3700_v40 = vld [vmem:[#allocation2 + $0x98] sm:$0xff]  ;;  %637 = vst.msk [vmem:[#allocation2 + $0x5a8] sm:$0xff] %vm497_vm0, %v9412_v45  ;;  %508 = vst.msk [vmem:[#allocation2 + $0x5a0] sm:$0xff] %vm497_vm0, %v9433_v53 }
  0xb2   : > { %7360 = vmatpush3.bf16.msra.mxu0 %v8482_v9  ;;  %8371 = vmatpush3.bf16.msra.mxu1 %v8482_v9  ;;  %653 = vst.msk [vmem:[#allocation2 + $0x5a8] sm:$0xff] %vm514_vm1, %v11984_v15  ;;  %525 = vst.msk [vmem:[#allocation2 + $0x5a0] sm:$0xff] %vm514_vm1, %v11984_v15  ;;  %v8511_v60 = vld [vmem:[#allocation8 + $0x150] sm:$0xff]   ;;  %v9467_v9 = vld [vmem:[%s9325_s5 + $0x24] sm:$0xff]   ;;  %p8966_p7 = pnand %p8965_p5, %p8959_p3 }
  0xb3   : > { %7361 = vmatprep.subr.bf16.mxu0 %v8483_v10  ;;  %8364 = vmatprep.subr.bf16.mxu1 %v8483_v10  ;;  %v3844_v44 = vld [vmem:[#allocation2 + $0x518] sm:$0xff]  ;;  %v3699_v50 = vld [vmem:[#allocation2 + $0x90] sm:$0xff]  ;;  %501 = vst.msk [vmem:[#allocation2 + $0x1b0] sm:$0xff] %vm497_vm0, %v9467_v9  ;;  %v8554_v47 = vld [vmem:[%s9325_s5 + $0x8] ss:$0 sps:$4 sm:$0x11]  }
  0xb4   : > { %v8512_v62 = vld [vmem:[#allocation8 + $0x110] sm:$0xff]   ;;  %518 = vst.msk [vmem:[#allocation2 + $0x1b0] sm:$0xff] %vm514_vm1, %v11984_v15  ;;  %v9491_v33 = vld [vmem:[%s9332_s25 + $0x30] sm:$0xff]  }
  0xb5   : > { %v3843_v52 = vld [vmem:[#allocation2 + $0x510] sm:$0xff]  ;;  %v3718_v2 = vld [vmem:[#allocation2 + $0x128] sm:$0xff]  ;;  %631 = vst.msk [vmem:[#allocation2 + $0x248] sm:$0xff] %vm497_vm0, %v9491_v33  ;;  %v8549_v5 = vld [vmem:[#allocation8 + $0xf8] sm:$0xff]  }
  0xb6   : > { %7362 = vmatpush3.bf16.msra.mxu0 %v8484_v12  ;;  %8372 = vmatpush3.bf16.msra.mxu1 %v8484_v12  ;;  %v9449_v0 = vld [vmem:[%s9332_s25 + $0x24] sm:$0xff]   ;;  %647 = vst.msk [vmem:[#allocation2 + $0x248] sm:$0xff] %vm514_vm1, %v11984_v15 }
  0xb7   : > { %7363 = vmatprep.subr.bf16.mxu0 %v8485_v17  ;;  %8365 = vmatprep.subr.bf16.mxu1 %v8485_v17  ;;  %v9453_v3 = vld [vmem:[%s9332_s25 + $0x84] sm:$0xff]   ;;  %630 = vst.msk [vmem:[#allocation2 + $0x1b8] sm:$0xff] %vm497_vm0, %v9449_v0  ;;  %v3717_v8 = vld [vmem:[#allocation2 + $0x120] sm:$0xff]  ;;  %v1035_v61 = vshll.u32 %v9449_v0, 16 }
  0xb8   : > { %646 = vst.msk [vmem:[#allocation2 + $0x1b8] sm:$0xff] %vm514_vm1, %v11984_v15  ;;  %v9474_v17 = vld [vmem:[%s9325_s5 + $0x84] sm:$0xff]   ;;  %v9636_v36 = vld [vmem:[%s9325_s5 + $0x54] sm:$0xff]  }
  0xb9   : > { %v3862_v6 = vld [vmem:[#allocation2 + $0x5a8] sm:$0xff]  ;;  %638 = vst.msk [vmem:[#allocation2 + $0x638] sm:$0xff] %vm497_vm0, %v9453_v3  ;;  %509 = vst.msk [vmem:[#allocation2 + $0x630] sm:$0xff] %vm497_vm0, %v9474_v17  ;;  %v8551_v23 = vld [vmem:[#allocation8 + $0x178] sm:$0xff]  }
  0xba   : > { %7364 = vmatpush3.bf16.msra.mxu0 %v8486_v18  ;;  %8373 = vmatpush3.bf16.msra.mxu1 %v8486_v18  ;;  %654 = vst.msk [vmem:[#allocation2 + $0x638] sm:$0xff] %vm514_vm1, %v11984_v15  ;;  %v807_v18 = vshll.u32 %v9362_v16, 16  ;;  %526 = vst.msk [vmem:[#allocation2 + $0x630] sm:$0xff] %vm514_vm1, %v11984_v15  ;;  %v8536_v12 = vld [vmem:[#allocation8 + $0x128] sm:$0xff]   ;;  %v8552_v55 = vld [vmem:[#allocation8 + $0x138] sm:$0xff]  }
  0xbb   : > { %7365 = vmatprep.subr.bf16.mxu0 %v8487_v19  ;;  %8366 = vmatprep.subr.bf16.mxu1 %v8487_v19  ;;  %v3861_v19 = vld [vmem:[#allocation2 + $0x5a0] sm:$0xff]  ;;  %v3735_v54 = vld [vmem:[#allocation2 + $0x1b0] sm:$0xff]  ;;  %505 = vst.msk [vmem:[#allocation2 + $0x3f0] sm:$0xff] %vm497_vm0, %v9636_v36 }
  0xbc   : > { %522 = vst.msk [vmem:[#allocation2 + $0x3f0] sm:$0xff] %vm514_vm1, %v11984_v15  ;;  %v8553_v1 = vld [vmem:[%s9332_s25 + $0x8] ss:$0 sps:$4 sm:$0x11]  }
  0xbd   : > { %v1334_v43 = vrot.slane %v8553_v1, 1 }
  0xbe   : > { %7366 = vmatpush3.bf16.msra.mxu0 %v8488_v21  ;;  %8374 = vmatpush3.bf16.msra.mxu1 %v8488_v21  ;;  %v8517_v21 = vld [vmem:[#allocation8 + $0xd8] sm:$0xff]  }
  0xbf   : > { %7463 = vmatprep.subr.bf16.mxu1 %v8493_v24  ;;  %7575 = vmatprep.subr.bf16.mxu0 %v8495_v27  ;;  %v1023_v24 = vshll.u32 %v9406_v41, 16  ;;  %v9643_v27 = vld [vmem:[%s9325_s5 + $0xb4] sm:$0xff]  }
  0xc0   : > { %12037 = vst [vmem:[#allocation21_spill] sm:$0xff] %v9643_v27  ;;  %513 = vst.msk [vmem:[#allocation2 + $0x870] sm:$0xff] %vm497_vm0, %v9643_v27 }
  0xc1   : > { %5161 = vmatmul.mubr.bf16.vlgmr.msra.gmra.mrb[0].mxu0 %v3681_v29  ;;  %5225 = vmatmul.mubr.bf16.vlgmr.msra.gmra.mrb[0].mxu1 %v3825_v32  ;;  %v8519_v29 = vld [vmem:[#allocation8 + $0x158] sm:$0xff]   ;;  %530 = vst.msk [vmem:[#allocation2 + $0x870] sm:$0xff] %vm514_vm1, %v11984_v15 }
  0xc2   : > { %7464 = vmatpush3.bf16.msra.mxu1 %v8494_v30  ;;  %7576 = vmatpush3.bf16.msra.mxu0 %v8496_v31  ;;  %v735_v30 = vshll.u32 %v9419_v48, 16  ;;  %v8520_v31 = vld [vmem:[#allocation8 + $0x118] sm:$0xff]  }
  0xc3   : > { %5168 = vmatprep.mubr.bf16.mxu0 %v3700_v40  ;;  %5232 = vmatprep.mubr.bf16.mxu1 %v3844_v44  ;;  %v9503_v44 = vrot.slane %v807_v18, 1  ;;  %v8527_v18 = vld [vmem:[#allocation8 + $0x160] sm:$0xff]  }
  0xc4   : > { %7465 = vmatprep.subr.bf16.mxu1 %v8501_v34  ;;  %7577 = vmatprep.subr.bf16.mxu0 %v8503_v35  ;;  %v9493_v34 = vrot.slane %v1023_v24, 1  ;;  %v3736_v35 = vld [vmem:[#allocation2 + $0x1b8] sm:$0xff]  ;;  %v9501_v40 = vrot.slane %v735_v30, 1  ;;  %v9532_v24 = vrot.slane %v1035_v61, 1 }
  0xc6   : > { %7466 = vmatpush3.bf16.msra.mxu1 %v8502_v37  ;;  %7578 = vmatpush3.bf16.msra.mxu0 %v8504_v38  ;;  %v3880_v37 = vld [vmem:[#allocation2 + $0x638] sm:$0xff] }
  0xc7   : > { %7467 = vmatprep.subr.bf16.mxu1 %v8509_v56  ;;  %7579 = vmatprep.subr.bf16.mxu0 %v8511_v60  ;;  %v9499_v38 = vld [vmem:[%s9332_s25 + $0x90] sm:$0xff]   ;;  %v9514_v56 = vld [vmem:[%s9325_s5 + $0x90] sm:$0xff]  }
  0xc8   : > { %639 = vst.msk [vmem:[#allocation2 + $0x6c8] sm:$0xff] %vm497_vm0, %v9499_v38  ;;  %v3879_v60 = vld [vmem:[#allocation2 + $0x630] sm:$0xff]  ;;  %510 = vst.msk [vmem:[#allocation2 + $0x6c0] sm:$0xff] %vm497_vm0, %v9514_v56 }
  0xc9   : > { %5169 = vmatmul.mubr.bf16.gmra.mrb[4].mxu0 %v3699_v50  ;;  %5233 = vmatmul.mubr.bf16.gmra.mrb[4].mxu1 %v3843_v52  ;;  %v9508_v50 = vld [vmem:[%s9325_s5 + $0x30] sm:$0xff]   ;;  %655 = vst.msk [vmem:[#allocation2 + $0x6c8] sm:$0xff] %vm514_vm1, %v11984_v15  ;;  %527 = vst.msk [vmem:[#allocation2 + $0x6c0] sm:$0xff] %vm514_vm1, %v11984_v15 }
  0xca   : > { %7468 = vmatpush3.bf16.msra.mxu1 %v8510_v58  ;;  %7580 = vmatpush3.bf16.msra.mxu0 %v8512_v62  ;;  %502 = vst.msk [vmem:[#allocation2 + $0x240] sm:$0xff] %vm497_vm0, %v9508_v50  ;;  %v8525_v62 = vld [vmem:[#allocation8 + $0xe0] sm:$0xff]   ;;  %v759_v59 = vshll.u32 %v9508_v50, 16  ;;  %v8535_v52 = vld [vmem:[#allocation8 + $0x168] sm:$0xff]  }
  0xcb   : > { %5176 = vmatprep.mubr.bf16.mxu0 %v3718_v2  ;;  %5240 = vmatprep.mubr.bf16.mxu1 %v3862_v6  ;;  %519 = vst.msk [vmem:[#allocation2 + $0x240] sm:$0xff] %vm514_vm1, %v11984_v15  ;;  %v8526_v6 = vld [vmem:[#allocation8 + $0xa0] sm:$0xff]  }
  0xcc   : > { %7469 = vmatprep.subr.bf16.mxu1 %v8517_v21  ;;  %7581 = vmatprep.subr.bf16.mxu0 %v8519_v29  ;;  %v8528_v21 = vld [vmem:[#allocation8 + $0x120] sm:$0xff]   ;;  %v9584_v2 = vrot.slane %v759_v59, 1  ;;  %v8544_v59 = vld [vmem:[#allocation8 + $0x130] sm:$0xff]  }
  0xcd   : > { %v9535_v29 = vld [vmem:[%s9332_s25 + $0x3c] sm:$0xff]   ;;  %v9621_v58 = vld [vmem:[%s9332_s25 + $0x54] sm:$0xff]  }
  0xce   : > { %7470 = vmatpush3.bf16.msra.mxu1 %v8518_v25  ;;  %7582 = vmatpush3.bf16.msra.mxu0 %v8520_v31  ;;  %v3754_v25 = vld [vmem:[#allocation2 + $0x248] sm:$0xff]  ;;  %632 = vst.msk [vmem:[#allocation2 + $0x2d8] sm:$0xff] %vm497_vm0, %v9535_v29  ;;  %v9582_v31 = vld [vmem:[%s9332_s25 + $0xa8] sm:$0xff]   ;;  %634 = vst.msk [vmem:[#allocation2 + $0x3f8] sm:$0xff] %vm497_vm0, %v9621_v58 }
  0xcf   : > { %7471 = vmatprep.subr.bf16.mxu1 %v8525_v62  ;;  %7583 = vmatprep.subr.bf16.mxu0 %v8527_v18  ;;  %648 = vst.msk [vmem:[#allocation2 + $0x2d8] sm:$0xff] %vm514_vm1, %v11984_v15  ;;  %v8534_v18 = vld [vmem:[#allocation8 + $0xa8] sm:$0xff]   ;;  %12034 = vst [vmem:[#allocation18_spill] sm:$0xff] %v9582_v31 }
  0xd0   : > { %641 = vst.msk [vmem:[#allocation2 + $0x7e8] sm:$0xff] %vm497_vm0, %v9582_v31  ;;  %v3807_v31 = vld [vmem:[#allocation2 + $0x3f0] sm:$0xff] }
  0xd1   : > { %5177 = vmatmul.mubr.bf16.gmra.mrb[8].mxu0 %v3717_v8  ;;  %5241 = vmatmul.mubr.bf16.gmra.mrb[8].mxu1 %v3861_v19  ;;  %v1107_v8 = vshll.u32 %v9378_v22, 16  ;;  %v747_v19 = vshll.u32 %v9467_v9, 16  ;;  %657 = vst.msk [vmem:[#allocation2 + $0x7e8] sm:$0xff] %vm514_vm1, %v11984_v15  ;;  %650 = vst.msk [vmem:[#allocation2 + $0x3f8] sm:$0xff] %vm514_vm1, %v11984_v15 }
  0xd2   : > { %5184 = vmatprep.mubr.bf16.mxu0 %v3736_v35  ;;  %5248 = vmatprep.mubr.bf16.mxu1 %v3880_v37  ;;  %v9540_v35 = vld [vmem:[%s9332_s25 + $0x9c] sm:$0xff]   ;;  %v1047_v37 = vshll.u32 %v9491_v33, 16 }
  0xd3   : > { %7472 = vmatpush3.bf16.msra.mxu1 %v8526_v6  ;;  %7584 = vmatpush3.bf16.msra.mxu0 %v8528_v21  ;;  %v9548_v61 = vrot.slane %v747_v19, 1  ;;  %v9550_v62 = vrot.slane %v1107_v8, 1  ;;  %v3753_v6 = vld [vmem:[#allocation2 + $0x240] sm:$0xff]  ;;  %640 = vst.msk [vmem:[#allocation2 + $0x758] sm:$0xff] %vm497_vm0, %v9540_v35  ;;  %v8541_v19 = vld [vmem:[#allocation8 + $0xf0] sm:$0xff]  }
  0xd4   : > { %v3897_v21 = vld [vmem:[#allocation2 + $0x6c0] sm:$0xff]  ;;  %656 = vst.msk [vmem:[#allocation2 + $0x758] sm:$0xff] %vm514_vm1, %v11984_v15  ;;  %7585 = vmatprep.subr.bf16.mxu0 %v8535_v52  ;;  %v1059_v52 = vshll.u32 %v9535_v29, 16 }
  0xd5   : > { %v9562_v8 = vld [vmem:[%s9325_s5 + $0x9c] sm:$0xff]  }
  0xd6   : > { %12033 = vst [vmem:[#allocation17_spill] sm:$0xff] %v9562_v8  ;;  %511 = vst.msk [vmem:[#allocation2 + $0x750] sm:$0xff] %vm497_vm0, %v9562_v8 }
  0xd7   : > { %528 = vst.msk [vmem:[#allocation2 + $0x750] sm:$0xff] %vm514_vm1, %v11984_v15  ;;  %7586 = vmatpush3.bf16.msra.mxu0 %v8536_v12  ;;  %v9595_v12 = vld [vmem:[%s9325_s5 + $0x48] sm:$0xff]  }
  0xd8   : > { %504 = vst.msk [vmem:[#allocation2 + $0x360] sm:$0xff] %vm497_vm0, %v9595_v12  ;;  %v3808_v51 = vld [vmem:[#allocation2 + $0x3f8] sm:$0xff] }
  0xd9   : > { %5185 = vmatmul.mubr.bf16.gmra.mrb[12].mxu0 %v3735_v54  ;;  %5249 = vmatmul.mubr.bf16.gmra.mrb[12].mxu1 %v3879_v60  ;;  %v3898_v54 = vld [vmem:[#allocation2 + $0x6c8] sm:$0xff]  ;;  %v9546_v60 = vld [vmem:[%s9325_s5 + $0x3c] sm:$0xff]   ;;  %521 = vst.msk [vmem:[#allocation2 + $0x360] sm:$0xff] %vm514_vm1, %v11984_v15 }
  0xda   : > { %5192 = vmatprep.mubr.bf16.mxu0 %v3754_v25  ;;  %5256 = vmatprep.mubr.bf16.mxu1 %v3898_v54  ;;  %503 = vst.msk [vmem:[#allocation2 + $0x2d0] sm:$0xff] %vm497_vm0, %v9546_v60  ;;  %v8533_v54 = vld [vmem:[#allocation8 + $0xe8] sm:$0xff]   ;;  %v3772_v25 = vld [vmem:[#allocation2 + $0x2d8] sm:$0xff]  ;;  %v771_v30 = vshll.u32 %v9546_v60, 16 }
  0xdb   : > { %520 = vst.msk [vmem:[#allocation2 + $0x2d0] sm:$0xff] %vm514_vm1, %v11984_v15  ;;  %7473 = vmatprep.subr.bf16.mxu1 %v8533_v54  ;;  %v9602_v54 = vld [vmem:[%s9325_s5 + $0xa8] sm:$0xff]  }
  0xdc   : > { %7474 = vmatpush3.bf16.msra.mxu1 %v8534_v18  ;;  %v3916_v18 = vld [vmem:[#allocation2 + $0x758] sm:$0xff]  ;;  %12035 = vst [vmem:[#allocation19_spill] sm:$0xff] %v9602_v54  ;;  %512 = vst.msk [vmem:[#allocation2 + $0x7e0] sm:$0xff] %vm497_vm0, %v9602_v54  ;;  %v9630_v32 = vrot.slane %v771_v30, 1  ;;  %v831_v30 = vshll.u32 %v9433_v53, 16  ;;  %v8555_v54 = vld [vmem:[#allocation8 + $0x1c0] sm:$0xff]  }
  0xdd   : > { %529 = vst.msk [vmem:[#allocation2 + $0x7e0] sm:$0xff] %vm514_vm1, %v11984_v15  ;;  %7475 = vmatprep.subr.bf16.mxu1 %v8541_v19  ;;  %v3934_v19 = vld [vmem:[#allocation2 + $0x7e8] sm:$0xff] }
  0xde   : > { %v3915_v10 = vld [vmem:[#allocation2 + $0x750] sm:$0xff] }
  0xe1   : > { %5193 = vmatmul.mubr.bf16.gmra.mrb[16].mxu0 %v3753_v6  ;;  %5257 = vmatmul.mubr.bf16.gmra.mrb[16].mxu1 %v3897_v21  ;;  %v9568_v6 = vrot.slane %v1047_v37, 1  ;;  %v9578_v37 = vld [vmem:[%s9332_s25 + $0x48] sm:$0xff]  }
  0xe2   : > { %5200 = vmatprep.mubr.bf16.mxu0 %v3772_v25  ;;  %633 = vst.msk [vmem:[#allocation2 + $0x368] sm:$0xff] %vm497_vm0, %v9578_v37  ;;  %5264 = vmatprep.mubr.bf16.mxu1 %v3916_v18  ;;  %v3771_v21 = vld [vmem:[#allocation2 + $0x2d0] sm:$0xff]  ;;  %v9604_v18 = vrot.slane %v819_v57, 1  ;;  %v9614_v57 = vrot.slane %v1059_v52, 1 }
  0xe3   : > { %649 = vst.msk [vmem:[#allocation2 + $0x368] sm:$0xff] %vm514_vm1, %v11984_v15  ;;  %v8543_v25 = vld [vmem:[#allocation8 + $0x170] sm:$0xff]  }
  0xe4   : > { %7587 = vmatprep.subr.bf16.mxu0 %v8543_v25  ;;  %v8550_v25 = vld [vmem:[#allocation8 + $0xb8] sm:$0xff]  }
  0xe5   : > { %7588 = vmatpush3.bf16.msra.mxu0 %v8544_v59 }
  0xe6   : > { %7589 = vmatprep.subr.bf16.mxu0 %v8551_v23 }
  0xe9   : > { %5201 = vmatmul.mubr.bf16.gmra.mrb[20].mxu0 %v3771_v21  ;;  %5265 = vmatmul.mubr.bf16.gmra.mrb[20].mxu1 %v3915_v10  ;;  %v8542_v21 = vld [vmem:[#allocation8 + $0xb0] sm:$0xff]   ;;  %v1119_v10 = vshll.u32 %v9412_v45, 16 }
  0xea   : > { %7476 = vmatpush3.bf16.msra.mxu1 %v8542_v21  ;;  %v3790_v52 = vld [vmem:[#allocation2 + $0x368] sm:$0xff]  ;;  %5272 = vmatprep.mubr.bf16.mxu1 %v3934_v19  ;;  %v3933_v19 = vld [vmem:[#allocation2 + $0x7e0] sm:$0xff] }
  0xeb   : > { %5208 = vmatprep.mubr.bf16.mxu0 %v3790_v52  ;;  %v9628_v21 = vld [vmem:[%s9332_s25 + $0xb4] sm:$0xff]   ;;  %v9638_v59 = vrot.slane %v1119_v10, 1  ;;  %v1071_v10 = vshll.u32 %v9578_v37, 16  ;;  %7477 = vmatprep.subr.bf16.mxu1 %v8549_v5  ;;  %v12038_v5 = vshrl.u32 %v9355_v14, 16 }
  0xec   : > { %12036 = vst [vmem:[#allocation20_spill] sm:$0xff] %v9628_v21  ;;  %v3789_v52 = vld [vmem:[#allocation2 + $0x360] sm:$0xff]  ;;  %642 = vst.msk [vmem:[#allocation2 + $0x878] sm:$0xff] %vm497_vm0, %v9628_v21  ;;  %7590 = vmatpush3.bf16.msra.mxu0 %v8552_v55  ;;  %v716_v21 = vshll.u32 %v8554_v47, 16 }
  0xed   : > { %658 = vst.msk [vmem:[#allocation2 + $0x878] sm:$0xff] %vm514_vm1, %v11984_v15  ;;  %v1004_v15 = vshll.u32 %v8553_v1, 16  ;;  %v714_v27 = vor.u32 %v9421_v49, %v12038_v5  ;;  %v9672_v8 = vrot.slane %v1071_v10, 1  ;;  %v1255_v1 = vrot.slane %v9595_v12, 1 }
  0xee   : > { %7478 = vmatpush3.bf16.msra.mxu1 %v8550_v25  ;;  %v1238_v25 = vrot.slane %v8554_v47, 1  ;;  %v718_v49 = vrot.slane %v716_v21, 1  ;;  %v12040_v47 = vrot.slane %v9355_v14, 1  ;;  %v8559_v14 = vld [vmem:[%s9332_s25 + $0x14] ss:$0 sps:$4 sm:$0x11]  }
  0xef   : > { %v1006_v23 = vrot.slane %v1004_v15, 1  ;;  %7687 = vmatprep.subr.bf16.mxu1 %v8555_v54  ;;  %v12041_v15 = vmov 0   ;;  %v8560_v21 = vld [vmem:[%s9325_s5 + $0x14] ss:$0 sps:$4 sm:$0x11]   ;;  %v9695_v10 = vrot.slane %v831_v30, 1 }
  0xf0   : > { %v1016_v5 = vshll.u32 %v8559_v14, 16 }
  0xf1   : > { %5209 = vmatmul.mubr.bf16.gmra.mrb[24].mxu0 %v3789_v52  ;;  %5273 = vmatmul.mubr.bf16.gmra.mrb[24].mxu1 %v3933_v19  ;;  %v783_v19 = vshll.u32 %v9595_v12, 16  ;;  %v1002_v52 = vor.u32 %v9408_v42, %v997_v39  ;;  %v781_v39 = vshrl.u32 %v9595_v12, 16  ;;  %v3951_v42 = vld [vmem:[#allocation2 + $0x870] sm:$0xff]  ;;  %v12064_v12 = vshrl.u32 %v9621_v58, 16 }
  0xf2   : > { %5216 = vmatprep.mubr.bf16.mxu0 %v3808_v51  ;;  %v12039_v51 = vrot.slane %v9347_v11, 1  ;;  %v1018_v30 = vrot.slane %v1016_v5, 1 }
  0xf3   : > { %v1007_v11 = vsel %vm707_vm3, %v1002_v52, %v1006_v23  ;;  %v9689_v54 = vrot.slane %v783_v19, 1  ;;  %v1337_v19 = vrot.slane %v8559_v14, 1  ;;  %v8558_v14 = vld [vmem:[#allocation8 + $0x200] sm:$0xff]  }
  0xf4   : > { %v3952_v46 = vld [vmem:[#allocation2 + $0x878] sm:$0xff]  ;;  %v1335_v55 = vsel %vm1236_vm2, %v12039_v51, %v1334_v43  ;;  %v8557_v43 = vld [vmem:[#allocation8 + $0x240] sm:$0xff]   ;;  %1204 = vst.msk [vmem:[#allocation2 + $0x18] sm:$0xff] %vm497_vm0, %v1007_v11  ;;  %v728_v51 = vshll.u32 %v8560_v21, 16  ;;  %v12045_v11 = vshrl.u32 %v9406_v41, 16 }
  0xf5   : > { %5280 = vmatprep.mubr.bf16.mxu1 %v3952_v46  ;;  %1397 = vst.msk [vmem:[#allocation2 + $0x28] sm:$0xff] %vm497_vm0, %v1335_v55  ;;  %v1239_v46 = vsel %vm1236_vm2, %v12040_v47, %v1238_v25  ;;  %7799 = vmatprep.subr.bf16.mxu0 %v8557_v43  ;;  %v12043_v25 = vshrl.u32 %v9387_v26, 16  ;;  %v1241_v55 = vrot.slane %v8560_v21, 1  ;;  %v12044_v47 = vrot.slane %v9375_v20, 1 }
  0xf6   : > { %1413 = vst.msk [vmem:[#allocation2 + $0x28] sm:$0xff] %vm514_vm1, %v12041_v15  ;;  %1220 = vst.msk [vmem:[#allocation2 + $0x18] sm:$0xff] %vm514_vm1, %v12041_v15  ;;  %v8562_v43 = vld [vmem:[%s9325_s5 + $0x20] ss:$0 sps:$4 sm:$0x11]   ;;  %v12046_v21 = vrot.slane %v9387_v26, 1 }
  0xf7   : > { %1301 = vst.msk [vmem:[#allocation2 + $0x20] sm:$0xff] %vm497_vm0, %v1239_v46  ;;  %v726_v23 = vor.u32 %v9455_v4, %v12043_v25  ;;  %v1338_v46 = vsel %vm1236_vm2, %v12044_v47, %v1337_v19  ;;  %v730_v4 = vrot.slane %v728_v51, 1  ;;  %v740_v47 = vshll.u32 %v8562_v43, 16  ;;  %v8565_v26 = vld [vmem:[#allocation8 + $0x248] sm:$0xff]  }
  0xf8   : > { %1317 = vst.msk [vmem:[#allocation2 + $0x20] sm:$0xff] %vm514_vm1, %v12041_v15  ;;  %v1244_v51 = vrot.slane %v8562_v43, 1 }
  0xf9   : > { %5217 = vmatmul.mubr.bf16.gmra.mrb[28].mxu0 %v3807_v31  ;;  %5281 = vmatmul.mubr.bf16.gmra.mrb[28].mxu1 %v3951_v42  ;;  %v719_v31 = vsel %vm707_vm3, %v714_v27, %v718_v49  ;;  %v12042_v27 = vshrl.u32 %v9375_v20, 16  ;;  %v8561_v42 = vld [vmem:[%s9332_s25 + $0x20] ss:$0 sps:$4 sm:$0x11]   ;;  %1398 = vst.msk [vmem:[#allocation2 + $0xb8] sm:$0xff] %vm497_vm0, %v1338_v46 }
  0xfa   : > { %916 = vst.msk [vmem:[#allocation2 + $0x10] sm:$0xff] %vm497_vm0, %v719_v31  ;;  %v8556_v31 = vld [vmem:[#allocation8 + $0x180] sm:$0xff]   ;;  %v1028_v25 = vshll.u32 %v8561_v42, 16  ;;  %v1340_v5 = vrot.slane %v8561_v42, 1  ;;  %v8563_v46 = vld [vmem:[#allocation8 + $0x1c8] sm:$0xff]   ;;  %v731_v42 = vsel %vm707_vm3, %v726_v23, %v730_v4  ;;  %v12049_v23 = vrot.slane %v9419_v48, 1 }
  0xfb   : > { %932 = vst.msk [vmem:[#allocation2 + $0x10] sm:$0xff] %vm514_vm1, %v12041_v15  ;;  %v1014_v52 = vor.u32 %v9446_v63, %v12042_v27  ;;  %v1026_v63 = vor.u32 %v9493_v34, %v12045_v11  ;;  %v1242_v27 = vsel %vm1236_vm2, %v12046_v21, %v1241_v55  ;;  %1414 = vst.msk [vmem:[#allocation2 + $0xb8] sm:$0xff] %vm514_vm1, %v12041_v15  ;;  %v12047_v34 = vshrl.u32 %v9419_v48, 16  ;;  %v8566_v21 = vld [vmem:[#allocation8 + $0x208] sm:$0xff]  }
  0xfc   : > { %1302 = vst.msk [vmem:[#allocation2 + $0xb0] sm:$0xff] %vm497_vm0, %v1242_v27  ;;  %917 = vst.msk [vmem:[#allocation2 + $0xa0] sm:$0xff] %vm497_vm0, %v731_v42  ;;  %v1245_v43 = vsel %vm1236_vm2, %v12049_v23, %v1244_v51  ;;  %v1083_v27 = vshll.u32 %v9621_v58, 16  ;;  %v8569_v51 = vld [vmem:[%s9332_s25 + $0x38] ss:$0 sps:$4 sm:$0x11]  }
  0xfd   : > { %v3686_v49 = vld [vmem:[#allocation2 + $0x28] sm:$0xff]  ;;  %v1019_v20 = vsel %vm707_vm3, %v1014_v52, %v1018_v30  ;;  %v738_v19 = vor.u32 %v9501_v40, %v12047_v34  ;;  %1318 = vst.msk [vmem:[#allocation2 + $0xb0] sm:$0xff] %vm514_vm1, %v12041_v15  ;;  %v1030_v52 = vrot.slane %v1028_v25, 1  ;;  %v12048_v30 = vrot.slane %v9406_v41, 1  ;;  %v3684_v40 = vld [vmem:[#allocation2 + $0x18] sm:$0xff]  ;;  %933 = vst.msk [vmem:[#allocation2 + $0xa0] sm:$0xff] %vm514_vm1, %v12041_v15 }
  0xfe   : > { %5482 = vmatprep.mubr.bf16.mxu0 %v3686_v49  ;;  %1205 = vst.msk [vmem:[#allocation2 + $0xa8] sm:$0xff] %vm497_vm0, %v1019_v20  ;;  %v742_v49 = vrot.slane %v740_v47, 1  ;;  %5321 = vmatprep.mubr.bf16.mxu1 %v3684_v40  ;;  %1303 = vst.msk [vmem:[#allocation2 + $0x140] sm:$0xff] %vm497_vm0, %v1245_v43  ;;  %v8567_v25 = vld [vmem:[%s9332_s25 + $0x2c] ss:$0 sps:$4 sm:$0x11]  }
  0xff   : > { %v3685_v55 = vld [vmem:[#allocation2 + $0x20] sm:$0xff]  ;;  %v1341_v11 = vsel %vm1236_vm2, %v12048_v30, %v1340_v5  ;;  %1221 = vst.msk [vmem:[#allocation2 + $0xa8] sm:$0xff] %vm514_vm1, %v12041_v15  ;;  %v1031_v4 = vsel %vm707_vm3, %v1026_v63, %v1030_v52  ;;  %1319 = vst.msk [vmem:[#allocation2 + $0x140] sm:$0xff] %vm514_vm1, %v12041_v15  ;;  %v8571_v5 = vld [vmem:[#allocation8 + $0x1d0] sm:$0xff]   ;;  %v12050_v20 = vshrl.u32 %v9449_v0, 16  ;;  %v1343_v47 = vrot.slane %v8567_v25, 1 }
 0x100   : > { %1399 = vst.msk [vmem:[#allocation2 + $0x148] sm:$0xff] %vm497_vm0, %v1341_v11  ;;  %1206 = vst.msk [vmem:[#allocation2 + $0x138] sm:$0xff] %vm497_vm0, %v1031_v4  ;;  %v743_v48 = vsel %vm707_vm3, %v738_v19, %v742_v49  ;;  %v8568_v63 = vld [vmem:[%s9325_s5 + $0x2c] ss:$0 sps:$4 sm:$0x11]   ;;  %v1040_v19 = vshll.u32 %v8567_v25, 16 }
 0x101   : > { %5483 = vmatmul.mubr.bf16.vlgmr.msra.gmra.mrb[32].mxu0 %v3685_v55  ;;  %1415 = vst.msk [vmem:[#allocation2 + $0x148] sm:$0xff] %vm514_vm1, %v12041_v15  ;;  %1222 = vst.msk [vmem:[#allocation2 + $0x138] sm:$0xff] %vm514_vm1, %v12041_v15  ;;  %v1038_v34 = vor.u32 %v9532_v24, %v12050_v20  ;;  %v12051_v55 = vshrl.u32 %v9467_v9, 16  ;;  %v752_v52 = vshll.u32 %v8568_v63, 16  ;;  %v1247_v30 = vrot.slane %v8568_v63, 1  ;;  %v8572_v40 = vld [vmem:[#allocation8 + $0x190] sm:$0xff]  }
 0x102   : > { %v3683_v41 = vld [vmem:[#allocation2 + $0x10] sm:$0xff]  ;;  %7800 = vmatpush3.bf16.msra.mxu0 %v8558_v14  ;;  %v8564_v14 = vld [vmem:[#allocation8 + $0x188] sm:$0xff]   ;;  %918 = vst.msk [vmem:[#allocation2 + $0x130] sm:$0xff] %vm497_vm0, %v743_v48  ;;  %v12052_v11 = vshrl.u32 %v9491_v33, 16  ;;  %v1042_v23 = vrot.slane %v1040_v19, 1  ;;  %v12053_v43 = vrot.slane %v9449_v0, 1 }
 0x103   : > { %5322 = vmatmul.mubr.bf16.vlgmr.msra.gmra.mrb[32].mxu1 %v3683_v41  ;;  %7801 = vmatprep.subr.bf16.mxu0 %v8565_v26  ;;  %934 = vst.msk [vmem:[#allocation2 + $0x130] sm:$0xff] %vm514_vm1, %v12041_v15  ;;  %v8573_v26 = vld [vmem:[#allocation8 + $0x250] sm:$0xff]   ;;  %v750_v42 = vor.u32 %v9548_v61, %v12051_v55  ;;  %v1052_v41 = vshll.u32 %v8569_v51, 16  ;;  %v1346_v4 = vrot.slane %v8569_v51, 1  ;;  %v754_v48 = vrot.slane %v752_v52, 1  ;;  %v8579_v0 = vld [vmem:[#allocation8 + $0x1d8] sm:$0xff]  }
 0x104   : > { %7688 = vmatpush3.bf16.msra.mxu1 %v8556_v31  ;;  %v3704_v31 = vld [vmem:[#allocation2 + $0xb8] sm:$0xff]  ;;  %v8574_v49 = vld [vmem:[#allocation8 + $0x210] sm:$0xff]   ;;  %v12054_v25 = vrot.slane %v9467_v9, 1  ;;  %v12055_v20 = vshrl.u32 %v9508_v50, 16  ;;  %v1354_v55 = vrot.slane %v9621_v58, 1 }
 0x105   : > { %7689 = vmatprep.subr.bf16.mxu1 %v8563_v46  ;;  %v1050_v46 = vor.u32 %v9568_v6, %v12052_v11  ;;  %5490 = vmatprep.mubr.bf16.mxu0 %v3704_v31  ;;  %v3703_v24 = vld [vmem:[#allocation2 + $0xb0] sm:$0xff]  ;;  %v1054_v9 = vrot.slane %v1052_v41, 1  ;;  %v8576_v41 = vld [vmem:[%s9325_s5 + $0x44] ss:$0 sps:$4 sm:$0x11]  }
 0x106   : > { %7802 = vmatpush3.bf16.msra.mxu0 %v8566_v21  ;;  %v1344_v21 = vsel %vm1236_vm2, %v12053_v43, %v1343_v47  ;;  %v3702_v61 = vld [vmem:[#allocation2 + $0xa8] sm:$0xff]  ;;  %v1248_v6 = vsel %vm1236_vm2, %v12054_v25, %v1247_v30  ;;  %v8570_v63 = vld [vmem:[%s9325_s5 + $0x38] ss:$0 sps:$4 sm:$0x11]   ;;  %v762_v19 = vor.u32 %v9584_v2, %v12055_v20  ;;  %v3701_v47 = vld [vmem:[#allocation2 + $0xa0] sm:$0xff]  ;;  %v755_v2 = vsel %vm707_vm3, %v750_v42, %v754_v48 }
 0x107   : > { %7803 = vmatprep.subr.bf16.mxu0 %v8573_v26  ;;  %1400 = vst.msk [vmem:[#allocation2 + $0x1d8] sm:$0xff] %vm497_vm0, %v1344_v21  ;;  %5329 = vmatprep.mubr.bf16.mxu1 %v3702_v61  ;;  %v1043_v26 = vsel %vm707_vm3, %v1038_v34, %v1042_v23  ;;  %1304 = vst.msk [vmem:[#allocation2 + $0x1d0] sm:$0xff] %vm497_vm0, %v1248_v6  ;;  %v764_v34 = vshll.u32 %v8570_v63, 16  ;;  %v1250_v52 = vrot.slane %v8570_v63, 1  ;;  %v9791_v30 = vrot.slane %v1083_v27, 1  ;;  %v3721_v27 = vld [vmem:[#allocation2 + $0x140] sm:$0xff] }
 0x108   : > { %7690 = vmatpush3.bf16.msra.mxu1 %v8564_v14  ;;  %v3722_v51 = vld [vmem:[#allocation2 + $0x148] sm:$0xff]  ;;  %1416 = vst.msk [vmem:[#allocation2 + $0x1d8] sm:$0xff] %vm514_vm1, %v12041_v15  ;;  %v12056_v14 = vrot.slane %v9491_v33, 1  ;;  %1320 = vst.msk [vmem:[#allocation2 + $0x1d0] sm:$0xff] %vm514_vm1, %v12041_v15  ;;  %v3720_v33 = vld [vmem:[#allocation2 + $0x138] sm:$0xff]  ;;  %v1055_v11 = vsel %vm707_vm3, %v1050_v46, %v1054_v9  ;;  %v795_v42 = vshll.u32 %v9636_v36, 16 }
 0x109   : > { %5491 = vmatmul.mubr.bf16.gmra.mrb[36].mxu0 %v3703_v24  ;;  %1207 = vst.msk [vmem:[#allocation2 + $0x1c8] sm:$0xff] %vm497_vm0, %v1043_v26  ;;  %7691 = vmatprep.subr.bf16.mxu1 %v8571_v5  ;;  %919 = vst.msk [vmem:[#allocation2 + $0x1c0] sm:$0xff] %vm497_vm0, %v755_v2  ;;  %v766_v5 = vrot.slane %v764_v34, 1  ;;  %v12057_v24 = vrot.slane %v9508_v50, 1  ;;  %v8580_v23 = vld [vmem:[#allocation8 + $0x198] sm:$0xff]   ;;  %v12058_v50 = vshrl.u32 %v9535_v29, 16 }
 0x10a   : > { %v1347_v31 = vsel %vm1236_vm2, %v12056_v14, %v1346_v4  ;;  %5498 = vmatprep.mubr.bf16.mxu0 %v3722_v51  ;;  %1223 = vst.msk [vmem:[#allocation2 + $0x1c8] sm:$0xff] %vm514_vm1, %v12041_v15  ;;  %7804 = vmatpush3.bf16.msra.mxu0 %v8574_v49  ;;  %935 = vst.msk [vmem:[#allocation2 + $0x1c0] sm:$0xff] %vm514_vm1, %v12041_v15  ;;  %v3719_v49 = vld [vmem:[#allocation2 + $0x130] sm:$0xff]  ;;  %v12059_v4 = vshrl.u32 %v9546_v60, 16  ;;  %v8581_v25 = vld [vmem:[#allocation8 + $0x258] sm:$0xff]   ;;  %v12060_v51 = vshrl.u32 %v9578_v37, 16 }
 0x10b   : > { %1401 = vst.msk [vmem:[#allocation2 + $0x268] sm:$0xff] %vm497_vm0, %v1347_v31  ;;  %5330 = vmatmul.mubr.bf16.gmra.mrb[36].mxu1 %v3701_v47  ;;  %1208 = vst.msk [vmem:[#allocation2 + $0x258] sm:$0xff] %vm497_vm0, %v1055_v11  ;;  %v1251_v46 = vsel %vm1236_vm2, %v12057_v24, %v1250_v52  ;;  %v767_v43 = vsel %vm707_vm3, %v762_v19, %v766_v5  ;;  %v8575_v21 = vld [vmem:[%s9332_s25 + $0x44] ss:$0 sps:$4 sm:$0x11]   ;;  %v776_v19 = vshll.u32 %v8576_v41, 16  ;;  %7805 = vmatprep.subr.bf16.mxu0 %v8581_v25 }
 0x10c   : > { %1417 = vst.msk [vmem:[#allocation2 + $0x268] sm:$0xff] %vm514_vm1, %v12041_v15  ;;  %5337 = vmatprep.mubr.bf16.mxu1 %v3720_v33  ;;  %7692 = vmatpush3.bf16.msra.mxu1 %v8572_v40  ;;  %1224 = vst.msk [vmem:[#allocation2 + $0x258] sm:$0xff] %vm514_vm1, %v12041_v15  ;;  %v1062_v40 = vor.u32 %v9614_v57, %v12058_v50  ;;  %v774_v61 = vor.u32 %v9630_v32, %v12059_v4  ;;  %v8577_v48 = vld [vmem:[%s9332_s25 + $0x50] ss:$0 sps:$4 sm:$0x11]   ;;  %v1064_v63 = vshll.u32 %v8575_v21, 16 }
 0x10d   : > { %1305 = vst.msk [vmem:[#allocation2 + $0x260] sm:$0xff] %vm497_vm0, %v1251_v46  ;;  %7693 = vmatprep.subr.bf16.mxu1 %v8579_v0  ;;  %920 = vst.msk [vmem:[#allocation2 + $0x250] sm:$0xff] %vm497_vm0, %v767_v43  ;;  %v1349_v20 = vrot.slane %v8575_v21, 1  ;;  %v1253_v0 = vrot.slane %v8576_v41, 1  ;;  %v8582_v47 = vld [vmem:[#allocation8 + $0x218] sm:$0xff]   ;;  %v1074_v57 = vor.u32 %v9672_v8, %v12060_v51  ;;  %v1076_v26 = vshll.u32 %v8577_v48, 16 }
 0x10e   : > { %1321 = vst.msk [vmem:[#allocation2 + $0x260] sm:$0xff] %vm514_vm1, %v12041_v15  ;;  %936 = vst.msk [vmem:[#allocation2 + $0x250] sm:$0xff] %vm514_vm1, %v12041_v15  ;;  %v1352_v9 = vrot.slane %v8577_v48, 1  ;;  %v793_v32 = vshrl.u32 %v9636_v36, 16  ;;  %v8587_v14 = vld [vmem:[#allocation8 + $0x1e0] sm:$0xff]   ;;  %v1066_v2 = vrot.slane %v1064_v63, 1  ;;  %7806 = vmatpush3.bf16.msra.mxu0 %v8582_v47  ;;  %v786_v50 = vor.u32 %v9689_v54, %v781_v39 }
 0x10f   : > { %v3740_v6 = vld [vmem:[#allocation2 + $0x1d8] sm:$0xff]  ;;  %v12061_v34 = vrot.slane %v9535_v29, 1  ;;  %v778_v33 = vrot.slane %v776_v19, 1  ;;  %v12062_v11 = vrot.slane %v9546_v60, 1  ;;  %v1078_v8 = vrot.slane %v1076_v26, 1  ;;  %v3739_v60 = vld [vmem:[#allocation2 + $0x1d0] sm:$0xff] }
 0x110   : > { %7694 = vmatpush3.bf16.msra.mxu1 %v8580_v23  ;;  %v12063_v5 = vrot.slane %v9578_v37, 1  ;;  %v8578_v46 = vld [vmem:[%s9325_s5 + $0x50] ss:$0 sps:$4 sm:$0x11]   ;;  %v1258_v29 = vrot.slane %v9636_v36, 1  ;;  %v8588_v23 = vld [vmem:[#allocation8 + $0x1a0] sm:$0xff]   ;;  %v1067_v43 = vsel %vm707_vm3, %v1062_v40, %v1066_v2 }
 0x111   : > { %5499 = vmatmul.mubr.bf16.gmra.mrb[40].mxu0 %v3721_v27  ;;  %v3738_v31 = vld [vmem:[#allocation2 + $0x1c8] sm:$0xff]  ;;  %v1350_v52 = vsel %vm1236_vm2, %v12061_v34, %v1349_v20  ;;  %v1254_v27 = vsel %vm1236_vm2, %v12062_v11, %v1253_v0  ;;  %7695 = vmatprep.subr.bf16.mxu1 %v8587_v14  ;;  %v797_v37 = vrot.slane %v795_v42, 1  ;;  %1209 = vst.msk [vmem:[#allocation2 + $0x2e8] sm:$0xff] %vm497_vm0, %v1067_v43  ;;  %v788_v40 = vshll.u32 %v8578_v46, 16  ;;  %v3737_v42 = vld [vmem:[#allocation2 + $0x1c0] sm:$0xff] }
 0x112   : > { %5506 = vmatprep.mubr.bf16.mxu0 %v3740_v6  ;;  %1402 = vst.msk [vmem:[#allocation2 + $0x2f8] sm:$0xff] %vm497_vm0, %v1350_v52  ;;  %1306 = vst.msk [vmem:[#allocation2 + $0x2f0] sm:$0xff] %vm497_vm0, %v1254_v27  ;;  %v1353_v24 = vsel %vm1236_vm2, %v12063_v5, %v1352_v9  ;;  %v1079_v41 = vsel %vm707_vm3, %v1074_v57, %v1078_v8  ;;  %v1256_v4 = vrot.slane %v8578_v46, 1  ;;  %v8583_v54 = vld [vmem:[%s9332_s25 + $0x5c] ss:$0 sps:$4 sm:$0x11]  }
 0x113   : > { %5338 = vmatmul.mubr.bf16.gmra.mrb[40].mxu1 %v3719_v49  ;;  %1418 = vst.msk [vmem:[#allocation2 + $0x2f8] sm:$0xff] %vm514_vm1, %v12041_v15  ;;  %v779_v49 = vsel %vm707_vm3, %v774_v61, %v778_v33  ;;  %1322 = vst.msk [vmem:[#allocation2 + $0x2f0] sm:$0xff] %vm514_vm1, %v12041_v15  ;;  %v3758_v21 = vld [vmem:[#allocation2 + $0x268] sm:$0xff]  ;;  %v8589_v61 = vld [vmem:[#allocation8 + $0x260] sm:$0xff]   ;;  %v790_v25 = vrot.slane %v788_v40, 1  ;;  %v1088_v0 = vshll.u32 %v8583_v54, 16  ;;  %v798_v14 = vor.u32 %v797_v37, %v793_v32 }
 0x114   : > { %5345 = vmatprep.mubr.bf16.mxu1 %v3738_v31  ;;  %1403 = vst.msk [vmem:[#allocation2 + $0x388] sm:$0xff] %vm497_vm0, %v1353_v24  ;;  %921 = vst.msk [vmem:[#allocation2 + $0x2e0] sm:$0xff] %vm497_vm0, %v779_v49  ;;  %7696 = vmatpush3.bf16.msra.mxu1 %v8588_v23  ;;  %v3756_v48 = vld [vmem:[#allocation2 + $0x258] sm:$0xff]  ;;  %v1257_v39 = vsel %vm1236_vm2, %v1255_v1, %v1256_v4  ;;  %v8590_v6 = vld [vmem:[#allocation8 + $0x220] sm:$0xff]   ;;  %v1086_v1 = vor.u32 %v9791_v30, %v12064_v12  ;;  %v1355_v47 = vrot.slane %v8583_v54, 1 }
 0x115   : > { %1419 = vst.msk [vmem:[#allocation2 + $0x388] sm:$0xff] %vm514_vm1, %v12041_v15  ;;  %1225 = vst.msk [vmem:[#allocation2 + $0x2e8] sm:$0xff] %vm514_vm1, %v12041_v15  ;;  %7807 = vmatprep.subr.bf16.mxu0 %v8589_v61  ;;  %v791_v63 = vsel %vm707_vm3, %v786_v50, %v790_v25  ;;  %v8584_v20 = vld [vmem:[%s9325_s5 + $0x5c] ss:$0 sps:$4 sm:$0x11]   ;;  %v8595_v19 = vld [vmem:[#allocation8 + $0x1e8] sm:$0xff]  }
 0x116   : > { %937 = vst.msk [vmem:[#allocation2 + $0x2e0] sm:$0xff] %vm514_vm1, %v12041_v15  ;;  %v8585_v51 = vld [vmem:[%s9332_s25 + $0x68] ss:$0 sps:$4 sm:$0x11]   ;;  %v12065_v57 = vshrl.u32 %v9350_v13, 16  ;;  %7808 = vmatpush3.bf16.msra.mxu0 %v8590_v6  ;;  %v8596_v9 = vld [vmem:[#allocation8 + $0x1a8] sm:$0xff]   ;;  %7697 = vmatprep.subr.bf16.mxu1 %v8595_v19 }
 0x117   : > { %1210 = vst.msk [vmem:[#allocation2 + $0x378] sm:$0xff] %vm497_vm0, %v1079_v41  ;;  %1307 = vst.msk [vmem:[#allocation2 + $0x380] sm:$0xff] %vm497_vm0, %v1257_v39  ;;  %v800_v31 = vshll.u32 %v8584_v20, 16  ;;  %v1259_v2 = vrot.slane %v8584_v20, 1  ;;  %v1267_v30 = vrot.slane %v9433_v53, 1  ;;  %v1090_v34 = vrot.slane %v1088_v0, 1 }
 0x118   : > { %1226 = vst.msk [vmem:[#allocation2 + $0x378] sm:$0xff] %vm514_vm1, %v12041_v15  ;;  %1323 = vst.msk [vmem:[#allocation2 + $0x380] sm:$0xff] %vm514_vm1, %v12041_v15  ;;  %v1098_v26 = vor.u32 %v9460_v7, %v12065_v57  ;;  %v1356_v7 = vsel %vm1236_vm2, %v1354_v55, %v1355_v47  ;;  %v1100_v52 = vshll.u32 %v8585_v51, 16  ;;  %v1358_v33 = vrot.slane %v8585_v51, 1  ;;  %7698 = vmatpush3.bf16.msra.mxu1 %v8596_v9  ;;  %v3757_v11 = vld [vmem:[#allocation2 + $0x260] sm:$0xff]  ;;  %v3755_v24 = vld [vmem:[#allocation2 + $0x250] sm:$0xff] }
 0x119   : > { %5507 = vmatmul.mubr.bf16.gmra.mrb[44].mxu0 %v3739_v60  ;;  %922 = vst.msk [vmem:[#allocation2 + $0x370] sm:$0xff] %vm497_vm0, %v791_v63  ;;  %1404 = vst.msk [vmem:[#allocation2 + $0x418] sm:$0xff] %vm497_vm0, %v1356_v7  ;;  %v802_v27 = vrot.slane %v800_v31, 1  ;;  %v1260_v32 = vsel %vm1236_vm2, %v1258_v29, %v1259_v2  ;;  %v8586_v8 = vld [vmem:[%s9325_s5 + $0x68] ss:$0 sps:$4 sm:$0x11]   ;;  %v1091_v58 = vsel %vm707_vm3, %v1086_v1, %v1090_v34 }
 0x11a   : > { %5514 = vmatprep.mubr.bf16.mxu0 %v3758_v21  ;;  %938 = vst.msk [vmem:[#allocation2 + $0x370] sm:$0xff] %vm514_vm1, %v12041_v15  ;;  %v1131_v5 = vshll.u32 %v9453_v3, 16  ;;  %v3776_v46 = vld [vmem:[#allocation2 + $0x2f8] sm:$0xff]  ;;  %1420 = vst.msk [vmem:[#allocation2 + $0x418] sm:$0xff] %vm514_vm1, %v12041_v15  ;;  %v1102_v55 = vrot.slane %v1100_v52, 1  ;;  %v12066_v23 = vrot.slane %v9350_v13, 1 }
 0x11b   : > { %5346 = vmatmul.mubr.bf16.gmra.mrb[44].mxu1 %v3737_v42  ;;  %1308 = vst.msk [vmem:[#allocation2 + $0x410] sm:$0xff] %vm497_vm0, %v1260_v32  ;;  %1211 = vst.msk [vmem:[#allocation2 + $0x408] sm:$0xff] %vm497_vm0, %v1091_v58  ;;  %v803_v36 = vsel %vm707_vm3, %v798_v14, %v802_v27  ;;  %v12067_v29 = vshrl.u32 %v9362_v16, 16  ;;  %v812_v49 = vshll.u32 %v8586_v8, 16  ;;  %v1262_v37 = vrot.slane %v8586_v8, 1  ;;  %v8597_v4 = vld [vmem:[#allocation8 + $0x268] sm:$0xff]  }
 0x11c   : > { %5353 = vmatprep.mubr.bf16.mxu1 %v3756_v48  ;;  %v1359_v60 = vsel %vm1236_vm2, %v12066_v23, %v1358_v33  ;;  %1324 = vst.msk [vmem:[#allocation2 + $0x410] sm:$0xff] %vm514_vm1, %v12041_v15  ;;  %v3774_v21 = vld [vmem:[#allocation2 + $0x2e8] sm:$0xff]  ;;  %1227 = vst.msk [vmem:[#allocation2 + $0x408] sm:$0xff] %vm514_vm1, %v12041_v15  ;;  %v1103_v13 = vsel %vm707_vm3, %v1098_v26, %v1102_v55  ;;  %v1129_v41 = vshrl.u32 %v9453_v3, 16  ;;  %v12068_v50 = vrot.slane %v9362_v16, 1  ;;  %v3775_v26 = vld [vmem:[#allocation2 + $0x2f0] sm:$0xff] }
 0x11d   : > { %1405 = vst.msk [vmem:[#allocation2 + $0x4a8] sm:$0xff] %vm497_vm0, %v1359_v60  ;;  %v810_v43 = vor.u32 %v9503_v44, %v12067_v29  ;;  %923 = vst.msk [vmem:[#allocation2 + $0x400] sm:$0xff] %vm497_vm0, %v803_v36  ;;  %v814_v44 = vrot.slane %v812_v49, 1  ;;  %v8591_v61 = vld [vmem:[%s9332_s25 + $0x74] ss:$0 sps:$4 sm:$0x11]   ;;  %7809 = vmatprep.subr.bf16.mxu0 %v8597_v4 }
 0x11e   : > { %1421 = vst.msk [vmem:[#allocation2 + $0x4a8] sm:$0xff] %vm514_vm1, %v12041_v15  ;;  %939 = vst.msk [vmem:[#allocation2 + $0x400] sm:$0xff] %vm514_vm1, %v12041_v15  ;;  %v1263_v40 = vsel %vm1236_vm2, %v12068_v50, %v1262_v37  ;;  %v9926_v42 = vrot.slane %v1131_v5, 1  ;;  %v12069_v16 = vshrl.u32 %v9378_v22, 16  ;;  %v12070_v54 = vshrl.u32 %v9392_v28, 16  ;;  %v8598_v63 = vld [vmem:[#allocation8 + $0x228] sm:$0xff]  }
 0x11f   : > { %1212 = vst.msk [vmem:[#allocation2 + $0x498] sm:$0xff] %vm497_vm0, %v1103_v13  ;;  %1309 = vst.msk [vmem:[#allocation2 + $0x4a0] sm:$0xff] %vm497_vm0, %v1263_v40  ;;  %v815_v48 = vsel %vm707_vm3, %v810_v43, %v814_v44  ;;  %v8592_v39 = vld [vmem:[%s9325_s5 + $0x74] ss:$0 sps:$4 sm:$0x11]   ;;  %v1112_v20 = vshll.u32 %v8591_v61, 16  ;;  %7810 = vmatpush3.bf16.msra.mxu0 %v8598_v63 }
 0x120   : > { %1228 = vst.msk [vmem:[#allocation2 + $0x498] sm:$0xff] %vm514_vm1, %v12041_v15  ;;  %1325 = vst.msk [vmem:[#allocation2 + $0x4a0] sm:$0xff] %vm514_vm1, %v12041_v15  ;;  %v1110_v25 = vor.u32 %v9550_v62, %v12069_v16  ;;  %v822_v6 = vor.u32 %v9604_v18, %v12070_v54  ;;  %v1361_v19 = vrot.slane %v8591_v61, 1  ;;  %v8593_v12 = vld [vmem:[%s9332_s25 + $0x80] ss:$0 sps:$4 sm:$0x11]   ;;  %v1134_v40 = vor.u32 %v9926_v42, %v1129_v41 }
 0x121   : > { %5515 = vmatmul.mubr.bf16.gmra.mrb[48].mxu0 %v3757_v11  ;;  %924 = vst.msk [vmem:[#allocation2 + $0x490] sm:$0xff] %vm497_vm0, %v815_v48  ;;  %v12071_v1 = vshrl.u32 %v9412_v45, 16  ;;  %v1366_v47 = vrot.slane %v9453_v3, 1  ;;  %v824_v62 = vshll.u32 %v8592_v39, 16  ;;  %v1265_v18 = vrot.slane %v8592_v39, 1  ;;  %v3794_v34 = vld [vmem:[#allocation2 + $0x388] sm:$0xff] }
 0x122   : > { %5522 = vmatprep.mubr.bf16.mxu0 %v3776_v46  ;;  %940 = vst.msk [vmem:[#allocation2 + $0x490] sm:$0xff] %vm514_vm1, %v12041_v15  ;;  %v841_v51 = vshrl.u32 %v9474_v17, 16  ;;  %v843_v57 = vshll.u32 %v9474_v17, 16  ;;  %v1114_v9 = vrot.slane %v1112_v20, 1  ;;  %v12072_v14 = vrot.slane %v9378_v22, 1  ;;  %v3773_v32 = vld [vmem:[#allocation2 + $0x2e0] sm:$0xff] }
 0x123   : > { %5354 = vmatmul.mubr.bf16.gmra.mrb[48].mxu1 %v3755_v24  ;;  %v1122_v0 = vor.u32 %v9638_v59, %v12071_v1  ;;  %v1124_v59 = vshll.u32 %v8593_v12, 16  ;;  %v1364_v2 = vrot.slane %v8593_v12, 1  ;;  %v826_v7 = vrot.slane %v824_v62, 1  ;;  %v8594_v11 = vld [vmem:[%s9325_s5 + $0x80] ss:$0 sps:$4 sm:$0x11]  }
 0x124   : > { %5361 = vmatprep.mubr.bf16.mxu1 %v3774_v21  ;;  %v1362_v31 = vsel %vm1236_vm2, %v12072_v14, %v1361_v19  ;;  %v12073_v52 = vrot.slane %v9392_v28, 1  ;;  %v1143_v27 = vshll.u32 %v9499_v38, 16  ;;  %v1115_v8 = vsel %vm707_vm3, %v1110_v25, %v1114_v9  ;;  %v3792_v58 = vld [vmem:[#allocation2 + $0x378] sm:$0xff]  ;;  %v3793_v21 = vld [vmem:[#allocation2 + $0x380] sm:$0xff]  ;;  %v3810_v42 = vld [vmem:[#allocation2 + $0x408] sm:$0xff] }
 0x125   : > { %1406 = vst.msk [vmem:[#allocation2 + $0x538] sm:$0xff] %vm497_vm0, %v1362_v31  ;;  %v1126_v22 = vrot.slane %v1124_v59, 1  ;;  %v12074_v5 = vrot.slane %v9412_v45, 1  ;;  %v12075_v28 = vshrl.u32 %v9433_v53, 16  ;;  %1213 = vst.msk [vmem:[#allocation2 + $0x528] sm:$0xff] %vm497_vm0, %v1115_v8  ;;  %v827_v55 = vsel %vm707_vm3, %v822_v6, %v826_v7  ;;  %v3812_v44 = vld [vmem:[#allocation2 + $0x418] sm:$0xff] }
 0x126   : > { %v1266_v33 = vsel %vm1236_vm2, %v12073_v52, %v1265_v18  ;;  %1422 = vst.msk [vmem:[#allocation2 + $0x538] sm:$0xff] %vm514_vm1, %v12041_v15  ;;  %v836_v23 = vshll.u32 %v8594_v11, 16  ;;  %v1268_v60 = vrot.slane %v8594_v11, 1  ;;  %v845_v45 = vrot.slane %v843_v57, 1  ;;  %1229 = vst.msk [vmem:[#allocation2 + $0x528] sm:$0xff] %vm514_vm1, %v12041_v15  ;;  %v3791_v6 = vld [vmem:[#allocation2 + $0x370] sm:$0xff] }
 0x127   : > { %1310 = vst.msk [vmem:[#allocation2 + $0x530] sm:$0xff] %vm497_vm0, %v1266_v33  ;;  %v1365_v24 = vsel %vm1236_vm2, %v12074_v5, %v1364_v2  ;;  %v834_v46 = vor.u32 %v9695_v10, %v12075_v28  ;;  %925 = vst.msk [vmem:[#allocation2 + $0x520] sm:$0xff] %vm497_vm0, %v827_v55  ;;  %v1127_v10 = vsel %vm707_vm3, %v1122_v0, %v1126_v22  ;;  %v1270_v36 = vrot.slane %v9474_v17, 1  ;;  %v8599_v17 = vld [vmem:[%s9332_s25 + $0x8c] ss:$0 sps:$4 sm:$0x11]  }
 0x128   : > { %1326 = vst.msk [vmem:[#allocation2 + $0x530] sm:$0xff] %vm514_vm1, %v12041_v15  ;;  %v1141_v29 = vshrl.u32 %v9499_v38, 16  ;;  %941 = vst.msk [vmem:[#allocation2 + $0x520] sm:$0xff] %vm514_vm1, %v12041_v15  ;;  %v838_v43 = vrot.slane %v836_v23, 1  ;;  %v1269_v49 = vsel %vm1236_vm2, %v1267_v30, %v1268_v60  ;;  %v1145_v37 = vrot.slane %v1143_v27, 1  ;;  %v8605_v2 = vld [vmem:[#allocation8 + $0x270] sm:$0xff]  }
 0x129   : > { %5523 = vmatmul.mubr.bf16.gmra.mrb[52].mxu0 %v3775_v26  ;;  %1407 = vst.msk [vmem:[#allocation2 + $0x5c8] sm:$0xff] %vm497_vm0, %v1365_v24  ;;  %1214 = vst.msk [vmem:[#allocation2 + $0x5b8] sm:$0xff] %vm497_vm0, %v1127_v10  ;;  %v853_v13 = vshrl.u32 %v9514_v56, 16  ;;  %v8600_v53 = vld [vmem:[%s9325_s5 + $0x8c] ss:$0 sps:$4 sm:$0x11]   ;;  %v846_v48 = vor.u32 %v845_v45, %v841_v51  ;;  %7811 = vmatprep.subr.bf16.mxu0 %v8605_v2 }
 0x12a   : > { %5530 = vmatprep.mubr.bf16.mxu0 %v3794_v34  ;;  %1423 = vst.msk [vmem:[#allocation2 + $0x5c8] sm:$0xff] %vm514_vm1, %v12041_v15  ;;  %1230 = vst.msk [vmem:[#allocation2 + $0x5b8] sm:$0xff] %vm514_vm1, %v12041_v15  ;;  %v839_v50 = vsel %vm707_vm3, %v834_v46, %v838_v43  ;;  %v855_v30 = vshll.u32 %v9514_v56, 16  ;;  %v1136_v4 = vshll.u32 %v8599_v17, 16  ;;  %v1367_v61 = vrot.slane %v8599_v17, 1  ;;  %v8603_v51 = vld [vmem:[#allocation8 + $0x1f0] sm:$0xff]  }
 0x12b   : > { %5362 = vmatmul.mubr.bf16.gmra.mrb[52].mxu1 %v3773_v32  ;;  %1311 = vst.msk [vmem:[#allocation2 + $0x5c0] sm:$0xff] %vm497_vm0, %v1269_v49  ;;  %926 = vst.msk [vmem:[#allocation2 + $0x5b0] sm:$0xff] %vm497_vm0, %v839_v50  ;;  %v848_v16 = vshll.u32 %v8600_v53, 16  ;;  %v1271_v25 = vrot.slane %v8600_v53, 1  ;;  %v1369_v54 = vrot.slane %v9499_v38, 1  ;;  %v1146_v19 = vor.u32 %v1145_v37, %v1141_v29  ;;  %v8604_v26 = vld [vmem:[#allocation8 + $0x1b0] sm:$0xff]   ;;  %7699 = vmatprep.subr.bf16.mxu1 %v8603_v51 }
 0x12c   : > { %5369 = vmatprep.mubr.bf16.mxu1 %v3792_v58  ;;  %1327 = vst.msk [vmem:[#allocation2 + $0x5c0] sm:$0xff] %vm514_vm1, %v12041_v15  ;;  %942 = vst.msk [vmem:[#allocation2 + $0x5b0] sm:$0xff] %vm514_vm1, %v12041_v15  ;;  %v8601_v39 = vld [vmem:[%s9332_s25 + $0x98] ss:$0 sps:$4 sm:$0x11]   ;;  %v1138_v63 = vrot.slane %v1136_v4, 1  ;;  %v1368_v20 = vsel %vm1236_vm2, %v1366_v47, %v1367_v61  ;;  %7700 = vmatpush3.bf16.msra.mxu1 %v8604_v26 }
 0x12d   : > { %v8602_v12 = vld [vmem:[%s9325_s5 + $0x98] ss:$0 sps:$4 sm:$0x11]   ;;  %v857_v41 = vrot.slane %v855_v30, 1  ;;  %1408 = vst.msk [vmem:[#allocation2 + $0x658] sm:$0xff] %vm497_vm0, %v1368_v20  ;;  %v850_v1 = vrot.slane %v848_v16, 1  ;;  %v1272_v0 = vsel %vm1236_vm2, %v1270_v36, %v1271_v25 }
 0x12e   : > { %v1148_v62 = vshll.u32 %v8601_v39, 16  ;;  %v1370_v18 = vrot.slane %v8601_v39, 1  ;;  %v1139_v38 = vsel %vm707_vm3, %v1134_v40, %v1138_v63  ;;  %1424 = vst.msk [vmem:[#allocation2 + $0x658] sm:$0xff] %vm514_vm1, %v12041_v15  ;;  %v860_v47 = vshll.u32 %v8602_v12, 16  ;;  %v3811_v34 = vld [vmem:[#allocation2 + $0x410] sm:$0xff]  ;;  %v3830_v7 = vld [vmem:[#allocation2 + $0x4a8] sm:$0xff] }
 0x12f   : > { %1312 = vst.msk [vmem:[#allocation2 + $0x650] sm:$0xff] %vm497_vm0, %v1272_v0  ;;  %v858_v3 = vor.u32 %v857_v41, %v853_v13  ;;  %v1273_v57 = vrot.slane %v9514_v56, 1  ;;  %1215 = vst.msk [vmem:[#allocation2 + $0x648] sm:$0xff] %vm497_vm0, %v1139_v38  ;;  %v851_v9 = vsel %vm707_vm3, %v846_v48, %v850_v1  ;;  %v1274_v59 = vrot.slane %v8602_v12, 1  ;;  %v3809_v11 = vld [vmem:[#allocation2 + $0x400] sm:$0xff]  ;;  %v8606_v32 = vld [vmem:[#allocation8 + $0x230] sm:$0xff]  }
 0x130   : > { %1328 = vst.msk [vmem:[#allocation2 + $0x650] sm:$0xff] %vm514_vm1, %v12041_v15  ;;  %v1150_v14 = vrot.slane %v1148_v62, 1  ;;  %v1371_v31 = vsel %vm1236_vm2, %v1369_v54, %v1370_v18  ;;  %1231 = vst.msk [vmem:[#allocation2 + $0x648] sm:$0xff] %vm514_vm1, %v12041_v15  ;;  %v862_v56 = vrot.slane %v860_v47, 1  ;;  %v1153_v8 = vshrl.u32 %v9540_v35, 16  ;;  %7812 = vmatpush3.bf16.msra.mxu0 %v8606_v32  ;;  %v3828_v58 = vld [vmem:[#allocation2 + $0x498] sm:$0xff] }
 0x131   : > { %5531 = vmatmul.mubr.bf16.gmra.mrb[56].mxu0 %v3793_v21  ;;  %927 = vst.msk [vmem:[#allocation2 + $0x640] sm:$0xff] %vm497_vm0, %v851_v9  ;;  %1409 = vst.msk [vmem:[#allocation2 + $0x6e8] sm:$0xff] %vm497_vm0, %v1371_v31  ;;  %v1275_v33 = vsel %vm1236_vm2, %v1273_v57, %v1274_v59  ;;  %v1155_v22 = vshll.u32 %v9540_v35, 16  ;;  %v8607_v5 = vld [vmem:[%s9332_s25 + $0xa4] ss:$0 sps:$4 sm:$0x11]  }
 0x132   : > { %5538 = vmatprep.mubr.bf16.mxu0 %v3812_v44  ;;  %943 = vst.msk [vmem:[#allocation2 + $0x640] sm:$0xff] %vm514_vm1, %v12041_v15  ;;  %v1151_v52 = vsel %vm707_vm3, %v1146_v19, %v1150_v14  ;;  %1425 = vst.msk [vmem:[#allocation2 + $0x6e8] sm:$0xff] %vm514_vm1, %v12041_v15  ;;  %v863_v27 = vsel %vm707_vm3, %v858_v3, %v862_v56  ;;  %v1372_v24 = vrot.slane %v9540_v35, 1  ;;  %v8608_v46 = vld [vmem:[%s9325_s5 + $0xa4] ss:$0 sps:$4 sm:$0x11]  }
 0x133   : > { %5370 = vmatmul.mubr.bf16.gmra.mrb[56].mxu1 %v3791_v6  ;;  %1216 = vst.msk [vmem:[#allocation2 + $0x6d8] sm:$0xff] %vm497_vm0, %v1151_v52  ;;  %1313 = vst.msk [vmem:[#allocation2 + $0x6e0] sm:$0xff] %vm497_vm0, %v1275_v33  ;;  %v1157_v28 = vrot.slane %v1155_v22, 1  ;;  %v1160_v55 = vshll.u32 %v8607_v5, 16  ;;  %v1373_v23 = vrot.slane %v8607_v5, 1  ;;  %v12076_v60 = vld [vmem:[#allocation17_spill] sm:$0xff] }
 0x134   : > { %5377 = vmatprep.mubr.bf16.mxu1 %v3810_v42  ;;  %1232 = vst.msk [vmem:[#allocation2 + $0x6d8] sm:$0xff] %vm514_vm1, %v12041_v15  ;;  %1329 = vst.msk [vmem:[#allocation2 + $0x6e0] sm:$0xff] %vm514_vm1, %v12041_v15  ;;  %v865_v45 = vshrl.u32 %v12076_v60, 16  ;;  %v867_v10 = vshll.u32 %v12076_v60, 16  ;;  %v8611_v36 = vld [vmem:[#allocation8 + $0x1f8] sm:$0xff]   ;;  %v872_v43 = vshll.u32 %v8608_v46, 16 }
 0x135   : > { %928 = vst.msk [vmem:[#allocation2 + $0x6d0] sm:$0xff] %vm497_vm0, %v863_v27  ;;  %v1158_v29 = vor.u32 %v1157_v28, %v1153_v8  ;;  %v1276_v35 = vrot.slane %v12076_v60, 1  ;;  %v1277_v49 = vrot.slane %v8608_v46, 1  ;;  %v1162_v37 = vrot.slane %v1160_v55, 1  ;;  %7701 = vmatprep.subr.bf16.mxu1 %v8611_v36  ;;  %v3829_v44 = vld [vmem:[#allocation2 + $0x4a0] sm:$0xff]  ;;  %v12077_v30 = vld [vmem:[#allocation18_spill] sm:$0xff] }
 0x136   : > { %944 = vst.msk [vmem:[#allocation2 + $0x6d0] sm:$0xff] %vm514_vm1, %v12041_v15  ;;  %v1374_v21 = vsel %vm1236_vm2, %v1372_v24, %v1373_v23  ;;  %v869_v17 = vrot.slane %v867_v10, 1  ;;  %v8609_v13 = vld [vmem:[%s9332_s25 + $0xb0] ss:$0 sps:$4 sm:$0x11]   ;;  %v874_v50 = vrot.slane %v872_v43, 1 }
 0x137   : > { %1410 = vst.msk [vmem:[#allocation2 + $0x778] sm:$0xff] %vm497_vm0, %v1374_v21  ;;  %v1278_v53 = vsel %vm1236_vm2, %v1276_v35, %v1277_v49  ;;  %v1165_v40 = vshrl.u32 %v12077_v30, 16  ;;  %v1167_v4 = vshll.u32 %v12077_v30, 16  ;;  %v8612_v61 = vld [vmem:[#allocation8 + $0x1b8] sm:$0xff]   ;;  %v1163_v48 = vsel %vm707_vm3, %v1158_v29, %v1162_v37  ;;  %v3827_v54 = vld [vmem:[#allocation2 + $0x490] sm:$0xff]  ;;  %v3846_v42 = vld [vmem:[#allocation2 + $0x528] sm:$0xff] }
 0x138   : > { %1426 = vst.msk [vmem:[#allocation2 + $0x778] sm:$0xff] %vm514_vm1, %v12041_v15  ;;  %v870_v16 = vor.u32 %v869_v17, %v865_v45  ;;  %v1172_v25 = vshll.u32 %v8609_v13, 16  ;;  %v1375_v39 = vrot.slane %v12077_v30, 1  ;;  %v3848_v6 = vld [vmem:[#allocation2 + $0x538] sm:$0xff]  ;;  %v1376_v20 = vrot.slane %v8609_v13, 1  ;;  %7702 = vmatpush3.bf16.msra.mxu1 %v8612_v61  ;;  %v3847_v52 = vld [vmem:[#allocation2 + $0x530] sm:$0xff] }
 0x139   : > { %5539 = vmatmul.mubr.bf16.gmra.mrb[60].mxu0 %v3811_v34  ;;  %1314 = vst.msk [vmem:[#allocation2 + $0x770] sm:$0xff] %vm497_vm0, %v1278_v53  ;;  %1217 = vst.msk [vmem:[#allocation2 + $0x768] sm:$0xff] %vm497_vm0, %v1163_v48  ;;  %v1169_v63 = vrot.slane %v1167_v4, 1  ;;  %v12078_v19 = vld [vmem:[#allocation19_spill] sm:$0xff]  ;;  %v12079_v34 = vld [vmem:[#allocation20_spill] sm:$0xff] }
 0x13a   : > { %5546 = vmatprep.mubr.bf16.mxu0 %v3830_v7  ;;  %1330 = vst.msk [vmem:[#allocation2 + $0x770] sm:$0xff] %vm514_vm1, %v12041_v15  ;;  %v877_v12 = vshrl.u32 %v12078_v19, 16  ;;  %v879_v41 = vshll.u32 %v12078_v19, 16  ;;  %1233 = vst.msk [vmem:[#allocation2 + $0x768] sm:$0xff] %vm514_vm1, %v12041_v15  ;;  %v875_v1 = vsel %vm707_vm3, %v870_v16, %v874_v50  ;;  %v1174_v0 = vrot.slane %v1172_v25, 1  ;;  %v8613_v47 = vld [vmem:[#allocation8 + $0x278] sm:$0xff]  }
 0x13b   : > { %5378 = vmatmul.mubr.bf16.gmra.mrb[60].mxu1 %v3809_v11  ;;  %v8610_v62 = vld [vmem:[%s9325_s5 + $0xb0] ss:$0 sps:$4 sm:$0x11]   ;;  %v1279_v18 = vrot.slane %v12078_v19, 1  ;;  %929 = vst.msk [vmem:[#allocation2 + $0x760] sm:$0xff] %vm497_vm0, %v875_v1  ;;  %v1170_v51 = vor.u32 %v1169_v63, %v1165_v40  ;;  %v1377_v38 = vsel %vm1236_vm2, %v1375_v39, %v1376_v20  ;;  %7813 = vmatprep.subr.bf16.mxu0 %v8613_v47  ;;  %v8614_v2 = vld [vmem:[#allocation8 + $0x238] sm:$0xff]  }
 0x13c   : > { %5385 = vmatprep.mubr.bf16.mxu1 %v3828_v58  ;;  %v881_v3 = vrot.slane %v879_v41, 1  ;;  %945 = vst.msk [vmem:[#allocation2 + $0x760] sm:$0xff] %vm514_vm1, %v12041_v15  ;;  %v884_v57 = vshll.u32 %v8610_v62, 16  ;;  %v1280_v26 = vrot.slane %v8610_v62, 1  ;;  %v1177_v56 = vshrl.u32 %v12079_v34, 16  ;;  %v3866_v27 = vld [vmem:[#allocation2 + $0x5c8] sm:$0xff]  ;;  %7814 = vmatpush3.bf16.msra.mxu0 %v8614_v2 }
 0x13d   : > { %1411 = vst.msk [vmem:[#allocation2 + $0x808] sm:$0xff] %vm497_vm0, %v1377_v38  ;;  %v1175_v9 = vsel %vm707_vm3, %v1170_v51, %v1174_v0  ;;  %v1179_v7 = vshll.u32 %v12079_v34, 16  ;;  %v8615_v33 = vld [vmem:[%s9332_s25 + $0xbc] ss:$0 sps:$4 sm:$0x11]   ;;  %v1378_v11 = vrot.slane %v12079_v34, 1 }
 0x13e   : > { %1427 = vst.msk [vmem:[#allocation2 + $0x808] sm:$0xff] %vm514_vm1, %v12041_v15  ;;  %v882_v14 = vor.u32 %v881_v3, %v877_v12  ;;  %v886_v31 = vrot.slane %v884_v57, 1  ;;  %v1281_v59 = vsel %vm1236_vm2, %v1279_v18, %v1280_v26  ;;  %v12080_v22 = vld [vmem:[#allocation21_spill] sm:$0xff]  ;;  %v1184_v28 = vshll.u32 %v8615_v33, 16  ;;  %v3864_v49 = vld [vmem:[#allocation2 + $0x5b8] sm:$0xff]  ;;  %v3863_v1 = vld [vmem:[#allocation2 + $0x5b0] sm:$0xff] }
 0x13f   : > { %1218 = vst.msk [vmem:[#allocation2 + $0x7f8] sm:$0xff] %vm497_vm0, %v1175_v9  ;;  %1315 = vst.msk [vmem:[#allocation2 + $0x800] sm:$0xff] %vm497_vm0, %v1281_v59  ;;  %v1181_v8 = vrot.slane %v1179_v7, 1  ;;  %v889_v5 = vshrl.u32 %v12080_v22, 16  ;;  %v891_v24 = vshll.u32 %v12080_v22, 16  ;;  %v1379_v46 = vrot.slane %v8615_v33, 1 }
 0x140   : > { %1234 = vst.msk [vmem:[#allocation2 + $0x7f8] sm:$0xff] %vm514_vm1, %v12041_v15  ;;  %v887_v32 = vsel %vm707_vm3, %v882_v14, %v886_v31  ;;  %1331 = vst.msk [vmem:[#allocation2 + $0x800] sm:$0xff] %vm514_vm1, %v12041_v15  ;;  %v8616_v58 = vld [vmem:[%s9325_s5 + $0xbc] ss:$0 sps:$4 sm:$0x11]   ;;  %v1282_v55 = vrot.slane %v12080_v22, 1 }
 0x141   : > { %5547 = vmatmul.mubr.bf16.gmra.mrb[64].mxu0 %v3829_v44  ;;  %930 = vst.msk [vmem:[#allocation2 + $0x7f0] sm:$0xff] %vm497_vm0, %v887_v32  ;;  %v1182_v23 = vor.u32 %v1181_v8, %v1177_v56  ;;  %v893_v60 = vrot.slane %v891_v24, 1  ;;  %v10097_v45 = vld [vmem:[%s9332_s25 + $0xc] sm:$0xff]   ;;  %v1186_v36 = vrot.slane %v1184_v28, 1  ;;  %v1380_v29 = vsel %vm1236_vm2, %v1378_v11, %v1379_v46  ;;  %v10115_v30 = vld [vmem:[%s9325_s5 + $0xc] sm:$0xff]   ;;  %v10170_v8 = vld [vmem:[%s9325_s5 + $0x24] sm:$0xff]  }
 0x142   : > { %5554 = vmatprep.mubr.bf16.mxu0 %v3848_v6  ;;  %946 = vst.msk [vmem:[#allocation2 + $0x7f0] sm:$0xff] %vm514_vm1, %v12041_v15  ;;  %v3845_v10 = vld [vmem:[#allocation2 + $0x520] sm:$0xff]  ;;  %v896_v43 = vshll.u32 %v8616_v58, 16  ;;  %v1283_v35 = vrot.slane %v8616_v58, 1  ;;  %v2124_v17 = vshrl.u32 %v10097_v45, 16  ;;  %v2126_v13 = vshll.u32 %v10097_v45, 16 }
 0x143   : > { %5386 = vmatmul.mubr.bf16.gmra.mrb[64].mxu1 %v3827_v54  ;;  %1412 = vst.msk [vmem:[#allocation2 + $0x898] sm:$0xff] %vm497_vm0, %v1380_v29  ;;  %v894_v37 = vor.u32 %v893_v60, %v889_v5  ;;  %1755 = vst.msk [vmem:[#allocation2 + $0x38] sm:$0xff] %vm497_vm0, %v10097_v45  ;;  %v10104_v21 = vld [vmem:[%s9332_s25 + $0x14] ss:$0 sps:$4 sm:$0x11]   ;;  %v1187_v44 = vsel %vm707_vm3, %v1182_v23, %v1186_v36  ;;  %v1836_v25 = vshrl.u32 %v10115_v30, 16 }
 0x144   : > { %5393 = vmatprep.mubr.bf16.mxu1 %v3846_v42  ;;  %1428 = vst.msk [vmem:[#allocation2 + $0x898] sm:$0xff] %vm514_vm1, %v12041_v15  ;;  %v898_v50 = vrot.slane %v896_v43, 1  ;;  %v1284_v53 = vsel %vm1236_vm2, %v1282_v55, %v1283_v35  ;;  %1771 = vst.msk [vmem:[#allocation2 + $0x38] sm:$0xff] %vm514_vm1, %v12041_v15  ;;  %v2128_v40 = vrot.slane %v2126_v13, 1  ;;  %v2131_v4 = vshll.u32 %v10104_v21, 16  ;;  %v8621_v61 = vld [vmem:[#allocation8 + $0x2c0] sm:$0xff]  }
 0x145   : > { %1219 = vst.msk [vmem:[#allocation2 + $0x888] sm:$0xff] %vm497_vm0, %v1187_v44  ;;  %1316 = vst.msk [vmem:[#allocation2 + $0x890] sm:$0xff] %vm497_vm0, %v1284_v53  ;;  %v10128_v16 = vld [vmem:[%s9325_s5 + $0x14] ss:$0 sps:$4 sm:$0x11]   ;;  %v1838_v39 = vshll.u32 %v10115_v30, 16  ;;  %7911 = vmatprep.subr.bf16.mxu1 %v8621_v61 }
 0x146   : > { %1235 = vst.msk [vmem:[#allocation2 + $0x888] sm:$0xff] %vm514_vm1, %v12041_v15  ;;  %v899_v48 = vsel %vm707_vm3, %v894_v37, %v898_v50  ;;  %1332 = vst.msk [vmem:[#allocation2 + $0x890] sm:$0xff] %vm514_vm1, %v12041_v15  ;;  %v3865_v54 = vld [vmem:[#allocation2 + $0x5c0] sm:$0xff]  ;;  %v2129_v6 = vor.u32 %v2128_v40, %v2124_v17  ;;  %v2133_v63 = vrot.slane %v2131_v4, 1  ;;  %v3884_v20 = vld [vmem:[#allocation2 + $0x658] sm:$0xff]  ;;  %v1843_v12 = vshll.u32 %v10128_v16, 16 }
 0x147   : > { %1627 = vst.msk [vmem:[#allocation2 + $0x30] sm:$0xff] %vm497_vm0, %v10115_v30  ;;  %931 = vst.msk [vmem:[#allocation2 + $0x880] sm:$0xff] %vm497_vm0, %v899_v48  ;;  %v1840_v19 = vrot.slane %v1838_v39, 1  ;;  %v8623_v41 = vld [vmem:[#allocation8 + $0x340] sm:$0xff]   ;;  %v3882_v18 = vld [vmem:[#allocation2 + $0x648] sm:$0xff]  ;;  %v1862_v36 = vshll.u32 %v10170_v8, 16 }
 0x148   : > { %1643 = vst.msk [vmem:[#allocation2 + $0x30] sm:$0xff] %vm514_vm1, %v12041_v15  ;;  %947 = vst.msk [vmem:[#allocation2 + $0x880] sm:$0xff] %vm514_vm1, %v12041_v15  ;;  %v2134_v42 = vsel %vm707_vm3, %v2129_v6, %v2133_v63  ;;  %v1845_v62 = vrot.slane %v1843_v12, 1  ;;  %8023 = vmatprep.subr.bf16.mxu0 %v8623_v41  ;;  %v10144_v38 = vld [vmem:[%s9332_s25 + $0x18] sm:$0xff]   ;;  %v3883_v47 = vld [vmem:[#allocation2 + $0x650] sm:$0xff] }
 0x149   : > { %5555 = vmatmul.mubr.bf16.gmra.mrb[68].mxu0 %v3847_v52  ;;  %2331 = vst.msk [vmem:[#allocation2 + $0x48] sm:$0xff] %vm497_vm0, %v2134_v42  ;;  %v1841_v0 = vor.u32 %v1840_v19, %v1836_v25  ;;  %v8626_v3 = vld [vmem:[%s9332_s25 + $0x20] ss:$0 sps:$4 sm:$0x11]   ;;  %1756 = vst.msk [vmem:[#allocation2 + $0xc8] sm:$0xff] %vm497_vm0, %v10144_v38  ;;  %v2136_v57 = vshrl.u32 %v10144_v38, 16 }
 0x14a   : > { %5562 = vmatprep.mubr.bf16.mxu0 %v3866_v27  ;;  %2347 = vst.msk [vmem:[#allocation2 + $0x48] sm:$0xff] %vm514_vm1, %v12041_v15  ;;  %v2138_v26 = vshll.u32 %v10144_v38, 16  ;;  %v10155_v9 = vld [vmem:[%s9325_s5 + $0x18] sm:$0xff]   ;;  %v3902_v14 = vld [vmem:[#allocation2 + $0x6e8] sm:$0xff]  ;;  %1772 = vst.msk [vmem:[#allocation2 + $0xc8] sm:$0xff] %vm514_vm1, %v12041_v15  ;;  %v2143_v31 = vshll.u32 %v8626_v3, 16 }
 0x14b   : > { %5394 = vmatmul.mubr.bf16.gmra.mrb[68].mxu1 %v3845_v10  ;;  %v1846_v51 = vsel %vm707_vm3, %v1841_v0, %v1845_v62  ;;  %1628 = vst.msk [vmem:[#allocation2 + $0xc0] sm:$0xff] %vm497_vm0, %v10155_v9  ;;  %v8628_v2 = vld [vmem:[%s9325_s5 + $0x20] ss:$0 sps:$4 sm:$0x11]   ;;  %v1848_v34 = vshrl.u32 %v10155_v9, 16  ;;  %v1850_v56 = vshll.u32 %v10155_v9, 16 }
 0x14c   : > { %5401 = vmatprep.mubr.bf16.mxu1 %v3864_v49  ;;  %2043 = vst.msk [vmem:[#allocation2 + $0x40] sm:$0xff] %vm497_vm0, %v1846_v51  ;;  %v2140_v59 = vrot.slane %v2138_v26, 1  ;;  %v2145_v7 = vrot.slane %v2143_v31, 1  ;;  %v10167_v52 = vld [vmem:[%s9332_s25 + $0x24] sm:$0xff]   ;;  %v3881_v33 = vld [vmem:[#allocation2 + $0x640] sm:$0xff]  ;;  %v1855_v32 = vshll.u32 %v8628_v2, 16 }
 0x14d   : > { %2059 = vst.msk [vmem:[#allocation2 + $0x40] sm:$0xff] %vm514_vm1, %v12041_v15  ;;  %1644 = vst.msk [vmem:[#allocation2 + $0xc0] sm:$0xff] %vm514_vm1, %v12041_v15  ;;  %v1852_v27 = vrot.slane %v1850_v56, 1  ;;  %v3900_v22 = vld [vmem:[#allocation2 + $0x6d8] sm:$0xff]  ;;  %v2148_v24 = vshrl.u32 %v10167_v52, 16  ;;  %v2150_v28 = vshll.u32 %v10167_v52, 16 }
 0x14e   : > { %v2141_v11 = vor.u32 %v2140_v59, %v2136_v57  ;;  %1757 = vst.msk [vmem:[#allocation2 + $0x158] sm:$0xff] %vm497_vm0, %v10167_v52  ;;  %v8630_v5 = vld [vmem:[%s9332_s25 + $0x2c] ss:$0 sps:$4 sm:$0x11]   ;;  %v1857_v55 = vrot.slane %v1855_v32, 1  ;;  %1629 = vst.msk [vmem:[#allocation2 + $0x150] sm:$0xff] %vm497_vm0, %v10170_v8 }
 0x14f   : > { %v1853_v58 = vor.u32 %v1852_v27, %v1848_v34  ;;  %1773 = vst.msk [vmem:[#allocation2 + $0x158] sm:$0xff] %vm514_vm1, %v12041_v15  ;;  %v2152_v23 = vrot.slane %v2150_v28, 1  ;;  %v2155_v60 = vshll.u32 %v8630_v5, 16  ;;  %1645 = vst.msk [vmem:[#allocation2 + $0x150] sm:$0xff] %vm514_vm1, %v12041_v15  ;;  %v1860_v10 = vshrl.u32 %v10170_v8, 16  ;;  %v3901_v17 = vld [vmem:[#allocation2 + $0x6e0] sm:$0xff] }
 0x150   : > { %v2146_v46 = vsel %vm707_vm3, %v2141_v11, %v2145_v7  ;;  %v8632_v43 = vld [vmem:[%s9325_s5 + $0x2c] ss:$0 sps:$4 sm:$0x11]   ;;  %v1864_v37 = vrot.slane %v1862_v36, 1  ;;  %v3920_v44 = vld [vmem:[#allocation2 + $0x778] sm:$0xff]  ;;  %v3899_v40 = vld [vmem:[#allocation2 + $0x6d0] sm:$0xff] }
 0x151   : > { %5563 = vmatmul.mubr.bf16.gmra.mrb[72].mxu0 %v3865_v54  ;;  %2332 = vst.msk [vmem:[#allocation2 + $0xd8] sm:$0xff] %vm497_vm0, %v2146_v46  ;;  %v1858_v29 = vsel %vm707_vm3, %v1853_v58, %v1857_v55  ;;  %v2153_v35 = vor.u32 %v2152_v23, %v2148_v24  ;;  %v2157_v49 = vrot.slane %v2155_v60, 1  ;;  %v1867_v13 = vshll.u32 %v8632_v43, 16  ;;  %v3918_v61 = vld [vmem:[#allocation2 + $0x768] sm:$0xff]  ;;  %v10200_v25 = vld [vmem:[%s9332_s25 + $0x30] sm:$0xff]   ;;  %v3919_v54 = vld [vmem:[#allocation2 + $0x770] sm:$0xff] }
 0x152   : > { %5570 = vmatprep.mubr.bf16.mxu0 %v3884_v20  ;;  %2348 = vst.msk [vmem:[#allocation2 + $0xd8] sm:$0xff] %vm514_vm1, %v12041_v15  ;;  %v1865_v53 = vor.u32 %v1864_v37, %v1860_v10  ;;  %v8638_v39 = vld [vmem:[%s9332_s25 + $0x38] ss:$0 sps:$4 sm:$0x11]   ;;  %v2160_v6 = vshrl.u32 %v10200_v25, 16  ;;  %v2162_v63 = vshll.u32 %v10200_v25, 16 }
 0x153   : > { %5402 = vmatmul.mubr.bf16.gmra.mrb[72].mxu1 %v3863_v1  ;;  %2044 = vst.msk [vmem:[#allocation2 + $0xd0] sm:$0xff] %vm497_vm0, %v1858_v29  ;;  %v2158_v50 = vsel %vm707_vm3, %v2153_v35, %v2157_v49  ;;  %v1869_v4 = vrot.slane %v1867_v13, 1  ;;  %1758 = vst.msk [vmem:[#allocation2 + $0x1e8] sm:$0xff] %vm497_vm0, %v10200_v25  ;;  %v10211_v20 = vld [vmem:[%s9325_s5 + $0x30] sm:$0xff]   ;;  %v2167_v41 = vshll.u32 %v8638_v39, 16  ;;  %v3917_v42 = vld [vmem:[#allocation2 + $0x760] sm:$0xff] }
 0x154   : > { %5409 = vmatprep.mubr.bf16.mxu1 %v3882_v18  ;;  %2060 = vst.msk [vmem:[#allocation2 + $0xd0] sm:$0xff] %vm514_vm1, %v12041_v15  ;;  %v10214_v19 = vld [vmem:[%s9332_s25 + $0x3c] sm:$0xff]   ;;  %1774 = vst.msk [vmem:[#allocation2 + $0x1e8] sm:$0xff] %vm514_vm1, %v12041_v15  ;;  %v2164_v1 = vrot.slane %v2162_v63, 1  ;;  %v1872_v62 = vshrl.u32 %v10211_v20, 16  ;;  %v1874_v18 = vshll.u32 %v10211_v20, 16 }
 0x155   : > { %2333 = vst.msk [vmem:[#allocation2 + $0x168] sm:$0xff] %vm497_vm0, %v2158_v50  ;;  %v1870_v48 = vsel %vm707_vm3, %v1865_v53, %v1869_v4  ;;  %v3938_v12 = vld [vmem:[#allocation2 + $0x808] sm:$0xff]  ;;  %1630 = vst.msk [vmem:[#allocation2 + $0x1e0] sm:$0xff] %vm497_vm0, %v10211_v20  ;;  %v8640_v0 = vld [vmem:[%s9325_s5 + $0x38] ss:$0 sps:$4 sm:$0x11]  }
 0x156   : > { %2349 = vst.msk [vmem:[#allocation2 + $0x168] sm:$0xff] %vm514_vm1, %v12041_v15  ;;  %v3936_v51 = vld [vmem:[#allocation2 + $0x7f8] sm:$0xff]  ;;  %v2169_v3 = vrot.slane %v2167_v41, 1  ;;  %1646 = vst.msk [vmem:[#allocation2 + $0x1e0] sm:$0xff] %vm514_vm1, %v12041_v15  ;;  %v1876_v57 = vrot.slane %v1874_v18, 1  ;;  %v1879_v26 = vshll.u32 %v8640_v0, 16 }
 0x157   : > { %2045 = vst.msk [vmem:[#allocation2 + $0x160] sm:$0xff] %vm497_vm0, %v1870_v48  ;;  %1759 = vst.msk [vmem:[#allocation2 + $0x278] sm:$0xff] %vm497_vm0, %v10214_v19  ;;  %v2172_v31 = vshrl.u32 %v10214_v19, 16  ;;  %v2174_v59 = vshll.u32 %v10214_v19, 16  ;;  %v10233_v2 = vld [vmem:[%s9325_s5 + $0x3c] sm:$0xff]   ;;  %v3954_v29 = vld [vmem:[#allocation2 + $0x888] sm:$0xff] }
 0x158   : > { %2061 = vst.msk [vmem:[#allocation2 + $0x160] sm:$0xff] %vm514_vm1, %v12041_v15  ;;  %1775 = vst.msk [vmem:[#allocation2 + $0x278] sm:$0xff] %vm514_vm1, %v12041_v15  ;;  %v1877_v56 = vor.u32 %v1876_v57, %v1872_v62  ;;  %v1881_v7 = vrot.slane %v1879_v26, 1  ;;  %v8644_v27 = vld [vmem:[%s9325_s5 + $0x44] ss:$0 sps:$4 sm:$0x11]  }
 0x159   : > { %5571 = vmatmul.mubr.bf16.gmra.mrb[76].mxu0 %v3883_v47  ;;  %v2165_v47 = vor.u32 %v2164_v1, %v2160_v6  ;;  %v2176_v11 = vrot.slane %v2174_v59, 1  ;;  %1631 = vst.msk [vmem:[#allocation2 + $0x270] sm:$0xff] %vm497_vm0, %v10233_v2  ;;  %v1884_v5 = vshrl.u32 %v10233_v2, 16  ;;  %v1886_v24 = vshll.u32 %v10233_v2, 16  ;;  %v3935_v58 = vld [vmem:[#allocation2 + $0x7f0] sm:$0xff]  ;;  %v3937_v55 = vld [vmem:[#allocation2 + $0x800] sm:$0xff] }
 0x15a   : > { %5578 = vmatprep.mubr.bf16.mxu0 %v3902_v14  ;;  %v8642_v14 = vld [vmem:[%s9332_s25 + $0x44] ss:$0 sps:$4 sm:$0x11]   ;;  %v1882_v32 = vsel %vm707_vm3, %v1877_v56, %v1881_v7  ;;  %1647 = vst.msk [vmem:[#allocation2 + $0x270] sm:$0xff] %vm514_vm1, %v12041_v15  ;;  %v1891_v46 = vshll.u32 %v8644_v27, 16  ;;  %v3956_v60 = vld [vmem:[#allocation2 + $0x898] sm:$0xff] }
 0x15b   : > { %5410 = vmatmul.mubr.bf16.gmra.mrb[76].mxu1 %v3881_v33  ;;  %v2170_v34 = vsel %vm707_vm3, %v2165_v47, %v2169_v3  ;;  %v2179_v33 = vshll.u32 %v8642_v14, 16  ;;  %2046 = vst.msk [vmem:[#allocation2 + $0x1f0] sm:$0xff] %vm497_vm0, %v1882_v32  ;;  %v2177_v28 = vor.u32 %v2176_v11, %v2172_v31  ;;  %v1888_v23 = vrot.slane %v1886_v24, 1  ;;  %v10255_v35 = vld [vmem:[%s9332_s25 + $0x48] sm:$0xff]   ;;  %v3690_v4 = vld [vmem:[#allocation2 + $0x48] sm:$0xff]  ;;  %v3953_v0 = vld [vmem:[#allocation2 + $0x880] sm:$0xff] }
 0x15c   : > { %5417 = vmatprep.mubr.bf16.mxu1 %v3900_v22  ;;  %2334 = vst.msk [vmem:[#allocation2 + $0x1f8] sm:$0xff] %vm497_vm0, %v2170_v34  ;;  %v1893_v36 = vrot.slane %v1891_v46, 1  ;;  %v8650_v37 = vld [vmem:[%s9332_s25 + $0x50] ss:$0 sps:$4 sm:$0x11]   ;;  %1760 = vst.msk [vmem:[#allocation2 + $0x308] sm:$0xff] %vm497_vm0, %v10255_v35 }
 0x15d   : > { %2350 = vst.msk [vmem:[#allocation2 + $0x1f8] sm:$0xff] %vm514_vm1, %v12041_v15  ;;  %v2181_v22 = vrot.slane %v2179_v33, 1  ;;  %2062 = vst.msk [vmem:[#allocation2 + $0x1f0] sm:$0xff] %vm514_vm1, %v12041_v15  ;;  %v1889_v43 = vor.u32 %v1888_v23, %v1884_v5  ;;  %v2184_v13 = vshrl.u32 %v10255_v35, 16  ;;  %v3955_v50 = vld [vmem:[#allocation2 + $0x890] sm:$0xff]  ;;  %v2191_v53 = vshll.u32 %v8650_v37, 16 }
 0x15e   : > { %1776 = vst.msk [vmem:[#allocation2 + $0x308] sm:$0xff] %vm514_vm1, %v12041_v15  ;;  %v10279_v63 = vld [vmem:[%s9332_s25 + $0x54] sm:$0xff]   ;;  %v8654_v1 = vld [vmem:[%s9332_s25 + $0x5c] ss:$0 sps:$4 sm:$0x11]   ;;  %v3687_v5 = vld [vmem:[#allocation2 + $0x30] sm:$0xff] }
 0x15f   : > { %v2182_v10 = vsel %vm707_vm3, %v2177_v28, %v2181_v22  ;;  %v1894_v49 = vsel %vm707_vm3, %v1889_v43, %v1893_v36  ;;  %1761 = vst.msk [vmem:[#allocation2 + $0x398] sm:$0xff] %vm497_vm0, %v10279_v63  ;;  %v2196_v18 = vshrl.u32 %v10279_v63, 16  ;;  %v3688_v3 = vld [vmem:[#allocation2 + $0x38] sm:$0xff]  ;;  %v2203_v26 = vshll.u32 %v8654_v1, 16  ;;  %v3689_v33 = vld [vmem:[#allocation2 + $0x40] sm:$0xff]  ;;  %v8635_v28 = vld [vmem:[#allocation8 + $0x348] sm:$0xff]  }
 0x160   : > { %2335 = vst.msk [vmem:[#allocation2 + $0x288] sm:$0xff] %vm497_vm0, %v2182_v10  ;;  %2047 = vst.msk [vmem:[#allocation2 + $0x280] sm:$0xff] %vm497_vm0, %v1894_v49  ;;  %v8656_v31 = vld [vmem:[%s9325_s5 + $0x5c] ss:$0 sps:$4 sm:$0x11]   ;;  %v8624_v11 = vld [vmem:[#allocation8 + $0x300] sm:$0xff]  }
 0x161   : > { %5579 = vmatmul.mubr.bf16.gmra.mrb[80].mxu0 %v3901_v17  ;;  %2351 = vst.msk [vmem:[#allocation2 + $0x288] sm:$0xff] %vm514_vm1, %v12041_v15  ;;  %v10260_v17 = vld [vmem:[%s9325_s5 + $0x48] sm:$0xff]   ;;  %2063 = vst.msk [vmem:[#allocation2 + $0x280] sm:$0xff] %vm514_vm1, %v12041_v15  ;;  %v2205_v7 = vrot.slane %v2203_v26, 1  ;;  %v1915_v22 = vshll.u32 %v8656_v31, 16  ;;  %v3708_v23 = vld [vmem:[#allocation2 + $0xd8] sm:$0xff] }
 0x162   : > { %5586 = vmatprep.mubr.bf16.mxu0 %v3920_v44  ;;  %v2186_v44 = vshll.u32 %v10255_v35, 16  ;;  %1632 = vst.msk [vmem:[#allocation2 + $0x300] sm:$0xff] %vm497_vm0, %v10260_v17  ;;  %v1896_v48 = vshrl.u32 %v10260_v17, 16  ;;  %v1898_v39 = vshll.u32 %v10260_v17, 16  ;;  %v8622_v24 = vld [vmem:[#allocation8 + $0x280] sm:$0xff]   ;;  %v2459_v10 = vrot.slane %v10097_v45, 1 }
 0x163   : > { %5418 = vmatmul.mubr.bf16.gmra.mrb[80].mxu1 %v3899_v40  ;;  %v8652_v40 = vld [vmem:[%s9325_s5 + $0x50] ss:$0 sps:$4 sm:$0x11]   ;;  %1648 = vst.msk [vmem:[#allocation2 + $0x300] sm:$0xff] %vm514_vm1, %v12041_v15  ;;  %1777 = vst.msk [vmem:[#allocation2 + $0x398] sm:$0xff] %vm514_vm1, %v12041_v15  ;;  %v2460_v49 = vrot.slane %v10104_v21, 1 }
 0x164   : > { %5425 = vmatprep.mubr.bf16.mxu1 %v3918_v61  ;;  %v2188_v61 = vrot.slane %v2186_v44, 1  ;;  %v1903_v6 = vshll.u32 %v8652_v40, 16  ;;  %v3706_v36 = vld [vmem:[#allocation2 + $0xc8] sm:$0xff]  ;;  %v2363_v37 = vrot.slane %v10115_v30, 1  ;;  %v2364_v21 = vrot.slane %v10128_v16, 1  ;;  %v8645_v30 = vld [vmem:[#allocation8 + $0x2d0] sm:$0xff]  }
 0x165   : > { %v8662_v44 = vld [vmem:[%s9332_s25 + $0x68] ss:$0 sps:$4 sm:$0x11]   ;;  %v8634_v45 = vld [vmem:[#allocation8 + $0x288] sm:$0xff]  }
 0x166   : > { %v2189_v41 = vor.u32 %v2188_v61, %v2184_v13  ;;  %v1905_v62 = vrot.slane %v1903_v6, 1  ;;  %v10316_v13 = vld [vmem:[%s9332_s25 + $0x60] sm:$0xff]   ;;  %v2215_v61 = vshll.u32 %v8662_v44, 16  ;;  %v8664_v16 = vld [vmem:[%s9325_s5 + $0x68] ss:$0 sps:$4 sm:$0x11]   ;;  %v2365_v6 = vsel %vm1236_vm2, %v2363_v37, %v2364_v21 }
 0x167   : > { %1762 = vst.msk [vmem:[#allocation2 + $0x428] sm:$0xff] %vm497_vm0, %v10316_v13  ;;  %v2208_v40 = vshrl.u32 %v10316_v13, 16  ;;  %2427 = vst.msk [vmem:[#allocation2 + $0x50] sm:$0xff] %vm497_vm0, %v2365_v6  ;;  %v8666_v31 = vld [vmem:[%s9332_s25 + $0x74] ss:$0 sps:$4 sm:$0x11]  }
 0x168   : > { %1778 = vst.msk [vmem:[#allocation2 + $0x428] sm:$0xff] %vm514_vm1, %v12041_v15  ;;  %v2217_v1 = vrot.slane %v2215_v61, 1  ;;  %2443 = vst.msk [vmem:[#allocation2 + $0x50] sm:$0xff] %vm514_vm1, %v12041_v15  ;;  %v3744_v37 = vld [vmem:[#allocation2 + $0x1f8] sm:$0xff]  ;;  %v8669_v44 = vld [vmem:[#allocation8 + $0x2e0] sm:$0xff]  }
 0x169   : > { %5587 = vmatmul.mubr.bf16.gmra.mrb[84].mxu0 %v3919_v54  ;;  %v2193_v54 = vrot.slane %v2191_v53, 1  ;;  %v2461_v53 = vsel %vm1236_vm2, %v2459_v10, %v2460_v49  ;;  %v8671_v10 = vld [vmem:[#allocation8 + $0x360] sm:$0xff]  }
 0x16a   : > { %5594 = vmatprep.mubr.bf16.mxu0 %v3938_v12  ;;  %v10282_v12 = vld [vmem:[%s9325_s5 + $0x54] sm:$0xff]   ;;  %2523 = vst.msk [vmem:[#allocation2 + $0x58] sm:$0xff] %vm497_vm0, %v2461_v53 }
 0x16b   : > { %5426 = vmatmul.mubr.bf16.gmra.mrb[84].mxu1 %v3917_v42  ;;  %v1900_v42 = vrot.slane %v1898_v39, 1  ;;  %1633 = vst.msk [vmem:[#allocation2 + $0x390] sm:$0xff] %vm497_vm0, %v10282_v12  ;;  %v2194_v47 = vsel %vm707_vm3, %v2189_v41, %v2193_v54  ;;  %v1908_v59 = vshrl.u32 %v10282_v12, 16  ;;  %v1910_v34 = vshll.u32 %v10282_v12, 16  ;;  %v3707_v39 = vld [vmem:[#allocation2 + $0xd0] sm:$0xff]  ;;  %v3726_v41 = vld [vmem:[#allocation2 + $0x168] sm:$0xff] }
 0x16c   : > { %5433 = vmatprep.mubr.bf16.mxu1 %v3936_v51  ;;  %v2198_v51 = vshll.u32 %v10279_v63, 16  ;;  %1649 = vst.msk [vmem:[#allocation2 + $0x390] sm:$0xff] %vm514_vm1, %v12041_v15  ;;  %v8648_v54 = vld [vmem:[#allocation8 + $0x310] sm:$0xff]   ;;  %2539 = vst.msk [vmem:[#allocation2 + $0x58] sm:$0xff] %vm514_vm1, %v12041_v15 }
 0x16d   : > { %v1901_v57 = vor.u32 %v1900_v42, %v1896_v48  ;;  %2336 = vst.msk [vmem:[#allocation2 + $0x318] sm:$0xff] %vm497_vm0, %v2194_v47  ;;  %v1912_v32 = vrot.slane %v1910_v34, 1  ;;  %v10328_v48 = vld [vmem:[%s9325_s5 + $0x60] sm:$0xff]   ;;  %v8646_v34 = vld [vmem:[#allocation8 + $0x290] sm:$0xff]  }
 0x16e   : > { %v2200_v14 = vrot.slane %v2198_v51, 1  ;;  %2352 = vst.msk [vmem:[#allocation2 + $0x318] sm:$0xff] %vm514_vm1, %v12041_v15  ;;  %v1927_v51 = vshll.u32 %v8664_v16, 16  ;;  %v3724_v47 = vld [vmem:[#allocation2 + $0x158] sm:$0xff] }
 0x16f   : > { %v1906_v56 = vsel %vm707_vm3, %v1901_v57, %v1905_v62  ;;  %1634 = vst.msk [vmem:[#allocation2 + $0x420] sm:$0xff] %vm497_vm0, %v10328_v48  ;;  %v1922_v62 = vshll.u32 %v10328_v48, 16  ;;  %v8659_v57 = vld [vmem:[#allocation8 + $0x358] sm:$0xff]  }
 0x170   : > { %2048 = vst.msk [vmem:[#allocation2 + $0x310] sm:$0xff] %vm497_vm0, %v1906_v56  ;;  %v2201_v27 = vor.u32 %v2200_v14, %v2196_v18  ;;  %v3705_v18 = vld [vmem:[#allocation2 + $0xc0] sm:$0xff]  ;;  %v1929_v56 = vrot.slane %v1927_v51, 1  ;;  %v3742_v51 = vld [vmem:[#allocation2 + $0x1e8] sm:$0xff] }
 0x171   : > { %5595 = vmatmul.mubr.bf16.gmra.mrb[88].mxu0 %v3937_v55  ;;  %2064 = vst.msk [vmem:[#allocation2 + $0x310] sm:$0xff] %vm514_vm1, %v12041_v15  ;;  %v1917_v55 = vrot.slane %v1915_v22, 1  ;;  %1650 = vst.msk [vmem:[#allocation2 + $0x420] sm:$0xff] %vm514_vm1, %v12041_v15  ;;  %v1924_v14 = vrot.slane %v1922_v62, 1 }
 0x172   : > { %5602 = vmatprep.mubr.bf16.mxu0 %v3956_v60  ;;  %v2206_v46 = vsel %vm707_vm3, %v2201_v27, %v2205_v7  ;;  %v8633_v60 = vld [vmem:[#allocation8 + $0x2c8] sm:$0xff]   ;;  %v8660_v27 = vld [vmem:[#allocation8 + $0x318] sm:$0xff]  }
 0x173   : > { %5434 = vmatmul.mubr.bf16.gmra.mrb[88].mxu1 %v3935_v58  ;;  %v1913_v58 = vor.u32 %v1912_v32, %v1908_v59  ;;  %2337 = vst.msk [vmem:[#allocation2 + $0x3a8] sm:$0xff] %vm497_vm0, %v2206_v46  ;;  %v10351_v59 = vld [vmem:[%s9325_s5 + $0x6c] sm:$0xff]   ;;  %v8668_v46 = vld [vmem:[%s9325_s5 + $0x74] ss:$0 sps:$4 sm:$0x11]  }
 0x174   : > { %5441 = vmatprep.mubr.bf16.mxu1 %v3954_v29  ;;  %v8636_v29 = vld [vmem:[#allocation8 + $0x308] sm:$0xff]   ;;  %2353 = vst.msk [vmem:[#allocation2 + $0x3a8] sm:$0xff] %vm514_vm1, %v12041_v15  ;;  %v1939_v49 = vshll.u32 %v8668_v46, 16 }
 0x175   : > { %v1918_v43 = vsel %vm707_vm3, %v1913_v58, %v1917_v55  ;;  %1635 = vst.msk [vmem:[#allocation2 + $0x4b0] sm:$0xff] %vm497_vm0, %v10351_v59  ;;  %v1932_v58 = vshrl.u32 %v10351_v59, 16  ;;  %v1934_v55 = vshll.u32 %v10351_v59, 16 }
 0x176   : > { %2049 = vst.msk [vmem:[#allocation2 + $0x3a0] sm:$0xff] %vm497_vm0, %v1918_v43 }
 0x177   : > { %2065 = vst.msk [vmem:[#allocation2 + $0x3a0] sm:$0xff] %vm514_vm1, %v12041_v15  ;;  %1651 = vst.msk [vmem:[#allocation2 + $0x4b0] sm:$0xff] %vm514_vm1, %v12041_v15  ;;  %v1936_v43 = vrot.slane %v1934_v55, 1  ;;  %v10411_v55 = vld [vmem:[%s9332_s25 + $0x84] sm:$0xff]  }
 0x178   : > { %1765 = vst.msk [vmem:[#allocation2 + $0x5d8] sm:$0xff] %vm497_vm0, %v10411_v55 }
 0x179   : > { %5603 = vmatmul.mubr.bf16.gmra.mrb[92].mxu0 %v3955_v50  ;;  %v8647_v50 = vld [vmem:[#allocation8 + $0x350] sm:$0xff]   ;;  %1781 = vst.msk [vmem:[#allocation2 + $0x5d8] sm:$0xff] %vm514_vm1, %v12041_v15 }
 0x17a   : > { %5804 = vmatprep.mubr.bf16.mxu0 %v3690_v4  ;;  %v2210_v4 = vshll.u32 %v10316_v13, 16 }
 0x17b   : > { %5442 = vmatmul.mubr.bf16.gmra.mrb[92].mxu1 %v3953_v0  ;;  %v1920_v0 = vshrl.u32 %v10328_v48, 16 }
 0x17c   : > { %5643 = vmatprep.mubr.bf16.mxu1 %v3688_v3  ;;  %v2212_v42 = vrot.slane %v2210_v4, 1  ;;  %v10345_v3 = vld [vmem:[%s9332_s25 + $0x6c] sm:$0xff]  }
 0x17d   : > { %1763 = vst.msk [vmem:[#allocation2 + $0x4b8] sm:$0xff] %vm497_vm0, %v10345_v3  ;;  %v2220_v7 = vshrl.u32 %v10345_v3, 16  ;;  %v1925_v22 = vor.u32 %v1924_v14, %v1920_v0  ;;  %v8672_v4 = vld [vmem:[#allocation8 + $0x320] sm:$0xff]   ;;  %v8674_v14 = vld [vmem:[%s9332_s25 + $0x80] ss:$0 sps:$4 sm:$0x11]  }
 0x17e   : > { %v2213_v26 = vor.u32 %v2212_v42, %v2208_v40  ;;  %1779 = vst.msk [vmem:[#allocation2 + $0x4b8] sm:$0xff] %vm514_vm1, %v12041_v15  ;;  %v1941_v40 = vrot.slane %v1939_v49, 1  ;;  %v10384_v0 = vld [vmem:[%s9332_s25 + $0x78] sm:$0xff]  }
 0x17f   : > { %1764 = vst.msk [vmem:[#allocation2 + $0x548] sm:$0xff] %vm497_vm0, %v10384_v0 }
 0x180   : > { %v2218_v32 = vsel %vm707_vm3, %v2213_v26, %v2217_v1  ;;  %v8670_v1 = vld [vmem:[#allocation8 + $0x2a0] sm:$0xff]   ;;  %1780 = vst.msk [vmem:[#allocation2 + $0x548] sm:$0xff] %vm514_vm1, %v12041_v15 }
 0x181   : > { %5805 = vmatmul.mubr.bf16.vlgmr.msra.gmra.mrb[96].mxu0 %v3689_v33  ;;  %v2222_v33 = vshll.u32 %v10345_v3, 16  ;;  %2338 = vst.msk [vmem:[#allocation2 + $0x438] sm:$0xff] %vm497_vm0, %v2218_v32 }
 0x182   : > { %8024 = vmatpush3.bf16.msra.mxu0 %v8624_v11  ;;  %5812 = vmatprep.mubr.bf16.mxu0 %v3708_v23  ;;  %v8657_v11 = vld [vmem:[#allocation8 + $0x2d8] sm:$0xff]   ;;  %2354 = vst.msk [vmem:[#allocation2 + $0x438] sm:$0xff] %vm514_vm1, %v12041_v15  ;;  %v1930_v23 = vsel %vm707_vm3, %v1925_v22, %v1929_v56  ;;  %v3743_v56 = vld [vmem:[#allocation2 + $0x1f0] sm:$0xff]  ;;  %v3741_v22 = vld [vmem:[#allocation2 + $0x1e0] sm:$0xff] }
 0x183   : > { %5644 = vmatmul.mubr.bf16.vlgmr.msra.gmra.mrb[96].mxu1 %v3687_v5  ;;  %8025 = vmatprep.subr.bf16.mxu0 %v8635_v28  ;;  %v2227_v5 = vshll.u32 %v8666_v31, 16  ;;  %v2224_v28 = vrot.slane %v2222_v33, 1  ;;  %2050 = vst.msk [vmem:[#allocation2 + $0x430] sm:$0xff] %vm497_vm0, %v1930_v23  ;;  %v2232_v31 = vshrl.u32 %v10384_v0, 16  ;;  %v2239_v33 = vshll.u32 %v8674_v14, 16  ;;  %v10414_v23 = vld [vmem:[%s9325_s5 + $0x84] sm:$0xff]  }
 0x184   : > { %7912 = vmatpush3.bf16.msra.mxu1 %v8622_v24  ;;  %5651 = vmatprep.mubr.bf16.mxu1 %v3706_v36  ;;  %v8658_v24 = vld [vmem:[#allocation8 + $0x298] sm:$0xff]   ;;  %v3725_v36 = vld [vmem:[#allocation2 + $0x160] sm:$0xff]  ;;  %2066 = vst.msk [vmem:[#allocation2 + $0x430] sm:$0xff] %vm514_vm1, %v12041_v15  ;;  %v8681_v14 = vld [vmem:[#allocation8 + $0x2e8] sm:$0xff]  }
 0x185   : > { %7913 = vmatprep.subr.bf16.mxu1 %v8633_v60  ;;  %v2229_v60 = vrot.slane %v2227_v5, 1  ;;  %v2241_v46 = vrot.slane %v2239_v33, 1  ;;  %1637 = vst.msk [vmem:[#allocation2 + $0x5d0] sm:$0xff] %vm497_vm0, %v10414_v23 }
 0x186   : > { %8026 = vmatpush3.bf16.msra.mxu0 %v8636_v29  ;;  %v2225_v29 = vor.u32 %v2224_v28, %v2220_v7  ;;  %1653 = vst.msk [vmem:[#allocation2 + $0x5d0] sm:$0xff] %vm514_vm1, %v12041_v15 }
 0x187   : > { %8027 = vmatprep.subr.bf16.mxu0 %v8647_v50 }
 0x188   : > { %7914 = vmatpush3.bf16.msra.mxu1 %v8634_v45  ;;  %v3723_v45 = vld [vmem:[#allocation2 + $0x150] sm:$0xff]  ;;  %v2230_v21 = vsel %vm707_vm3, %v2225_v29, %v2229_v60 }
 0x189   : > { %5813 = vmatmul.mubr.bf16.gmra.mrb[100].mxu0 %v3707_v39  ;;  %7915 = vmatprep.subr.bf16.mxu1 %v8645_v30  ;;  %v1937_v30 = vor.u32 %v1936_v43, %v1932_v58  ;;  %2339 = vst.msk [vmem:[#allocation2 + $0x4c8] sm:$0xff] %vm497_vm0, %v2230_v21 }
 0x18a   : > { %5820 = vmatprep.mubr.bf16.mxu0 %v3726_v41  ;;  %8028 = vmatpush3.bf16.msra.mxu0 %v8648_v54  ;;  %2355 = vst.msk [vmem:[#allocation2 + $0x4c8] sm:$0xff] %vm514_vm1, %v12041_v15 }
 0x18b   : > { %5652 = vmatmul.mubr.bf16.gmra.mrb[100].mxu1 %v3705_v18  ;;  %8029 = vmatprep.subr.bf16.mxu0 %v8659_v57  ;;  %v1942_v42 = vsel %vm707_vm3, %v1937_v30, %v1941_v40  ;;  %v3760_v40 = vld [vmem:[#allocation2 + $0x278] sm:$0xff] }
 0x18c   : > { %5659 = vmatprep.mubr.bf16.mxu1 %v3724_v47  ;;  %7916 = vmatpush3.bf16.msra.mxu1 %v8646_v34  ;;  %2051 = vst.msk [vmem:[#allocation2 + $0x4c0] sm:$0xff] %vm497_vm0, %v1942_v42  ;;  %v10388_v47 = vld [vmem:[%s9325_s5 + $0x78] sm:$0xff]   ;;  %v2234_v34 = vshll.u32 %v10384_v0, 16 }
 0x18d   : > { %7917 = vmatprep.subr.bf16.mxu1 %v8657_v11  ;;  %2067 = vst.msk [vmem:[#allocation2 + $0x4c0] sm:$0xff] %vm514_vm1, %v12041_v15  ;;  %v8676_v11 = vld [vmem:[%s9325_s5 + $0x80] ss:$0 sps:$4 sm:$0x11]   ;;  %v1946_v32 = vshll.u32 %v10388_v47, 16 }
 0x18e   : > { %8030 = vmatpush3.bf16.msra.mxu0 %v8660_v27  ;;  %1636 = vst.msk [vmem:[#allocation2 + $0x540] sm:$0xff] %vm497_vm0, %v10388_v47  ;;  %v2236_v7 = vrot.slane %v2234_v34, 1  ;;  %v1944_v27 = vshrl.u32 %v10388_v47, 16  ;;  %v1951_v58 = vshll.u32 %v8676_v11, 16 }
 0x18f   : > { %8031 = vmatprep.subr.bf16.mxu0 %v8671_v10  ;;  %1652 = vst.msk [vmem:[#allocation2 + $0x540] sm:$0xff] %vm514_vm1, %v12041_v15  ;;  %v1948_v29 = vrot.slane %v1946_v32, 1 }
 0x190   : > { %7918 = vmatpush3.bf16.msra.mxu1 %v8658_v24  ;;  %v2237_v28 = vor.u32 %v2236_v7, %v2232_v31  ;;  %v3761_v31 = vld [vmem:[#allocation2 + $0x280] sm:$0xff]  ;;  %v3780_v7 = vld [vmem:[#allocation2 + $0x318] sm:$0xff] }
 0x191   : > { %5821 = vmatmul.mubr.bf16.gmra.mrb[104].mxu0 %v3725_v36  ;;  %7919 = vmatprep.subr.bf16.mxu1 %v8669_v44  ;;  %v3762_v36 = vld [vmem:[#allocation2 + $0x288] sm:$0xff] }
 0x192   : > { %5828 = vmatprep.mubr.bf16.mxu0 %v3744_v37  ;;  %8032 = vmatpush3.bf16.msra.mxu0 %v8672_v4  ;;  %v1949_v4 = vor.u32 %v1948_v29, %v1944_v27  ;;  %v8682_v27 = vld [vmem:[#allocation8 + $0x2a8] sm:$0xff]  }
 0x193   : > { %5660 = vmatmul.mubr.bf16.gmra.mrb[104].mxu1 %v3723_v45  ;;  %v2242_v45 = vsel %vm707_vm3, %v2237_v28, %v2241_v46 }
 0x194   : > { %v7367_v50 = vpop.f32.mrb[0].mxu0  ;;  %v7415_v53 = vpop.f32.mrb[0].mxu1  ;;  %5667 = vmatprep.mubr.bf16.mxu1 %v3742_v51  ;;  %7920 = vmatpush3.bf16.msra.mxu1 %v8670_v1  ;;  %2340 = vst.msk [vmem:[#allocation2 + $0x558] sm:$0xff] %vm497_vm0, %v2242_v45  ;;  %v1958_v51 = vshll.u32 %v10414_v23, 16 }
 0x195   : > { %v7368_v61 = vpop.f32.mrb[1].mxu0  ;;  %v7416_v39 = vpop.f32.mrb[1].mxu1  ;;  %2356 = vst.msk [vmem:[#allocation2 + $0x558] sm:$0xff] %vm514_vm1, %v12041_v15  ;;  %7921 = vmatprep.subr.bf16.mxu1 %v8681_v14  ;;  %v3798_v14 = vld [vmem:[#allocation2 + $0x3a8] sm:$0xff] }
 0x196   : > { %v10376_v54 = vadd.f32 %v7368_v61, %v7367_v50  ;;  %v10378_v16 = vadd.f32 %v7416_v39, %v7415_v53  ;;  %v7370_v6 = vpop.f32.mrb[2].mxu0  ;;  %v7418_v41 = vpop.f32.mrb[2].mxu1  ;;  %v1953_v50 = vrot.slane %v1951_v58, 1  ;;  %v8678_v53 = vld [vmem:[%s9332_s25 + $0x8c] ss:$0 sps:$4 sm:$0x11]  }
 0x197   : > { %v7371_v62 = vpop.f32.mrb[3].mxu0  ;;  %v7419_v18 = vpop.f32.mrb[3].mxu1  ;;  %v2244_v61 = vshrl.u32 %v10411_v55, 16  ;;  %v2246_v39 = vshll.u32 %v10411_v55, 16  ;;  %v2251_v42 = vshll.u32 %v8678_v53, 16  ;;  %v1960_v11 = vrot.slane %v1958_v51, 1 }
 0x198   : > { %v10390_v57 = vadd.f32 %v7371_v62, %v7370_v6  ;;  %v10392_v26 = vadd.f32 %v7419_v18, %v7418_v41  ;;  %v1954_v1 = vsel %vm707_vm3, %v1949_v4, %v1953_v50  ;;  %v1956_v18 = vshrl.u32 %v10414_v23, 16  ;;  %7922 = vmatpush3.bf16.msra.mxu1 %v8682_v27  ;;  %v8684_v50 = vld [vmem:[#allocation8 + $0x328] sm:$0xff]  }
 0x199   : > { %5829 = vmatmul.mubr.bf16.gmra.mrb[108].mxu0 %v3743_v56  ;;  %v2248_v62 = vrot.slane %v2246_v39, 1  ;;  %2052 = vst.msk [vmem:[#allocation2 + $0x550] sm:$0xff] %vm497_vm0, %v1954_v1  ;;  %v2253_v34 = vrot.slane %v2251_v42, 1  ;;  %v8680_v56 = vld [vmem:[%s9325_s5 + $0x8c] ss:$0 sps:$4 sm:$0x11]  }
 0x19a   : > { %5836 = vmatprep.mubr.bf16.mxu0 %v3762_v36  ;;  %2068 = vst.msk [vmem:[#allocation2 + $0x550] sm:$0xff] %vm514_vm1, %v12041_v15  ;;  %v10458_v42 = vld [vmem:[#allocation9] ss:$0 sm:$0xff] }
 0x19b   : > { %5668 = vmatmul.mubr.bf16.gmra.mrb[108].mxu1 %v3741_v22  ;;  %v2249_v33 = vor.u32 %v2248_v62, %v2244_v61  ;;  %v8686_v51 = vld [vmem:[%s9332_s25 + $0x98] ss:$0 sps:$4 sm:$0x11]  }
 0x19c   : > { %v7373_v5 = vpop.f32.mrb[4].mxu0  ;;  %v7421_v24 = vpop.f32.mrb[4].mxu1  ;;  %5675 = vmatprep.mubr.bf16.mxu1 %v3760_v40  ;;  %v10453_v40 = vld [vmem:[%s9332_s25 + $0x90] sm:$0xff]  }
 0x19d   : > { %v7374_v60 = vpop.f32.mrb[5].mxu0  ;;  %v7422_v10 = vpop.f32.mrb[5].mxu1  ;;  %v2254_v58 = vsel %vm707_vm3, %v2249_v33, %v2253_v34  ;;  %1766 = vst.msk [vmem:[#allocation2 + $0x668] sm:$0xff] %vm497_vm0, %v10453_v40  ;;  %v2256_v1 = vshrl.u32 %v10453_v40, 16  ;;  %v2258_v62 = vshll.u32 %v10453_v40, 16  ;;  %v10471_v34 = vld [vmem:[%s9325_s5 + $0x90] sm:$0xff]  }
 0x19e   : > { %v10416_v43 = vadd.f32 %v7374_v60, %v7373_v5  ;;  %v10418_v49 = vadd.f32 %v7422_v10, %v7421_v24  ;;  %v7376_v37 = vpop.f32.mrb[6].mxu0  ;;  %v7424_v44 = vpop.f32.mrb[6].mxu1  ;;  %v1963_v5 = vshll.u32 %v8680_v56, 16  ;;  %v8683_v24 = vld [vmem:[#allocation8 + $0x368] sm:$0xff]   ;;  %v1961_v60 = vor.u32 %v1960_v11, %v1956_v18  ;;  %v3759_v10 = vld [vmem:[#allocation2 + $0x270] sm:$0xff]  ;;  %2341 = vst.msk [vmem:[#allocation2 + $0x5e8] sm:$0xff] %vm497_vm0, %v2254_v58 }
 0x19f   : > { %v7377_v21 = vpop.f32.mrb[7].mxu0  ;;  %v7425_v30 = vpop.f32.mrb[7].mxu1  ;;  %8033 = vmatprep.subr.bf16.mxu0 %v8683_v24  ;;  %2357 = vst.msk [vmem:[#allocation2 + $0x5e8] sm:$0xff] %vm514_vm1, %v12041_v15  ;;  %v3779_v18 = vld [vmem:[#allocation2 + $0x310] sm:$0xff]  ;;  %1782 = vst.msk [vmem:[#allocation2 + $0x668] sm:$0xff] %vm514_vm1, %v12041_v15  ;;  %v10475_v56 = vadd.f32 %v10378_v16, %v10458_v42  ;;  %v3777_v11 = vld [vmem:[#allocation2 + $0x300] sm:$0xff] }
 0x1a0   : > { %v10433_v6 = vadd.f32 %v7377_v21, %v7376_v37  ;;  %v10435_v41 = vadd.f32 %v7425_v30, %v7424_v44  ;;  %v1965_v45 = vrot.slane %v1963_v5, 1  ;;  %v3778_v30 = vld [vmem:[#allocation2 + $0x308] sm:$0xff]  ;;  %8034 = vmatpush3.bf16.msra.mxu0 %v8684_v50  ;;  %v10483_v33 = vadd.f32 %v10418_v49, %v10458_v42  ;;  %v8688_v5 = vld [vmem:[%s9325_s5 + $0x98] ss:$0 sps:$4 sm:$0x11]   ;;  %1638 = vst.msk [vmem:[#allocation2 + $0x660] sm:$0xff] %vm497_vm0, %v10471_v34 }
 0x1a1   : > { %5837 = vmatmul.mubr.bf16.gmra.mrb[112].mxu0 %v3761_v31  ;;  %v2260_v31 = vrot.slane %v2258_v62, 1  ;;  %v1968_v58 = vshrl.u32 %v10471_v34, 16  ;;  %1654 = vst.msk [vmem:[#allocation2 + $0x660] sm:$0xff] %vm514_vm1, %v12041_v15  ;;  %v1975_v50 = vshll.u32 %v8688_v5, 16  ;;  %v3797_v5 = vld [vmem:[#allocation2 + $0x3a0] sm:$0xff] }
 0x1a2   : > { %5844 = vmatprep.mubr.bf16.mxu0 %v3780_v7  ;;  %v1966_v39 = vsel %vm707_vm3, %v1961_v60, %v1965_v45  ;;  %v10479_v7 = vadd.f32 %v10392_v26, %v10458_v42  ;;  %12082 = vst [vmem:[#allocation18_spill] sm:$0xff] %v10483_v33  ;;  %v10488_v24 = vadd.f32 %v10435_v41, %v10458_v42  ;;  %v1970_v60 = vshll.u32 %v10471_v34, 16  ;;  %v8695_v33 = vld [vmem:[#allocation8 + $0x370] sm:$0xff]  }
 0x1a3   : > { %5676 = vmatmul.mubr.bf16.gmra.mrb[112].mxu1 %v3759_v10  ;;  %2053 = vst.msk [vmem:[#allocation2 + $0x5e0] sm:$0xff] %vm497_vm0, %v1966_v39  ;;  %v2261_v49 = vor.u32 %v2260_v31, %v2256_v1  ;;  %v10508_v39 = vld [vmem:[%s9325_s5 + $0x9c] sm:$0xff]   ;;  %v1977_v31 = vrot.slane %v1975_v50, 1  ;;  %8035 = vmatprep.subr.bf16.mxu0 %v8695_v33 }
 0x1a4   : > { %v7379_v32 = vpop.f32.mrb[8].mxu0  ;;  %v7427_v22 = vpop.f32.mrb[8].mxu1  ;;  %5683 = vmatprep.mubr.bf16.mxu1 %v3778_v30  ;;  %2069 = vst.msk [vmem:[#allocation2 + $0x5e0] sm:$0xff] %vm514_vm1, %v12041_v15  ;;  %12081 = vst [vmem:[#allocation17_spill] sm:$0xff] %v10479_v7  ;;  %v10560_v33 = vld [vmem:[%s9332_s25 + $0xa8] sm:$0xff]   ;;  %v2369_v7 = vrot.slane %v10170_v8, 1 }
 0x1a5   : > { %v7380_v28 = vpop.f32.mrb[9].mxu0  ;;  %v7428_v46 = vpop.f32.mrb[9].mxu1  ;;  %12083 = vst [vmem:[#allocation19_spill] sm:$0xff] %v10488_v24  ;;  %1639 = vst.msk [vmem:[#allocation2 + $0x6f0] sm:$0xff] %vm497_vm0, %v10508_v39 }
 0x1a6   : > { %v10447_v36 = vadd.f32 %v7380_v28, %v7379_v32  ;;  %v7429_v29 = vadd.f32 %v7428_v46, %v7427_v22  ;;  %v7382_v37 = vpop.f32.mrb[10].mxu0  ;;  %v7430_v44 = vpop.f32.mrb[10].mxu1  ;;  %v2263_v22 = vshll.u32 %v8686_v51, 16  ;;  %1655 = vst.msk [vmem:[#allocation2 + $0x6f0] sm:$0xff] %vm514_vm1, %v12041_v15 }
 0x1a7   : > { %v7383_v53 = vpop.f32.mrb[11].mxu0  ;;  %v7431_v21 = vpop.f32.mrb[11].mxu1  ;;  %1768 = vst.msk [vmem:[#allocation2 + $0x788] sm:$0xff] %vm497_vm0, %v10560_v33 }
 0x1a8   : > { %v10455_v4 = vadd.f32 %v7383_v53, %v7382_v37  ;;  %v7432_v61 = vadd.f32 %v7431_v21, %v7430_v44  ;;  %v10491_v16 = vadd.f32 %v7429_v29, %v10458_v42  ;;  %v3796_v44 = vld [vmem:[#allocation2 + $0x398] sm:$0xff]  ;;  %v2265_v45 = vrot.slane %v2263_v22, 1  ;;  %v10505_v53 = vld [vmem:[%s9332_s25 + $0x9c] sm:$0xff]   ;;  %1784 = vst.msk [vmem:[#allocation2 + $0x788] sm:$0xff] %vm514_vm1, %v12041_v15 }
 0x1a9   : > { %5845 = vmatmul.mubr.bf16.gmra.mrb[116].mxu0 %v3779_v18  ;;  %1767 = vst.msk [vmem:[#allocation2 + $0x6f8] sm:$0xff] %vm497_vm0, %v10505_v53  ;;  %v2270_v22 = vshll.u32 %v10505_v53, 16 }
 0x1aa   : > { %12084 = vst [vmem:[#allocation20_spill] sm:$0xff] %v10491_v16  ;;  %v10494_v26 = vadd.f32 %v7432_v61, %v10458_v42  ;;  %v1972_v61 = vrot.slane %v1970_v60, 1  ;;  %5852 = vmatprep.mubr.bf16.mxu0 %v3798_v14  ;;  %v2266_v51 = vsel %vm707_vm3, %v2261_v49, %v2265_v45  ;;  %1783 = vst.msk [vmem:[#allocation2 + $0x6f8] sm:$0xff] %vm514_vm1, %v12041_v15  ;;  %v8692_v60 = vld [vmem:[%s9325_s5 + $0xa4] ss:$0 sps:$4 sm:$0x11]  }
 0x1ab   : > { %5684 = vmatmul.mubr.bf16.gmra.mrb[116].mxu1 %v3777_v11  ;;  %2342 = vst.msk [vmem:[#allocation2 + $0x678] sm:$0xff] %vm497_vm0, %v2266_v51  ;;  %v3795_v45 = vld [vmem:[#allocation2 + $0x390] sm:$0xff]  ;;  %v3814_v51 = vld [vmem:[#allocation2 + $0x428] sm:$0xff] }
 0x1ac   : > { %v7385_v27 = vpop.f32.mrb[12].mxu0  ;;  %v7433_v32 = vpop.f32.mrb[12].mxu1  ;;  %12085 = vst [vmem:[#allocation21_spill] sm:$0xff] %v10494_v26  ;;  %v1973_v18 = vor.u32 %v1972_v61, %v1968_v58  ;;  %5691 = vmatprep.mubr.bf16.mxu1 %v3796_v44  ;;  %2358 = vst.msk [vmem:[#allocation2 + $0x678] sm:$0xff] %vm514_vm1, %v12041_v15  ;;  %v2272_v58 = vrot.slane %v2270_v22, 1  ;;  %v8694_v22 = vld [vmem:[#allocation8 + $0x2b0] sm:$0xff]  }
 0x1ad   : > { %v7386_v28 = vpop.f32.mrb[13].mxu0  ;;  %v7434_v46 = vpop.f32.mrb[13].mxu1 }
 0x1ae   : > { %v10500_v41 = vadd.f32 %v7386_v28, %v7385_v27  ;;  %v7435_v10 = vadd.f32 %v7434_v46, %v7433_v32  ;;  %v7388_v29 = vpop.f32.mrb[14].mxu0  ;;  %v7436_v37 = vpop.f32.mrb[14].mxu1  ;;  %v8690_v27 = vld [vmem:[%s9332_s25 + $0xa4] ss:$0 sps:$4 sm:$0x11]   ;;  %v2268_v32 = vshrl.u32 %v10505_v53, 16  ;;  %v1978_v49 = vsel %vm707_vm3, %v1973_v18, %v1977_v31 }
 0x1af   : > { %v7389_v21 = vpop.f32.mrb[15].mxu0  ;;  %v7437_v30 = vpop.f32.mrb[15].mxu1  ;;  %v2275_v11 = vshll.u32 %v8690_v27, 16  ;;  %v1980_v28 = vshrl.u32 %v10508_v39, 16  ;;  %2054 = vst.msk [vmem:[#allocation2 + $0x670] sm:$0xff] %vm497_vm0, %v1978_v49  ;;  %v1987_v18 = vshll.u32 %v8692_v60, 16 }
 0x1b0   : > { %v10510_v1 = vadd.f32 %v7389_v21, %v7388_v29  ;;  %v7438_v62 = vadd.f32 %v7437_v30, %v7436_v37  ;;  %v10530_v46 = vadd.f32 %v7435_v10, %v10458_v42  ;;  %v1982_v29 = vshll.u32 %v10508_v39, 16  ;;  %v8693_v37 = vld [vmem:[#allocation8 + $0x2f0] sm:$0xff]   ;;  %v3816_v10 = vld [vmem:[#allocation2 + $0x438] sm:$0xff]  ;;  %2070 = vst.msk [vmem:[#allocation2 + $0x670] sm:$0xff] %vm514_vm1, %v12041_v15 }
 0x1b1   : > { %v2277_v21 = vrot.slane %v2275_v11, 1  ;;  %v2273_v31 = vor.u32 %v2272_v58, %v2268_v32  ;;  %7923 = vmatprep.subr.bf16.mxu1 %v8693_v37  ;;  %5853 = vmatmul.mubr.bf16.gmra.mrb[120].mxu0 %v3797_v5  ;;  %v1989_v24 = vrot.slane %v1987_v18, 1  ;;  %v2366_v37 = vrot.slane %v10155_v9, 1  ;;  %v10576_v18 = vld [vmem:[%s9325_s5 + $0xa8] sm:$0xff]  }
 0x1b2   : > { %12086 = vst [vmem:[#allocation22_spill] sm:$0xff] %v10530_v46  ;;  %v10536_v44 = vadd.f32 %v7438_v62, %v10458_v42  ;;  %v1984_v27 = vrot.slane %v1982_v29, 1  ;;  %7924 = vmatpush3.bf16.msra.mxu1 %v8694_v22  ;;  %5860 = vmatprep.mubr.bf16.mxu0 %v3816_v10  ;;  %v12089_v9 = vrot.slane %v10144_v38, 1  ;;  %v2282_v38 = vshll.u32 %v10560_v33, 16  ;;  %12091 = vst [vmem:[#allocation26_spill] sm:$0xff] %v10576_v18  ;;  %v10579_v22 = vld [vmem:[%s9332_s25 + $0xb4] sm:$0xff]  }
 0x1b3   : > { %v2278_v26 = vsel %vm707_vm3, %v2273_v31, %v2277_v21  ;;  %5692 = vmatmul.mubr.bf16.gmra.mrb[120].mxu1 %v3795_v45  ;;  %v2280_v31 = vshrl.u32 %v10560_v33, 16  ;;  %12092 = vst [vmem:[#allocation27_spill] sm:$0xff] %v10579_v22  ;;  %1640 = vst.msk [vmem:[#allocation2 + $0x780] sm:$0xff] %vm497_vm0, %v10576_v18 }
 0x1b4   : > { %12087 = vst [vmem:[#allocation23_spill] sm:$0xff] %v10536_v44  ;;  %v7391_v50 = vpop.f32.mrb[16].mxu0  ;;  %v7439_v30 = vpop.f32.mrb[16].mxu1  ;;  %v1985_v16 = vor.u32 %v1984_v27, %v1980_v28  ;;  %2343 = vst.msk [vmem:[#allocation2 + $0x708] sm:$0xff] %vm497_vm0, %v2278_v26  ;;  %5699 = vmatprep.mubr.bf16.mxu1 %v3814_v51  ;;  %v3834_v51 = vld [vmem:[#allocation2 + $0x4c8] sm:$0xff] }
 0x1b5   : > { %v7392_v61 = vpop.f32.mrb[17].mxu0  ;;  %v7440_v62 = vpop.f32.mrb[17].mxu1  ;;  %2359 = vst.msk [vmem:[#allocation2 + $0x708] sm:$0xff] %vm514_vm1, %v12041_v15  ;;  %v8809_v28 = vld [vmem:[%s9332_s25 + $0x20] ss:$0 sps:$4 sm:$0x11]  }
 0x1b6   : > { %v10541_v14 = vadd.f32 %v7392_v61, %v7391_v50  ;;  %v7394_v44 = vpop.f32.mrb[18].mxu0  ;;  %v7441_v46 = vadd.f32 %v7440_v62, %v7439_v30  ;;  %v7442_v49 = vpop.f32.mrb[18].mxu1  ;;  %v1990_v60 = vsel %vm707_vm3, %v1985_v16, %v1989_v24  ;;  %v2463_v29 = vrot.slane %v8809_v28, 1  ;;  %v8696_v50 = vld [vmem:[#allocation8 + $0x330] sm:$0xff]   ;;  %v3813_v61 = vld [vmem:[#allocation2 + $0x420] sm:$0xff]  ;;  %1769 = vst.msk [vmem:[#allocation2 + $0x818] sm:$0xff] %vm497_vm0, %v10579_v22 }
 0x1b7   : > { %v7395_v11 = vpop.f32.mrb[19].mxu0  ;;  %v7443_v58 = vpop.f32.mrb[19].mxu1  ;;  %2055 = vst.msk [vmem:[#allocation2 + $0x700] sm:$0xff] %vm497_vm0, %v1990_v60  ;;  %v8810_v26 = vld [vmem:[%s9325_s5 + $0x20] ss:$0 sps:$4 sm:$0x11]   ;;  %8036 = vmatpush3.bf16.msra.mxu0 %v8696_v50 }
 0x1b8   : > { %v10544_v32 = vadd.f32 %v7395_v11, %v7394_v44  ;;  %v7444_v5 = vadd.f32 %v7443_v58, %v7442_v49  ;;  %v3815_v44 = vld [vmem:[#allocation2 + $0x430] sm:$0xff]  ;;  %v2367_v45 = vrot.slane %v8810_v26, 1  ;;  %v10555_v21 = vadd.f32 %v7441_v46, %v10458_v42  ;;  %2071 = vst.msk [vmem:[#allocation2 + $0x700] sm:$0xff] %vm514_vm1, %v12041_v15  ;;  %v8698_v24 = vld [vmem:[%s9332_s25 + $0xb0] ss:$0 sps:$4 sm:$0x11]  }
 0x1b9   : > { %v2464_v16 = vsel %vm1236_vm2, %v12089_v9, %v2463_v29  ;;  %v2287_v27 = vshll.u32 %v8698_v24, 16  ;;  %v8700_v49 = vld [vmem:[%s9325_s5 + $0xb0] ss:$0 sps:$4 sm:$0x11]   ;;  %5861 = vmatmul.mubr.bf16.gmra.mrb[124].mxu0 %v3815_v44  ;;  %v3832_v60 = vld [vmem:[#allocation2 + $0x4b8] sm:$0xff]  ;;  %v2284_v28 = vrot.slane %v2282_v38, 1 }
 0x1ba   : > { %12088 = vst [vmem:[#allocation24_spill] sm:$0xff] %v10555_v21  ;;  %v10567_v30 = vadd.f32 %v7444_v5, %v10458_v42  ;;  %2524 = vst.msk [vmem:[#allocation2 + $0xe8] sm:$0xff] %vm497_vm0, %v2464_v16  ;;  %v2368_v46 = vsel %vm1236_vm2, %v2366_v37, %v2367_v45  ;;  %v10596_v37 = vld [vmem:[%s9325_s5 + $0xb4] sm:$0xff]   ;;  %5868 = vmatprep.mubr.bf16.mxu0 %v3834_v51  ;;  %v1992_v44 = vshrl.u32 %v10576_v18, 16  ;;  %v1994_v45 = vshll.u32 %v10576_v18, 16 }
 0x1bb   : > { %2540 = vst.msk [vmem:[#allocation2 + $0xe8] sm:$0xff] %vm514_vm1, %v12041_v15  ;;  %v2289_v29 = vrot.slane %v2287_v27, 1  ;;  %12093 = vst [vmem:[#allocation28_spill] sm:$0xff] %v10596_v37  ;;  %v1999_v24 = vshll.u32 %v8700_v49, 16  ;;  %v2292_v9 = vshrl.u32 %v10579_v22, 16  ;;  %5700 = vmatmul.mubr.bf16.gmra.mrb[124].mxu1 %v3813_v61  ;;  %v2285_v51 = vor.u32 %v2284_v28, %v2280_v31  ;;  %v3831_v31 = vld [vmem:[#allocation2 + $0x4b0] sm:$0xff] }
 0x1bc   : > { %12090 = vst [vmem:[#allocation25_spill] sm:$0xff] %v10567_v30  ;;  %v7397_v10 = vpop.f32.mrb[20].mxu0  ;;  %2428 = vst.msk [vmem:[#allocation2 + $0xe0] sm:$0xff] %vm497_vm0, %v2368_v46  ;;  %v7445_v11 = vpop.f32.mrb[20].mxu1  ;;  %v2294_v38 = vshll.u32 %v10579_v22, 16  ;;  %5707 = vmatprep.mubr.bf16.mxu1 %v3832_v60  ;;  %v1996_v49 = vrot.slane %v1994_v45, 1 }
 0x1bd   : > { %v7398_v62 = vpop.f32.mrb[21].mxu0  ;;  %2444 = vst.msk [vmem:[#allocation2 + $0xe0] sm:$0xff] %vm514_vm1, %v12041_v15  ;;  %v7446_v50 = vpop.f32.mrb[21].mxu1  ;;  %1656 = vst.msk [vmem:[#allocation2 + $0x780] sm:$0xff] %vm514_vm1, %v12041_v15  ;;  %v2001_v30 = vrot.slane %v1999_v24, 1  ;;  %v2006_v60 = vshll.u32 %v10596_v37, 16 }
 0x1be   : > { %v10589_v58 = vadd.f32 %v7398_v62, %v7397_v10  ;;  %v7400_v5 = vpop.f32.mrb[22].mxu0  ;;  %1785 = vst.msk [vmem:[#allocation2 + $0x818] sm:$0xff] %vm514_vm1, %v12041_v15  ;;  %v7447_v16 = vadd.f32 %v7446_v50, %v7445_v11  ;;  %v7448_v46 = vpop.f32.mrb[22].mxu1  ;;  %v3833_v62 = vld [vmem:[#allocation2 + $0x4c0] sm:$0xff]  ;;  %v2290_v11 = vsel %vm707_vm3, %v2285_v51, %v2289_v29  ;;  %v2296_v50 = vrot.slane %v2294_v38, 1  ;;  %v3852_v24 = vld [vmem:[#allocation2 + $0x558] sm:$0xff] }
 0x1bf   : > { %v7401_v26 = vpop.f32.mrb[23].mxu0  ;;  %1641 = vst.msk [vmem:[#allocation2 + $0x810] sm:$0xff] %vm497_vm0, %v10596_v37  ;;  %v7449_v27 = vpop.f32.mrb[23].mxu1  ;;  %2344 = vst.msk [vmem:[#allocation2 + $0x798] sm:$0xff] %vm497_vm0, %v2290_v11  ;;  %v1997_v28 = vor.u32 %v1996_v49, %v1992_v44  ;;  %v8705_v51 = vld [vmem:[#allocation8 + $0x2f8] sm:$0xff]   ;;  %v2008_v49 = vrot.slane %v2006_v60, 1 }
 0x1c0   : > { %v10605_v10 = vadd.f32 %v7401_v26, %v7400_v5  ;;  %1657 = vst.msk [vmem:[#allocation2 + $0x810] sm:$0xff] %vm514_vm1, %v12041_v15  ;;  %v7450_v61 = vadd.f32 %v7449_v27, %v7448_v46  ;;  %v8702_v5 = vld [vmem:[%s9332_s25 + $0xbc] ss:$0 sps:$4 sm:$0x11]   ;;  %v2004_v26 = vshrl.u32 %v10596_v37, 16  ;;  %v10618_v45 = vadd.f32 %v7447_v16, %v10458_v42  ;;  %2360 = vst.msk [vmem:[#allocation2 + $0x798] sm:$0xff] %vm514_vm1, %v12041_v15 }
 0x1c1   : > { %v2297_v46 = vor.u32 %v2296_v50, %v2292_v9  ;;  %v2299_v27 = vshll.u32 %v8702_v5, 16  ;;  %v8704_v29 = vld [vmem:[%s9325_s5 + $0xbc] ss:$0 sps:$4 sm:$0x11]   ;;  %v2002_v44 = vsel %vm707_vm3, %v1997_v28, %v2001_v30  ;;  %5869 = vmatmul.mubr.bf16.gmra.mrb[128].mxu0 %v3833_v62  ;;  %v3850_v37 = vld [vmem:[#allocation2 + $0x548] sm:$0xff]  ;;  %7925 = vmatprep.subr.bf16.mxu1 %v8705_v51 }
 0x1c2   : > { %12094 = vst [vmem:[#allocation29_spill] sm:$0xff] %v10618_v45  ;;  %v10624_v38 = vadd.f32 %v7450_v61, %v10458_v42  ;;  %v8706_v11 = vld [vmem:[#allocation8 + $0x2b8] sm:$0xff]   ;;  %2056 = vst.msk [vmem:[#allocation2 + $0x790] sm:$0xff] %vm497_vm0, %v2002_v44  ;;  %v2011_v45 = vshll.u32 %v8704_v29, 16  ;;  %5876 = vmatprep.mubr.bf16.mxu0 %v3852_v24  ;;  %v2009_v61 = vor.u32 %v2008_v49, %v2004_v26  ;;  %v3851_v44 = vld [vmem:[#allocation2 + $0x550] sm:$0xff] }
 0x1c3   : > { %v2301_v16 = vrot.slane %v2299_v27, 1  ;;  %v8707_v22 = vld [vmem:[#allocation8 + $0x378] sm:$0xff]   ;;  %2072 = vst.msk [vmem:[#allocation2 + $0x790] sm:$0xff] %vm514_vm1, %v12041_v15  ;;  %7926 = vmatpush3.bf16.msra.mxu1 %v8706_v11  ;;  %v2465_v27 = vrot.slane %v10167_v52, 1 }
 0x1c4   : > { %12095 = vst [vmem:[#allocation30_spill] sm:$0xff] %v10624_v38  ;;  %v7403_v21 = vpop.f32.mrb[24].mxu0  ;;  %v7451_v9 = vpop.f32.mrb[24].mxu1  ;;  %5708 = vmatmul.mubr.bf16.gmra.mrb[128].mxu1 %v3831_v31  ;;  %v2013_v60 = vrot.slane %v2011_v45, 1  ;;  %8037 = vmatprep.subr.bf16.mxu0 %v8707_v22  ;;  %v8708_v52 = vld [vmem:[#allocation8 + $0x338] sm:$0xff]   ;;  %v3849_v45 = vld [vmem:[#allocation2 + $0x540] sm:$0xff] }
 0x1c5   : > { %v7404_v5 = vpop.f32.mrb[25].mxu0  ;;  %v7452_v62 = vpop.f32.mrb[25].mxu1  ;;  %v2302_v28 = vsel %vm707_vm3, %v2297_v46, %v2301_v16  ;;  %5715 = vmatprep.mubr.bf16.mxu1 %v3850_v37  ;;  %v3870_v46 = vld [vmem:[#allocation2 + $0x5e8] sm:$0xff]  ;;  %v8811_v49 = vld [vmem:[%s9332_s25 + $0x2c] ss:$0 sps:$4 sm:$0x11]   ;;  %8038 = vmatpush3.bf16.msra.mxu0 %v8708_v52 }
 0x1c6   : > { %v10630_v30 = vadd.f32 %v7404_v5, %v7403_v21  ;;  %v7406_v50 = vpop.f32.mrb[26].mxu0  ;;  %v7453_v29 = vadd.f32 %v7452_v62, %v7451_v9  ;;  %v7454_v24 = vpop.f32.mrb[26].mxu1  ;;  %2345 = vst.msk [vmem:[#allocation2 + $0x828] sm:$0xff] %vm497_vm0, %v2302_v28  ;;  %v2014_v22 = vsel %vm707_vm3, %v2009_v61, %v2013_v60  ;;  %v10642_v37 = vld [vmem:[%s9332_s25 + $0xc0] sm:$0xff]   ;;  %v2466_v11 = vrot.slane %v8811_v49, 1  ;;  %v10652_v5 = vld [vmem:[%s9325_s5 + $0xc0] sm:$0xff]  }
 0x1c7   : > { %v7407_v51 = vpop.f32.mrb[27].mxu0  ;;  %v7455_v31 = vpop.f32.mrb[27].mxu1  ;;  %2361 = vst.msk [vmem:[#allocation2 + $0x828] sm:$0xff] %vm514_vm1, %v12041_v15  ;;  %12096 = vst [vmem:[#allocation31_spill] sm:$0xff] %v10642_v37  ;;  %v2304_v61 = vshrl.u32 %v10642_v37, 16  ;;  %v2306_v62 = vshll.u32 %v10642_v37, 16 }
 0x1c8   : > { %v10635_v21 = vadd.f32 %v7407_v51, %v7406_v50  ;;  %v7456_v26 = vadd.f32 %v7455_v31, %v7454_v24  ;;  %2057 = vst.msk [vmem:[#allocation2 + $0x820] sm:$0xff] %vm497_vm0, %v2014_v22  ;;  %v10646_v16 = vadd.f32 %v7453_v29, %v10458_v42  ;;  %v8710_v9 = vld [vmem:[%s9332_s25 + $0xc8] ss:$0 sps:$4 sm:$0x11]   ;;  %12098 = vst [vmem:[#allocation33_spill] sm:$0xff] %v10652_v5  ;;  %v2016_v24 = vshrl.u32 %v10652_v5, 16 }
 0x1c9   : > { %2073 = vst.msk [vmem:[#allocation2 + $0x820] sm:$0xff] %vm514_vm1, %v12041_v15  ;;  %v2467_v50 = vsel %vm1236_vm2, %v2465_v27, %v2466_v11  ;;  %5877 = vmatmul.mubr.bf16.gmra.mrb[132].mxu0 %v3851_v44  ;;  %v3868_v60 = vld [vmem:[#allocation2 + $0x5d8] sm:$0xff]  ;;  %v2311_v29 = vshll.u32 %v8710_v9, 16  ;;  %v2018_v51 = vshll.u32 %v10652_v5, 16  ;;  %v2308_v27 = vrot.slane %v2306_v62, 1 }
 0x1ca   : > { %12097 = vst [vmem:[#allocation32_spill] sm:$0xff] %v10646_v16  ;;  %1770 = vst.msk [vmem:[#allocation2 + $0x8a8] sm:$0xff] %vm497_vm0, %v10642_v37  ;;  %v10660_v28 = vadd.f32 %v7456_v26, %v10458_v42  ;;  %5884 = vmatprep.mubr.bf16.mxu0 %v3870_v46  ;;  %v8712_v44 = vld [vmem:[%s9325_s5 + $0xc8] ss:$0 sps:$4 sm:$0x11]  }
 0x1cb   : > { %1786 = vst.msk [vmem:[#allocation2 + $0x8a8] sm:$0xff] %vm514_vm1, %v12041_v15  ;;  %v2313_v26 = vrot.slane %v2311_v29, 1  ;;  %v2020_v49 = vrot.slane %v2018_v51, 1  ;;  %v3869_v46 = vld [vmem:[#allocation2 + $0x5e0] sm:$0xff]  ;;  %v2309_v62 = vor.u32 %v2308_v27, %v2304_v61 }
 0x1cc   : > { %12099 = vst [vmem:[#allocation34_spill] sm:$0xff] %v10660_v28  ;;  %1642 = vst.msk [vmem:[#allocation2 + $0x8a0] sm:$0xff] %vm497_vm0, %v10652_v5  ;;  %v7409_v31 = vpop.f32.mrb[28].mxu0  ;;  %5716 = vmatmul.mubr.bf16.gmra.mrb[132].mxu1 %v3849_v45  ;;  %v7457_v22 = vpop.f32.mrb[28].mxu1  ;;  %v2023_v28 = vshll.u32 %v8712_v44, 16  ;;  %v10677_v45 = vld [vmem:[%s9332_s25 + $0x18] sm:$0xff]  }
 0x1cd   : > { %2525 = vst.msk [vmem:[#allocation2 + $0x178] sm:$0xff] %vm497_vm0, %v2467_v50  ;;  %v7410_v52 = vpop.f32.mrb[29].mxu0  ;;  %v7458_v9 = vpop.f32.mrb[29].mxu1  ;;  %5723 = vmatprep.mubr.bf16.mxu1 %v3868_v60  ;;  %v2021_v37 = vor.u32 %v2020_v49, %v2016_v24  ;;  %v10684_v60 = vld [vmem:[%s9325_s5 + $0x18] sm:$0xff]   ;;  %2881 = vst.msk [vmem:[#allocation2 + $0x68] sm:$0xff] %vm497_vm0, %v10677_v45  ;;  %v8715_v24 = vld [vmem:[#allocation8 + $0x3c0] sm:$0xff]  }
 0x1ce   : > { %1658 = vst.msk [vmem:[#allocation2 + $0x8a0] sm:$0xff] %vm514_vm1, %v12041_v15  ;;  %2541 = vst.msk [vmem:[#allocation2 + $0x178] sm:$0xff] %vm514_vm1, %v12041_v15  ;;  %v10674_v11 = vadd.f32 %v7410_v52, %v7409_v31  ;;  %v7412_v50 = vpop.f32.mrb[30].mxu0  ;;  %v7459_v16 = vadd.f32 %v7458_v9, %v7457_v22  ;;  %v7460_v38 = vpop.f32.mrb[30].mxu1  ;;  %v3888_v31 = vld [vmem:[#allocation2 + $0x678] sm:$0xff]  ;;  %v2314_v52 = vsel %vm707_vm3, %v2309_v62, %v2313_v26  ;;  %v2025_v18 = vrot.slane %v2023_v28, 1 }
 0x1cf   : > { %v7413_v5 = vpop.f32.mrb[31].mxu0  ;;  %v7461_v51 = vpop.f32.mrb[31].mxu1  ;;  %2346 = vst.msk [vmem:[#allocation2 + $0x8b8] sm:$0xff] %vm497_vm0, %v2314_v52  ;;  %v8812_v27 = vld [vmem:[%s9325_s5 + $0x2c] ss:$0 sps:$4 sm:$0x11]   ;;  %8135 = vmatprep.subr.bf16.mxu1 %v8715_v24 }
 0x1d0   : > { %v10680_v29 = vadd.f32 %v7413_v5, %v7412_v50  ;;  %v7462_v61 = vadd.f32 %v7461_v51, %v7460_v38  ;;  %v2370_v44 = vrot.slane %v8812_v27, 1  ;;  %v10691_v8 = vadd.f32 %v7459_v16, %v10458_v42  ;;  %v3867_v5 = vld [vmem:[#allocation2 + $0x5d0] sm:$0xff]  ;;  %2362 = vst.msk [vmem:[#allocation2 + $0x8b8] sm:$0xff] %vm514_vm1, %v12041_v15  ;;  %2897 = vst.msk [vmem:[#allocation2 + $0x68] sm:$0xff] %vm514_vm1, %v12041_v15  ;;  %v3886_v22 = vld [vmem:[#allocation2 + $0x668] sm:$0xff] }
 0x1d1   : > { %v2026_v28 = vsel %vm707_vm3, %v2021_v37, %v2025_v18  ;;  %2753 = vst.msk [vmem:[#allocation2 + $0x60] sm:$0xff] %vm497_vm0, %v10684_v60  ;;  %v2468_v38 = vrot.slane %v10200_v25, 1  ;;  %5885 = vmatmul.mubr.bf16.gmra.mrb[136].mxu0 %v3869_v46  ;;  %v8813_v37 = vld [vmem:[%s9332_s25 + $0x38] ss:$0 sps:$4 sm:$0x11]   ;;  %v2372_v26 = vrot.slane %v10211_v20, 1 }
 0x1d2   : > { %2058 = vst.msk [vmem:[#allocation2 + $0x8b0] sm:$0xff] %vm497_vm0, %v2026_v28  ;;  %v2371_v18 = vsel %vm1236_vm2, %v2369_v7, %v2370_v44  ;;  %v2469_v16 = vrot.slane %v8813_v37, 1  ;;  %v10708_v49 = vadd.f32 %v7462_v61, %v10458_v42  ;;  %5892 = vmatprep.mubr.bf16.mxu0 %v3888_v31  ;;  %v8717_v25 = vld [vmem:[#allocation8 + $0x440] sm:$0xff]   ;;  %v8814_v9 = vld [vmem:[%s9325_s5 + $0x38] ss:$0 sps:$4 sm:$0x11]   ;;  %v5163_v37 = vadd.f32 %v10376_v54, %v10458_v42 }
 0x1d3   : > { %2769 = vst.msk [vmem:[#allocation2 + $0x60] sm:$0xff] %vm514_vm1, %v12041_v15  ;;  %2074 = vst.msk [vmem:[#allocation2 + $0x8b0] sm:$0xff] %vm514_vm1, %v12041_v15  ;;  %v2373_v50 = vrot.slane %v8814_v9, 1  ;;  %v2471_v20 = vrot.slane %v10214_v19, 1  ;;  %8247 = vmatprep.subr.bf16.mxu0 %v8717_v25  ;;  %v10720_v31 = vld [vmem:[%s9332_s25 + $0x24] sm:$0xff]   ;;  %v10731_v28 = vld [vmem:[%s9325_s5 + $0x24] sm:$0xff]  }
 0x1d4   : > { %2429 = vst.msk [vmem:[#allocation2 + $0x170] sm:$0xff] %vm497_vm0, %v2371_v18  ;;  %5724 = vmatmul.mubr.bf16.gmra.mrb[136].mxu1 %v3867_v5  ;;  %v2470_v7 = vsel %vm1236_vm2, %v2468_v38, %v2469_v16  ;;  %v8815_v46 = vld [vmem:[%s9332_s25 + $0x44] ss:$0 sps:$4 sm:$0x11]   ;;  %v7591_v51 = vpop.f32.mrb[32].mxu0  ;;  %2882 = vst.msk [vmem:[#allocation2 + $0xf8] sm:$0xff] %vm497_vm0, %v10720_v31 }
 0x1d5   : > { %2445 = vst.msk [vmem:[#allocation2 + $0x170] sm:$0xff] %vm514_vm1, %v12041_v15  ;;  %v2472_v62 = vrot.slane %v8815_v46, 1  ;;  %5731 = vmatprep.mubr.bf16.mxu1 %v3886_v22  ;;  %v2374_v52 = vsel %vm1236_vm2, %v2372_v26, %v2373_v50  ;;  %v7592_v61 = vpop.f32.mrb[33].mxu0  ;;  %v3887_v5 = vld [vmem:[#allocation2 + $0x670] sm:$0xff]  ;;  %v3906_v18 = vld [vmem:[#allocation2 + $0x708] sm:$0xff]  ;;  %2898 = vst.msk [vmem:[#allocation2 + $0xf8] sm:$0xff] %vm514_vm1, %v12041_v15 }
 0x1d6   : > { %2526 = vst.msk [vmem:[#allocation2 + $0x208] sm:$0xff] %vm497_vm0, %v2470_v7  ;;  %2430 = vst.msk [vmem:[#allocation2 + $0x200] sm:$0xff] %vm497_vm0, %v2374_v52  ;;  %v7479_v24 = vpop.f32.mrb[32].mxu1  ;;  %v7593_v27 = vadd.f32 %v7592_v61, %v7591_v51  ;;  %v7594_v44 = vpop.f32.mrb[34].mxu0  ;;  %v3885_v9 = vld [vmem:[#allocation2 + $0x660] sm:$0xff]  ;;  %v2375_v7 = vrot.slane %v10233_v2, 1  ;;  %v5166_v61 = vadd.f32 %v10390_v57, %v10458_v42 }
 0x1d7   : > { %2542 = vst.msk [vmem:[#allocation2 + $0x208] sm:$0xff] %vm514_vm1, %v12041_v15  ;;  %v2473_v19 = vsel %vm1236_vm2, %v2471_v20, %v2472_v62  ;;  %2446 = vst.msk [vmem:[#allocation2 + $0x200] sm:$0xff] %vm514_vm1, %v12041_v15  ;;  %v7480_v38 = vpop.f32.mrb[33].mxu1  ;;  %v7595_v22 = vpop.f32.mrb[35].mxu0  ;;  %v10745_v50 = vld [vmem:[%s9332_s25 + $0x30] sm:$0xff]   ;;  %v10751_v62 = vld [vmem:[%s9325_s5 + $0x30] sm:$0xff]  }
 0x1d8   : > { %2527 = vst.msk [vmem:[#allocation2 + $0x298] sm:$0xff] %vm497_vm0, %v2473_v19  ;;  %v7481_v16 = vadd.f32 %v7480_v38, %v7479_v24  ;;  %v7482_v26 = vpop.f32.mrb[34].mxu1  ;;  %v7596_v25 = vadd.f32 %v7595_v22, %v7594_v44  ;;  %2754 = vst.msk [vmem:[#allocation2 + $0xf0] sm:$0xff] %vm497_vm0, %v10731_v28  ;;  %v3904_v46 = vld [vmem:[#allocation2 + $0x6f8] sm:$0xff]  ;;  %v2474_v2 = vrot.slane %v10255_v35, 1 }
 0x1d9   : > { %2543 = vst.msk [vmem:[#allocation2 + $0x298] sm:$0xff] %vm514_vm1, %v12041_v15  ;;  %v7483_v20 = vpop.f32.mrb[35].mxu1  ;;  %5893 = vmatmul.mubr.bf16.gmra.mrb[140].mxu0 %v3887_v5  ;;  %2770 = vst.msk [vmem:[#allocation2 + $0xf0] sm:$0xff] %vm514_vm1, %v12041_v15  ;;  %v8816_v54 = vld [vmem:[%s9325_s5 + $0x44] ss:$0 sps:$4 sm:$0x11]  }
 0x1da   : > { %v2376_v51 = vrot.slane %v8816_v54, 1  ;;  %v5324_v52 = vadd.f32 %v7481_v16, %v5163_v37  ;;  %v7484_v19 = vadd.f32 %v7483_v20, %v7482_v26  ;;  %5900 = vmatprep.mubr.bf16.mxu0 %v3906_v18  ;;  %2883 = vst.msk [vmem:[#allocation2 + $0x188] sm:$0xff] %vm497_vm0, %v10745_v50  ;;  %2755 = vst.msk [vmem:[#allocation2 + $0x180] sm:$0xff] %vm497_vm0, %v10751_v62  ;;  %v8817_v44 = vld [vmem:[%s9332_s25 + $0x50] ss:$0 sps:$4 sm:$0x11]  }
 0x1db   : > { %2899 = vst.msk [vmem:[#allocation2 + $0x188] sm:$0xff] %vm514_vm1, %v12041_v15  ;;  %v2475_v5 = vrot.slane %v8817_v44, 1  ;;  %2771 = vst.msk [vmem:[#allocation2 + $0x180] sm:$0xff] %vm514_vm1, %v12041_v15  ;;  %v2378_v20 = vrot.slane %v10260_v17, 1  ;;  %v2477_v17 = vrot.slane %v10279_v63, 1  ;;  %v10800_v63 = vld [vmem:[%s9332_s25 + $0x48] sm:$0xff]  }
 0x1dc   : > { %5732 = vmatmul.mubr.bf16.gmra.mrb[140].mxu1 %v3885_v9  ;;  %v2377_v24 = vsel %vm1236_vm2, %v2375_v7, %v2376_v51  ;;  %v10765_v38 = vadd.f32 %v7593_v27, %v5324_v52  ;;  %v5327_v57 = vadd.f32 %v7484_v19, %v5166_v61  ;;  %v7597_v22 = vpop.f32.mrb[36].mxu0  ;;  %v3905_v9 = vld [vmem:[#allocation2 + $0x700] sm:$0xff]  ;;  %v3924_v7 = vld [vmem:[#allocation2 + $0x798] sm:$0xff]  ;;  %v3903_v19 = vld [vmem:[#allocation2 + $0x6f0] sm:$0xff]  ;;  %2885 = vst.msk [vmem:[#allocation2 + $0x2a8] sm:$0xff] %vm497_vm0, %v10800_v63 }
 0x1dd   : > { %5739 = vmatprep.mubr.bf16.mxu1 %v3904_v46  ;;  %2431 = vst.msk [vmem:[#allocation2 + $0x290] sm:$0xff] %vm497_vm0, %v2377_v24  ;;  %v7598_v35 = vpop.f32.mrb[37].mxu0  ;;  %v2476_v18 = vsel %vm1236_vm2, %v2474_v2, %v2475_v5  ;;  %v5171_v46 = vadd.f32 %v10416_v43, %v10458_v42  ;;  %v3922_v2 = vld [vmem:[#allocation2 + $0x788] sm:$0xff]  ;;  %v5174_v43 = vadd.f32 %v10433_v6, %v10458_v42  ;;  %v2381_v6 = vrot.slane %v10282_v12, 1 }
 0x1de   : > { %2447 = vst.msk [vmem:[#allocation2 + $0x290] sm:$0xff] %vm514_vm1, %v12041_v15  ;;  %v10773_v37 = vadd.f32 %v7596_v25, %v5327_v57  ;;  %v7485_v16 = vpop.f32.mrb[36].mxu1  ;;  %v7599_v27 = vadd.f32 %v7598_v35, %v7597_v22  ;;  %v7600_v26 = vpop.f32.mrb[38].mxu0  ;;  %v10782_v24 = vld [vmem:[%s9332_s25 + $0x3c] sm:$0xff]   ;;  %v10789_v22 = vld [vmem:[%s9325_s5 + $0x3c] sm:$0xff]   ;;  %2901 = vst.msk [vmem:[#allocation2 + $0x2a8] sm:$0xff] %vm514_vm1, %v12041_v15 }
 0x1df   : > { %2528 = vst.msk [vmem:[#allocation2 + $0x328] sm:$0xff] %vm497_vm0, %v2476_v18  ;;  %v7486_v54 = vpop.f32.mrb[37].mxu1  ;;  %v7601_v51 = vpop.f32.mrb[39].mxu0  ;;  %v8818_v44 = vld [vmem:[%s9325_s5 + $0x50] ss:$0 sps:$4 sm:$0x11]  }
 0x1e0   : > { %2544 = vst.msk [vmem:[#allocation2 + $0x328] sm:$0xff] %vm514_vm1, %v12041_v15  ;;  %v7487_v25 = vadd.f32 %v7486_v54, %v7485_v16  ;;  %v7488_v52 = vpop.f32.mrb[38].mxu1  ;;  %v7602_v61 = vadd.f32 %v7601_v51, %v7600_v26  ;;  %v2379_v5 = vrot.slane %v8818_v44, 1  ;;  %v8819_v26 = vld [vmem:[%s9332_s25 + $0x5c] ss:$0 sps:$4 sm:$0x11]  }
 0x1e1   : > { %v7489_v57 = vpop.f32.mrb[39].mxu1  ;;  %5901 = vmatmul.mubr.bf16.gmra.mrb[144].mxu0 %v3905_v9  ;;  %2884 = vst.msk [vmem:[#allocation2 + $0x218] sm:$0xff] %vm497_vm0, %v10782_v24  ;;  %v2478_v54 = vrot.slane %v8819_v26, 1  ;;  %2756 = vst.msk [vmem:[#allocation2 + $0x210] sm:$0xff] %vm497_vm0, %v10789_v22  ;;  %v10815_v12 = vld [vmem:[%s9325_s5 + $0x48] sm:$0xff]  }
 0x1e2   : > { %v5332_v35 = vadd.f32 %v7487_v25, %v5171_v46  ;;  %v7490_v18 = vadd.f32 %v7489_v57, %v7488_v52  ;;  %5908 = vmatprep.mubr.bf16.mxu0 %v3924_v7  ;;  %v2380_v16 = vsel %vm1236_vm2, %v2378_v20, %v2379_v5  ;;  %2900 = vst.msk [vmem:[#allocation2 + $0x218] sm:$0xff] %vm514_vm1, %v12041_v15  ;;  %v8820_v42 = vld [vmem:[%s9325_s5 + $0x5c] ss:$0 sps:$4 sm:$0x11]   ;;  %2772 = vst.msk [vmem:[#allocation2 + $0x210] sm:$0xff] %vm514_vm1, %v12041_v15 }
 0x1e3   : > { %2432 = vst.msk [vmem:[#allocation2 + $0x320] sm:$0xff] %vm497_vm0, %v2380_v16  ;;  %v2382_v9 = vrot.slane %v8820_v42, 1  ;;  %v2479_v51 = vsel %vm1236_vm2, %v2477_v17, %v2478_v54  ;;  %v3923_v5 = vld [vmem:[#allocation2 + $0x790] sm:$0xff]  ;;  %2757 = vst.msk [vmem:[#allocation2 + $0x2a0] sm:$0xff] %vm497_vm0, %v10815_v12  ;;  %v3921_v54 = vld [vmem:[#allocation2 + $0x780] sm:$0xff] }
 0x1e4   : > { %5740 = vmatmul.mubr.bf16.gmra.mrb[144].mxu1 %v3903_v19  ;;  %v10805_v7 = vadd.f32 %v7599_v27, %v5332_v35  ;;  %v5335_v20 = vadd.f32 %v7490_v18, %v5174_v43  ;;  %v7603_v46 = vpop.f32.mrb[40].mxu0  ;;  %2448 = vst.msk [vmem:[#allocation2 + $0x320] sm:$0xff] %vm514_vm1, %v12041_v15  ;;  %v3942_v43 = vld [vmem:[#allocation2 + $0x828] sm:$0xff]  ;;  %2773 = vst.msk [vmem:[#allocation2 + $0x2a0] sm:$0xff] %vm514_vm1, %v12041_v15  ;;  %v3940_v42 = vld [vmem:[#allocation2 + $0x818] sm:$0xff] }
 0x1e5   : > { %5747 = vmatprep.mubr.bf16.mxu1 %v3922_v2  ;;  %v7604_v25 = vpop.f32.mrb[41].mxu0  ;;  %2529 = vst.msk [vmem:[#allocation2 + $0x3b8] sm:$0xff] %vm497_vm0, %v2479_v51  ;;  %v2383_v27 = vsel %vm1236_vm2, %v2381_v6, %v2382_v9  ;;  %v2480_v9 = vrot.slane %v10316_v13, 1  ;;  %v8822_v51 = vld [vmem:[%s9332_s25 + $0x68] ss:$0 sps:$4 sm:$0x11]  }
 0x1e6   : > { %v10819_v52 = vadd.f32 %v7602_v61, %v5335_v20  ;;  %v7491_v19 = vpop.f32.mrb[40].mxu1  ;;  %v7605_v2 = vadd.f32 %v7604_v25, %v7603_v46  ;;  %v7606_v44 = vpop.f32.mrb[42].mxu0  ;;  %2545 = vst.msk [vmem:[#allocation2 + $0x3b8] sm:$0xff] %vm514_vm1, %v12041_v15  ;;  %v10830_v61 = vld [vmem:[#allocation9] ss:$0 sm:$0xff]  ;;  %v2481_v25 = vrot.slane %v8822_v51, 1 }
 0x1e7   : > { %2433 = vst.msk [vmem:[#allocation2 + $0x3b0] sm:$0xff] %vm497_vm0, %v2383_v27  ;;  %v7492_v17 = vpop.f32.mrb[41].mxu1  ;;  %v7607_v57 = vpop.f32.mrb[43].mxu0  ;;  %v5179_v35 = vadd.f32 %v10830_v61, %v10447_v36  ;;  %v5182_v46 = vadd.f32 %v10830_v61, %v10455_v4  ;;  %v10841_v27 = vld [vmem:[%s9332_s25 + $0x54] sm:$0xff]   ;;  %v10849_v4 = vld [vmem:[%s9325_s5 + $0x54] sm:$0xff]  }
 0x1e8   : > { %2449 = vst.msk [vmem:[#allocation2 + $0x3b0] sm:$0xff] %vm514_vm1, %v12041_v15  ;;  %v7493_v18 = vadd.f32 %v7492_v17, %v7491_v19  ;;  %v7494_v16 = vpop.f32.mrb[42].mxu1  ;;  %v7608_v26 = vadd.f32 %v7607_v57, %v7606_v44  ;;  %v2384_v19 = vrot.slane %v10328_v48, 1  ;;  %v8823_v44 = vld [vmem:[%s9325_s5 + $0x68] ss:$0 sps:$4 sm:$0x11]  }
 0x1e9   : > { %v7495_v6 = vpop.f32.mrb[43].mxu1  ;;  %5909 = vmatmul.mubr.bf16.gmra.mrb[148].mxu0 %v3923_v5  ;;  %v2385_v5 = vrot.slane %v8823_v44, 1  ;;  %v2483_v17 = vrot.slane %v10345_v3, 1  ;;  %2886 = vst.msk [vmem:[#allocation2 + $0x338] sm:$0xff] %vm497_vm0, %v10841_v27  ;;  %2758 = vst.msk [vmem:[#allocation2 + $0x330] sm:$0xff] %vm497_vm0, %v10849_v4  ;;  %v10872_v51 = vld [vmem:[%s9325_s5 + $0x60] sm:$0xff]  }
 0x1ea   : > { %v5340_v20 = vadd.f32 %v7493_v18, %v5179_v35  ;;  %v7496_v36 = vadd.f32 %v7495_v6, %v7494_v16  ;;  %5916 = vmatprep.mubr.bf16.mxu0 %v3942_v43  ;;  %v2482_v43 = vsel %vm1236_vm2, %v2480_v9, %v2481_v25  ;;  %v8824_v16 = vld [vmem:[%s9332_s25 + $0x74] ss:$0 sps:$4 sm:$0x11]   ;;  %2902 = vst.msk [vmem:[#allocation2 + $0x338] sm:$0xff] %vm514_vm1, %v12041_v15  ;;  %v10864_v9 = vld [vmem:[%s9332_s25 + $0x60] sm:$0xff]   ;;  %2774 = vst.msk [vmem:[#allocation2 + $0x330] sm:$0xff] %vm514_vm1, %v12041_v15 }
 0x1eb   : > { %2530 = vst.msk [vmem:[#allocation2 + $0x448] sm:$0xff] %vm497_vm0, %v2482_v43  ;;  %v2386_v48 = vsel %vm1236_vm2, %v2384_v19, %v2385_v5  ;;  %v2484_v3 = vrot.slane %v8824_v16, 1  ;;  %v5187_v19 = vadd.f32 %v10830_v61, %v10500_v41  ;;  %2887 = vst.msk [vmem:[#allocation2 + $0x3c8] sm:$0xff] %vm497_vm0, %v10864_v9  ;;  %v2387_v16 = vrot.slane %v10351_v59, 1  ;;  %v3959_v59 = vld [vmem:[#allocation2 + $0x8b0] sm:$0xff] }
 0x1ec   : > { %5748 = vmatmul.mubr.bf16.gmra.mrb[148].mxu1 %v3921_v54  ;;  %v10846_v13 = vadd.f32 %v7605_v2, %v5340_v20  ;;  %v5343_v57 = vadd.f32 %v7496_v36, %v5182_v46  ;;  %v7609_v35 = vpop.f32.mrb[44].mxu0  ;;  %v3941_v20 = vld [vmem:[#allocation2 + $0x820] sm:$0xff]  ;;  %2546 = vst.msk [vmem:[#allocation2 + $0x448] sm:$0xff] %vm514_vm1, %v12041_v15  ;;  %v3960_v36 = vld [vmem:[#allocation2 + $0x8b8] sm:$0xff]  ;;  %2903 = vst.msk [vmem:[#allocation2 + $0x3c8] sm:$0xff] %vm514_vm1, %v12041_v15 }
 0x1ed   : > { %5755 = vmatprep.mubr.bf16.mxu1 %v3940_v42  ;;  %v7610_v18 = vpop.f32.mrb[45].mxu0  ;;  %2434 = vst.msk [vmem:[#allocation2 + $0x440] sm:$0xff] %vm497_vm0, %v2386_v48  ;;  %v2485_v25 = vsel %vm1236_vm2, %v2483_v17, %v2484_v3  ;;  %2759 = vst.msk [vmem:[#allocation2 + $0x3c0] sm:$0xff] %vm497_vm0, %v10872_v51  ;;  %v5190_v17 = vadd.f32 %v10830_v61, %v10510_v1  ;;  %v8825_v1 = vld [vmem:[%s9325_s5 + $0x74] ss:$0 sps:$4 sm:$0x11]  }
 0x1ee   : > { %12100 = vst [vmem:[#allocation35_spill] sm:$0xff] %v10846_v13  ;;  %v10857_v2 = vadd.f32 %v7608_v26, %v5343_v57  ;;  %v7497_v54 = vpop.f32.mrb[44].mxu1  ;;  %v7611_v6 = vadd.f32 %v7610_v18, %v7609_v35  ;;  %v7612_v42 = vpop.f32.mrb[46].mxu0  ;;  %2450 = vst.msk [vmem:[#allocation2 + $0x440] sm:$0xff] %vm514_vm1, %v12041_v15  ;;  %v3939_v35 = vld [vmem:[#allocation2 + $0x810] sm:$0xff]  ;;  %v3958_v18 = vld [vmem:[#allocation2 + $0x8a8] sm:$0xff] }
 0x1ef   : > { %v7498_v46 = vpop.f32.mrb[45].mxu1  ;;  %v7613_v26 = vpop.f32.mrb[47].mxu0  ;;  %2531 = vst.msk [vmem:[#allocation2 + $0x4d8] sm:$0xff] %vm497_vm0, %v2485_v25  ;;  %v2388_v25 = vrot.slane %v8825_v1, 1 }
 0x1f0   : > { %12101 = vst [vmem:[#allocation36_spill] sm:$0xff] %v10857_v2  ;;  %v7499_v44 = vadd.f32 %v7498_v46, %v7497_v54  ;;  %v7500_v5 = vpop.f32.mrb[46].mxu1  ;;  %v7614_v57 = vadd.f32 %v7613_v26, %v7612_v42  ;;  %2547 = vst.msk [vmem:[#allocation2 + $0x4d8] sm:$0xff] %vm514_vm1, %v12041_v15  ;;  %v3694_v46 = vld [vmem:[#allocation2 + $0x68] sm:$0xff]  ;;  %v10896_v26 = vld [vmem:[%s9332_s25 + $0x6c] sm:$0xff]  }
 0x1f1   : > { %v7501_v43 = vpop.f32.mrb[47].mxu1  ;;  %5917 = vmatmul.mubr.bf16.gmra.mrb[152].mxu0 %v3941_v20  ;;  %2775 = vst.msk [vmem:[#allocation2 + $0x3c0] sm:$0xff] %vm514_vm1, %v12041_v15 }
 0x1f2   : > { %v5348_v41 = vadd.f32 %v7499_v44, %v5187_v19  ;;  %v7502_v48 = vadd.f32 %v7501_v43, %v7500_v5  ;;  %5924 = vmatprep.mubr.bf16.mxu0 %v3960_v36  ;;  %2888 = vst.msk [vmem:[#allocation2 + $0x458] sm:$0xff] %vm497_vm0, %v10896_v26 }
 0x1f3   : > { %2904 = vst.msk [vmem:[#allocation2 + $0x458] sm:$0xff] %vm514_vm1, %v12041_v15 }
 0x1f4   : > { %5756 = vmatmul.mubr.bf16.gmra.mrb[152].mxu1 %v3939_v35  ;;  %v10893_v3 = vadd.f32 %v7611_v6, %v5348_v41  ;;  %v5351_v54 = vadd.f32 %v7502_v48, %v5190_v17  ;;  %v7615_v42 = vpop.f32.mrb[48].mxu0  ;;  %v2486_v6 = vrot.slane %v10384_v0, 1  ;;  %v10908_v41 = vld [vmem:[%s9332_s25 + $0x78] sm:$0xff]   ;;  %v2389_v17 = vsel %vm1236_vm2, %v2387_v16, %v2388_v25  ;;  %v8826_v0 = vld [vmem:[%s9332_s25 + $0x80] ss:$0 sps:$4 sm:$0x11]  }
 0x1f5   : > { %5763 = vmatprep.mubr.bf16.mxu1 %v3958_v18  ;;  %v7616_v20 = vpop.f32.mrb[49].mxu0  ;;  %v10905_v18 = vld [vmem:[%s9325_s5 + $0x6c] sm:$0xff]   ;;  %2435 = vst.msk [vmem:[#allocation2 + $0x4d0] sm:$0xff] %vm497_vm0, %v2389_v17  ;;  %v2487_v1 = vrot.slane %v8826_v0, 1  ;;  %v3692_v16 = vld [vmem:[#allocation2 + $0x58] sm:$0xff]  ;;  %2889 = vst.msk [vmem:[#allocation2 + $0x4e8] sm:$0xff] %vm497_vm0, %v10908_v41 }
 0x1f6   : > { %12102 = vst [vmem:[#allocation37_spill] sm:$0xff] %v10893_v3  ;;  %v10899_v36 = vadd.f32 %v7614_v57, %v5351_v54  ;;  %v7503_v19 = vpop.f32.mrb[48].mxu1  ;;  %v7617_v44 = vadd.f32 %v7616_v20, %v7615_v42  ;;  %v7618_v5 = vpop.f32.mrb[50].mxu0  ;;  %v5195_v57 = vadd.f32 %v10830_v61, %v10541_v14  ;;  %v3957_v20 = vld [vmem:[#allocation2 + $0x8a0] sm:$0xff]  ;;  %2760 = vst.msk [vmem:[#allocation2 + $0x450] sm:$0xff] %vm497_vm0, %v10905_v18 }
 0x1f7   : > { %v7504_v35 = vpop.f32.mrb[49].mxu1  ;;  %v7619_v43 = vpop.f32.mrb[51].mxu0  ;;  %2451 = vst.msk [vmem:[#allocation2 + $0x4d0] sm:$0xff] %vm514_vm1, %v12041_v15  ;;  %2776 = vst.msk [vmem:[#allocation2 + $0x450] sm:$0xff] %vm514_vm1, %v12041_v15  ;;  %v8718_v0 = vld [vmem:[#allocation8 + $0x400] sm:$0xff]  }
 0x1f8   : > { %12103 = vst [vmem:[#allocation38_spill] sm:$0xff] %v10899_v36  ;;  %v7505_v48 = vadd.f32 %v7504_v35, %v7503_v19  ;;  %v7506_v54 = vpop.f32.mrb[50].mxu1  ;;  %v7620_v42 = vadd.f32 %v7619_v43, %v7618_v5  ;;  %v5198_v36 = vadd.f32 %v10830_v61, %v10544_v32  ;;  %2905 = vst.msk [vmem:[#allocation2 + $0x4e8] sm:$0xff] %vm514_vm1, %v12041_v15  ;;  %v10930_v32 = vld [vmem:[%s9325_s5 + $0x78] sm:$0xff]   ;;  %v2390_v5 = vrot.slane %v10388_v47, 1 }
 0x1f9   : > { %v7507_v3 = vpop.f32.mrb[51].mxu1  ;;  %5925 = vmatmul.mubr.bf16.gmra.mrb[156].mxu0 %v3959_v59  ;;  %v2488_v19 = vsel %vm1236_vm2, %v2486_v6, %v2487_v1  ;;  %v8827_v59 = vld [vmem:[%s9325_s5 + $0x80] ss:$0 sps:$4 sm:$0x11]   ;;  %2761 = vst.msk [vmem:[#allocation2 + $0x4e0] sm:$0xff] %vm497_vm0, %v10930_v32 }
 0x1fa   : > { %v5356_v14 = vadd.f32 %v7505_v48, %v5195_v57  ;;  %v7508_v25 = vadd.f32 %v7507_v3, %v7506_v54  ;;  %6126 = vmatprep.mubr.bf16.mxu0 %v3694_v46  ;;  %2532 = vst.msk [vmem:[#allocation2 + $0x568] sm:$0xff] %vm497_vm0, %v2488_v19  ;;  %v2391_v35 = vrot.slane %v8827_v59, 1  ;;  %v3693_v54 = vld [vmem:[#allocation2 + $0x60] sm:$0xff] }
 0x1fb   : > { %2548 = vst.msk [vmem:[#allocation2 + $0x568] sm:$0xff] %vm514_vm1, %v12041_v15  ;;  %2777 = vst.msk [vmem:[#allocation2 + $0x4e0] sm:$0xff] %vm514_vm1, %v12041_v15 }
 0x1fc   : > { %5764 = vmatmul.mubr.bf16.gmra.mrb[156].mxu1 %v3957_v20  ;;  %v10936_v43 = vadd.f32 %v7617_v44, %v5356_v14  ;;  %v5359_v3 = vadd.f32 %v7508_v25, %v5198_v36  ;;  %v7621_v46 = vpop.f32.mrb[52].mxu0  ;;  %v2392_v47 = vsel %vm1236_vm2, %v2390_v5, %v2391_v35  ;;  %v3691_v36 = vld [vmem:[#allocation2 + $0x50] sm:$0xff]  ;;  %v8716_v20 = vld [vmem:[#allocation8 + $0x380] sm:$0xff]   ;;  %v3712_v14 = vld [vmem:[#allocation2 + $0xf8] sm:$0xff] }
 0x1fd   : > { %5965 = vmatprep.mubr.bf16.mxu1 %v3692_v16  ;;  %v7622_v17 = vpop.f32.mrb[53].mxu0  ;;  %2436 = vst.msk [vmem:[#allocation2 + $0x560] sm:$0xff] %vm497_vm0, %v2392_v47  ;;  %v8725_v25 = vld [vmem:[#allocation8 + $0x448] sm:$0xff]  }
 0x1fe   : > { %12104 = vst [vmem:[#allocation39_spill] sm:$0xff] %v10936_v43  ;;  %v10945_v6 = vadd.f32 %v7620_v42, %v5359_v3  ;;  %v7509_v57 = vpop.f32.mrb[52].mxu1  ;;  %v7623_v44 = vadd.f32 %v7622_v17, %v7621_v46  ;;  %v7624_v48 = vpop.f32.mrb[54].mxu0  ;;  %2452 = vst.msk [vmem:[#allocation2 + $0x560] sm:$0xff] %vm514_vm1, %v12041_v15  ;;  %v5203_v42 = vadd.f32 %v10830_v61, %v10589_v58  ;;  %v3710_v35 = vld [vmem:[#allocation2 + $0xe8] sm:$0xff] }
 0x1ff   : > { %v7510_v1 = vpop.f32.mrb[53].mxu1  ;;  %v7625_v16 = vpop.f32.mrb[55].mxu0  ;;  %v8723_v46 = vld [vmem:[#allocation8 + $0x3c8] sm:$0xff]   ;;  %v8828_v43 = vld [vmem:[%s9332_s25 + $0x8c] ss:$0 sps:$4 sm:$0x11]   ;;  %v5206_v58 = vadd.f32 %v10830_v61, %v10605_v10 }
 0x200   : > { %12105 = vst [vmem:[#allocation40_spill] sm:$0xff] %v10945_v6  ;;  %v7511_v19 = vadd.f32 %v7510_v1, %v7509_v57  ;;  %v7512_v5 = vpop.f32.mrb[54].mxu1  ;;  %v7626_v59 = vadd.f32 %v7625_v16, %v7624_v48  ;;  %v8726_v17 = vld [vmem:[#allocation8 + $0x408] sm:$0xff]   ;;  %v2489_v6 = vrot.slane %v10411_v55, 1  ;;  %v2490_v2 = vrot.slane %v8828_v43, 1  ;;  %v8733_v1 = vld [vmem:[#allocation8 + $0x450] sm:$0xff]  }
 0x201   : > { %v7513_v3 = vpop.f32.mrb[55].mxu1  ;;  %6127 = vmatmul.mubr.bf16.vlgmr.msra.gmra.mrb[160].mxu0 %v3693_v54  ;;  %v10953_v47 = vld [vmem:[%s9332_s25 + $0x84] sm:$0xff]   ;;  %v10960_v48 = vld [vmem:[%s9325_s5 + $0x84] sm:$0xff]   ;;  %v2393_v54 = vrot.slane %v10414_v23, 1 }
 0x202   : > { %v5364_v13 = vadd.f32 %v7511_v19, %v5203_v42  ;;  %v7514_v57 = vadd.f32 %v7513_v3, %v7512_v5  ;;  %8248 = vmatpush3.bf16.msra.mxu0 %v8718_v0  ;;  %6134 = vmatprep.mubr.bf16.mxu0 %v3712_v14  ;;  %2890 = vst.msk [vmem:[#allocation2 + $0x578] sm:$0xff] %vm497_vm0, %v10953_v47  ;;  %v8829_v43 = vld [vmem:[%s9325_s5 + $0x8c] ss:$0 sps:$4 sm:$0x11]   ;;  %2762 = vst.msk [vmem:[#allocation2 + $0x570] sm:$0xff] %vm497_vm0, %v10960_v48  ;;  %v10975_v23 = vld [vmem:[%s9332_s25 + $0x90] sm:$0xff]  }
 0x203   : > { %8249 = vmatprep.subr.bf16.mxu0 %v8725_v25  ;;  %v2491_v55 = vsel %vm1236_vm2, %v2489_v6, %v2490_v2  ;;  %v2394_v16 = vrot.slane %v8829_v43, 1  ;;  %v8724_v42 = vld [vmem:[#allocation8 + $0x388] sm:$0xff]   ;;  %2906 = vst.msk [vmem:[#allocation2 + $0x578] sm:$0xff] %vm514_vm1, %v12041_v15  ;;  %12107 = vst [vmem:[#allocation42_spill] sm:$0xff] %v10975_v23  ;;  %v3709_v5 = vld [vmem:[#allocation2 + $0xe0] sm:$0xff] }
 0x204   : > { %5966 = vmatmul.mubr.bf16.vlgmr.msra.gmra.mrb[160].mxu1 %v3691_v36  ;;  %v10967_v10 = vadd.f32 %v7623_v44, %v5364_v13  ;;  %v5367_v0 = vadd.f32 %v7514_v57, %v5206_v58  ;;  %v7627_v14 = vpop.f32.mrb[56].mxu0  ;;  %2533 = vst.msk [vmem:[#allocation2 + $0x5f8] sm:$0xff] %vm497_vm0, %v2491_v55  ;;  %v10978_v2 = vld [vmem:[%s9325_s5 + $0x90] sm:$0xff]   ;;  %2891 = vst.msk [vmem:[#allocation2 + $0x608] sm:$0xff] %vm497_vm0, %v10975_v23  ;;  %v3728_v57 = vld [vmem:[#allocation2 + $0x178] sm:$0xff] }
 0x205   : > { %8136 = vmatpush3.bf16.msra.mxu1 %v8716_v20  ;;  %5973 = vmatprep.mubr.bf16.mxu1 %v3710_v35  ;;  %v7628_v6 = vpop.f32.mrb[57].mxu0  ;;  %v8731_v13 = vld [vmem:[#allocation8 + $0x3d0] sm:$0xff]   ;;  %2778 = vst.msk [vmem:[#allocation2 + $0x570] sm:$0xff] %vm514_vm1, %v12041_v15  ;;  %2549 = vst.msk [vmem:[#allocation2 + $0x5f8] sm:$0xff] %vm514_vm1, %v12041_v15  ;;  %v2395_v44 = vsel %vm1236_vm2, %v2393_v54, %v2394_v16  ;;  %v8741_v54 = vld [vmem:[#allocation8 + $0x458] sm:$0xff]  }
 0x206   : > { %12106 = vst [vmem:[#allocation41_spill] sm:$0xff] %v10967_v10  ;;  %8137 = vmatprep.subr.bf16.mxu1 %v8723_v46  ;;  %v10985_v36 = vadd.f32 %v7626_v59, %v5367_v0  ;;  %v7515_v20 = vpop.f32.mrb[56].mxu1  ;;  %v7629_v25 = vadd.f32 %v7628_v6, %v7627_v14  ;;  %v7630_v19 = vpop.f32.mrb[58].mxu0  ;;  %v3711_v35 = vld [vmem:[#allocation2 + $0xf0] sm:$0xff]  ;;  %8250 = vmatpush3.bf16.msra.mxu0 %v8726_v17  ;;  %2437 = vst.msk [vmem:[#allocation2 + $0x5f0] sm:$0xff] %vm497_vm0, %v2395_v44  ;;  %v3730_v59 = vld [vmem:[#allocation2 + $0x188] sm:$0xff] }
 0x207   : > { %v8734_v3 = vld [vmem:[#allocation8 + $0x410] sm:$0xff]   ;;  %2763 = vst.msk [vmem:[#allocation2 + $0x600] sm:$0xff] %vm497_vm0, %v10978_v2  ;;  %v7516_v46 = vpop.f32.mrb[57].mxu1  ;;  %v7631_v58 = vpop.f32.mrb[59].mxu0  ;;  %8251 = vmatprep.subr.bf16.mxu0 %v8733_v1  ;;  %v5211_v17 = vadd.f32 %v10830_v61, %v10630_v30  ;;  %v8739_v1 = vld [vmem:[#allocation8 + $0x3d8] sm:$0xff]   ;;  %v5214_v44 = vadd.f32 %v10830_v61, %v10635_v21  ;;  %v2492_v30 = vrot.slane %v10453_v40, 1 }
 0x208   : > { %12108 = vst [vmem:[#allocation43_spill] sm:$0xff] %v10985_v36  ;;  %2907 = vst.msk [vmem:[#allocation2 + $0x608] sm:$0xff] %vm514_vm1, %v12041_v15  ;;  %v7517_v55 = vadd.f32 %v7516_v46, %v7515_v20  ;;  %v7518_v43 = vpop.f32.mrb[58].mxu1  ;;  %v7632_v16 = vadd.f32 %v7631_v58, %v7630_v19  ;;  %v8732_v0 = vld [vmem:[#allocation8 + $0x390] sm:$0xff]   ;;  %v8740_v10 = vld [vmem:[#allocation8 + $0x398] sm:$0xff]   ;;  %v3060_v40 = vshll.u32 %v10930_v32, 16 }
 0x209   : > { %2453 = vst.msk [vmem:[#allocation2 + $0x5f0] sm:$0xff] %vm514_vm1, %v12041_v15  ;;  %2779 = vst.msk [vmem:[#allocation2 + $0x600] sm:$0xff] %vm514_vm1, %v12041_v15  ;;  %8138 = vmatpush3.bf16.msra.mxu1 %v8724_v42  ;;  %v7519_v14 = vpop.f32.mrb[59].mxu1  ;;  %6135 = vmatmul.mubr.bf16.gmra.mrb[164].mxu0 %v3711_v35  ;;  %v8742_v23 = vld [vmem:[#allocation8 + $0x418] sm:$0xff]   ;;  %v8749_v20 = vld [vmem:[#allocation8 + $0x460] sm:$0xff]   ;;  %v2396_v35 = vrot.slane %v10471_v34, 1 }
 0x20a   : > { %8139 = vmatprep.subr.bf16.mxu1 %v8731_v13  ;;  %v5372_v6 = vadd.f32 %v7517_v55, %v5211_v17  ;;  %v7520_v36 = vadd.f32 %v7519_v14, %v7518_v43  ;;  %6142 = vmatprep.mubr.bf16.mxu0 %v3730_v59  ;;  %v8830_v19 = vld [vmem:[%s9332_s25 + $0x98] ss:$0 sps:$4 sm:$0x11]   ;;  %v3748_v55 = vld [vmem:[#allocation2 + $0x218] sm:$0xff]  ;;  %v11012_v14 = vld [vmem:[%s9332_s25 + $0x9c] sm:$0xff]  }
 0x20b   : > { %8252 = vmatpush3.bf16.msra.mxu0 %v8734_v3  ;;  %v2493_v13 = vrot.slane %v8830_v19, 1  ;;  %v3729_v3 = vld [vmem:[#allocation2 + $0x180] sm:$0xff]  ;;  %v8757_v19 = vld [vmem:[#allocation8 + $0x468] sm:$0xff]   ;;  %2892 = vst.msk [vmem:[#allocation2 + $0x698] sm:$0xff] %vm497_vm0, %v11012_v14 }
 0x20c   : > { %5974 = vmatmul.mubr.bf16.gmra.mrb[164].mxu1 %v3709_v5  ;;  %8253 = vmatprep.subr.bf16.mxu0 %v8741_v54  ;;  %v11006_v46 = vadd.f32 %v7629_v25, %v5372_v6  ;;  %v5375_v21 = vadd.f32 %v7520_v36, %v5214_v44  ;;  %v7633_v58 = vpop.f32.mrb[60].mxu0  ;;  %v8747_v59 = vld [vmem:[#allocation8 + $0x3e0] sm:$0xff]   ;;  %v8831_v5 = vld [vmem:[%s9325_s5 + $0x98] ss:$0 sps:$4 sm:$0x11]   ;;  %2908 = vst.msk [vmem:[#allocation2 + $0x698] sm:$0xff] %vm514_vm1, %v12041_v15 }
 0x20d   : > { %5981 = vmatprep.mubr.bf16.mxu1 %v3728_v57  ;;  %8140 = vmatpush3.bf16.msra.mxu1 %v8732_v0  ;;  %v2397_v54 = vrot.slane %v8831_v5, 1  ;;  %v7634_v17 = vpop.f32.mrb[61].mxu0  ;;  %v2494_v43 = vsel %vm1236_vm2, %v2492_v30, %v2493_v13  ;;  %v3727_v57 = vld [vmem:[#allocation2 + $0x170] sm:$0xff]  ;;  %v8748_v0 = vld [vmem:[#allocation8 + $0x3a0] sm:$0xff]   ;;  %v2495_v30 = vrot.slane %v10505_v53, 1  ;;  %v5219_v53 = vadd.f32 %v10830_v61, %v10674_v11 }
 0x20e   : > { %12109 = vst [vmem:[#allocation44_spill] sm:$0xff] %v11006_v46  ;;  %8141 = vmatprep.subr.bf16.mxu1 %v8739_v1  ;;  %v11014_v34 = vadd.f32 %v7632_v16, %v5375_v21  ;;  %v7521_v25 = vpop.f32.mrb[60].mxu1  ;;  %v7635_v36 = vadd.f32 %v7634_v17, %v7633_v58  ;;  %v7636_v6 = vpop.f32.mrb[62].mxu0  ;;  %v8750_v44 = vld [vmem:[#allocation8 + $0x420] sm:$0xff]   ;;  %2534 = vst.msk [vmem:[#allocation2 + $0x688] sm:$0xff] %vm497_vm0, %v2494_v43  ;;  %v3746_v16 = vld [vmem:[#allocation2 + $0x208] sm:$0xff]  ;;  %v5222_v43 = vadd.f32 %v10830_v61, %v10680_v29 }
 0x20f   : > { %8254 = vmatpush3.bf16.msra.mxu0 %v8742_v23  ;;  %v2398_v1 = vsel %vm1236_vm2, %v2396_v35, %v2397_v54  ;;  %v7522_v13 = vpop.f32.mrb[61].mxu1  ;;  %v7637_v5 = vpop.f32.mrb[63].mxu0  ;;  %2550 = vst.msk [vmem:[#allocation2 + $0x688] sm:$0xff] %vm514_vm1, %v12041_v15  ;;  %v11025_v23 = vld [vmem:[%s9325_s5 + $0x9c] sm:$0xff]   ;;  %v8758_v29 = vld [vmem:[#allocation8 + $0x428] sm:$0xff]   ;;  %v2399_v61 = vrot.slane %v10508_v39, 1 }
 0x210   : > { %12110 = vst [vmem:[#allocation45_spill] sm:$0xff] %v11014_v34  ;;  %8255 = vmatprep.subr.bf16.mxu0 %v8749_v20  ;;  %2438 = vst.msk [vmem:[#allocation2 + $0x680] sm:$0xff] %vm497_vm0, %v2398_v1  ;;  %v8832_v21 = vld [vmem:[%s9332_s25 + $0xa4] ss:$0 sps:$4 sm:$0x11]   ;;  %v7523_v35 = vadd.f32 %v7522_v13, %v7521_v25  ;;  %v7524_v54 = vpop.f32.mrb[62].mxu1  ;;  %v7638_v17 = vadd.f32 %v7637_v5, %v7636_v6 }
 0x211   : > { %v2496_v58 = vrot.slane %v8832_v21, 1  ;;  %8142 = vmatpush3.bf16.msra.mxu1 %v8740_v10  ;;  %2454 = vst.msk [vmem:[#allocation2 + $0x680] sm:$0xff] %vm514_vm1, %v12041_v15  ;;  %v11035_v20 = vld [vmem:[%s9332_s25 + $0xa8] sm:$0xff]   ;;  %v7525_v1 = vpop.f32.mrb[63].mxu1  ;;  %6143 = vmatmul.mubr.bf16.gmra.mrb[168].mxu0 %v3729_v3  ;;  %v3072_v10 = vshll.u32 %v10960_v48, 16  ;;  %v8755_v25 = vld [vmem:[#allocation8 + $0x3e8] sm:$0xff]  }
 0x212   : > { %8143 = vmatprep.subr.bf16.mxu1 %v8747_v59  ;;  %2764 = vst.msk [vmem:[#allocation2 + $0x690] sm:$0xff] %vm497_vm0, %v11025_v23  ;;  %v5380_v13 = vadd.f32 %v7523_v35, %v5219_v53  ;;  %v7526_v5 = vadd.f32 %v7525_v1, %v7524_v54  ;;  %6150 = vmatprep.mubr.bf16.mxu0 %v3748_v55  ;;  %2893 = vst.msk [vmem:[#allocation2 + $0x728] sm:$0xff] %vm497_vm0, %v11035_v20  ;;  %v8833_v3 = vld [vmem:[%s9325_s5 + $0xa4] ss:$0 sps:$4 sm:$0x11]   ;;  %v11052_v21 = vld [vmem:[%s9325_s5 + $0xa8] sm:$0xff]  }
 0x213   : > { %v2497_v6 = vsel %vm1236_vm2, %v2495_v30, %v2496_v58  ;;  %8256 = vmatpush3.bf16.msra.mxu0 %v8750_v44  ;;  %2780 = vst.msk [vmem:[#allocation2 + $0x690] sm:$0xff] %vm514_vm1, %v12041_v15  ;;  %v2400_v59 = vrot.slane %v8833_v3, 1  ;;  %v11054_v30 = vrot.slane %v3060_v40, 1  ;;  %2909 = vst.msk [vmem:[#allocation2 + $0x728] sm:$0xff] %vm514_vm1, %v12041_v15  ;;  %v3747_v53 = vld [vmem:[#allocation2 + $0x210] sm:$0xff]  ;;  %v8756_v35 = vld [vmem:[#allocation8 + $0x3a8] sm:$0xff]  }
 0x214   : > { %2535 = vst.msk [vmem:[#allocation2 + $0x718] sm:$0xff] %vm497_vm0, %v2497_v6  ;;  %5982 = vmatmul.mubr.bf16.gmra.mrb[168].mxu1 %v3727_v57  ;;  %8257 = vmatprep.subr.bf16.mxu0 %v8757_v19  ;;  %v11061_v44 = vadd.f32 %v7635_v36, %v5380_v13  ;;  %v5383_v58 = vadd.f32 %v7526_v5, %v5222_v43  ;;  %v7639_v39 = vpop.f32.mrb[64].mxu0  ;;  %2765 = vst.msk [vmem:[#allocation2 + $0x720] sm:$0xff] %vm497_vm0, %v11052_v21  ;;  %v3766_v19 = vld [vmem:[#allocation2 + $0x2a8] sm:$0xff]  ;;  %v8763_v36 = vld [vmem:[#allocation8 + $0x3f0] sm:$0xff]   ;;  %v11072_v5 = vrot.slane %v3072_v10, 1 }
 0x215   : > { %2551 = vst.msk [vmem:[#allocation2 + $0x718] sm:$0xff] %vm514_vm1, %v12041_v15  ;;  %5989 = vmatprep.mubr.bf16.mxu1 %v3746_v16  ;;  %8144 = vmatpush3.bf16.msra.mxu1 %v8748_v0  ;;  %v2401_v40 = vsel %vm1236_vm2, %v2399_v61, %v2400_v59  ;;  %v7640_v57 = vpop.f32.mrb[65].mxu0  ;;  %2781 = vst.msk [vmem:[#allocation2 + $0x720] sm:$0xff] %vm514_vm1, %v12041_v15  ;;  %v8765_v16 = vld [vmem:[#allocation8 + $0x470] sm:$0xff]   ;;  %v3745_v13 = vld [vmem:[#allocation2 + $0x200] sm:$0xff]  ;;  %v3096_v42 = vshll.u32 %v11025_v23, 16 }
 0x216   : > { %12111 = vst [vmem:[#allocation46_spill] sm:$0xff] %v11061_v44  ;;  %8145 = vmatprep.subr.bf16.mxu1 %v8755_v25  ;;  %2439 = vst.msk [vmem:[#allocation2 + $0x710] sm:$0xff] %vm497_vm0, %v2401_v40  ;;  %v11070_v43 = vadd.f32 %v7638_v17, %v5383_v58  ;;  %v7527_v0 = vpop.f32.mrb[64].mxu1  ;;  %v7641_v1 = vadd.f32 %v7640_v57, %v7639_v39  ;;  %v7642_v6 = vpop.f32.mrb[66].mxu0  ;;  %v8766_v25 = vld [vmem:[#allocation8 + $0x430] sm:$0xff]   ;;  %v3764_v59 = vld [vmem:[#allocation2 + $0x298] sm:$0xff] }
 0x217   : > { %8258 = vmatpush3.bf16.msra.mxu0 %v8758_v29  ;;  %2455 = vst.msk [vmem:[#allocation2 + $0x710] sm:$0xff] %vm514_vm1, %v12041_v15  ;;  %v7528_v61 = vpop.f32.mrb[65].mxu1  ;;  %v7643_v3 = vpop.f32.mrb[67].mxu0  ;;  %v3084_v17 = vshll.u32 %v10978_v2, 16  ;;  %v8764_v58 = vld [vmem:[#allocation8 + $0x3b0] sm:$0xff]   ;;  %v2498_v39 = vrot.slane %v10560_v33, 1 }
 0x218   : > { %12112 = vst [vmem:[#allocation47_spill] sm:$0xff] %v11070_v43  ;;  %8259 = vmatprep.subr.bf16.mxu0 %v8765_v16  ;;  %v7529_v10 = vadd.f32 %v7528_v61, %v7527_v0  ;;  %v7530_v57 = vpop.f32.mrb[66].mxu1  ;;  %v7644_v54 = vadd.f32 %v7643_v3, %v7642_v6  ;;  %v8834_v29 = vld [vmem:[%s9332_s25 + $0xb0] ss:$0 sps:$4 sm:$0x11]   ;;  %v11084_v16 = vld [vmem:[%s9332_s25 + $0xb4] sm:$0xff]  }
 0x219   : > { %8146 = vmatpush3.bf16.msra.mxu1 %v8756_v35  ;;  %v2499_v55 = vrot.slane %v8834_v29, 1  ;;  %v7531_v11 = vpop.f32.mrb[67].mxu1  ;;  %6151 = vmatmul.mubr.bf16.gmra.mrb[172].mxu0 %v3747_v53  ;;  %12113 = vst [vmem:[#allocation48_spill] sm:$0xff] %v11084_v16  ;;  %v12114_v0 = vld [vmem:[#allocation26_spill] sm:$0xff]  ;;  %2894 = vst.msk [vmem:[#allocation2 + $0x7b8] sm:$0xff] %vm497_vm0, %v11084_v16 }
 0x21a   : > { %8147 = vmatprep.subr.bf16.mxu1 %v8763_v36  ;;  %v5388_v40 = vadd.f32 %v7529_v10, %v10475_v56  ;;  %v7532_v43 = vadd.f32 %v7531_v11, %v7530_v57  ;;  %6158 = vmatprep.mubr.bf16.mxu0 %v3766_v19  ;;  %v2402_v35 = vrot.slane %v12114_v0, 1  ;;  %v8835_v6 = vld [vmem:[%s9325_s5 + $0xb0] ss:$0 sps:$4 sm:$0x11]   ;;  %v11090_v61 = vld [vmem:[%s9325_s5 + $0xb4] sm:$0xff]   ;;  %2910 = vst.msk [vmem:[#allocation2 + $0x7b8] sm:$0xff] %vm514_vm1, %v12041_v15 }
 0x21b   : > { %8260 = vmatpush3.bf16.msra.mxu0 %v8766_v25  ;;  %v2500_v33 = vsel %vm1236_vm2, %v2498_v39, %v2499_v55  ;;  %v2403_v53 = vrot.slane %v8835_v6, 1  ;;  %v12116_v56 = vld [vmem:[#allocation17_spill] sm:$0xff]  ;;  %2766 = vst.msk [vmem:[#allocation2 + $0x7b0] sm:$0xff] %vm497_vm0, %v11090_v61  ;;  %v3763_v6 = vld [vmem:[#allocation2 + $0x290] sm:$0xff] }
 0x21c   : > { %5990 = vmatmul.mubr.bf16.gmra.mrb[172].mxu1 %v3745_v13  ;;  %2536 = vst.msk [vmem:[#allocation2 + $0x7a8] sm:$0xff] %vm497_vm0, %v2500_v33  ;;  %v11092_v36 = vadd.f32 %v7641_v1, %v5388_v40  ;;  %v5391_v11 = vadd.f32 %v7532_v43, %v12116_v56  ;;  %v7645_v19 = vpop.f32.mrb[68].mxu0  ;;  %v3765_v55 = vld [vmem:[#allocation2 + $0x2a0] sm:$0xff]  ;;  %v12117_v13 = vld [vmem:[#allocation27_spill] sm:$0xff]  ;;  %v11101_v40 = vrot.slane %v3084_v17, 1  ;;  %v3108_v43 = vshll.u32 %v11052_v21, 16 }
 0x21d   : > { %5997 = vmatprep.mubr.bf16.mxu1 %v3764_v59  ;;  %8148 = vmatpush3.bf16.msra.mxu1 %v8764_v58  ;;  %2552 = vst.msk [vmem:[#allocation2 + $0x7a8] sm:$0xff] %vm514_vm1, %v12041_v15  ;;  %v2501_v25 = vrot.slane %v12117_v13, 1  ;;  %v8836_v3 = vld [vmem:[%s9332_s25 + $0xbc] ss:$0 sps:$4 sm:$0x11]   ;;  %v7646_v10 = vpop.f32.mrb[69].mxu0  ;;  %v2404_v58 = vsel %vm1236_vm2, %v2402_v35, %v2403_v53 }
 0x21e   : > { %12115 = vst [vmem:[#allocation26_spill] sm:$0xff] %v11092_v36  ;;  %v2502_v39 = vrot.slane %v8836_v3, 1  ;;  %v3784_v1 = vld [vmem:[#allocation2 + $0x338] sm:$0xff]  ;;  %v11111_v57 = vld [vmem:[%s9332_s25 + $0xc0] sm:$0xff]   ;;  %v11113_v29 = vadd.f32 %v7644_v54, %v5391_v11  ;;  %v7533_v33 = vpop.f32.mrb[68].mxu1  ;;  %v7647_v17 = vadd.f32 %v7646_v10, %v7645_v19  ;;  %v7648_v0 = vpop.f32.mrb[70].mxu0 }
 0x21f   : > { %12118 = vst [vmem:[#allocation17_spill] sm:$0xff] %v11111_v57  ;;  %2440 = vst.msk [vmem:[#allocation2 + $0x7a0] sm:$0xff] %vm497_vm0, %v2404_v58  ;;  %v12120_v35 = vld [vmem:[#allocation28_spill] sm:$0xff]  ;;  %v7534_v3 = vpop.f32.mrb[69].mxu1  ;;  %v7649_v59 = vpop.f32.mrb[71].mxu0  ;;  %v3782_v54 = vld [vmem:[#allocation2 + $0x328] sm:$0xff] }
 0x220   : > { %12119 = vst [vmem:[#allocation27_spill] sm:$0xff] %v11113_v29  ;;  %2782 = vst.msk [vmem:[#allocation2 + $0x7b0] sm:$0xff] %vm514_vm1, %v12041_v15  ;;  %v2503_v56 = vsel %vm1236_vm2, %v2501_v25, %v2502_v39  ;;  %v2405_v53 = vrot.slane %v12120_v35, 1  ;;  %v11121_v13 = vld [vmem:[%s9325_s5 + $0xc0] sm:$0xff]   ;;  %v7535_v25 = vadd.f32 %v7534_v3, %v7533_v33  ;;  %v7536_v39 = vpop.f32.mrb[70].mxu1  ;;  %v7650_v58 = vadd.f32 %v7649_v59, %v7648_v0  ;;  %v3802_v36 = vld [vmem:[#allocation2 + $0x3c8] sm:$0xff] }
 0x221   : > { %12121 = vst [vmem:[#allocation28_spill] sm:$0xff] %v11121_v13  ;;  %2456 = vst.msk [vmem:[#allocation2 + $0x7a0] sm:$0xff] %vm514_vm1, %v12041_v15  ;;  %v8837_v19 = vld [vmem:[%s9325_s5 + $0xbc] ss:$0 sps:$4 sm:$0x11]   ;;  %v11130_v35 = vrot.slane %v3096_v42, 1  ;;  %6159 = vmatmul.mubr.bf16.gmra.mrb[176].mxu0 %v3765_v55 }
 0x222   : > { %2537 = vst.msk [vmem:[#allocation2 + $0x838] sm:$0xff] %vm497_vm0, %v2503_v56  ;;  %2895 = vst.msk [vmem:[#allocation2 + $0x848] sm:$0xff] %vm497_vm0, %v11111_v57  ;;  %v2406_v10 = vrot.slane %v8837_v19, 1  ;;  %v8771_v56 = vld [vmem:[#allocation8 + $0x3f8] sm:$0xff]   ;;  %v7537_v11 = vpop.f32.mrb[71].mxu1  ;;  %v12122_v42 = vld [vmem:[#allocation18_spill] sm:$0xff]  ;;  %6166 = vmatprep.mubr.bf16.mxu0 %v3784_v1 }
 0x223   : > { %2553 = vst.msk [vmem:[#allocation2 + $0x838] sm:$0xff] %vm514_vm1, %v12041_v15  ;;  %2911 = vst.msk [vmem:[#allocation2 + $0x848] sm:$0xff] %vm514_vm1, %v12041_v15  ;;  %v5396_v0 = vadd.f32 %v7535_v25, %v12122_v42  ;;  %v7538_v3 = vadd.f32 %v7537_v11, %v7536_v39  ;;  %8149 = vmatprep.subr.bf16.mxu1 %v8771_v56  ;;  %v8772_v29 = vld [vmem:[#allocation8 + $0x3b8] sm:$0xff]   ;;  %v3120_v55 = vshll.u32 %v11090_v61, 16  ;;  %v3783_v39 = vld [vmem:[#allocation2 + $0x330] sm:$0xff]  ;;  %v11153_v42 = vrot.slane %v3108_v43, 1 }
 0x224   : > { %2767 = vst.msk [vmem:[#allocation2 + $0x840] sm:$0xff] %vm497_vm0, %v11121_v13  ;;  %v2407_v59 = vsel %vm1236_vm2, %v2405_v53, %v2406_v10  ;;  %5998 = vmatmul.mubr.bf16.gmra.mrb[176].mxu1 %v3763_v6  ;;  %v12123_v53 = vld [vmem:[#allocation31_spill] sm:$0xff]  ;;  %v7651_v1 = vpop.f32.mrb[72].mxu0 }
 0x225   : > { %2783 = vst.msk [vmem:[#allocation2 + $0x840] sm:$0xff] %vm514_vm1, %v12041_v15  ;;  %v2504_v10 = vrot.slane %v12123_v53, 1  ;;  %v11150_v33 = vadd.f32 %v7647_v17, %v5396_v0  ;;  %v12125_v25 = vld [vmem:[#allocation19_spill] sm:$0xff]  ;;  %6005 = vmatprep.mubr.bf16.mxu1 %v3782_v54  ;;  %8150 = vmatpush3.bf16.msra.mxu1 %v8772_v29  ;;  %v7652_v19 = vpop.f32.mrb[73].mxu0  ;;  %v3132_v53 = vshll.u32 %v11121_v13, 16  ;;  %v11165_v16 = vrot.slane %v3120_v55, 1 }
 0x226   : > { %2441 = vst.msk [vmem:[#allocation2 + $0x830] sm:$0xff] %vm497_vm0, %v2407_v59  ;;  %v5399_v11 = vadd.f32 %v7538_v3, %v12125_v25  ;;  %v8773_v56 = vld [vmem:[#allocation8 + $0x478] sm:$0xff]   ;;  %v7539_v3 = vpop.f32.mrb[72].mxu1  ;;  %v7653_v25 = vadd.f32 %v7652_v19, %v7651_v1  ;;  %v7654_v54 = vpop.f32.mrb[74].mxu0 }
 0x227   : > { %2457 = vst.msk [vmem:[#allocation2 + $0x830] sm:$0xff] %vm514_vm1, %v12041_v15  ;;  %12124 = vst [vmem:[#allocation18_spill] sm:$0xff] %v11150_v33  ;;  %v8838_v6 = vld [vmem:[%s9332_s25 + $0xc8] ss:$0 sps:$4 sm:$0x11]   ;;  %v3781_v33 = vld [vmem:[#allocation2 + $0x320] sm:$0xff]  ;;  %8261 = vmatprep.subr.bf16.mxu0 %v8773_v56 }
 0x228   : > { %v2505_v59 = vrot.slane %v8838_v6, 1  ;;  %v8774_v17 = vld [vmem:[#allocation8 + $0x438] sm:$0xff]   ;;  %v11158_v0 = vadd.f32 %v7650_v58, %v5399_v11  ;;  %v12128_v6 = vld [vmem:[#allocation33_spill] sm:$0xff]  ;;  %v7540_v46 = vpop.f32.mrb[73].mxu1  ;;  %v7655_v44 = vpop.f32.mrb[75].mxu0  ;;  %v2962_v58 = vshrl.u32 %v10684_v60, 16 }
 0x229   : > { %v11162_v29 = vld [vmem:[%s9332_s25 + $0xcc] sm:$0xff]   ;;  %v2408_v34 = vrot.slane %v12128_v6, 1  ;;  %12129 = vst [vmem:[#allocation33_spill] sm:$0xff] %v11165_v16  ;;  %8262 = vmatpush3.bf16.msra.mxu0 %v8774_v17  ;;  %v7541_v19 = vadd.f32 %v7540_v46, %v7539_v3  ;;  %v7542_v11 = vpop.f32.mrb[74].mxu1  ;;  %v7656_v1 = vadd.f32 %v7655_v44, %v7654_v54  ;;  %v11182_v54 = vrot.slane %v3132_v53, 1 }
 0x22a   : > { %12126 = vst [vmem:[#allocation31_spill] sm:$0xff] %v11158_v0  ;;  %v2506_v43 = vsel %vm1236_vm2, %v2504_v10, %v2505_v59  ;;  %12127 = vst [vmem:[#allocation19_spill] sm:$0xff] %v11162_v29  ;;  %v3800_v57 = vld [vmem:[#allocation2 + $0x3b8] sm:$0xff]  ;;  %v8839_v56 = vld [vmem:[%s9325_s5 + $0xc8] ss:$0 sps:$4 sm:$0x11]   ;;  %6167 = vmatmul.mubr.bf16.gmra.mrb[180].mxu0 %v3783_v39 }
 0x22b   : > { %2538 = vst.msk [vmem:[#allocation2 + $0x8c8] sm:$0xff] %vm497_vm0, %v2506_v43  ;;  %2896 = vst.msk [vmem:[#allocation2 + $0x8d8] sm:$0xff] %vm497_vm0, %v11162_v29  ;;  %v2409_v55 = vrot.slane %v8839_v56, 1  ;;  %v11176_v59 = vld [vmem:[%s9325_s5 + $0xcc] sm:$0xff]   ;;  %v7543_v6 = vpop.f32.mrb[75].mxu1  ;;  %v12131_v46 = vld [vmem:[#allocation20_spill] sm:$0xff]  ;;  %6174 = vmatprep.mubr.bf16.mxu0 %v3802_v36 }
 0x22c   : > { %2554 = vst.msk [vmem:[#allocation2 + $0x8c8] sm:$0xff] %vm514_vm1, %v12041_v15  ;;  %12130 = vst [vmem:[#allocation49_spill] sm:$0xff] %v11176_v59  ;;  %v5404_v44 = vadd.f32 %v7541_v19, %v12131_v46  ;;  %v7544_v3 = vadd.f32 %v7543_v6, %v7542_v11  ;;  %v8777_v56 = vld [vmem:[%s9332_s25 + $0x20] ss:$0 sps:$4 sm:$0x11]   ;;  %6006 = vmatmul.mubr.bf16.gmra.mrb[180].mxu1 %v3781_v33  ;;  %v3250_v19 = vshrl.u32 %v10677_v45, 16 }
 0x22d   : > { %2912 = vst.msk [vmem:[#allocation2 + $0x8d8] sm:$0xff] %vm514_vm1, %v12041_v15  ;;  %12132 = vst [vmem:[#allocation20_spill] sm:$0xff] %v11182_v54  ;;  %v2410_v43 = vsel %vm1236_vm2, %v2408_v34, %v2409_v55  ;;  %v3252_v36 = vshll.u32 %v10677_v45, 16  ;;  %v3585_v53 = vrot.slane %v10677_v45, 1  ;;  %v12134_v11 = vld [vmem:[#allocation21_spill] sm:$0xff]  ;;  %v7657_v6 = vpop.f32.mrb[76].mxu0  ;;  %6013 = vmatprep.mubr.bf16.mxu1 %v3800_v57 }
 0x22e   : > { %2768 = vst.msk [vmem:[#allocation2 + $0x8d0] sm:$0xff] %vm497_vm0, %v11176_v59  ;;  %2442 = vst.msk [vmem:[#allocation2 + $0x8c0] sm:$0xff] %vm497_vm0, %v2410_v43  ;;  %v11195_v34 = vadd.f32 %v7653_v25, %v5404_v44  ;;  %v5407_v55 = vadd.f32 %v7544_v3, %v12134_v11  ;;  %v3257_v33 = vshll.u32 %v8777_v56, 16  ;;  %v3586_v46 = vrot.slane %v8777_v56, 1  ;;  %v7658_v17 = vpop.f32.mrb[77].mxu0  ;;  %v7545_v44 = vpop.f32.mrb[76].mxu1 }
 0x22f   : > { %2784 = vst.msk [vmem:[#allocation2 + $0x8d0] sm:$0xff] %vm514_vm1, %v12041_v15  ;;  %2458 = vst.msk [vmem:[#allocation2 + $0x8c0] sm:$0xff] %vm514_vm1, %v12041_v15  ;;  %v8778_v43 = vld [vmem:[%s9325_s5 + $0x20] ss:$0 sps:$4 sm:$0x11]   ;;  %v3254_v10 = vrot.slane %v3252_v36, 1  ;;  %v7659_v3 = vadd.f32 %v7658_v17, %v7657_v6 }
 0x230   : > { %12133 = vst [vmem:[#allocation50_spill] sm:$0xff] %v11195_v34  ;;  %v2964_v45 = vshll.u32 %v10684_v60, 16  ;;  %v11204_v25 = vadd.f32 %v7656_v1, %v5407_v55  ;;  %v7660_v11 = vpop.f32.mrb[78].mxu0  ;;  %v3799_v57 = vld [vmem:[#allocation2 + $0x3b0] sm:$0xff]  ;;  %v3801_v34 = vld [vmem:[#allocation2 + $0x3c0] sm:$0xff]  ;;  %v3259_v0 = vrot.slane %v3257_v33, 1  ;;  %v3587_v56 = vsel %vm1236_vm2, %v3585_v53, %v3586_v46 }
 0x231   : > { %v7546_v29 = vpop.f32.mrb[77].mxu1  ;;  %v7661_v54 = vpop.f32.mrb[79].mxu0  ;;  %v3820_v13 = vld [vmem:[#allocation2 + $0x458] sm:$0xff]  ;;  %v3255_v39 = vor.u32 %v3254_v10, %v3250_v19  ;;  %3649 = vst.msk [vmem:[#allocation2 + $0x88] sm:$0xff] %vm497_vm0, %v3587_v56  ;;  %v2969_v16 = vshll.u32 %v8778_v43, 16  ;;  %v3489_v1 = vrot.slane %v10684_v60, 1 }
 0x232   : > { %12135 = vst [vmem:[#allocation21_spill] sm:$0xff] %v11204_v25  ;;  %v2966_v36 = vrot.slane %v2964_v45, 1  ;;  %v7547_v55 = vadd.f32 %v7546_v29, %v7545_v44  ;;  %v7548_v25 = vpop.f32.mrb[78].mxu1  ;;  %v7662_v17 = vadd.f32 %v7661_v54, %v7660_v11  ;;  %3665 = vst.msk [vmem:[#allocation2 + $0x88] sm:$0xff] %vm514_vm1, %v12041_v15  ;;  %v3490_v53 = vrot.slane %v8778_v43, 1  ;;  %6175 = vmatmul.mubr.bf16.gmra.mrb[184].mxu0 %v3801_v34  ;;  %v3818_v10 = vld [vmem:[#allocation2 + $0x448] sm:$0xff] }
 0x233   : > { %v8779_v33 = vld [vmem:[%s9332_s25 + $0x2c] ss:$0 sps:$4 sm:$0x11]   ;;  %v7549_v46 = vpop.f32.mrb[79].mxu1  ;;  %v3260_v19 = vsel %vm707_vm3, %v3255_v39, %v3259_v0  ;;  %v2971_v56 = vrot.slane %v2969_v16, 1  ;;  %v3262_v60 = vshrl.u32 %v10720_v31, 16  ;;  %6182 = vmatprep.mubr.bf16.mxu0 %v3820_v13 }
 0x234   : > { %v2967_v45 = vor.u32 %v2966_v36, %v2962_v58  ;;  %v12136_v29 = vld [vmem:[#allocation22_spill] sm:$0xff]  ;;  %v7550_v54 = vadd.f32 %v7549_v46, %v7548_v25  ;;  %3457 = vst.msk [vmem:[#allocation2 + $0x78] sm:$0xff] %vm497_vm0, %v3260_v19  ;;  %v3491_v11 = vsel %vm1236_vm2, %v3489_v1, %v3490_v53  ;;  %v3264_v43 = vshll.u32 %v10720_v31, 16  ;;  %6014 = vmatmul.mubr.bf16.gmra.mrb[184].mxu1 %v3799_v57  ;;  %v12138_v34 = vld [vmem:[#allocation23_spill] sm:$0xff]  ;;  %v7663_v36 = vpop.f32.mrb[80].mxu0 }
 0x235   : > { %v5412_v44 = vadd.f32 %v7547_v55, %v12136_v29  ;;  %v8780_v6 = vld [vmem:[%s9325_s5 + $0x2c] ss:$0 sps:$4 sm:$0x11]   ;;  %3473 = vst.msk [vmem:[#allocation2 + $0x78] sm:$0xff] %vm514_vm1, %v12041_v15  ;;  %v3269_v0 = vshll.u32 %v8779_v33, 16  ;;  %v3588_v58 = vrot.slane %v10720_v31, 1  ;;  %6021 = vmatprep.mubr.bf16.mxu1 %v3818_v10 }
 0x236   : > { %v2972_v16 = vsel %vm707_vm3, %v2967_v45, %v2971_v56  ;;  %3553 = vst.msk [vmem:[#allocation2 + $0x80] sm:$0xff] %vm497_vm0, %v3491_v11  ;;  %v3589_v13 = vrot.slane %v8779_v33, 1  ;;  %v5415_v25 = vadd.f32 %v7550_v54, %v12138_v34  ;;  %v3266_v57 = vrot.slane %v3264_v43, 1  ;;  %v8781_v55 = vld [vmem:[%s9332_s25 + $0x38] ss:$0 sps:$4 sm:$0x11]  }
 0x237   : > { %v11225_v39 = vadd.f32 %v7659_v3, %v5412_v44  ;;  %3169 = vst.msk [vmem:[#allocation2 + $0x70] sm:$0xff] %vm497_vm0, %v2972_v16  ;;  %v2974_v1 = vshrl.u32 %v10731_v28, 16  ;;  %v7664_v53 = vpop.f32.mrb[81].mxu0  ;;  %v3271_v31 = vrot.slane %v3269_v0, 1  ;;  %v2976_v33 = vshll.u32 %v10731_v28, 16  ;;  %v7551_v19 = vpop.f32.mrb[80].mxu1 }
 0x238   : > { %3569 = vst.msk [vmem:[#allocation2 + $0x80] sm:$0xff] %vm514_vm1, %v12041_v15  ;;  %3185 = vst.msk [vmem:[#allocation2 + $0x70] sm:$0xff] %vm514_vm1, %v12041_v15  ;;  %v3590_v3 = vsel %vm1236_vm2, %v3588_v58, %v3589_v13  ;;  %v2981_v46 = vshll.u32 %v8780_v6, 16  ;;  %v11237_v10 = vadd.f32 %v7662_v17, %v5415_v25  ;;  %v7665_v45 = vadd.f32 %v7664_v53, %v7663_v36  ;;  %v7666_v56 = vpop.f32.mrb[82].mxu0  ;;  %v3817_v29 = vld [vmem:[#allocation2 + $0x440] sm:$0xff]  ;;  %v3819_v44 = vld [vmem:[#allocation2 + $0x450] sm:$0xff] }
 0x239   : > { %12137 = vst [vmem:[#allocation22_spill] sm:$0xff] %v11225_v39  ;;  %v3838_v54 = vld [vmem:[#allocation2 + $0x4e8] sm:$0xff]  ;;  %v3267_v11 = vor.u32 %v3266_v57, %v3262_v60  ;;  %3650 = vst.msk [vmem:[#allocation2 + $0x118] sm:$0xff] %vm497_vm0, %v3590_v3  ;;  %v3492_v43 = vrot.slane %v10731_v28, 1  ;;  %v7552_v16 = vpop.f32.mrb[81].mxu1  ;;  %v7667_v0 = vpop.f32.mrb[83].mxu0 }
 0x23a   : > { %12139 = vst [vmem:[#allocation23_spill] sm:$0xff] %v11237_v10  ;;  %v3836_v34 = vld [vmem:[#allocation2 + $0x4d8] sm:$0xff]  ;;  %v12140_v58 = vshll.u32 %v11176_v59, 16  ;;  %3666 = vst.msk [vmem:[#allocation2 + $0x118] sm:$0xff] %vm514_vm1, %v12041_v15  ;;  %v2978_v17 = vrot.slane %v2976_v33, 1  ;;  %v2983_v25 = vrot.slane %v2981_v46, 1  ;;  %v7553_v53 = vadd.f32 %v7552_v16, %v7551_v19  ;;  %6183 = vmatmul.mubr.bf16.gmra.mrb[188].mxu0 %v3819_v44 }
 0x23b   : > { %v3493_v36 = vrot.slane %v8780_v6, 1  ;;  %v7554_v60 = vpop.f32.mrb[82].mxu1  ;;  %v7668_v57 = vadd.f32 %v7667_v0, %v7666_v56  ;;  %v3272_v3 = vsel %vm707_vm3, %v3267_v11, %v3271_v31  ;;  %v3274_v28 = vshrl.u32 %v10745_v50, 16  ;;  %v8782_v33 = vld [vmem:[%s9325_s5 + $0x38] ss:$0 sps:$4 sm:$0x11]   ;;  %6190 = vmatprep.mubr.bf16.mxu0 %v3838_v54 }
 0x23c   : > { %v11243_v13 = vrot.slane %v12140_v58, 1  ;;  %v7555_v10 = vpop.f32.mrb[83].mxu1  ;;  %3458 = vst.msk [vmem:[#allocation2 + $0x108] sm:$0xff] %vm497_vm0, %v3272_v3  ;;  %v2979_v58 = vor.u32 %v2978_v17, %v2974_v1  ;;  %v3281_v59 = vshll.u32 %v8781_v55, 16  ;;  %v12142_v46 = vld [vmem:[#allocation24_spill] sm:$0xff]  ;;  %v3591_v31 = vrot.slane %v10745_v50, 1  ;;  %6022 = vmatmul.mubr.bf16.gmra.mrb[188].mxu1 %v3817_v29 }
 0x23d   : > { %v3494_v39 = vsel %vm1236_vm2, %v3492_v43, %v3493_v36  ;;  %v5420_v6 = vadd.f32 %v7553_v53, %v12142_v46  ;;  %v7556_v19 = vadd.f32 %v7555_v10, %v7554_v60  ;;  %3474 = vst.msk [vmem:[#allocation2 + $0x108] sm:$0xff] %vm514_vm1, %v12041_v15  ;;  %v3592_v56 = vrot.slane %v8781_v55, 1  ;;  %v12143_v43 = vld [vmem:[#allocation25_spill] sm:$0xff]  ;;  %6029 = vmatprep.mubr.bf16.mxu1 %v3836_v34  ;;  %v8783_v29 = vld [vmem:[%s9332_s25 + $0x44] ss:$0 sps:$4 sm:$0x11]  }
 0x23e   : > { %12141 = vst [vmem:[#allocation51_spill] sm:$0xff] %v11243_v13  ;;  %v3276_v13 = vshll.u32 %v10745_v50, 16  ;;  %3554 = vst.msk [vmem:[#allocation2 + $0x110] sm:$0xff] %vm497_vm0, %v3494_v39  ;;  %v2984_v1 = vsel %vm707_vm3, %v2979_v58, %v2983_v25  ;;  %v3283_v11 = vrot.slane %v3281_v59, 1  ;;  %v2986_v10 = vshrl.u32 %v10751_v62, 16  ;;  %v7669_v39 = vpop.f32.mrb[84].mxu0 }
 0x23f   : > { %3570 = vst.msk [vmem:[#allocation2 + $0x110] sm:$0xff] %vm514_vm1, %v12041_v15  ;;  %v11262_v54 = vadd.f32 %v7665_v45, %v5420_v6  ;;  %v5423_v16 = vadd.f32 %v7556_v19, %v12143_v43  ;;  %v3593_v50 = vsel %vm1236_vm2, %v3591_v31, %v3592_v56  ;;  %v2988_v55 = vshll.u32 %v10751_v62, 16  ;;  %v7670_v0 = vpop.f32.mrb[85].mxu0  ;;  %v11274_v25 = vld [vmem:[%s9325_s5 + $0x44] ss:$0 sps:$4 sm:$0x11]  }
 0x240   : > { %v3278_v44 = vrot.slane %v3276_v13, 1  ;;  %3170 = vst.msk [vmem:[#allocation2 + $0x100] sm:$0xff] %vm497_vm0, %v2984_v1  ;;  %3651 = vst.msk [vmem:[#allocation2 + $0x1a8] sm:$0xff] %vm497_vm0, %v3593_v50  ;;  %v2993_v45 = vshll.u32 %v8782_v33, 16  ;;  %v3495_v13 = vrot.slane %v10751_v62, 1  ;;  %v3496_v17 = vrot.slane %v8782_v33, 1 }
 0x241   : > { %3186 = vst.msk [vmem:[#allocation2 + $0x100] sm:$0xff] %vm514_vm1, %v12041_v15  ;;  %v11276_v34 = vadd.f32 %v7668_v57, %v5423_v16  ;;  %v7557_v36 = vpop.f32.mrb[84].mxu1  ;;  %v7671_v53 = vadd.f32 %v7670_v0, %v7669_v39  ;;  %v7672_v60 = vpop.f32.mrb[86].mxu0  ;;  %v3837_v3 = vld [vmem:[#allocation2 + $0x4e0] sm:$0xff]  ;;  %v3856_v58 = vld [vmem:[#allocation2 + $0x578] sm:$0xff]  ;;  %3667 = vst.msk [vmem:[#allocation2 + $0x1a8] sm:$0xff] %vm514_vm1, %v12041_v15 }
 0x242   : > { %v3279_v59 = vor.u32 %v3278_v44, %v3274_v28  ;;  %v2990_v46 = vrot.slane %v2988_v55, 1  ;;  %v3286_v28 = vshrl.u32 %v10782_v24, 16  ;;  %v7558_v6 = vpop.f32.mrb[85].mxu1  ;;  %v7673_v19 = vpop.f32.mrb[87].mxu0  ;;  %v2995_v33 = vrot.slane %v2993_v45, 1  ;;  %v3835_v43 = vld [vmem:[#allocation2 + $0x4d0] sm:$0xff]  ;;  %6191 = vmatmul.mubr.bf16.gmra.mrb[192].mxu0 %v3837_v3 }
 0x243   : > { %v3497_v31 = vsel %vm1236_vm2, %v3495_v13, %v3496_v17  ;;  %v3288_v57 = vshll.u32 %v10782_v24, 16  ;;  %v7559_v56 = vadd.f32 %v7558_v6, %v7557_v36  ;;  %v7560_v1 = vpop.f32.mrb[86].mxu1  ;;  %v7674_v44 = vadd.f32 %v7673_v19, %v7672_v60  ;;  %v3854_v55 = vld [vmem:[#allocation2 + $0x568] sm:$0xff]  ;;  %6198 = vmatprep.mubr.bf16.mxu0 %v3856_v58  ;;  %v8785_v3 = vld [vmem:[%s9332_s25 + $0x50] ss:$0 sps:$4 sm:$0x11]  }
 0x244   : > { %v3284_v62 = vsel %vm707_vm3, %v3279_v59, %v3283_v11  ;;  %v2991_v16 = vor.u32 %v2990_v46, %v2986_v10  ;;  %3555 = vst.msk [vmem:[#allocation2 + $0x1a0] sm:$0xff] %vm497_vm0, %v3497_v31  ;;  %v3293_v39 = vshll.u32 %v8783_v29, 16  ;;  %v7561_v50 = vpop.f32.mrb[87].mxu1  ;;  %v3594_v0 = vrot.slane %v10782_v24, 1  ;;  %v12144_v10 = vld [vmem:[#allocation29_spill] sm:$0xff]  ;;  %6030 = vmatmul.mubr.bf16.gmra.mrb[192].mxu1 %v3835_v43 }
 0x245   : > { %3459 = vst.msk [vmem:[#allocation2 + $0x198] sm:$0xff] %vm497_vm0, %v3284_v62  ;;  %v3290_v11 = vrot.slane %v3288_v57, 1  ;;  %v3595_v59 = vrot.slane %v8783_v29, 1  ;;  %v2998_v45 = vshrl.u32 %v10789_v22, 16  ;;  %v5428_v13 = vadd.f32 %v7559_v56, %v12144_v10  ;;  %v12145_v62 = vld [vmem:[#allocation30_spill] sm:$0xff]  ;;  %v7675_v57 = vpop.f32.mrb[88].mxu0  ;;  %6037 = vmatprep.mubr.bf16.mxu1 %v3854_v55 }
 0x246   : > { %3475 = vst.msk [vmem:[#allocation2 + $0x198] sm:$0xff] %vm514_vm1, %v12041_v15  ;;  %3571 = vst.msk [vmem:[#allocation2 + $0x1a0] sm:$0xff] %vm514_vm1, %v12041_v15  ;;  %v7562_v17 = vadd.f32 %v7561_v50, %v7560_v1  ;;  %v2996_v36 = vsel %vm707_vm3, %v2991_v16, %v2995_v33  ;;  %v3295_v60 = vrot.slane %v3293_v39, 1  ;;  %v3000_v19 = vshll.u32 %v10789_v22, 16  ;;  %v7676_v33 = vpop.f32.mrb[89].mxu0  ;;  %v3855_v56 = vld [vmem:[#allocation2 + $0x570] sm:$0xff] }
 0x247   : > { %3171 = vst.msk [vmem:[#allocation2 + $0x190] sm:$0xff] %vm497_vm0, %v2996_v36  ;;  %v3291_v46 = vor.u32 %v3290_v11, %v3286_v28  ;;  %v3596_v6 = vsel %vm1236_vm2, %v3594_v0, %v3595_v59  ;;  %v3005_v24 = vshll.u32 %v11274_v25, 16  ;;  %v11299_v29 = vadd.f32 %v7671_v53, %v5428_v13  ;;  %v7563_v50 = vpop.f32.mrb[88].mxu1  ;;  %v7678_v11 = vpop.f32.mrb[90].mxu0  ;;  %v3874_v13 = vld [vmem:[#allocation2 + $0x608] sm:$0xff] }
 0x248   : > { %v5431_v31 = vadd.f32 %v7562_v17, %v12145_v62  ;;  %3187 = vst.msk [vmem:[#allocation2 + $0x190] sm:$0xff] %vm514_vm1, %v12041_v15  ;;  %v3498_v58 = vrot.slane %v10789_v22, 1  ;;  %v3499_v28 = vrot.slane %v11274_v25, 1  ;;  %v3002_v53 = vrot.slane %v3000_v19, 1  ;;  %v7564_v59 = vpop.f32.mrb[89].mxu1  ;;  %v7679_v10 = vpop.f32.mrb[91].mxu0 }
 0x249   : > { %3652 = vst.msk [vmem:[#allocation2 + $0x238] sm:$0xff] %vm497_vm0, %v3596_v6  ;;  %v3296_v1 = vsel %vm707_vm3, %v3291_v46, %v3295_v60  ;;  %v3007_v43 = vrot.slane %v3005_v24, 1  ;;  %v3298_v16 = vshrl.u32 %v10800_v63, 16  ;;  %v7677_v55 = vadd.f32 %v7676_v33, %v7675_v57  ;;  %v8786_v0 = vld [vmem:[%s9325_s5 + $0x50] ss:$0 sps:$4 sm:$0x11]  }
 0x24a   : > { %3668 = vst.msk [vmem:[#allocation2 + $0x238] sm:$0xff] %vm514_vm1, %v12041_v15  ;;  %v11311_v39 = vadd.f32 %v7674_v44, %v5431_v31  ;;  %v3500_v22 = vsel %vm1236_vm2, %v3498_v58, %v3499_v28  ;;  %v3300_v25 = vshll.u32 %v10800_v63, 16  ;;  %v3003_v17 = vor.u32 %v3002_v53, %v2998_v45  ;;  %v7566_v6 = vpop.f32.mrb[90].mxu1  ;;  %v3853_v24 = vld [vmem:[#allocation2 + $0x560] sm:$0xff]  ;;  %v3872_v62 = vld [vmem:[#allocation2 + $0x5f8] sm:$0xff]  ;;  %6199 = vmatmul.mubr.bf16.gmra.mrb[196].mxu0 %v3855_v56 }
 0x24b   : > { %3460 = vst.msk [vmem:[#allocation2 + $0x228] sm:$0xff] %vm497_vm0, %v3296_v1  ;;  %3556 = vst.msk [vmem:[#allocation2 + $0x230] sm:$0xff] %vm497_vm0, %v3500_v22  ;;  %v3305_v44 = vshll.u32 %v8785_v3, 16  ;;  %v3597_v36 = vrot.slane %v10800_v63, 1  ;;  %v3598_v60 = vrot.slane %v8785_v3, 1  ;;  %v7565_v46 = vadd.f32 %v7564_v59, %v7563_v50  ;;  %v7567_v58 = vpop.f32.mrb[91].mxu1  ;;  %6206 = vmatprep.mubr.bf16.mxu0 %v3874_v13 }
 0x24c   : > { %3476 = vst.msk [vmem:[#allocation2 + $0x228] sm:$0xff] %vm514_vm1, %v12041_v15  ;;  %v7680_v19 = vadd.f32 %v7679_v10, %v7678_v11  ;;  %3572 = vst.msk [vmem:[#allocation2 + $0x230] sm:$0xff] %vm514_vm1, %v12041_v15  ;;  %v3302_v31 = vrot.slane %v3300_v25, 1  ;;  %v3010_v57 = vshrl.u32 %v10815_v12, 16  ;;  %v3008_v45 = vsel %vm707_vm3, %v3003_v17, %v3007_v43  ;;  %v12146_v1 = vld [vmem:[#allocation32_spill] sm:$0xff]  ;;  %6038 = vmatmul.mubr.bf16.gmra.mrb[196].mxu1 %v3853_v24  ;;  %v7681_v17 = vpop.f32.mrb[92].mxu0 }
 0x24d   : > { %v3307_v28 = vrot.slane %v3305_v44, 1  ;;  %v3599_v63 = vsel %vm1236_vm2, %v3597_v36, %v3598_v60  ;;  %v3012_v3 = vshll.u32 %v10815_v12, 16  ;;  %v8787_v33 = vld [vmem:[%s9332_s25 + $0x5c] ss:$0 sps:$4 sm:$0x11]   ;;  %v5436_v53 = vadd.f32 %v7565_v46, %v12146_v1  ;;  %3172 = vst.msk [vmem:[#allocation2 + $0x220] sm:$0xff] %vm497_vm0, %v3008_v45  ;;  %6045 = vmatprep.mubr.bf16.mxu1 %v3872_v62 }
 0x24e   : > { %v7568_v50 = vadd.f32 %v7567_v58, %v7566_v6  ;;  %v3303_v11 = vor.u32 %v3302_v31, %v3298_v16  ;;  %3653 = vst.msk [vmem:[#allocation2 + $0x2c8] sm:$0xff] %vm497_vm0, %v3599_v63  ;;  %v3017_v22 = vshll.u32 %v8786_v0, 16  ;;  %v3501_v43 = vrot.slane %v10815_v12, 1  ;;  %v12147_v16 = vld [vmem:[#allocation34_spill] sm:$0xff]  ;;  %v7682_v46 = vpop.f32.mrb[93].mxu0  ;;  %v3873_v62 = vld [vmem:[#allocation2 + $0x600] sm:$0xff] }
 0x24f   : > { %3188 = vst.msk [vmem:[#allocation2 + $0x220] sm:$0xff] %vm514_vm1, %v12041_v15  ;;  %3669 = vst.msk [vmem:[#allocation2 + $0x2c8] sm:$0xff] %vm514_vm1, %v12041_v15  ;;  %v3014_v56 = vrot.slane %v3012_v3, 1  ;;  %v3502_v25 = vrot.slane %v8786_v0, 1  ;;  %v3310_v59 = vshrl.u32 %v10841_v27, 16  ;;  %v11337_v10 = vadd.f32 %v7677_v55, %v5436_v53  ;;  %v7569_v55 = vpop.f32.mrb[92].mxu1 }
 0x250   : > { %v5439_v13 = vadd.f32 %v7568_v50, %v12147_v16  ;;  %v3308_v44 = vsel %vm707_vm3, %v3303_v11, %v3307_v28  ;;  %v3019_v36 = vrot.slane %v3017_v22, 1  ;;  %v8788_v60 = vld [vmem:[%s9325_s5 + $0x5c] ss:$0 sps:$4 sm:$0x11]   ;;  %v3312_v12 = vshll.u32 %v10841_v27, 16  ;;  %v7684_v45 = vpop.f32.mrb[94].mxu0 }
 0x251   : > { %3461 = vst.msk [vmem:[#allocation2 + $0x2b8] sm:$0xff] %vm497_vm0, %v3308_v44  ;;  %v3015_v6 = vor.u32 %v3014_v56, %v3010_v57  ;;  %v3503_v24 = vsel %vm1236_vm2, %v3501_v43, %v3502_v25  ;;  %v3317_v0 = vshll.u32 %v8787_v33, 16  ;;  %v7683_v58 = vadd.f32 %v7682_v46, %v7681_v17  ;;  %v3871_v63 = vld [vmem:[#allocation2 + $0x5f0] sm:$0xff]  ;;  %v7570_v3 = vpop.f32.mrb[93].mxu1  ;;  %v7685_v1 = vpop.f32.mrb[95].mxu0  ;;  %v3892_v53 = vld [vmem:[#allocation2 + $0x698] sm:$0xff] }
 0x252   : > { %v11345_v31 = vadd.f32 %v7680_v19, %v5439_v13  ;;  %3477 = vst.msk [vmem:[#allocation2 + $0x2b8] sm:$0xff] %vm514_vm1, %v12041_v15  ;;  %v3600_v28 = vrot.slane %v10841_v27, 1  ;;  %v3601_v57 = vrot.slane %v8787_v33, 1  ;;  %v3314_v50 = vrot.slane %v3312_v12, 1  ;;  %v7572_v43 = vpop.f32.mrb[94].mxu1  ;;  %v3890_v16 = vld [vmem:[#allocation2 + $0x688] sm:$0xff]  ;;  %6207 = vmatmul.mubr.bf16.gmra.mrb[200].mxu0 %v3873_v62 }
 0x253   : > { %3557 = vst.msk [vmem:[#allocation2 + $0x2c0] sm:$0xff] %vm497_vm0, %v3503_v24  ;;  %v3020_v19 = vsel %vm707_vm3, %v3015_v6, %v3019_v36  ;;  %v3319_v11 = vrot.slane %v3317_v0, 1  ;;  %v3022_v22 = vshrl.u32 %v10849_v4, 16  ;;  %v7571_v56 = vadd.f32 %v7570_v3, %v7569_v55  ;;  %v8789_v13 = vld [vmem:[%s9332_s25 + $0x68] ss:$0 sps:$4 sm:$0x11]   ;;  %6214 = vmatprep.mubr.bf16.mxu0 %v3892_v53 }
 0x254   : > { %3573 = vst.msk [vmem:[#allocation2 + $0x2c0] sm:$0xff] %vm514_vm1, %v12041_v15  ;;  %v7686_v25 = vadd.f32 %v7685_v1, %v7684_v45  ;;  %v3602_v27 = vsel %vm1236_vm2, %v3600_v28, %v3601_v57  ;;  %v3024_v33 = vshll.u32 %v10849_v4, 16  ;;  %v7573_v17 = vpop.f32.mrb[95].mxu1  ;;  %v3315_v44 = vor.u32 %v3314_v50, %v3310_v59  ;;  %6046 = vmatmul.mubr.bf16.gmra.mrb[200].mxu1 %v3871_v63  ;;  %v7815_v57 = vpop.f32.mrb[96].mxu0  ;;  %v3891_v53 = vld [vmem:[#allocation2 + $0x690] sm:$0xff] }
 0x255   : > { %3173 = vst.msk [vmem:[#allocation2 + $0x2b0] sm:$0xff] %vm497_vm0, %v3020_v19  ;;  %3654 = vst.msk [vmem:[#allocation2 + $0x358] sm:$0xff] %vm497_vm0, %v3602_v27  ;;  %v3029_v36 = vshll.u32 %v8788_v60, 16  ;;  %v3504_v46 = vrot.slane %v10849_v4, 1  ;;  %v3505_v6 = vrot.slane %v8788_v60, 1  ;;  %v5444_v24 = vadd.f32 %v7571_v56, %v10691_v8  ;;  %6053 = vmatprep.mubr.bf16.mxu1 %v3890_v16  ;;  %v7816_v1 = vpop.f32.mrb[97].mxu0 }
 0x256   : > { %3189 = vst.msk [vmem:[#allocation2 + $0x2b0] sm:$0xff] %vm514_vm1, %v12041_v15  ;;  %v7574_v12 = vadd.f32 %v7573_v17, %v7572_v43  ;;  %3670 = vst.msk [vmem:[#allocation2 + $0x358] sm:$0xff] %vm514_vm1, %v12041_v15  ;;  %v3026_v0 = vrot.slane %v3024_v33, 1  ;;  %v3322_v55 = vshrl.u32 %v10864_v9, 16  ;;  %v3320_v59 = vsel %vm707_vm3, %v3315_v44, %v3319_v11  ;;  %v7818_v16 = vpop.f32.mrb[98].mxu0  ;;  %v3910_v27 = vld [vmem:[#allocation2 + $0x728] sm:$0xff] }
 0x257   : > { %v3031_v45 = vrot.slane %v3029_v36, 1  ;;  %v3506_v62 = vsel %vm1236_vm2, %v3504_v46, %v3505_v6  ;;  %v3324_v28 = vshll.u32 %v10864_v9, 16  ;;  %v8790_v4 = vld [vmem:[%s9325_s5 + $0x68] ss:$0 sps:$4 sm:$0x11]   ;;  %v11371_v60 = vadd.f32 %v7683_v58, %v5444_v24  ;;  %3462 = vst.msk [vmem:[#allocation2 + $0x348] sm:$0xff] %vm497_vm0, %v3320_v59 }
 0x258   : > { %v5447_v8 = vadd.f32 %v7574_v12, %v10708_v49  ;;  %v3027_v3 = vor.u32 %v3026_v0, %v3022_v22  ;;  %3558 = vst.msk [vmem:[#allocation2 + $0x350] sm:$0xff] %vm497_vm0, %v3506_v62  ;;  %v3329_v63 = vshll.u32 %v8789_v13, 16  ;;  %v3603_v19 = vrot.slane %v10864_v9, 1  ;;  %v8791_v11 = vld [vmem:[%s9332_s25 + $0x74] ss:$0 sps:$4 sm:$0x11]  }
 0x259   : > { %3478 = vst.msk [vmem:[#allocation2 + $0x348] sm:$0xff] %vm514_vm1, %v12041_v15  ;;  %3574 = vst.msk [vmem:[#allocation2 + $0x350] sm:$0xff] %vm514_vm1, %v12041_v15  ;;  %v3326_v58 = vrot.slane %v3324_v28, 1  ;;  %v3604_v49 = vrot.slane %v8789_v13, 1  ;;  %v3034_v50 = vshrl.u32 %v10872_v51, 16  ;;  %v7703_v22 = vpop.f32.mrb[96].mxu1  ;;  %v7817_v43 = vadd.f32 %v7816_v1, %v7815_v57 }
 0x25a   : > { %v11383_v56 = vadd.f32 %v7686_v25, %v5447_v8  ;;  %v3032_v33 = vsel %vm707_vm3, %v3027_v3, %v3031_v45  ;;  %v3331_v17 = vrot.slane %v3329_v63, 1  ;;  %v7704_v44 = vpop.f32.mrb[97].mxu1  ;;  %v7819_v36 = vpop.f32.mrb[99].mxu0  ;;  %v3036_v13 = vshll.u32 %v10872_v51, 16  ;;  %v3889_v0 = vld [vmem:[#allocation2 + $0x680] sm:$0xff]  ;;  %6215 = vmatmul.mubr.bf16.gmra.mrb[204].mxu0 %v3891_v53 }
 0x25b   : > { %3174 = vst.msk [vmem:[#allocation2 + $0x340] sm:$0xff] %vm497_vm0, %v3032_v33  ;;  %v3327_v46 = vor.u32 %v3326_v58, %v3322_v55  ;;  %v3605_v9 = vsel %vm1236_vm2, %v3603_v19, %v3604_v49  ;;  %v3041_v6 = vshll.u32 %v8790_v4, 16  ;;  %v7705_v24 = vadd.f32 %v7704_v44, %v7703_v22  ;;  %v7706_v25 = vpop.f32.mrb[98].mxu1  ;;  %v3908_v55 = vld [vmem:[#allocation2 + $0x718] sm:$0xff]  ;;  %6222 = vmatprep.mubr.bf16.mxu0 %v3910_v27  ;;  %v3909_v33 = vld [vmem:[#allocation2 + $0x720] sm:$0xff] }
 0x25c   : > { %v7820_v12 = vadd.f32 %v7819_v36, %v7818_v16  ;;  %3190 = vst.msk [vmem:[#allocation2 + $0x340] sm:$0xff] %vm514_vm1, %v12041_v15  ;;  %v3507_v59 = vrot.slane %v10872_v51, 1  ;;  %v3508_v45 = vrot.slane %v8790_v4, 1  ;;  %v7707_v62 = vpop.f32.mrb[99].mxu1  ;;  %v3038_v8 = vrot.slane %v3036_v13, 1  ;;  %6054 = vmatmul.mubr.bf16.gmra.mrb[204].mxu1 %v3889_v0  ;;  %v7821_v27 = vpop.f32.mrb[100].mxu0 }
 0x25d   : > { %3655 = vst.msk [vmem:[#allocation2 + $0x3e8] sm:$0xff] %vm497_vm0, %v3605_v9  ;;  %v3332_v28 = vsel %vm707_vm3, %v3327_v46, %v3331_v17  ;;  %v3043_v57 = vrot.slane %v3041_v6, 1  ;;  %v3334_v3 = vshrl.u32 %v10896_v26, 16  ;;  %v5646_v63 = vadd.f32 %v7705_v24, %v10765_v38  ;;  %v8792_v53 = vld [vmem:[%s9325_s5 + $0x74] ss:$0 sps:$4 sm:$0x11]   ;;  %6061 = vmatprep.mubr.bf16.mxu1 %v3908_v55 }
 0x25e   : > { %3671 = vst.msk [vmem:[#allocation2 + $0x3e8] sm:$0xff] %vm514_vm1, %v12041_v15  ;;  %v7708_v1 = vadd.f32 %v7707_v62, %v7706_v25  ;;  %v3509_v51 = vsel %vm1236_vm2, %v3507_v59, %v3508_v45  ;;  %v3336_v4 = vshll.u32 %v10896_v26, 16  ;;  %v3039_v58 = vor.u32 %v3038_v8, %v3034_v50  ;;  %v7822_v44 = vpop.f32.mrb[101].mxu0  ;;  %v7709_v9 = vpop.f32.mrb[100].mxu1  ;;  %v3928_v62 = vld [vmem:[#allocation2 + $0x7b8] sm:$0xff] }
 0x25f   : > { %3463 = vst.msk [vmem:[#allocation2 + $0x3d8] sm:$0xff] %vm497_vm0, %v3332_v28  ;;  %3559 = vst.msk [vmem:[#allocation2 + $0x3e0] sm:$0xff] %vm497_vm0, %v3509_v51  ;;  %v3341_v19 = vshll.u32 %v8791_v11, 16  ;;  %v3606_v38 = vrot.slane %v10896_v26, 1  ;;  %v3607_v49 = vrot.slane %v8791_v11, 1  ;;  %v11406_v22 = vadd.f32 %v7817_v43, %v5646_v63  ;;  %v7824_v6 = vpop.f32.mrb[102].mxu0 }
 0x260   : > { %3479 = vst.msk [vmem:[#allocation2 + $0x3d8] sm:$0xff] %vm514_vm1, %v12041_v15  ;;  %v5649_v16 = vadd.f32 %v7708_v1, %v10773_v37  ;;  %3575 = vst.msk [vmem:[#allocation2 + $0x3e0] sm:$0xff] %vm514_vm1, %v12041_v15  ;;  %v3338_v17 = vrot.slane %v3336_v4, 1  ;;  %v3046_v50 = vshrl.u32 %v10905_v18, 16  ;;  %v3044_v36 = vsel %vm707_vm3, %v3039_v58, %v3043_v57  ;;  %v7710_v59 = vpop.f32.mrb[101].mxu1  ;;  %v7825_v45 = vpop.f32.mrb[103].mxu0 }
 0x261   : > { %v3343_v46 = vrot.slane %v3341_v19, 1  ;;  %v3608_v26 = vsel %vm1236_vm2, %v3606_v38, %v3607_v49  ;;  %v3048_v11 = vshll.u32 %v10905_v18, 16  ;;  %v8793_v43 = vld [vmem:[%s9332_s25 + $0x80] ss:$0 sps:$4 sm:$0x11]   ;;  %v7823_v13 = vadd.f32 %v7822_v44, %v7821_v27  ;;  %3175 = vst.msk [vmem:[#allocation2 + $0x3d0] sm:$0xff] %vm497_vm0, %v3044_v36 }
 0x262   : > { %v11416_v37 = vadd.f32 %v7820_v12, %v5649_v16  ;;  %v3339_v24 = vor.u32 %v3338_v17, %v3334_v3  ;;  %3656 = vst.msk [vmem:[#allocation2 + $0x478] sm:$0xff] %vm497_vm0, %v3608_v26  ;;  %v3053_v25 = vshll.u32 %v8792_v53, 16  ;;  %v8794_v0 = vld [vmem:[%s9325_s5 + $0x80] ss:$0 sps:$4 sm:$0x11]   ;;  %v3510_v55 = vrot.slane %v10905_v18, 1  ;;  %6223 = vmatmul.mubr.bf16.gmra.mrb[208].mxu0 %v3909_v33 }
 0x263   : > { %3191 = vst.msk [vmem:[#allocation2 + $0x3d0] sm:$0xff] %vm514_vm1, %v12041_v15  ;;  %3672 = vst.msk [vmem:[#allocation2 + $0x478] sm:$0xff] %vm514_vm1, %v12041_v15  ;;  %v3050_v12 = vrot.slane %v3048_v11, 1  ;;  %v3511_v28 = vrot.slane %v8792_v53, 1  ;;  %v12148_v8 = vshrl.u32 %v10930_v32, 16  ;;  %v7711_v3 = vadd.f32 %v7710_v59, %v7709_v9  ;;  %v7712_v63 = vpop.f32.mrb[102].mxu1  ;;  %6230 = vmatprep.mubr.bf16.mxu0 %v3928_v62 }
 0x264   : > { %v7826_v1 = vadd.f32 %v7825_v45, %v7824_v6  ;;  %v3907_v51 = vld [vmem:[#allocation2 + $0x710] sm:$0xff]  ;;  %v3926_v4 = vld [vmem:[#allocation2 + $0x7a8] sm:$0xff]  ;;  %v3344_v58 = vsel %vm707_vm3, %v3339_v24, %v3343_v46  ;;  %v3055_v19 = vrot.slane %v3053_v25, 1  ;;  %v7713_v38 = vpop.f32.mrb[103].mxu1  ;;  %v3346_v53 = vshrl.u32 %v10908_v41, 16  ;;  %v7827_v9 = vpop.f32.mrb[104].mxu0 }
 0x265   : > { %v3063_v57 = vor.u32 %v11054_v30, %v12148_v8  ;;  %3464 = vst.msk [vmem:[#allocation2 + $0x468] sm:$0xff] %vm497_vm0, %v3344_v58  ;;  %v3051_v49 = vor.u32 %v3050_v12, %v3046_v50  ;;  %v3512_v18 = vsel %vm1236_vm2, %v3510_v55, %v3511_v28  ;;  %v3348_v16 = vshll.u32 %v10908_v41, 16  ;;  %v11435_v30 = vld [vmem:[%s9332_s25 + $0x8c] ss:$0 sps:$4 sm:$0x11]   ;;  %6062 = vmatmul.mubr.bf16.gmra.mrb[208].mxu1 %v3907_v51  ;;  %v7828_v24 = vpop.f32.mrb[105].mxu0 }
 0x266   : > { %v5654_v27 = vadd.f32 %v7711_v3, %v10805_v7  ;;  %v7714_v17 = vadd.f32 %v7713_v38, %v7712_v63  ;;  %3480 = vst.msk [vmem:[#allocation2 + $0x468] sm:$0xff] %vm514_vm1, %v12041_v15  ;;  %v3353_v33 = vshll.u32 %v8793_v43, 16  ;;  %v3609_v50 = vrot.slane %v10908_v41, 1  ;;  %6069 = vmatprep.mubr.bf16.mxu1 %v3926_v4  ;;  %v7830_v55 = vpop.f32.mrb[106].mxu0  ;;  %v3925_v28 = vld [vmem:[#allocation2 + $0x7a0] sm:$0xff]  ;;  %v3927_v8 = vld [vmem:[#allocation2 + $0x7b0] sm:$0xff] }
 0x267   : > { %3560 = vst.msk [vmem:[#allocation2 + $0x470] sm:$0xff] %vm497_vm0, %v3512_v18  ;;  %v3056_v44 = vsel %vm707_vm3, %v3051_v49, %v3055_v19  ;;  %v3350_v36 = vrot.slane %v3348_v16, 1  ;;  %v3610_v46 = vrot.slane %v8793_v43, 1  ;;  %v3065_v7 = vshll.u32 %v8794_v0, 16  ;;  %v3946_v3 = vld [vmem:[#allocation2 + $0x848] sm:$0xff]  ;;  %v7831_v58 = vpop.f32.mrb[107].mxu0 }
 0x268   : > { %3576 = vst.msk [vmem:[#allocation2 + $0x470] sm:$0xff] %vm514_vm1, %v12041_v15  ;;  %v11445_v26 = vadd.f32 %v7823_v13, %v5654_v27  ;;  %v5657_v11 = vadd.f32 %v7714_v17, %v10819_v52  ;;  %v3355_v6 = vrot.slane %v3353_v33, 1  ;;  %v3514_v41 = vrot.slane %v8794_v0, 1  ;;  %v8796_v13 = vld [vmem:[%s9325_s5 + $0x8c] ss:$0 sps:$4 sm:$0x11]  }
 0x269   : > { %3176 = vst.msk [vmem:[#allocation2 + $0x460] sm:$0xff] %vm497_vm0, %v3056_v44  ;;  %v3351_v25 = vor.u32 %v3350_v36, %v3346_v53  ;;  %v3611_v59 = vsel %vm1236_vm2, %v3609_v50, %v3610_v46  ;;  %v3067_v45 = vrot.slane %v3065_v7, 1  ;;  %v3358_v43 = vshrl.u32 %v10953_v47, 16  ;;  %v7715_v52 = vpop.f32.mrb[104].mxu1  ;;  %v3944_v33 = vld [vmem:[#allocation2 + $0x838] sm:$0xff] }
 0x26a   : > { %3192 = vst.msk [vmem:[#allocation2 + $0x460] sm:$0xff] %vm514_vm1, %v12041_v15  ;;  %v11454_v62 = vadd.f32 %v7826_v1, %v5657_v11  ;;  %v7829_v12 = vadd.f32 %v7828_v24, %v7827_v9  ;;  %v12149_v0 = vrot.slane %v10930_v32, 1  ;;  %v3360_v51 = vshll.u32 %v10953_v47, 16  ;;  %v7716_v4 = vpop.f32.mrb[105].mxu1  ;;  %6231 = vmatmul.mubr.bf16.gmra.mrb[212].mxu0 %v3927_v8  ;;  %v12151_v7 = vld [vmem:[#allocation35_spill] sm:$0xff] }
 0x26b   : > { %3657 = vst.msk [vmem:[#allocation2 + $0x508] sm:$0xff] %vm497_vm0, %v3611_v59  ;;  %v3356_v1 = vsel %vm707_vm3, %v3351_v25, %v3355_v6  ;;  %v3068_v19 = vsel %vm707_vm3, %v3063_v57, %v3067_v45  ;;  %v3365_v38 = vshll.u32 %v11435_v30, 16  ;;  %v3612_v32 = vrot.slane %v10953_v47, 1  ;;  %v7718_v18 = vpop.f32.mrb[106].mxu1  ;;  %6238 = vmatprep.mubr.bf16.mxu0 %v3946_v3 }
 0x26c   : > { %v3515_v63 = vsel %vm1236_vm2, %v12149_v0, %v3514_v41  ;;  %3673 = vst.msk [vmem:[#allocation2 + $0x508] sm:$0xff] %vm514_vm1, %v12041_v15  ;;  %v7717_v49 = vadd.f32 %v7716_v4, %v7715_v52  ;;  %v7832_v53 = vadd.f32 %v7831_v58, %v7830_v55  ;;  %v3362_v16 = vrot.slane %v3360_v51, 1  ;;  %v8797_v57 = vld [vmem:[%s9332_s25 + $0x98] ss:$0 sps:$4 sm:$0x11]   ;;  %v7719_v17 = vpop.f32.mrb[107].mxu1 }
 0x26d   : > { %3561 = vst.msk [vmem:[#allocation2 + $0x500] sm:$0xff] %vm497_vm0, %v3515_v63  ;;  %3465 = vst.msk [vmem:[#allocation2 + $0x4f8] sm:$0xff] %vm497_vm0, %v3356_v1  ;;  %v3613_v27 = vrot.slane %v11435_v30, 1  ;;  %v3367_v47 = vrot.slane %v3365_v38, 1  ;;  %v12150_v50 = vshrl.u32 %v10960_v48, 16  ;;  %v3077_v36 = vshll.u32 %v8796_v13, 16  ;;  %6070 = vmatmul.mubr.bf16.gmra.mrb[212].mxu1 %v3925_v28 }
 0x26e   : > { %3177 = vst.msk [vmem:[#allocation2 + $0x4f0] sm:$0xff] %vm497_vm0, %v3068_v19  ;;  %v3517_v46 = vrot.slane %v8796_v13, 1  ;;  %v5662_v30 = vadd.f32 %v7717_v49, %v12151_v7  ;;  %v7720_v11 = vadd.f32 %v7719_v17, %v7718_v18  ;;  %v3363_v9 = vor.u32 %v3362_v16, %v3358_v43  ;;  %v8798_v41 = vld [vmem:[%s9325_s5 + $0x98] ss:$0 sps:$4 sm:$0x11]   ;;  %v12154_v55 = vld [vmem:[#allocation36_spill] sm:$0xff]  ;;  %6077 = vmatprep.mubr.bf16.mxu1 %v3944_v33 }
 0x26f   : > { %3577 = vst.msk [vmem:[#allocation2 + $0x500] sm:$0xff] %vm514_vm1, %v12041_v15  ;;  %3481 = vst.msk [vmem:[#allocation2 + $0x4f8] sm:$0xff] %vm514_vm1, %v12041_v15  ;;  %v3075_v44 = vor.u32 %v11072_v5, %v12150_v50  ;;  %v3614_v6 = vsel %vm1236_vm2, %v3612_v32, %v3613_v27  ;;  %v3079_v24 = vrot.slane %v3077_v36, 1  ;;  %v12152_v25 = vrot.slane %v10960_v48, 1  ;;  %v12153_v5 = vld [vmem:[#allocation42_spill] sm:$0xff]  ;;  %v7833_v8 = vpop.f32.mrb[108].mxu0 }
 0x270   : > { %3193 = vst.msk [vmem:[#allocation2 + $0x4f0] sm:$0xff] %vm514_vm1, %v12041_v15  ;;  %v3370_v45 = vshrl.u32 %v12153_v5, 16  ;;  %v3372_v13 = vshll.u32 %v12153_v5, 16  ;;  %v11490_v52 = vadd.f32 %v7829_v12, %v5662_v30  ;;  %v5665_v43 = vadd.f32 %v7720_v11, %v12154_v55  ;;  %v11498_v28 = vld [vmem:[%s9332_s25 + $0xa4] ss:$0 sps:$4 sm:$0x11]  }
 0x271   : > { %3658 = vst.msk [vmem:[#allocation2 + $0x598] sm:$0xff] %vm497_vm0, %v3614_v6  ;;  %v3518_v59 = vsel %vm1236_vm2, %v12152_v25, %v3517_v46  ;;  %v3368_v3 = vsel %vm707_vm3, %v3363_v9, %v3367_v47  ;;  %v3377_v48 = vshll.u32 %v8797_v57, 16  ;;  %v7834_v0 = vpop.f32.mrb[109].mxu0  ;;  %v3080_v12 = vsel %vm707_vm3, %v3075_v44, %v3079_v24  ;;  %v7721_v1 = vpop.f32.mrb[108].mxu1  ;;  %v3945_v32 = vld [vmem:[#allocation2 + $0x840] sm:$0xff]  ;;  %v3962_v6 = vld [vmem:[#allocation2 + $0x8c8] sm:$0xff] }
 0x272   : > { %3674 = vst.msk [vmem:[#allocation2 + $0x598] sm:$0xff] %vm514_vm1, %v12041_v15  ;;  %v3374_v63 = vrot.slane %v3372_v13, 1  ;;  %v3615_v51 = vrot.slane %v12153_v5, 1  ;;  %v3616_v4 = vrot.slane %v8797_v57, 1  ;;  %v11505_v58 = vadd.f32 %v7832_v53, %v5665_v43  ;;  %v7836_v38 = vpop.f32.mrb[110].mxu0  ;;  %v7722_v27 = vpop.f32.mrb[109].mxu1  ;;  %6239 = vmatmul.mubr.bf16.gmra.mrb[216].mxu0 %v3945_v32 }
 0x273   : > { %3562 = vst.msk [vmem:[#allocation2 + $0x590] sm:$0xff] %vm497_vm0, %v3518_v59  ;;  %3466 = vst.msk [vmem:[#allocation2 + $0x588] sm:$0xff] %vm497_vm0, %v3368_v3  ;;  %v7835_v19 = vadd.f32 %v7834_v0, %v7833_v8  ;;  %v3379_v49 = vrot.slane %v3377_v48, 1  ;;  %v12155_v18 = vshrl.u32 %v10978_v2, 16  ;;  %v7837_v17 = vpop.f32.mrb[111].mxu0  ;;  %v3943_v57 = vld [vmem:[#allocation2 + $0x830] sm:$0xff]  ;;  %v7723_v36 = vadd.f32 %v7722_v27, %v7721_v1 }
 0x274   : > { %3578 = vst.msk [vmem:[#allocation2 + $0x590] sm:$0xff] %vm514_vm1, %v12041_v15  ;;  %3482 = vst.msk [vmem:[#allocation2 + $0x588] sm:$0xff] %vm514_vm1, %v12041_v15  ;;  %v3964_v53 = vld [vmem:[#allocation2 + $0x8d8] sm:$0xff]  ;;  %v3375_v33 = vor.u32 %v3374_v63, %v3370_v45  ;;  %v3617_v47 = vsel %vm1236_vm2, %v3615_v51, %v3616_v4  ;;  %v3089_v50 = vshll.u32 %v8798_v41, 16  ;;  %v3520_v44 = vrot.slane %v8798_v41, 1  ;;  %v7724_v46 = vpop.f32.mrb[110].mxu1 }
 0x275   : > { %3178 = vst.msk [vmem:[#allocation2 + $0x580] sm:$0xff] %vm497_vm0, %v3080_v12  ;;  %v3087_v16 = vor.u32 %v11101_v40, %v12155_v18  ;;  %v7838_v7 = vadd.f32 %v7837_v17, %v7836_v38  ;;  %3659 = vst.msk [vmem:[#allocation2 + $0x628] sm:$0xff] %vm497_vm0, %v3617_v47  ;;  %v3382_v40 = vshrl.u32 %v11012_v14, 16  ;;  %v3384_v30 = vshll.u32 %v11012_v14, 16  ;;  %v7725_v9 = vpop.f32.mrb[111].mxu1  ;;  %v12157_v45 = vld [vmem:[#allocation37_spill] sm:$0xff]  ;;  %6246 = vmatprep.mubr.bf16.mxu0 %v3964_v53 }
 0x276   : > { %3194 = vst.msk [vmem:[#allocation2 + $0x580] sm:$0xff] %vm514_vm1, %v12041_v15  ;;  %v8800_v11 = vld [vmem:[%s9325_s5 + $0xa4] ss:$0 sps:$4 sm:$0x11]   ;;  %v3380_v24 = vsel %vm707_vm3, %v3375_v33, %v3379_v49  ;;  %3675 = vst.msk [vmem:[#allocation2 + $0x628] sm:$0xff] %vm514_vm1, %v12041_v15  ;;  %v3091_v41 = vrot.slane %v3089_v50, 1  ;;  %v5670_v13 = vadd.f32 %v7723_v36, %v12157_v45  ;;  %v7726_v55 = vadd.f32 %v7725_v9, %v7724_v46 }
 0x277   : > { %v12156_v25 = vrot.slane %v10978_v2, 1  ;;  %v3389_v5 = vshll.u32 %v11498_v28, 16  ;;  %3467 = vst.msk [vmem:[#allocation2 + $0x618] sm:$0xff] %vm497_vm0, %v3380_v24  ;;  %v3386_v43 = vrot.slane %v3384_v30, 1  ;;  %v3618_v8 = vrot.slane %v11012_v14, 1  ;;  %6078 = vmatmul.mubr.bf16.gmra.mrb[216].mxu1 %v3943_v57  ;;  %v12159_v4 = vld [vmem:[#allocation38_spill] sm:$0xff] }
 0x278   : > { %v11532_v3 = vld [vmem:[%s9332_s25 + $0xb0] ss:$0 sps:$4 sm:$0x11]   ;;  %3483 = vst.msk [vmem:[#allocation2 + $0x618] sm:$0xff] %vm514_vm1, %v12041_v15  ;;  %v3092_v2 = vsel %vm707_vm3, %v3087_v16, %v3091_v41  ;;  %v3619_v0 = vrot.slane %v11498_v28, 1  ;;  %v12158_v12 = vshrl.u32 %v11025_v23, 16  ;;  %v11546_v14 = vadd.f32 %v7835_v19, %v5670_v13  ;;  %6085 = vmatprep.mubr.bf16.mxu1 %v3962_v6 }
 0x279   : > { %v3521_v59 = vsel %vm1236_vm2, %v12156_v25, %v3520_v44  ;;  %v3391_v48 = vrot.slane %v3389_v5, 1  ;;  %v11544_v51 = vld [vmem:[%s9325_s5 + $0xb0] ss:$0 sps:$4 sm:$0x11]   ;;  %v5673_v1 = vadd.f32 %v7726_v55, %v12159_v4  ;;  %v7839_v38 = vpop.f32.mrb[112].mxu0  ;;  %3179 = vst.msk [vmem:[#allocation2 + $0x610] sm:$0xff] %vm497_vm0, %v3092_v2  ;;  %v3387_v32 = vor.u32 %v3386_v43, %v3382_v40 }
 0x27a   : > { %3563 = vst.msk [vmem:[#allocation2 + $0x620] sm:$0xff] %vm497_vm0, %v3521_v59  ;;  %v3099_v63 = vor.u32 %v11130_v35, %v12158_v12  ;;  %v3101_v49 = vshll.u32 %v8800_v11, 16  ;;  %v7840_v18 = vpop.f32.mrb[113].mxu0  ;;  %v3620_v28 = vsel %vm1236_vm2, %v3618_v8, %v3619_v0  ;;  %v3523_v16 = vrot.slane %v8800_v11, 1  ;;  %v7727_v17 = vpop.f32.mrb[112].mxu1  ;;  %v3963_v33 = vld [vmem:[#allocation2 + $0x8d0] sm:$0xff] }
 0x27b   : > { %3579 = vst.msk [vmem:[#allocation2 + $0x620] sm:$0xff] %vm514_vm1, %v12041_v15  ;;  %3195 = vst.msk [vmem:[#allocation2 + $0x610] sm:$0xff] %vm514_vm1, %v12041_v15  ;;  %v3394_v35 = vshrl.u32 %v11035_v20, 16  ;;  %v3396_v19 = vshll.u32 %v11035_v20, 16  ;;  %v11555_v27 = vadd.f32 %v7838_v7, %v5673_v1  ;;  %v7841_v57 = vadd.f32 %v7840_v18, %v7839_v38  ;;  %v7842_v53 = vpop.f32.mrb[114].mxu0  ;;  %v7728_v44 = vpop.f32.mrb[113].mxu1  ;;  %6247 = vmatmul.mubr.bf16.gmra.mrb[220].mxu0 %v3963_v33 }
 0x27c   : > { %v3392_v47 = vsel %vm707_vm3, %v3387_v32, %v3391_v48  ;;  %3660 = vst.msk [vmem:[#allocation2 + $0x6b8] sm:$0xff] %vm497_vm0, %v3620_v28  ;;  %v3103_v50 = vrot.slane %v3101_v49, 1  ;;  %v7843_v36 = vpop.f32.mrb[115].mxu0  ;;  %v3698_v46 = vld [vmem:[#allocation2 + $0x88] sm:$0xff]  ;;  %v12160_v7 = vrot.slane %v11025_v23, 1  ;;  %v3401_v11 = vshll.u32 %v11532_v3, 16 }
 0x27d   : > { %3468 = vst.msk [vmem:[#allocation2 + $0x6a8] sm:$0xff] %vm497_vm0, %v3392_v47  ;;  %v3398_v30 = vrot.slane %v3396_v19, 1  ;;  %v3621_v9 = vrot.slane %v11035_v20, 1  ;;  %v7729_v6 = vadd.f32 %v7728_v44, %v7727_v17  ;;  %v7730_v24 = vpop.f32.mrb[114].mxu1  ;;  %v7844_v41 = vadd.f32 %v7843_v36, %v7842_v53  ;;  %v3961_v25 = vld [vmem:[#allocation2 + $0x8c0] sm:$0xff]  ;;  %v3696_v13 = vld [vmem:[#allocation2 + $0x78] sm:$0xff]  ;;  %6448 = vmatprep.mubr.bf16.mxu0 %v3698_v46 }
 0x27e   : > { %3676 = vst.msk [vmem:[#allocation2 + $0x6b8] sm:$0xff] %vm514_vm1, %v12041_v15  ;;  %v3524_v40 = vsel %vm1236_vm2, %v12160_v7, %v3523_v16  ;;  %3484 = vst.msk [vmem:[#allocation2 + $0x6a8] sm:$0xff] %vm514_vm1, %v12041_v15  ;;  %v3104_v59 = vsel %vm707_vm3, %v3099_v63, %v3103_v50  ;;  %v3622_v23 = vrot.slane %v11532_v3, 1  ;;  %v8803_v5 = vld [vmem:[%s9332_s25 + $0xbc] ss:$0 sps:$4 sm:$0x11]  }
 0x27f   : > { %3564 = vst.msk [vmem:[#allocation2 + $0x6b0] sm:$0xff] %vm497_vm0, %v3524_v40  ;;  %v7731_v45 = vpop.f32.mrb[115].mxu1  ;;  %3180 = vst.msk [vmem:[#allocation2 + $0x6a0] sm:$0xff] %vm497_vm0, %v3104_v59  ;;  %v3399_v20 = vor.u32 %v3398_v30, %v3394_v35  ;;  %v3403_v55 = vrot.slane %v3401_v11, 1  ;;  %v12161_v43 = vshrl.u32 %v11052_v21, 16  ;;  %v3113_v2 = vshll.u32 %v11544_v51, 16  ;;  %6086 = vmatmul.mubr.bf16.gmra.mrb[220].mxu1 %v3961_v25 }
 0x280   : > { %3580 = vst.msk [vmem:[#allocation2 + $0x6b0] sm:$0xff] %vm514_vm1, %v12041_v15  ;;  %v12162_v48 = vld [vmem:[#allocation39_spill] sm:$0xff]  ;;  %v7732_v0 = vadd.f32 %v7731_v45, %v7730_v24  ;;  %3196 = vst.msk [vmem:[#allocation2 + $0x6a0] sm:$0xff] %vm514_vm1, %v12041_v15  ;;  %v3623_v12 = vsel %vm1236_vm2, %v3621_v9, %v3622_v23  ;;  %v3526_v63 = vrot.slane %v11544_v51, 1  ;;  %v12163_v1 = vld [vmem:[#allocation48_spill] sm:$0xff]  ;;  %v7845_v35 = vpop.f32.mrb[116].mxu0  ;;  %6287 = vmatprep.mubr.bf16.mxu1 %v3696_v13 }
 0x281   : > { %v3111_v8 = vor.u32 %v11153_v42, %v12161_v43  ;;  %v5678_v3 = vadd.f32 %v7729_v6, %v12162_v48  ;;  %v3404_v4 = vsel %vm707_vm3, %v3399_v20, %v3403_v55  ;;  %3661 = vst.msk [vmem:[#allocation2 + $0x748] sm:$0xff] %vm497_vm0, %v3623_v12  ;;  %v3115_v42 = vrot.slane %v3113_v2, 1  ;;  %v8804_v49 = vld [vmem:[%s9325_s5 + $0xbc] ss:$0 sps:$4 sm:$0x11]   ;;  %v7846_v33 = vpop.f32.mrb[117].mxu0 }
 0x282   : > { %v3406_v38 = vshrl.u32 %v12163_v1, 16  ;;  %v3408_v32 = vshll.u32 %v12163_v1, 16  ;;  %v12164_v28 = vld [vmem:[#allocation40_spill] sm:$0xff]  ;;  %3469 = vst.msk [vmem:[#allocation2 + $0x738] sm:$0xff] %vm497_vm0, %v3404_v4  ;;  %v12165_v51 = vrot.slane %v11052_v21, 1  ;;  %v3413_v17 = vshll.u32 %v8803_v5, 16 }
 0x283   : > { %v11590_v18 = vadd.f32 %v7841_v57, %v5678_v3  ;;  %v5681_v16 = vadd.f32 %v7732_v0, %v12164_v28  ;;  %3677 = vst.msk [vmem:[#allocation2 + $0x748] sm:$0xff] %vm514_vm1, %v12041_v15  ;;  %v11600_v53 = vld [vmem:[%s9332_s25 + $0xc8] ss:$0 sps:$4 sm:$0x11]   ;;  %3485 = vst.msk [vmem:[#allocation2 + $0x738] sm:$0xff] %vm514_vm1, %v12041_v15  ;;  %v3116_v57 = vsel %vm707_vm3, %v3111_v8, %v3115_v42  ;;  %v3624_v50 = vrot.slane %v12163_v1, 1 }
 0x284   : > { %v3527_v19 = vsel %vm1236_vm2, %v12165_v51, %v3526_v63  ;;  %v3410_v47 = vrot.slane %v3408_v32, 1  ;;  %v3625_v44 = vrot.slane %v8803_v5, 1  ;;  %v7733_v21 = vpop.f32.mrb[116].mxu1  ;;  %v7847_v46 = vadd.f32 %v7846_v33, %v7845_v35  ;;  %v7848_v7 = vpop.f32.mrb[118].mxu0  ;;  %v3697_v40 = vld [vmem:[#allocation2 + $0x80] sm:$0xff]  ;;  %3181 = vst.msk [vmem:[#allocation2 + $0x730] sm:$0xff] %vm497_vm0, %v3116_v57 }
 0x285   : > { %3565 = vst.msk [vmem:[#allocation2 + $0x740] sm:$0xff] %vm497_vm0, %v3527_v19  ;;  %v11607_v36 = vadd.f32 %v7844_v41, %v5681_v16  ;;  %v3415_v30 = vrot.slane %v3413_v17, 1  ;;  %v12166_v11 = vshrl.u32 %v11090_v61, 16  ;;  %v12167_v9 = vld [vmem:[#allocation33_spill] sm:$0xff]  ;;  %v7734_v24 = vpop.f32.mrb[117].mxu1  ;;  %v7849_v25 = vpop.f32.mrb[119].mxu0  ;;  %6449 = vmatmul.mubr.bf16.vlgmr.msra.gmra.mrb[224].mxu0 %v3697_v40 }
 0x286   : > { %3581 = vst.msk [vmem:[#allocation2 + $0x740] sm:$0xff] %vm514_vm1, %v12041_v15  ;;  %v3695_v59 = vld [vmem:[#allocation2 + $0x70] sm:$0xff]  ;;  %v3716_v41 = vld [vmem:[#allocation2 + $0x118] sm:$0xff]  ;;  %3197 = vst.msk [vmem:[#allocation2 + $0x730] sm:$0xff] %vm514_vm1, %v12041_v15  ;;  %v3411_v23 = vor.u32 %v3410_v47, %v3406_v38  ;;  %v3626_v5 = vsel %vm1236_vm2, %v3624_v50, %v3625_v44  ;;  %v3125_v45 = vshll.u32 %v8804_v49, 16  ;;  %v3529_v13 = vrot.slane %v8804_v49, 1 }
 0x287   : > { %v3123_v6 = vor.u32 %v12167_v9, %v12166_v11  ;;  %v7735_v20 = vadd.f32 %v7734_v24, %v7733_v21  ;;  %v7736_v55 = vpop.f32.mrb[118].mxu1  ;;  %v7850_v43 = vadd.f32 %v7849_v25, %v7848_v7  ;;  %3662 = vst.msk [vmem:[#allocation2 + $0x7d8] sm:$0xff] %vm497_vm0, %v3626_v5  ;;  %v12168_v8 = vld [vmem:[#allocation17_spill] sm:$0xff]  ;;  %v12169_v42 = vrot.slane %v11090_v61, 1  ;;  %6456 = vmatprep.mubr.bf16.mxu0 %v3716_v41  ;;  %v12171_v17 = vld [vmem:[#allocation28_spill] sm:$0xff]  ;;  %v12174_v21 = vld [vmem:[#allocation43_spill] sm:$0xff] }
 0x288   : > { %v3418_v2 = vshrl.u32 %v12168_v8, 16  ;;  %v3420_v48 = vshll.u32 %v12168_v8, 16  ;;  %v8806_v3 = vld [vmem:[%s9325_s5 + $0xc8] ss:$0 sps:$4 sm:$0x11]   ;;  %v7737_v0 = vpop.f32.mrb[119].mxu1  ;;  %v3416_v63 = vsel %vm707_vm3, %v3411_v23, %v3415_v30  ;;  %6288 = vmatmul.mubr.bf16.vlgmr.msra.gmra.mrb[224].mxu1 %v3695_v59 }
 0x289   : > { %v3714_v12 = vld [vmem:[#allocation2 + $0x108] sm:$0xff]  ;;  %3678 = vst.msk [vmem:[#allocation2 + $0x7d8] sm:$0xff] %vm514_vm1, %v12041_v15  ;;  %v3127_v4 = vrot.slane %v3125_v45, 1  ;;  %v3530_v1 = vsel %vm1236_vm2, %v12169_v42, %v3529_v13  ;;  %v3425_v38 = vshll.u32 %v11600_v53, 16  ;;  %v7738_v28 = vadd.f32 %v7737_v0, %v7736_v55  ;;  %v12173_v57 = vld [vmem:[#allocation20_spill] sm:$0xff]  ;;  %v7851_v40 = vpop.f32.mrb[120].mxu0 }
 0x28a   : > { %v12170_v32 = vld [vmem:[#allocation41_spill] sm:$0xff]  ;;  %3470 = vst.msk [vmem:[#allocation2 + $0x7c8] sm:$0xff] %vm497_vm0, %v3416_v63  ;;  %3566 = vst.msk [vmem:[#allocation2 + $0x7d0] sm:$0xff] %vm497_vm0, %v3530_v1  ;;  %v3422_v16 = vrot.slane %v3420_v48, 1  ;;  %v3627_v35 = vrot.slane %v12168_v8, 1  ;;  %v3628_v19 = vrot.slane %v11600_v53, 1  ;;  %6295 = vmatprep.mubr.bf16.mxu1 %v3714_v12 }
 0x28b   : > { %v5686_v49 = vadd.f32 %v7735_v20, %v12170_v32  ;;  %3486 = vst.msk [vmem:[#allocation2 + $0x7c8] sm:$0xff] %vm514_vm1, %v12041_v15  ;;  %v3128_v61 = vsel %vm707_vm3, %v3123_v6, %v3127_v4  ;;  %3582 = vst.msk [vmem:[#allocation2 + $0x7d0] sm:$0xff] %vm514_vm1, %v12041_v15  ;;  %v3427_v51 = vrot.slane %v3425_v38, 1  ;;  %v12172_v33 = vshrl.u32 %v12171_v17, 16  ;;  %v7852_v6 = vpop.f32.mrb[121].mxu0  ;;  %v12175_v25 = vld [vmem:[#allocation19_spill] sm:$0xff] }
 0x28c   : > { %v8807_v50 = vld [vmem:[%s9332_s25 + $0xd4] ss:$0 sps:$4 sm:$0x11]   ;;  %v5689_v7 = vadd.f32 %v7738_v28, %v12174_v21  ;;  %3182 = vst.msk [vmem:[#allocation2 + $0x7c0] sm:$0xff] %vm497_vm0, %v3128_v61  ;;  %v3423_v30 = vor.u32 %v3422_v16, %v3418_v2  ;;  %v3137_v11 = vshll.u32 %v8806_v3, 16  ;;  %v3629_v53 = vsel %vm1236_vm2, %v3627_v35, %v3628_v19  ;;  %v7739_v23 = vpop.f32.mrb[120].mxu1 }
 0x28d   : > { %v3135_v47 = vor.u32 %v12173_v57, %v12172_v33  ;;  %v11643_v44 = vadd.f32 %v7847_v46, %v5686_v49  ;;  %v8808_v9 = vld [vmem:[%s9325_s5 + $0xd4] ss:$0 sps:$4 sm:$0x11]   ;;  %3198 = vst.msk [vmem:[#allocation2 + $0x7c0] sm:$0xff] %vm514_vm1, %v12041_v15  ;;  %v3532_v24 = vrot.slane %v8806_v3, 1  ;;  %v3430_v59 = vshrl.u32 %v12175_v25, 16 }
 0x28e   : > { %v3432_v46 = vshll.u32 %v12175_v25, 16  ;;  %v11653_v41 = vadd.f32 %v7850_v43, %v5689_v7  ;;  %v7853_v5 = vadd.f32 %v7852_v6, %v7851_v40  ;;  %v7854_v45 = vpop.f32.mrb[122].mxu0  ;;  %v3715_v13 = vld [vmem:[#allocation2 + $0x110] sm:$0xff]  ;;  %v3428_v20 = vsel %vm707_vm3, %v3423_v30, %v3427_v51  ;;  %3663 = vst.msk [vmem:[#allocation2 + $0x868] sm:$0xff] %vm497_vm0, %v3629_v53  ;;  %v7740_v8 = vpop.f32.mrb[121].mxu1  ;;  %v3734_v48 = vld [vmem:[#allocation2 + $0x1a8] sm:$0xff] }
 0x28f   : > { %v3139_v55 = vrot.slane %v3137_v11, 1  ;;  %v7855_v2 = vpop.f32.mrb[123].mxu0  ;;  %3471 = vst.msk [vmem:[#allocation2 + $0x858] sm:$0xff] %vm497_vm0, %v3428_v20  ;;  %v12176_v43 = vrot.slane %v12171_v17, 1  ;;  %v3437_v12 = vshll.u32 %v8807_v50, 16  ;;  %v3630_v63 = vrot.slane %v12175_v25, 1  ;;  %6457 = vmatmul.mubr.bf16.gmra.mrb[228].mxu0 %v3715_v13 }
 0x290   : > { %3679 = vst.msk [vmem:[#allocation2 + $0x868] sm:$0xff] %vm514_vm1, %v12041_v15  ;;  %v3434_v0 = vrot.slane %v3432_v46, 1  ;;  %v7741_v4 = vadd.f32 %v7740_v8, %v7739_v23  ;;  %v7742_v42 = vpop.f32.mrb[122].mxu1  ;;  %v7856_v1 = vadd.f32 %v7855_v2, %v7854_v45  ;;  %v3713_v38 = vld [vmem:[#allocation2 + $0x100] sm:$0xff]  ;;  %3487 = vst.msk [vmem:[#allocation2 + $0x858] sm:$0xff] %vm514_vm1, %v12041_v15  ;;  %v3631_v49 = vrot.slane %v8807_v50, 1  ;;  %6464 = vmatprep.mubr.bf16.mxu0 %v3734_v48 }
 0x291   : > { %v3533_v3 = vsel %vm1236_vm2, %v12176_v43, %v3532_v24  ;;  %v3140_v32 = vsel %vm707_vm3, %v3135_v47, %v3139_v55  ;;  %v7743_v28 = vpop.f32.mrb[123].mxu1  ;;  %v3732_v16 = vld [vmem:[#allocation2 + $0x198] sm:$0xff]  ;;  %v3439_v61 = vrot.slane %v3437_v12, 1  ;;  %v12177_v51 = vld [vmem:[#allocation49_spill] sm:$0xff]  ;;  %v3149_v57 = vshll.u32 %v8808_v9, 16  ;;  %6296 = vmatmul.mubr.bf16.gmra.mrb[228].mxu1 %v3713_v38  ;;  %v7857_v25 = vpop.f32.mrb[124].mxu0 }
 0x292   : > { %3567 = vst.msk [vmem:[#allocation2 + $0x860] sm:$0xff] %vm497_vm0, %v3533_v3  ;;  %3183 = vst.msk [vmem:[#allocation2 + $0x850] sm:$0xff] %vm497_vm0, %v3140_v32  ;;  %v3435_v35 = vor.u32 %v3434_v0, %v3430_v59  ;;  %v12178_v19 = vshrl.u32 %v12177_v51, 16  ;;  %v12179_v17 = vld [vmem:[#allocation51_spill] sm:$0xff]  ;;  %v12180_v21 = vld [vmem:[#allocation44_spill] sm:$0xff]  ;;  %v7744_v7 = vadd.f32 %v7743_v28, %v7742_v42  ;;  %v3632_v50 = vsel %vm1236_vm2, %v3630_v63, %v3631_v49  ;;  %v7858_v46 = vpop.f32.mrb[125].mxu0 }
 0x293   : > { %3583 = vst.msk [vmem:[#allocation2 + $0x860] sm:$0xff] %vm514_vm1, %v12041_v15  ;;  %v5694_v47 = vadd.f32 %v7741_v4, %v12180_v21  ;;  %3199 = vst.msk [vmem:[#allocation2 + $0x850] sm:$0xff] %vm514_vm1, %v12041_v15  ;;  %v3535_v40 = vrot.slane %v8808_v9, 1  ;;  %v3151_v11 = vrot.slane %v3149_v57, 1  ;;  %v12181_v53 = vld [vmem:[#allocation45_spill] sm:$0xff]  ;;  %6303 = vmatprep.mubr.bf16.mxu1 %v3732_v16  ;;  %v12182_v59 = vrot.slane %v12177_v51, 1 }
 0x294   : > { %v3147_v33 = vor.u32 %v12179_v17, %v12178_v19  ;;  %v3440_v30 = vsel %vm707_vm3, %v3435_v35, %v3439_v61  ;;  %3664 = vst.msk [vmem:[#allocation2 + $0x8f8] sm:$0xff] %vm497_vm0, %v3632_v50  ;;  %v5697_v24 = vadd.f32 %v7744_v7, %v12181_v53  ;;  %v7745_v45 = vpop.f32.mrb[124].mxu1  ;;  %v7859_v13 = vadd.f32 %v7858_v46, %v7857_v25  ;;  %v7860_v20 = vpop.f32.mrb[126].mxu0  ;;  %v3733_v55 = vld [vmem:[#allocation2 + $0x1a0] sm:$0xff]  ;;  %v3752_v48 = vld [vmem:[#allocation2 + $0x238] sm:$0xff]  ;;  %v3731_v12 = vld [vmem:[#allocation2 + $0x190] sm:$0xff] }
 0x295   : > { %v11680_v6 = vadd.f32 %v7853_v5, %v5694_v47  ;;  %3472 = vst.msk [vmem:[#allocation2 + $0x8e8] sm:$0xff] %vm497_vm0, %v3440_v30  ;;  %v3536_v9 = vsel %vm1236_vm2, %v12182_v59, %v3535_v40  ;;  %v7746_v8 = vpop.f32.mrb[125].mxu1  ;;  %v7861_v2 = vpop.f32.mrb[127].mxu0  ;;  %v3750_v4 = vld [vmem:[#allocation2 + $0x228] sm:$0xff]  ;;  %v12184_v49 = vld [vmem:[#allocation47_spill] sm:$0xff]  ;;  %v3749_v40 = vld [vmem:[#allocation2 + $0x220] sm:$0xff] }
 0x296   : > { %3680 = vst.msk [vmem:[#allocation2 + $0x8f8] sm:$0xff] %vm514_vm1, %v12041_v15  ;;  %3488 = vst.msk [vmem:[#allocation2 + $0x8e8] sm:$0xff] %vm514_vm1, %v12041_v15  ;;  %v3152_v23 = vsel %vm707_vm3, %v3147_v33, %v3151_v11  ;;  %v11693_v5 = vadd.f32 %v7856_v1, %v5697_v24  ;;  %v7747_v43 = vadd.f32 %v7746_v8, %v7745_v45  ;;  %v7748_v3 = vpop.f32.mrb[126].mxu1  ;;  %v12183_v42 = vld [vmem:[#allocation46_spill] sm:$0xff]  ;;  %v7863_v16 = vpop.f32.mrb[128].mxu0  ;;  %v3768_v11 = vld [vmem:[#allocation2 + $0x2b8] sm:$0xff] }
 0x297   : > { %3568 = vst.msk [vmem:[#allocation2 + $0x8f0] sm:$0xff] %vm497_vm0, %v3536_v9  ;;  %3184 = vst.msk [vmem:[#allocation2 + $0x8e0] sm:$0xff] %vm497_vm0, %v3152_v23  ;;  %v7862_v0 = vadd.f32 %v7861_v2, %v7860_v20  ;;  %v7749_v63 = vpop.f32.mrb[127].mxu1  ;;  %6465 = vmatmul.mubr.bf16.gmra.mrb[232].mxu0 %v3733_v55  ;;  %v7864_v35 = vpop.f32.mrb[129].mxu0  ;;  %v3751_v17 = vld [vmem:[#allocation2 + $0x230] sm:$0xff]  ;;  %v3770_v21 = vld [vmem:[#allocation2 + $0x2c8] sm:$0xff] }
 0x298   : > { %3584 = vst.msk [vmem:[#allocation2 + $0x8f0] sm:$0xff] %vm514_vm1, %v12041_v15  ;;  %3200 = vst.msk [vmem:[#allocation2 + $0x8e0] sm:$0xff] %vm514_vm1, %v12041_v15  ;;  %v5702_v1 = vadd.f32 %v7747_v43, %v12183_v42  ;;  %v7750_v38 = vadd.f32 %v7749_v63, %v7748_v3  ;;  %6472 = vmatprep.mubr.bf16.mxu0 %v3752_v48  ;;  %v7751_v61 = vpop.f32.mrb[128].mxu1  ;;  %v7865_v51 = vadd.f32 %v7864_v35, %v7863_v16  ;;  %v7866_v19 = vpop.f32.mrb[130].mxu0  ;;  %v12185_v53 = vld [vmem:[#allocation26_spill] sm:$0xff]  ;;  %v12186_v9 = vld [vmem:[#allocation27_spill] sm:$0xff] }
 0x299   : > { %6304 = vmatmul.mubr.bf16.gmra.mrb[232].mxu1 %v3731_v12  ;;  %v7752_v33 = vpop.f32.mrb[129].mxu1  ;;  %v7867_v57 = vpop.f32.mrb[131].mxu0  ;;  %v3769_v2 = vld [vmem:[#allocation2 + $0x2c0] sm:$0xff]  ;;  %v3788_v3 = vld [vmem:[#allocation2 + $0x358] sm:$0xff] }
 0x29a   : > { %v11701_v32 = vadd.f32 %v7859_v13, %v5702_v1  ;;  %v5705_v28 = vadd.f32 %v7750_v38, %v12184_v49  ;;  %6311 = vmatprep.mubr.bf16.mxu1 %v3750_v4  ;;  %v7753_v47 = vadd.f32 %v7752_v33, %v7751_v61  ;;  %v7754_v7 = vpop.f32.mrb[130].mxu1  ;;  %v7868_v50 = vadd.f32 %v7867_v57, %v7866_v19  ;;  %v3767_v4 = vld [vmem:[#allocation2 + $0x2b0] sm:$0xff]  ;;  %v3786_v1 = vld [vmem:[#allocation2 + $0x348] sm:$0xff] }
 0x29b   : > { %v7755_v30 = vpop.f32.mrb[131].mxu1  ;;  %v12187_v38 = vld [vmem:[#allocation18_spill] sm:$0xff]  ;;  %v12188_v35 = vld [vmem:[#allocation31_spill] sm:$0xff] }
 0x29c   : > { %v11704_v15 = vadd.f32 %v7862_v0, %v5705_v28  ;;  %v5710_v24 = vadd.f32 %v7753_v47, %v12185_v53  ;;  %v7756_v25 = vadd.f32 %v7755_v30, %v7754_v7  ;;  %v7869_v23 = vpop.f32.mrb[132].mxu0  ;;  %v3787_v47 = vld [vmem:[#allocation2 + $0x350] sm:$0xff] }
 0x29d   : > { %v7870_v45 = vpop.f32.mrb[133].mxu0 }
 0x29e   : > { %v11707_v59 = vadd.f32 %v7865_v51, %v5710_v24  ;;  %v5713_v46 = vadd.f32 %v7756_v25, %v12186_v9  ;;  %v7871_v55 = vadd.f32 %v7870_v45, %v7869_v23  ;;  %v7872_v8 = vpop.f32.mrb[134].mxu0  ;;  %v3785_v24 = vld [vmem:[#allocation2 + $0x340] sm:$0xff]  ;;  %v3804_v9 = vld [vmem:[#allocation2 + $0x3d8] sm:$0xff] }
 0x29f   : > { %6473 = vmatmul.mubr.bf16.gmra.mrb[236].mxu0 %v3751_v17  ;;  %v7757_v20 = vpop.f32.mrb[132].mxu1  ;;  %v7873_v43 = vpop.f32.mrb[135].mxu0 }
 0x2a0   : > { %6480 = vmatprep.mubr.bf16.mxu0 %v3770_v21  ;;  %v11710_v13 = vadd.f32 %v7868_v50, %v5713_v46  ;;  %v7758_v48 = vpop.f32.mrb[133].mxu1  ;;  %v7874_v63 = vadd.f32 %v7873_v43, %v7872_v8  ;;  %v12189_v46 = vld [vmem:[#allocation50_spill] sm:$0xff] }
 0x2a1   : > { %6312 = vmatmul.mubr.bf16.gmra.mrb[236].mxu1 %v3749_v40  ;;  %v7759_v0 = vadd.f32 %v7758_v48, %v7757_v20  ;;  %v7760_v12 = vpop.f32.mrb[134].mxu1  ;;  %v3806_v40 = vld [vmem:[#allocation2 + $0x3e8] sm:$0xff] }
 0x2a2   : > { %6319 = vmatprep.mubr.bf16.mxu1 %v3768_v11  ;;  %v7761_v42 = vpop.f32.mrb[135].mxu1 }
 0x2a3   : > { %v5718_v49 = vadd.f32 %v7759_v0, %v12187_v38  ;;  %v7762_v28 = vadd.f32 %v7761_v42, %v7760_v12 }
 0x2a4   : > { %v7875_v51 = vpop.f32.mrb[136].mxu0 }
 0x2a5   : > { %v11713_v16 = vadd.f32 %v7871_v55, %v5718_v49  ;;  %v5721_v61 = vadd.f32 %v7762_v28, %v12188_v35  ;;  %v7876_v19 = vpop.f32.mrb[137].mxu0  ;;  %v12190_v55 = vld [vmem:[#allocation21_spill] sm:$0xff]  ;;  %v3803_v35 = vld [vmem:[#allocation2 + $0x3d0] sm:$0xff] }
 0x2a6   : > { %v7877_v57 = vadd.f32 %v7876_v19, %v7875_v51  ;;  %v7878_v21 = vpop.f32.mrb[138].mxu0  ;;  %v3822_v51 = vld [vmem:[#allocation2 + $0x468] sm:$0xff] }
 0x2a7   : > { %6481 = vmatmul.mubr.bf16.gmra.mrb[240].mxu0 %v3769_v2  ;;  %v11716_v17 = vadd.f32 %v7874_v63, %v5721_v61  ;;  %v7763_v33 = vpop.f32.mrb[136].mxu1  ;;  %v7879_v50 = vpop.f32.mrb[139].mxu0  ;;  %v3805_v63 = vld [vmem:[#allocation2 + $0x3e0] sm:$0xff]  ;;  %v12191_v19 = vld [vmem:[#allocation22_spill] sm:$0xff] }
 0x2a8   : > { %6488 = vmatprep.mubr.bf16.mxu0 %v3788_v3  ;;  %v7764_v7 = vpop.f32.mrb[137].mxu1  ;;  %v7880_v53 = vadd.f32 %v7879_v50, %v7878_v21 }
 0x2a9   : > { %6320 = vmatmul.mubr.bf16.gmra.mrb[240].mxu1 %v3767_v4  ;;  %v7765_v30 = vadd.f32 %v7764_v7, %v7763_v33  ;;  %v7766_v11 = vpop.f32.mrb[138].mxu1 }
 0x2aa   : > { %6327 = vmatprep.mubr.bf16.mxu1 %v3786_v1  ;;  %v7767_v25 = vpop.f32.mrb[139].mxu1  ;;  %v3824_v1 = vld [vmem:[#allocation2 + $0x478] sm:$0xff] }
 0x2ab   : > { %v5726_v23 = vadd.f32 %v7765_v30, %v12189_v46  ;;  %v7768_v45 = vadd.f32 %v7767_v25, %v7766_v11  ;;  %v3823_v25 = vld [vmem:[#allocation2 + $0x470] sm:$0xff] }
 0x2ac   : > { %v7881_v2 = vpop.f32.mrb[140].mxu0 }
 0x2ad   : > { %v11719_v20 = vadd.f32 %v7877_v57, %v5726_v23  ;;  %v5729_v8 = vadd.f32 %v7768_v45, %v12190_v55  ;;  %v7882_v48 = vpop.f32.mrb[141].mxu0  ;;  %v3842_v23 = vld [vmem:[#allocation2 + $0x508] sm:$0xff] }
 0x2ae   : > { %v7883_v0 = vadd.f32 %v7882_v48, %v7881_v2  ;;  %v7884_v12 = vpop.f32.mrb[142].mxu0  ;;  %v3821_v2 = vld [vmem:[#allocation2 + $0x460] sm:$0xff] }
 0x2af   : > { %6489 = vmatmul.mubr.bf16.gmra.mrb[244].mxu0 %v3787_v47  ;;  %v11722_v43 = vadd.f32 %v7880_v53, %v5729_v8  ;;  %v7769_v3 = vpop.f32.mrb[140].mxu1  ;;  %v7885_v42 = vpop.f32.mrb[143].mxu0  ;;  %v12192_v47 = vld [vmem:[#allocation23_spill] sm:$0xff] }
 0x2b0   : > { %6496 = vmatprep.mubr.bf16.mxu0 %v3806_v40  ;;  %v7770_v4 = vpop.f32.mrb[141].mxu1  ;;  %v7886_v28 = vadd.f32 %v7885_v42, %v7884_v12 }
 0x2b1   : > { %6328 = vmatmul.mubr.bf16.gmra.mrb[244].mxu1 %v3785_v24  ;;  %v7771_v38 = vadd.f32 %v7770_v4, %v7769_v3  ;;  %v7772_v49 = vpop.f32.mrb[142].mxu1  ;;  %v3840_v3 = vld [vmem:[#allocation2 + $0x4f8] sm:$0xff] }
 0x2b2   : > { %6335 = vmatprep.mubr.bf16.mxu1 %v3804_v9  ;;  %v7773_v61 = vpop.f32.mrb[143].mxu1 }
 0x2b3   : > { %v5734_v33 = vadd.f32 %v7771_v38, %v12191_v19  ;;  %v7774_v57 = vadd.f32 %v7773_v61, %v7772_v49  ;;  %v3841_v61 = vld [vmem:[#allocation2 + $0x500] sm:$0xff] }
 0x2b4   : > { %v7887_v50 = vpop.f32.mrb[144].mxu0 }
 0x2b5   : > { %v11725_v21 = vadd.f32 %v7883_v0, %v5734_v33  ;;  %v5737_v7 = vadd.f32 %v7774_v57, %v12192_v47  ;;  %v7888_v40 = vpop.f32.mrb[145].mxu0  ;;  %v3860_v33 = vld [vmem:[#allocation2 + $0x598] sm:$0xff] }
 0x2b6   : > { %v7889_v53 = vadd.f32 %v7888_v40, %v7887_v50  ;;  %v7890_v24 = vpop.f32.mrb[146].mxu0  ;;  %v3858_v40 = vld [vmem:[#allocation2 + $0x588] sm:$0xff] }
 0x2b7   : > { %6497 = vmatmul.mubr.bf16.gmra.mrb[248].mxu0 %v3805_v63  ;;  %v11728_v30 = vadd.f32 %v7886_v28, %v5737_v7  ;;  %v7775_v11 = vpop.f32.mrb[144].mxu1  ;;  %v7891_v46 = vpop.f32.mrb[147].mxu0  ;;  %v3839_v7 = vld [vmem:[#allocation2 + $0x4f0] sm:$0xff] }
 0x2b8   : > { %6504 = vmatprep.mubr.bf16.mxu0 %v3824_v1  ;;  %v7776_v9 = vpop.f32.mrb[145].mxu1  ;;  %v7892_v8 = vadd.f32 %v7891_v46, %v7890_v24 }
 0x2b9   : > { %6336 = vmatmul.mubr.bf16.gmra.mrb[248].mxu1 %v3803_v35  ;;  %v7777_v45 = vadd.f32 %v7776_v9, %v7775_v11  ;;  %v7778_v55 = vpop.f32.mrb[146].mxu1 }
 0x2ba   : > { %6343 = vmatprep.mubr.bf16.mxu1 %v3822_v51  ;;  %v7779_v48 = vpop.f32.mrb[147].mxu1 }
 0x2bb   : > { %v5742_v0 = vadd.f32 %v7777_v45, %v11262_v54  ;;  %v7780_v12 = vadd.f32 %v7779_v48, %v7778_v55 }
 0x2bc   : > { %v7893_v42 = vpop.f32.mrb[148].mxu0 }
 0x2bd   : > { %v11731_v63 = vadd.f32 %v7889_v53, %v5742_v0  ;;  %v5745_v4 = vadd.f32 %v7780_v12, %v11276_v34  ;;  %v7894_v1 = vpop.f32.mrb[149].mxu0 }
 0x2be   : > { %v7895_v28 = vadd.f32 %v7894_v1, %v7893_v42  ;;  %v7896_v35 = vpop.f32.mrb[150].mxu0  ;;  %v3876_v1 = vld [vmem:[#allocation2 + $0x618] sm:$0xff] }
 0x2bf   : > { %6505 = vmatmul.mubr.bf16.gmra.mrb[252].mxu0 %v3823_v25  ;;  %v11734_v38 = vadd.f32 %v7892_v8, %v5745_v4  ;;  %v7781_v49 = vpop.f32.mrb[148].mxu1  ;;  %v7897_v19 = vpop.f32.mrb[151].mxu0  ;;  %v3859_v8 = vld [vmem:[#allocation2 + $0x590] sm:$0xff]  ;;  %v3857_v4 = vld [vmem:[#allocation2 + $0x580] sm:$0xff] }
 0x2c0   : > { %6512 = vmatprep.mubr.bf16.mxu0 %v3842_v23  ;;  %v7782_v51 = vpop.f32.mrb[149].mxu1  ;;  %v7898_v47 = vadd.f32 %v7897_v19, %v7896_v35 }
 0x2c1   : > { %6344 = vmatmul.mubr.bf16.gmra.mrb[252].mxu1 %v3821_v2  ;;  %v7783_v54 = vadd.f32 %v7782_v51, %v7781_v49  ;;  %v7784_v57 = vpop.f32.mrb[150].mxu1 }
 0x2c2   : > { %6351 = vmatprep.mubr.bf16.mxu1 %v3840_v3  ;;  %v7785_v50 = vpop.f32.mrb[151].mxu1  ;;  %v3878_v3 = vld [vmem:[#allocation2 + $0x628] sm:$0xff] }
 0x2c3   : > { %v5750_v34 = vadd.f32 %v7783_v54, %v11299_v29  ;;  %v7786_v11 = vadd.f32 %v7785_v50, %v7784_v57 }
 0x2c4   : > { %v7899_v25 = vpop.f32.mrb[152].mxu0 }
 0x2c5   : > { %v11737_v53 = vadd.f32 %v7895_v28, %v5750_v34  ;;  %v5753_v24 = vadd.f32 %v7786_v11, %v11311_v39  ;;  %v7900_v9 = vpop.f32.mrb[153].mxu0 }
 0x2c6   : > { %v7901_v45 = vadd.f32 %v7900_v9, %v7899_v25  ;;  %v7902_v55 = vpop.f32.mrb[154].mxu0  ;;  %v3894_v9 = vld [vmem:[#allocation2 + $0x6a8] sm:$0xff] }
 0x2c7   : > { %6513 = vmatmul.mubr.bf16.gmra.mrb[0].mxu0 %v3841_v61  ;;  %v11740_v46 = vadd.f32 %v7898_v47, %v5753_v24  ;;  %v7787_v23 = vpop.f32.mrb[152].mxu1  ;;  %v7903_v48 = vpop.f32.mrb[155].mxu0  ;;  %v3877_v47 = vld [vmem:[#allocation2 + $0x620] sm:$0xff]  ;;  %v3875_v24 = vld [vmem:[#allocation2 + $0x610] sm:$0xff] }
 0x2c8   : > { %6520 = vmatprep.mubr.bf16.mxu0 %v3860_v33  ;;  %v7788_v2 = vpop.f32.mrb[153].mxu1  ;;  %v7904_v12 = vadd.f32 %v7903_v48, %v7902_v55 }
 0x2c9   : > { %6352 = vmatmul.mubr.bf16.gmra.mrb[0].mxu1 %v3839_v7  ;;  %v7789_v29 = vadd.f32 %v7788_v2, %v7787_v23  ;;  %v7790_v0 = vpop.f32.mrb[154].mxu1 }
 0x2ca   : > { %6359 = vmatprep.mubr.bf16.mxu1 %v3858_v40  ;;  %v7791_v42 = vpop.f32.mrb[155].mxu1  ;;  %v3896_v40 = vld [vmem:[#allocation2 + $0x6b8] sm:$0xff] }
 0x2cb   : > { %v5758_v39 = vadd.f32 %v7789_v29, %v11337_v10  ;;  %v7792_v49 = vadd.f32 %v7791_v42, %v7790_v0 }
 0x2cc   : > { %v7905_v61 = vpop.f32.mrb[156].mxu0 }
 0x2cd   : > { %v11743_v28 = vadd.f32 %v7901_v45, %v5758_v39  ;;  %v5761_v35 = vadd.f32 %v7792_v49, %v11345_v31  ;;  %v7906_v51 = vpop.f32.mrb[157].mxu0 }
 0x2ce   : > { %v7907_v54 = vadd.f32 %v7906_v51, %v7905_v61  ;;  %v7908_v57 = vpop.f32.mrb[158].mxu0  ;;  %v3912_v51 = vld [vmem:[#allocation2 + $0x738] sm:$0xff] }
 0x2cf   : > { %6521 = vmatmul.mubr.bf16.gmra.mrb[4].mxu0 %v3859_v8  ;;  %v11746_v19 = vadd.f32 %v7904_v12, %v5761_v35  ;;  %v7793_v33 = vpop.f32.mrb[156].mxu1  ;;  %v7909_v50 = vpop.f32.mrb[159].mxu0  ;;  %v3895_v12 = vld [vmem:[#allocation2 + $0x6b0] sm:$0xff]  ;;  %v3893_v35 = vld [vmem:[#allocation2 + $0x6a0] sm:$0xff] }
 0x2d0   : > { %6528 = vmatprep.mubr.bf16.mxu0 %v3878_v3  ;;  %v7794_v7 = vpop.f32.mrb[157].mxu1  ;;  %v7910_v11 = vadd.f32 %v7909_v50, %v7908_v57 }
 0x2d1   : > { %6360 = vmatmul.mubr.bf16.gmra.mrb[4].mxu1 %v3857_v4  ;;  %v7795_v10 = vadd.f32 %v7794_v7, %v7793_v33  ;;  %v7796_v34 = vpop.f32.mrb[158].mxu1 }
 0x2d2   : > { %6367 = vmatprep.mubr.bf16.mxu1 %v3876_v1  ;;  %v7797_v25 = vpop.f32.mrb[159].mxu1  ;;  %v3914_v1 = vld [vmem:[#allocation2 + $0x748] sm:$0xff] }
 0x2d3   : > { %v5766_v31 = vadd.f32 %v7795_v10, %v11371_v60  ;;  %v7798_v23 = vadd.f32 %v7797_v25, %v7796_v34 }
 0x2d4   : > { %v8039_v8 = vpop.f32.mrb[160].mxu0 }
 0x2d5   : > { %v11749_v45 = vadd.f32 %v7907_v54, %v5766_v31  ;;  %v5769_v55 = vadd.f32 %v7798_v23, %v11383_v56  ;;  %v8040_v2 = vpop.f32.mrb[161].mxu0 }
 0x2d6   : > { %v8041_v29 = vadd.f32 %v8040_v2, %v8039_v8  ;;  %v8042_v0 = vpop.f32.mrb[162].mxu0  ;;  %v3930_v2 = vld [vmem:[#allocation2 + $0x7c8] sm:$0xff] }
 0x2d7   : > { %6529 = vmatmul.mubr.bf16.gmra.mrb[8].mxu0 %v3877_v47  ;;  %v11752_v48 = vadd.f32 %v7910_v11, %v5769_v55  ;;  %v7927_v3 = vpop.f32.mrb[160].mxu1  ;;  %v8043_v42 = vpop.f32.mrb[163].mxu0  ;;  %v3913_v11 = vld [vmem:[#allocation2 + $0x740] sm:$0xff]  ;;  %v3911_v55 = vld [vmem:[#allocation2 + $0x730] sm:$0xff] }
 0x2d8   : > { %6536 = vmatprep.mubr.bf16.mxu0 %v3896_v40  ;;  %v7928_v4 = vpop.f32.mrb[161].mxu1  ;;  %v8044_v49 = vadd.f32 %v8043_v42, %v8042_v0 }
 0x2d9   : > { %6368 = vmatmul.mubr.bf16.gmra.mrb[8].mxu1 %v3875_v24  ;;  %v7929_v60 = vadd.f32 %v7928_v4, %v7927_v3  ;;  %v7930_v39 = vpop.f32.mrb[162].mxu1 }
 0x2da   : > { %6375 = vmatprep.mubr.bf16.mxu1 %v3894_v9  ;;  %v7931_v61 = vpop.f32.mrb[163].mxu1  ;;  %v3932_v9 = vld [vmem:[#allocation2 + $0x7d8] sm:$0xff] }
 0x2db   : > { %v5968_v56 = vadd.f32 %v7929_v60, %v11406_v22  ;;  %v7932_v33 = vadd.f32 %v7931_v61, %v7930_v39 }
 0x2dc   : > { %v8045_v47 = vpop.f32.mrb[164].mxu0 }
 0x2dd   : > { %v11755_v54 = vadd.f32 %v8041_v29, %v5968_v56  ;;  %v5971_v57 = vadd.f32 %v7932_v33, %v11416_v37  ;;  %v8046_v7 = vpop.f32.mrb[165].mxu0 }
 0x2de   : > { %v8047_v10 = vadd.f32 %v8046_v7, %v8045_v47  ;;  %v8048_v34 = vpop.f32.mrb[166].mxu0  ;;  %v3948_v7 = vld [vmem:[#allocation2 + $0x858] sm:$0xff] }
 0x2df   : > { %6537 = vmatmul.mubr.bf16.gmra.mrb[12].mxu0 %v3895_v12  ;;  %v11758_v50 = vadd.f32 %v8044_v49, %v5971_v57  ;;  %v7933_v40 = vpop.f32.mrb[164].mxu1  ;;  %v8049_v25 = vpop.f32.mrb[167].mxu0  ;;  %v3931_v49 = vld [vmem:[#allocation2 + $0x7d0] sm:$0xff]  ;;  %v3929_v57 = vld [vmem:[#allocation2 + $0x7c0] sm:$0xff] }
 0x2e0   : > { %6544 = vmatprep.mubr.bf16.mxu0 %v3914_v1  ;;  %v7934_v24 = vpop.f32.mrb[165].mxu1  ;;  %v8050_v23 = vadd.f32 %v8049_v25, %v8048_v34 }
 0x2e1   : > { %6376 = vmatmul.mubr.bf16.gmra.mrb[12].mxu1 %v3893_v35  ;;  %v7935_v22 = vadd.f32 %v7934_v24, %v7933_v40  ;;  %v7936_v31 = vpop.f32.mrb[166].mxu1 }
 0x2e2   : > { %6383 = vmatprep.mubr.bf16.mxu1 %v3912_v51  ;;  %v7937_v8 = vpop.f32.mrb[167].mxu1  ;;  %v3950_v51 = vld [vmem:[#allocation2 + $0x868] sm:$0xff] }
 0x2e3   : > { %v5976_v37 = vadd.f32 %v7935_v22, %v11445_v26  ;;  %v7938_v3 = vadd.f32 %v7937_v8, %v7936_v31 }
 0x2e4   : > { %v8051_v12 = vpop.f32.mrb[168].mxu0 }
 0x2e5   : > { %v11761_v29 = vadd.f32 %v8047_v10, %v5976_v37  ;;  %v5979_v0 = vadd.f32 %v7938_v3, %v11454_v62  ;;  %v8052_v4 = vpop.f32.mrb[169].mxu0 }
 0x2e6   : > { %v8053_v60 = vadd.f32 %v8052_v4, %v8051_v12  ;;  %v8054_v39 = vpop.f32.mrb[170].mxu0  ;;  %v3966_v4 = vld [vmem:[#allocation2 + $0x8e8] sm:$0xff] }
 0x2e7   : > { %6545 = vmatmul.mubr.bf16.gmra.mrb[16].mxu0 %v3913_v11  ;;  %v11764_v42 = vadd.f32 %v8050_v23, %v5979_v0  ;;  %v7939_v1 = vpop.f32.mrb[168].mxu1  ;;  %v8055_v61 = vpop.f32.mrb[171].mxu0  ;;  %v3949_v23 = vld [vmem:[#allocation2 + $0x860] sm:$0xff]  ;;  %v3947_v0 = vld [vmem:[#allocation2 + $0x850] sm:$0xff] }
 0x2e8   : > { %6552 = vmatprep.mubr.bf16.mxu0 %v3932_v9  ;;  %v7940_v35 = vpop.f32.mrb[169].mxu1  ;;  %v8056_v33 = vadd.f32 %v8055_v61, %v8054_v39 }
 0x2e9   : > { %6384 = vmatmul.mubr.bf16.gmra.mrb[16].mxu1 %v3911_v55  ;;  %v7941_v26 = vadd.f32 %v7940_v35, %v7939_v1  ;;  %v7942_v56 = vpop.f32.mrb[170].mxu1 }
 0x2ea   : > { %6391 = vmatprep.mubr.bf16.mxu1 %v3930_v2  ;;  %v7943_v47 = vpop.f32.mrb[171].mxu1  ;;  %v3968_v2 = vld [vmem:[#allocation2 + $0x8f8] sm:$0xff] }
 0x2eb   : > { %v5984_v62 = vadd.f32 %v7941_v26, %v11490_v52  ;;  %v7944_v40 = vadd.f32 %v7943_v47, %v7942_v56 }
 0x2ec   : > { %v8057_v11 = vpop.f32.mrb[172].mxu0 }
 0x2ed   : > { %v11767_v10 = vadd.f32 %v8053_v60, %v5984_v62  ;;  %v5987_v34 = vadd.f32 %v7944_v40, %v11505_v58  ;;  %v8058_v24 = vpop.f32.mrb[173].mxu0  ;;  %v3965_v40 = vld [vmem:[#allocation2 + $0x8e0] sm:$0xff] }
 0x2ee   : > { %v8059_v22 = vadd.f32 %v8058_v24, %v8057_v11  ;;  %v8060_v31 = vpop.f32.mrb[174].mxu0 }
 0x2ef   : > { %6553 = vmatmul.mubr.bf16.gmra.mrb[20].mxu0 %v3931_v49  ;;  %v11770_v25 = vadd.f32 %v8056_v33, %v5987_v34  ;;  %v7945_v9 = vpop.f32.mrb[172].mxu1  ;;  %v8061_v8 = vpop.f32.mrb[175].mxu0  ;;  %v3967_v33 = vld [vmem:[#allocation2 + $0x8f0] sm:$0xff] }
 0x2f0   : > { %6560 = vmatprep.mubr.bf16.mxu0 %v3950_v51  ;;  %v7946_v55 = vpop.f32.mrb[173].mxu1  ;;  %v8062_v3 = vadd.f32 %v8061_v8, %v8060_v31 }
 0x2f1   : > { %6392 = vmatmul.mubr.bf16.gmra.mrb[20].mxu1 %v3929_v57  ;;  %v7947_v52 = vadd.f32 %v7946_v55, %v7945_v9  ;;  %v7948_v37 = vpop.f32.mrb[174].mxu1 }
 0x2f2   : > { %6399 = vmatprep.mubr.bf16.mxu1 %v3948_v7  ;;  %v7949_v12 = vpop.f32.mrb[175].mxu1 }
 0x2f3   : > { %v5992_v58 = vadd.f32 %v7947_v52, %v11546_v14  ;;  %v7950_v1 = vadd.f32 %v7949_v12, %v7948_v37 }
 0x2f4   : > { %v8063_v49 = vpop.f32.mrb[176].mxu0 }
 0x2f5   : > { %v11773_v60 = vadd.f32 %v8059_v22, %v5992_v58  ;;  %v5995_v39 = vadd.f32 %v7950_v1, %v11555_v27  ;;  %v8064_v35 = vpop.f32.mrb[177].mxu0 }
 0x2f6   : > { %v8065_v26 = vadd.f32 %v8064_v35, %v8063_v49  ;;  %v8066_v56 = vpop.f32.mrb[178].mxu0 }
 0x2f7   : > { %6561 = vmatmul.mubr.bf16.gmra.mrb[24].mxu0 %v3949_v23  ;;  %v11776_v61 = vadd.f32 %v8062_v3, %v5995_v39  ;;  %v7951_v51 = vpop.f32.mrb[176].mxu1  ;;  %v8067_v47 = vpop.f32.mrb[179].mxu0 }
 0x2f8   : > { %6568 = vmatprep.mubr.bf16.mxu0 %v3968_v2  ;;  %v7952_v57 = vpop.f32.mrb[177].mxu1  ;;  %v8068_v62 = vadd.f32 %v8067_v47, %v8066_v56 }
 0x2f9   : > { %6400 = vmatmul.mubr.bf16.gmra.mrb[24].mxu1 %v3947_v0  ;;  %v7953_v7 = vadd.f32 %v7952_v57, %v7951_v51  ;;  %v7954_v14 = vpop.f32.mrb[178].mxu1 }
 0x2fa   : > { %6407 = vmatprep.mubr.bf16.mxu1 %v3966_v4  ;;  %v7955_v34 = vpop.f32.mrb[179].mxu1 }
 0x2fb   : > { %v6000_v11 = vadd.f32 %v7953_v7, %v11590_v18  ;;  %v7956_v27 = vadd.f32 %v7955_v34, %v7954_v14 }
 0x2fd   : > { %v11779_v24 = vadd.f32 %v8065_v26, %v6000_v11  ;;  %v6003_v9 = vadd.f32 %v7956_v27, %v11607_v36  ;;  %v8069_v22 = vpop.f32.mrb[180].mxu0 }
 0x2fe   : > { %v8070_v31 = vpop.f32.mrb[181].mxu0 }
 0x2ff   : > { %6569 = vmatmul.mubr.bf16.gmra.mrb[28].mxu0 %v3967_v33  ;;  %v11782_v23 = vadd.f32 %v8068_v62, %v6003_v9  ;;  %v7957_v55 = vpop.f32.mrb[180].mxu1  ;;  %v8071_v8 = vadd.f32 %v8070_v31, %v8069_v22  ;;  %v8072_v2 = vpop.f32.mrb[182].mxu0 }
 0x300   : > { %v7958_v52 = vpop.f32.mrb[181].mxu1  ;;  %v8073_v37 = vpop.f32.mrb[183].mxu0 }
 0x301   : > { %6408 = vmatmul.mubr.bf16.gmra.mrb[28].mxu1 %v3965_v40  ;;  %v7959_v3 = vadd.f32 %v7958_v52, %v7957_v55  ;;  %v7960_v0 = vpop.f32.mrb[182].mxu1  ;;  %v8074_v12 = vadd.f32 %v8073_v37, %v8072_v2 }
 0x302   : > { %v7961_v4 = vpop.f32.mrb[183].mxu1 }
 0x303   : > { %v6008_v18 = vadd.f32 %v7959_v3, %v11643_v44  ;;  %v7962_v58 = vadd.f32 %v7961_v4, %v7960_v0 }
 0x305   : > { %v11785_v1 = vadd.f32 %v8071_v8, %v6008_v18  ;;  %v6011_v36 = vadd.f32 %v7962_v58, %v11653_v41  ;;  %v8075_v39 = vpop.f32.mrb[184].mxu0 }
 0x306   : > { %v8076_v49 = vpop.f32.mrb[185].mxu0 }
 0x307   : > { %v11788_v35 = vadd.f32 %v8074_v12, %v6011_v36  ;;  %v7963_v51 = vpop.f32.mrb[184].mxu1  ;;  %v8077_v26 = vadd.f32 %v8076_v49, %v8075_v39  ;;  %v8078_v56 = vpop.f32.mrb[186].mxu0 }
 0x308   : > { %v7964_v33 = vpop.f32.mrb[185].mxu1  ;;  %v8079_v57 = vpop.f32.mrb[187].mxu0 }
 0x309   : > { %v7965_v47 = vadd.f32 %v7964_v33, %v7963_v51  ;;  %v7966_v7 = vpop.f32.mrb[186].mxu1  ;;  %v8080_v14 = vadd.f32 %v8079_v57, %v8078_v56 }
 0x30a   : > { %v7967_v62 = vpop.f32.mrb[187].mxu1 }
 0x30b   : > { %v6016_v44 = vadd.f32 %v7965_v47, %v11680_v6  ;;  %v7968_v40 = vadd.f32 %v7967_v62, %v7966_v7 }
 0x30d   : > { %v11791_v34 = vadd.f32 %v8077_v26, %v6016_v44  ;;  %v6019_v41 = vadd.f32 %v7968_v40, %v11693_v5  ;;  %v8081_v11 = vpop.f32.mrb[188].mxu0 }
 0x30e   : > { %v8082_v27 = vpop.f32.mrb[189].mxu0 }
 0x30f   : > { %v11794_v9 = vadd.f32 %v8080_v14, %v6019_v41  ;;  %v7969_v22 = vpop.f32.mrb[188].mxu1  ;;  %v8083_v31 = vadd.f32 %v8082_v27, %v8081_v11  ;;  %v8084_v55 = vpop.f32.mrb[190].mxu0 }
 0x310   : > { %v7970_v8 = vpop.f32.mrb[189].mxu1  ;;  %v8085_v2 = vpop.f32.mrb[191].mxu0 }
 0x311   : > { %v7971_v52 = vadd.f32 %v7970_v8, %v7969_v22  ;;  %v7972_v37 = vpop.f32.mrb[190].mxu1  ;;  %v8086_v3 = vadd.f32 %v8085_v2, %v8084_v55 }
 0x312   : > { %v7973_v0 = vpop.f32.mrb[191].mxu1 }
 0x313   : > { %v6024_v6 = vadd.f32 %v7971_v52, %v11701_v32  ;;  %v7974_v12 = vadd.f32 %v7973_v0, %v7972_v37 }
 0x315   : > { %v11797_v4 = vadd.f32 %v8083_v31, %v6024_v6  ;;  %v6027_v5 = vadd.f32 %v7974_v12, %v11704_v15  ;;  %v8087_v18 = vpop.f32.mrb[192].mxu0 }
 0x316   : > { %v8088_v58 = vpop.f32.mrb[193].mxu0 }
 0x317   : > { %v11800_v36 = vadd.f32 %v8086_v3, %v6027_v5  ;;  %v7975_v39 = vpop.f32.mrb[192].mxu1  ;;  %v8089_v49 = vadd.f32 %v8088_v58, %v8087_v18  ;;  %v8090_v51 = vpop.f32.mrb[194].mxu0 }
 0x318   : > { %v7976_v26 = vpop.f32.mrb[193].mxu1  ;;  %v8091_v56 = vpop.f32.mrb[195].mxu0 }
 0x319   : > { %v7977_v33 = vadd.f32 %v7976_v26, %v7975_v39  ;;  %v7978_v57 = vpop.f32.mrb[194].mxu1  ;;  %v8092_v47 = vadd.f32 %v8091_v56, %v8090_v51 }
 0x31a   : > { %v7979_v7 = vpop.f32.mrb[195].mxu1 }
 0x31b   : > { %v6032_v32 = vadd.f32 %v7977_v33, %v11707_v59  ;;  %v7980_v14 = vadd.f32 %v7979_v7, %v7978_v57 }
 0x31d   : > { %v11803_v62 = vadd.f32 %v8089_v49, %v6032_v32  ;;  %v6035_v15 = vadd.f32 %v7980_v14, %v11710_v13  ;;  %v8093_v44 = vpop.f32.mrb[196].mxu0 }
 0x31e   : > { %v8094_v40 = vpop.f32.mrb[197].mxu0 }
 0x31f   : > { %v11806_v41 = vadd.f32 %v8092_v47, %v6035_v15  ;;  %v7981_v11 = vpop.f32.mrb[196].mxu1  ;;  %v8095_v27 = vadd.f32 %v8094_v40, %v8093_v44  ;;  %v8096_v22 = vpop.f32.mrb[198].mxu0 }
 0x320   : > { %v7982_v31 = vpop.f32.mrb[197].mxu1  ;;  %v8097_v55 = vpop.f32.mrb[199].mxu0 }
 0x321   : > { %v7983_v8 = vadd.f32 %v7982_v31, %v7981_v11  ;;  %v7984_v2 = vpop.f32.mrb[198].mxu1  ;;  %v8098_v52 = vadd.f32 %v8097_v55, %v8096_v22 }
 0x322   : > { %v7985_v37 = vpop.f32.mrb[199].mxu1 }
 0x323   : > { %v6040_v59 = vadd.f32 %v7983_v8, %v11713_v16  ;;  %v7986_v3 = vadd.f32 %v7985_v37, %v7984_v2 }
 0x325   : > { %v11809_v0 = vadd.f32 %v8095_v27, %v6040_v59  ;;  %v6043_v13 = vadd.f32 %v7986_v3, %v11716_v17  ;;  %v8099_v6 = vpop.f32.mrb[200].mxu0 }
 0x326   : > { %v8100_v12 = vpop.f32.mrb[201].mxu0 }
 0x327   : > { %v11812_v5 = vadd.f32 %v8098_v52, %v6043_v13  ;;  %v7987_v18 = vpop.f32.mrb[200].mxu1  ;;  %v8101_v58 = vadd.f32 %v8100_v12, %v8099_v6  ;;  %v8102_v39 = vpop.f32.mrb[202].mxu0 }
 0x328   : > { %v7988_v49 = vpop.f32.mrb[201].mxu1  ;;  %v8103_v51 = vpop.f32.mrb[203].mxu0 }
 0x329   : > { %v7989_v26 = vadd.f32 %v7988_v49, %v7987_v18  ;;  %v7990_v56 = vpop.f32.mrb[202].mxu1  ;;  %v8104_v33 = vadd.f32 %v8103_v51, %v8102_v39 }
 0x32a   : > { %v7991_v57 = vpop.f32.mrb[203].mxu1 }
 0x32b   : > { %v6048_v16 = vadd.f32 %v7989_v26, %v11719_v20  ;;  %v7992_v47 = vadd.f32 %v7991_v57, %v7990_v56 }
 0x32d   : > { %v11815_v7 = vadd.f32 %v8101_v58, %v6048_v16  ;;  %v6051_v17 = vadd.f32 %v7992_v47, %v11722_v43  ;;  %v8105_v32 = vpop.f32.mrb[204].mxu0 }
 0x32e   : > { %v8106_v14 = vpop.f32.mrb[205].mxu0 }
 0x32f   : > { %v11818_v15 = vadd.f32 %v8104_v33, %v6051_v17  ;;  %v7993_v44 = vpop.f32.mrb[204].mxu1  ;;  %v8107_v40 = vadd.f32 %v8106_v14, %v8105_v32  ;;  %v8108_v11 = vpop.f32.mrb[206].mxu0 }
 0x330   : > { %v7994_v27 = vpop.f32.mrb[205].mxu1  ;;  %v8109_v22 = vpop.f32.mrb[207].mxu0 }
 0x331   : > { %v7995_v31 = vadd.f32 %v7994_v27, %v7993_v44  ;;  %v7996_v55 = vpop.f32.mrb[206].mxu1  ;;  %v8110_v8 = vadd.f32 %v8109_v22, %v8108_v11 }
 0x332   : > { %v7997_v2 = vpop.f32.mrb[207].mxu1 }
 0x333   : > { %v6056_v20 = vadd.f32 %v7995_v31, %v11725_v21  ;;  %v7998_v52 = vadd.f32 %v7997_v2, %v7996_v55 }
 0x335   : > { %v11821_v37 = vadd.f32 %v8107_v40, %v6056_v20  ;;  %v6059_v43 = vadd.f32 %v7998_v52, %v11728_v30  ;;  %v8111_v59 = vpop.f32.mrb[208].mxu0 }
 0x336   : > { %v8112_v3 = vpop.f32.mrb[209].mxu0 }
 0x337   : > { %v11824_v13 = vadd.f32 %v8110_v8, %v6059_v43  ;;  %v8113_v12 = vadd.f32 %v8112_v3, %v8111_v59  ;;  %v8114_v18 = vpop.f32.mrb[210].mxu0 }
 0x338   : > { %v7999_v6 = vpop.f32.mrb[208].mxu1  ;;  %v8115_v39 = vpop.f32.mrb[211].mxu0 }
 0x339   : > { %v8000_v58 = vpop.f32.mrb[209].mxu1  ;;  %v8116_v26 = vadd.f32 %v8115_v39, %v8114_v18 }
 0x33a   : > { %v8001_v49 = vadd.f32 %v8000_v58, %v7999_v6  ;;  %v8002_v51 = vpop.f32.mrb[210].mxu1 }
 0x33b   : > { %v8003_v56 = vpop.f32.mrb[211].mxu1 }
 0x33c   : > { %v6064_v21 = vadd.f32 %v8001_v49, %v11731_v63  ;;  %v8004_v33 = vadd.f32 %v8003_v56, %v8002_v51 }
 0x33d   : > { %v8117_v16 = vpop.f32.mrb[212].mxu0 }
 0x33e   : > { %v11827_v57 = vadd.f32 %v8113_v12, %v6064_v21  ;;  %v6067_v30 = vadd.f32 %v8004_v33, %v11734_v38  ;;  %v8118_v47 = vpop.f32.mrb[213].mxu0 }
 0x33f   : > { %v8119_v14 = vadd.f32 %v8118_v47, %v8117_v16  ;;  %v8120_v44 = vpop.f32.mrb[214].mxu0 }
 0x340   : > { %v11830_v17 = vadd.f32 %v8116_v26, %v6067_v30  ;;  %v8005_v32 = vpop.f32.mrb[212].mxu1  ;;  %v8121_v11 = vpop.f32.mrb[215].mxu0 }
 0x341   : > { %v8006_v40 = vpop.f32.mrb[213].mxu1  ;;  %v8122_v31 = vadd.f32 %v8121_v11, %v8120_v44 }
 0x342   : > { %v8007_v27 = vadd.f32 %v8006_v40, %v8005_v32  ;;  %v8008_v22 = vpop.f32.mrb[214].mxu1 }
 0x343   : > { %v8009_v55 = vpop.f32.mrb[215].mxu1 }
 0x344   : > { %v6072_v63 = vadd.f32 %v8007_v27, %v11737_v53  ;;  %v8010_v8 = vadd.f32 %v8009_v55, %v8008_v22 }
 0x345   : > { %v8123_v20 = vpop.f32.mrb[216].mxu0 }
 0x346   : > { %v11833_v2 = vadd.f32 %v8119_v14, %v6072_v63  ;;  %v6075_v38 = vadd.f32 %v8010_v8, %v11740_v46  ;;  %v8124_v52 = vpop.f32.mrb[217].mxu0 }
 0x347   : > { %v8125_v3 = vadd.f32 %v8124_v52, %v8123_v20  ;;  %v8126_v6 = vpop.f32.mrb[218].mxu0 }
 0x348   : > { %v11836_v43 = vadd.f32 %v8122_v31, %v6075_v38  ;;  %v8127_v18 = vpop.f32.mrb[219].mxu0 }
 0x349   : > { %v8128_v49 = vadd.f32 %v8127_v18, %v8126_v6 }
 0x34a   : > { %v8011_v59 = vpop.f32.mrb[216].mxu1 }
 0x34b   : > { %v8012_v12 = vpop.f32.mrb[217].mxu1 }
 0x34c   : > { %v8013_v58 = vadd.f32 %v8012_v12, %v8011_v59  ;;  %v8014_v39 = vpop.f32.mrb[218].mxu1 }
 0x34d   : > { %v8015_v51 = vpop.f32.mrb[219].mxu1 }
 0x34e   : > { %v6080_v53 = vadd.f32 %v8013_v58, %v11743_v28  ;;  %v8016_v26 = vadd.f32 %v8015_v51, %v8014_v39  ;;  %v8129_v21 = vpop.f32.mrb[220].mxu0 }
 0x34f   : > { %v8130_v33 = vpop.f32.mrb[221].mxu0 }
 0x350   : > { %v11839_v56 = vadd.f32 %v8125_v3, %v6080_v53  ;;  %v6083_v46 = vadd.f32 %v8016_v26, %v11746_v19  ;;  %v8131_v47 = vadd.f32 %v8130_v33, %v8129_v21  ;;  %v8132_v32 = vpop.f32.mrb[222].mxu0 }
 0x351   : > { %v8133_v44 = vpop.f32.mrb[223].mxu0 }
 0x352   : > { %v11842_v30 = vadd.f32 %v8128_v49, %v6083_v46  ;;  %v8017_v16 = vpop.f32.mrb[220].mxu1  ;;  %v8134_v27 = vadd.f32 %v8133_v44, %v8132_v32 }
 0x353   : > { %v8018_v14 = vpop.f32.mrb[221].mxu1 }
 0x354   : > { %v8019_v40 = vadd.f32 %v8018_v14, %v8017_v16  ;;  %v8020_v11 = vpop.f32.mrb[222].mxu1 }
 0x355   : > { %v8021_v22 = vpop.f32.mrb[223].mxu1 }
 0x356   : > { %v6088_v28 = vadd.f32 %v8019_v40, %v11749_v45  ;;  %v8022_v31 = vadd.f32 %v8021_v22, %v8020_v11 }
 0x358   : > { %v11845_v55 = vadd.f32 %v8131_v47, %v6088_v28  ;;  %v6091_v19 = vadd.f32 %v8022_v31, %v11752_v48  ;;  %v8263_v63 = vpop.f32.mrb[224].mxu0 }
 0x359   : > { %v8264_v8 = vpop.f32.mrb[225].mxu0 }
 0x35a   : > { %v11848_v38 = vadd.f32 %v8134_v27, %v6091_v19  ;;  %v8265_v52 = vadd.f32 %v8264_v8, %v8263_v63  ;;  %v8266_v59 = vpop.f32.mrb[226].mxu0 }
 0x35b   : > { %v8151_v20 = vpop.f32.mrb[224].mxu1  ;;  %v8267_v6 = vpop.f32.mrb[227].mxu0 }
 0x35c   : > { %v8152_v3 = vpop.f32.mrb[225].mxu1  ;;  %v8268_v58 = vadd.f32 %v8267_v6, %v8266_v59 }
 0x35d   : > { %v8153_v12 = vadd.f32 %v8152_v3, %v8151_v20  ;;  %v8154_v18 = vpop.f32.mrb[226].mxu1 }
 0x35e   : > { %v8155_v39 = vpop.f32.mrb[227].mxu1 }
 0x35f   : > { %v6290_v45 = vadd.f32 %v8153_v12, %v11755_v54  ;;  %v8156_v49 = vadd.f32 %v8155_v39, %v8154_v18 }
 0x361   : > { %v6451_v51 = vadd.f32 %v8265_v52, %v6290_v45  ;;  %v6293_v48 = vadd.f32 %v8156_v49, %v11758_v50 }
 0x362   : > { %v8269_v53 = vpop.f32.mrb[228].mxu0 }
 0x363   : > { %v8270_v26 = vpop.f32.mrb[229].mxu0  ;;  %v6577_v46 = vmax.f32 %v6451_v51, 0.0  ;;  %v6454_v21 = vadd.f32 %v8268_v58, %v6293_v48 }
 0x364   : > { %v8157_v33 = vpop.f32.mrb[228].mxu1  ;;  %v8271_v16 = vadd.f32 %v8270_v26, %v8269_v53  ;;  %v8272_v47 = vpop.f32.mrb[230].mxu0 }
 0x365   : > { %v8158_v32 = vpop.f32.mrb[229].mxu1  ;;  %v8273_v14 = vpop.f32.mrb[231].mxu0  ;;  %6609 = vst [vmem:[%s11853_s23] sm:$0xff] %v6577_v46  ;;  %v6578_v54 = vmax.f32 %v6454_v21, 0.0 }
 0x366   : > { %v8159_v44 = vadd.f32 %v8158_v32, %v8157_v33  ;;  %v8160_v40 = vpop.f32.mrb[230].mxu1  ;;  %v8274_v11 = vadd.f32 %v8273_v14, %v8272_v47 }
 0x367   : > { %v8161_v50 = vpop.f32.mrb[231].mxu1  ;;  %6610 = vst [vmem:[%s11853_s23 + $0x8] sm:$0xff] %v6578_v54 }
 0x368   : > { %v6298_v27 = vadd.f32 %v8159_v44, %v11761_v29  ;;  %v8162_v22 = vadd.f32 %v8161_v50, %v8160_v40 }
 0x36a   : > { %v6459_v28 = vadd.f32 %v8271_v16, %v6298_v27  ;;  %v6301_v31 = vadd.f32 %v8162_v22, %v11764_v42  ;;  %v8275_v19 = vpop.f32.mrb[232].mxu0 }
 0x36b   : > { %v8276_v63 = vpop.f32.mrb[233].mxu0 }
 0x36c   : > { %v6579_v8 = vmax.f32 %v6459_v28, 0.0  ;;  %v6462_v20 = vadd.f32 %v8274_v11, %v6301_v31  ;;  %v8163_v52 = vpop.f32.mrb[232].mxu1  ;;  %v8277_v59 = vadd.f32 %v8276_v63, %v8275_v19  ;;  %v8278_v3 = vpop.f32.mrb[234].mxu0 }
 0x36d   : > { %v8164_v6 = vpop.f32.mrb[233].mxu1  ;;  %v8279_v12 = vpop.f32.mrb[235].mxu0 }
 0x36e   : > { %6611 = vst [vmem:[%s11853_s23 + $0x10] sm:$0xff] %v6579_v8  ;;  %v6580_v18 = vmax.f32 %v6462_v20, 0.0  ;;  %v8165_v58 = vadd.f32 %v8164_v6, %v8163_v52  ;;  %v8166_v39 = vpop.f32.mrb[234].mxu1  ;;  %v8280_v45 = vadd.f32 %v8279_v12, %v8278_v3 }
 0x36f   : > { %v8167_v29 = vpop.f32.mrb[235].mxu1 }
 0x370   : > { %6612 = vst [vmem:[%s11853_s23 + $0x18] sm:$0xff] %v6580_v18  ;;  %v6306_v42 = vadd.f32 %v8165_v58, %v11767_v10  ;;  %v8168_v49 = vadd.f32 %v8167_v29, %v8166_v39 }
 0x372   : > { %v6467_v51 = vadd.f32 %v8277_v59, %v6306_v42  ;;  %v6309_v48 = vadd.f32 %v8168_v49, %v11770_v25  ;;  %v8281_v53 = vpop.f32.mrb[236].mxu0 }
 0x373   : > { %v8282_v26 = vpop.f32.mrb[237].mxu0 }
 0x374   : > { %v6581_v46 = vmax.f32 %v6467_v51, 0.0  ;;  %v6470_v21 = vadd.f32 %v8280_v45, %v6309_v48  ;;  %v8169_v33 = vpop.f32.mrb[236].mxu1  ;;  %v8283_v16 = vadd.f32 %v8282_v26, %v8281_v53  ;;  %v8284_v47 = vpop.f32.mrb[238].mxu0 }
 0x375   : > { %v8170_v32 = vpop.f32.mrb[237].mxu1  ;;  %v8285_v14 = vpop.f32.mrb[239].mxu0 }
 0x376   : > { %6613 = vst [vmem:[%s11853_s23 + $0x20] sm:$0xff] %v6581_v46  ;;  %v6582_v54 = vmax.f32 %v6470_v21, 0.0  ;;  %v8171_v44 = vadd.f32 %v8170_v32, %v8169_v33  ;;  %v8172_v40 = vpop.f32.mrb[238].mxu1  ;;  %v8286_v11 = vadd.f32 %v8285_v14, %v8284_v47 }
 0x377   : > { %v8173_v10 = vpop.f32.mrb[239].mxu1 }
 0x378   : > { %6614 = vst [vmem:[%s11853_s23 + $0x28] sm:$0xff] %v6582_v54  ;;  %v6314_v25 = vadd.f32 %v8171_v44, %v11773_v60  ;;  %v8174_v50 = vadd.f32 %v8173_v10, %v8172_v40 }
 0x37a   : > { %v6475_v27 = vadd.f32 %v8283_v16, %v6314_v25  ;;  %v6317_v22 = vadd.f32 %v8174_v50, %v11776_v61  ;;  %v8287_v28 = vpop.f32.mrb[240].mxu0 }
 0x37b   : > { %v8288_v31 = vpop.f32.mrb[241].mxu0 }
 0x37c   : > { %v6583_v19 = vmax.f32 %v6475_v27, 0.0  ;;  %v6478_v63 = vadd.f32 %v8286_v11, %v6317_v22  ;;  %v8175_v8 = vpop.f32.mrb[240].mxu1  ;;  %v8289_v20 = vadd.f32 %v8288_v31, %v8287_v28  ;;  %v8290_v52 = vpop.f32.mrb[242].mxu0 }
 0x37d   : > { %v8176_v59 = vpop.f32.mrb[241].mxu1  ;;  %v8291_v3 = vpop.f32.mrb[243].mxu0 }
 0x37e   : > { %6615 = vst [vmem:[%s11853_s23 + $0x30] sm:$0xff] %v6583_v19  ;;  %v6584_v6 = vmax.f32 %v6478_v63, 0.0  ;;  %v8177_v12 = vadd.f32 %v8176_v59, %v8175_v8  ;;  %v8178_v18 = vpop.f32.mrb[242].mxu1  ;;  %v8292_v58 = vadd.f32 %v8291_v3, %v8290_v52 }
 0x37f   : > { %v8179_v60 = vpop.f32.mrb[243].mxu1 }
 0x380   : > { %6616 = vst [vmem:[%s11853_s23 + $0x38] sm:$0xff] %v6584_v6  ;;  %v6322_v61 = vadd.f32 %v8177_v12, %v11779_v24  ;;  %v8180_v39 = vadd.f32 %v8179_v60, %v8178_v18 }
 0x382   : > { %v6483_v45 = vadd.f32 %v8289_v20, %v6322_v61  ;;  %v6325_v29 = vadd.f32 %v8180_v39, %v11782_v23  ;;  %v8293_v42 = vpop.f32.mrb[244].mxu0 }
 0x383   : > { %v8294_v49 = vpop.f32.mrb[245].mxu0 }
 0x384   : > { %v6585_v51 = vmax.f32 %v6483_v45, 0.0  ;;  %v6486_v48 = vadd.f32 %v8292_v58, %v6325_v29  ;;  %v8181_v53 = vpop.f32.mrb[244].mxu1  ;;  %v8295_v26 = vadd.f32 %v8294_v49, %v8293_v42  ;;  %v8296_v46 = vpop.f32.mrb[246].mxu0 }
 0x385   : > { %v8182_v21 = vpop.f32.mrb[245].mxu1  ;;  %v8297_v33 = vpop.f32.mrb[247].mxu0 }
 0x386   : > { %6617 = vst [vmem:[%s11853_s23 + $0x40] sm:$0xff] %v6585_v51  ;;  %v6586_v16 = vmax.f32 %v6486_v48, 0.0  ;;  %v8183_v47 = vadd.f32 %v8182_v21, %v8181_v53  ;;  %v8184_v32 = vpop.f32.mrb[246].mxu1  ;;  %v8298_v14 = vadd.f32 %v8297_v33, %v8296_v46 }
 0x387   : > { %v8185_v24 = vpop.f32.mrb[247].mxu1 }
 0x388   : > { %6618 = vst [vmem:[%s11853_s23 + $0x48] sm:$0xff] %v6586_v16  ;;  %v6330_v23 = vadd.f32 %v8183_v47, %v11785_v1  ;;  %v8186_v54 = vadd.f32 %v8185_v24, %v8184_v32 }
 0x38a   : > { %v6491_v44 = vadd.f32 %v8295_v26, %v6330_v23  ;;  %v6333_v40 = vadd.f32 %v8186_v54, %v11788_v35  ;;  %v8299_v11 = vpop.f32.mrb[248].mxu0 }
 0x38b   : > { %v8300_v10 = vpop.f32.mrb[249].mxu0 }
 0x38c   : > { %v6587_v25 = vmax.f32 %v6491_v44, 0.0  ;;  %v6494_v50 = vadd.f32 %v8298_v14, %v6333_v40  ;;  %v8187_v27 = vpop.f32.mrb[248].mxu1  ;;  %v8301_v22 = vadd.f32 %v8300_v10, %v8299_v11  ;;  %v8302_v28 = vpop.f32.mrb[250].mxu0 }
 0x38d   : > { %v8188_v31 = vpop.f32.mrb[249].mxu1  ;;  %v8303_v19 = vpop.f32.mrb[251].mxu0 }
 0x38e   : > { %6619 = vst [vmem:[%s11853_s23 + $0x50] sm:$0xff] %v6587_v25  ;;  %v6588_v63 = vmax.f32 %v6494_v50, 0.0  ;;  %v8189_v8 = vadd.f32 %v8188_v31, %v8187_v27  ;;  %v8190_v20 = vpop.f32.mrb[250].mxu1  ;;  %v8304_v52 = vadd.f32 %v8303_v19, %v8302_v28 }
 0x38f   : > { %v8191_v1 = vpop.f32.mrb[251].mxu1 }
 0x390   : > { %6620 = vst [vmem:[%s11853_s23 + $0x58] sm:$0xff] %v6588_v63  ;;  %v6338_v35 = vadd.f32 %v8189_v8, %v11791_v34  ;;  %v8192_v59 = vadd.f32 %v8191_v1, %v8190_v20 }
 0x392   : > { %v6499_v3 = vadd.f32 %v8301_v22, %v6338_v35  ;;  %v6341_v6 = vadd.f32 %v8192_v59, %v11794_v9  ;;  %v8305_v12 = vpop.f32.mrb[252].mxu0 }
 0x393   : > { %v8306_v18 = vpop.f32.mrb[253].mxu0 }
 0x394   : > { %v6589_v58 = vmax.f32 %v6499_v3, 0.0  ;;  %v6502_v60 = vadd.f32 %v8304_v52, %v6341_v6  ;;  %v8193_v61 = vpop.f32.mrb[252].mxu1  ;;  %v8307_v39 = vadd.f32 %v8306_v18, %v8305_v12  ;;  %v8308_v45 = vpop.f32.mrb[254].mxu0 }
 0x395   : > { %v8194_v29 = vpop.f32.mrb[253].mxu1  ;;  %v8309_v42 = vpop.f32.mrb[255].mxu0 }
 0x396   : > { %6621 = vst [vmem:[%s11853_s23 + $0x60] sm:$0xff] %v6589_v58  ;;  %v6590_v49 = vmax.f32 %v6502_v60, 0.0  ;;  %v8195_v51 = vadd.f32 %v8194_v29, %v8193_v61  ;;  %v8196_v48 = vpop.f32.mrb[254].mxu1  ;;  %v8310_v53 = vadd.f32 %v8309_v42, %v8308_v45 }
 0x397   : > { %v8197_v34 = vpop.f32.mrb[255].mxu1 }
 0x398   : > { %6622 = vst [vmem:[%s11853_s23 + $0x68] sm:$0xff] %v6590_v49  ;;  %v6346_v9 = vadd.f32 %v8195_v51, %v11797_v4  ;;  %v8198_v26 = vadd.f32 %v8197_v34, %v8196_v48 }
 0x39a   : > { %v6507_v46 = vadd.f32 %v8307_v39, %v6346_v9  ;;  %v6349_v21 = vadd.f32 %v8198_v26, %v11800_v36  ;;  %v8311_v33 = vpop.f32.mrb[0].mxu0 }
 0x39b   : > { %v8312_v16 = vpop.f32.mrb[1].mxu0 }
 0x39c   : > { %v6591_v47 = vmax.f32 %v6507_v46, 0.0  ;;  %v6510_v32 = vadd.f32 %v8310_v53, %v6349_v21  ;;  %v8199_v14 = vpop.f32.mrb[0].mxu1  ;;  %v8313_v24 = vadd.f32 %v8312_v16, %v8311_v33  ;;  %v8314_v23 = vpop.f32.mrb[2].mxu0 }
 0x39d   : > { %v8200_v54 = vpop.f32.mrb[1].mxu1  ;;  %v8315_v44 = vpop.f32.mrb[3].mxu0 }
 0x39e   : > { %6623 = vst [vmem:[%s11853_s23 + $0x70] sm:$0xff] %v6591_v47  ;;  %v6592_v40 = vmax.f32 %v6510_v32, 0.0  ;;  %v8201_v11 = vadd.f32 %v8200_v54, %v8199_v14  ;;  %v8202_v10 = vpop.f32.mrb[2].mxu1  ;;  %v8316_v25 = vadd.f32 %v8315_v44, %v8314_v23 }
 0x39f   : > { %v8203_v4 = vpop.f32.mrb[3].mxu1 }
 0x3a0   : > { %6624 = vst [vmem:[%s11853_s23 + $0x78] sm:$0xff] %v6592_v40  ;;  %v6354_v36 = vadd.f32 %v8201_v11, %v11803_v62  ;;  %v8204_v50 = vadd.f32 %v8203_v4, %v8202_v10 }
 0x3a2   : > { %v6515_v27 = vadd.f32 %v8313_v24, %v6354_v36  ;;  %v6357_v22 = vadd.f32 %v8204_v50, %v11806_v41  ;;  %v8317_v28 = vpop.f32.mrb[4].mxu0 }
 0x3a3   : > { %v8318_v31 = vpop.f32.mrb[5].mxu0 }
 0x3a4   : > { %v6593_v19 = vmax.f32 %v6515_v27, 0.0  ;;  %v6518_v63 = vadd.f32 %v8316_v25, %v6357_v22  ;;  %v8205_v8 = vpop.f32.mrb[4].mxu1  ;;  %v8319_v20 = vadd.f32 %v8318_v31, %v8317_v28  ;;  %v8320_v52 = vpop.f32.mrb[6].mxu0 }
 0x3a5   : > { %v8206_v1 = vpop.f32.mrb[5].mxu1  ;;  %v8321_v35 = vpop.f32.mrb[7].mxu0 }
 0x3a6   : > { %6625 = vst [vmem:[%s11853_s23 + $0x80] sm:$0xff] %v6593_v19  ;;  %v6594_v59 = vmax.f32 %v6518_v63, 0.0  ;;  %v8207_v3 = vadd.f32 %v8206_v1, %v8205_v8  ;;  %v8208_v6 = vpop.f32.mrb[6].mxu1  ;;  %v8322_v12 = vadd.f32 %v8321_v35, %v8320_v52 }
 0x3a7   : > { %v8209_v62 = vpop.f32.mrb[7].mxu1 }
 0x3a8   : > { %6626 = vst [vmem:[%s11853_s23 + $0x88] sm:$0xff] %v6594_v59  ;;  %v6362_v41 = vadd.f32 %v8207_v3, %v11809_v0  ;;  %v8210_v18 = vadd.f32 %v8209_v62, %v8208_v6 }
 0x3aa   : > { %v6523_v58 = vadd.f32 %v8319_v20, %v6362_v41  ;;  %v6365_v60 = vadd.f32 %v8210_v18, %v11812_v5  ;;  %v8323_v61 = vpop.f32.mrb[8].mxu0 }
 0x3ab   : > { %v8324_v39 = vpop.f32.mrb[9].mxu0 }
 0x3ac   : > { %v6595_v45 = vmax.f32 %v6523_v58, 0.0  ;;  %v6526_v29 = vadd.f32 %v8322_v12, %v6365_v60  ;;  %v8211_v42 = vpop.f32.mrb[8].mxu1  ;;  %v8325_v49 = vadd.f32 %v8324_v39, %v8323_v61  ;;  %v8326_v51 = vpop.f32.mrb[10].mxu0 }
 0x3ad   : > { %v8212_v48 = vpop.f32.mrb[9].mxu1  ;;  %v8327_v53 = vpop.f32.mrb[11].mxu0 }
 0x3ae   : > { %6627 = vst [vmem:[%s11853_s23 + $0x90] sm:$0xff] %v6595_v45  ;;  %v6596_v34 = vmax.f32 %v6526_v29, 0.0  ;;  %v8213_v9 = vadd.f32 %v8212_v48, %v8211_v42  ;;  %v8214_v26 = vpop.f32.mrb[10].mxu1  ;;  %v8328_v46 = vadd.f32 %v8327_v53, %v8326_v51 }
 0x3af   : > { %v8215_v0 = vpop.f32.mrb[11].mxu1 }
 0x3b0   : > { %6628 = vst [vmem:[%s11853_s23 + $0x98] sm:$0xff] %v6596_v34  ;;  %v6370_v5 = vadd.f32 %v8213_v9, %v11815_v7  ;;  %v8216_v21 = vadd.f32 %v8215_v0, %v8214_v26 }
 0x3b2   : > { %v6531_v33 = vadd.f32 %v8325_v49, %v6370_v5  ;;  %v6373_v16 = vadd.f32 %v8216_v21, %v11818_v15  ;;  %v8329_v47 = vpop.f32.mrb[12].mxu0 }
 0x3b3   : > { %v8330_v32 = vpop.f32.mrb[13].mxu0 }
 0x3b4   : > { %v6597_v14 = vmax.f32 %v6531_v33, 0.0  ;;  %v6534_v24 = vadd.f32 %v8328_v46, %v6373_v16  ;;  %v8217_v23 = vpop.f32.mrb[12].mxu1  ;;  %v8331_v54 = vadd.f32 %v8330_v32, %v8329_v47  ;;  %v8332_v44 = vpop.f32.mrb[14].mxu0 }
 0x3b5   : > { %v8218_v40 = vpop.f32.mrb[13].mxu1  ;;  %v8333_v11 = vpop.f32.mrb[15].mxu0 }
 0x3b6   : > { %6629 = vst [vmem:[%s11853_s23 + $0xa0] sm:$0xff] %v6597_v14  ;;  %v6598_v10 = vmax.f32 %v6534_v24, 0.0  ;;  %v8219_v25 = vadd.f32 %v8218_v40, %v8217_v23  ;;  %v8220_v4 = vpop.f32.mrb[14].mxu1  ;;  %v8334_v36 = vadd.f32 %v8333_v11, %v8332_v44 }
 0x3b7   : > { %v8221_v7 = vpop.f32.mrb[15].mxu1 }
 0x3b8   : > { %6630 = vst [vmem:[%s11853_s23 + $0xa8] sm:$0xff] %v6598_v10  ;;  %v6378_v15 = vadd.f32 %v8219_v25, %v11821_v37  ;;  %v8222_v50 = vadd.f32 %v8221_v7, %v8220_v4 }
 0x3ba   : > { %v6539_v27 = vadd.f32 %v8331_v54, %v6378_v15  ;;  %v6381_v22 = vadd.f32 %v8222_v50, %v11824_v13  ;;  %v8335_v28 = vpop.f32.mrb[16].mxu0 }
 0x3bb   : > { %v8336_v31 = vpop.f32.mrb[17].mxu0 }
 0x3bc   : > { %v6599_v19 = vmax.f32 %v6539_v27, 0.0  ;;  %v6542_v63 = vadd.f32 %v8334_v36, %v6381_v22  ;;  %v8223_v8 = vpop.f32.mrb[16].mxu1  ;;  %v8337_v20 = vadd.f32 %v8336_v31, %v8335_v28  ;;  %v8338_v52 = vpop.f32.mrb[18].mxu0 }
 0x3bd   : > { %v8224_v1 = vpop.f32.mrb[17].mxu1  ;;  %v8339_v35 = vpop.f32.mrb[19].mxu0 }
 0x3be   : > { %6631 = vst [vmem:[%s11853_s23 + $0xb0] sm:$0xff] %v6599_v19  ;;  %v6600_v59 = vmax.f32 %v6542_v63, 0.0  ;;  %v8225_v3 = vadd.f32 %v8224_v1, %v8223_v8  ;;  %v8226_v6 = vpop.f32.mrb[18].mxu1  ;;  %v8340_v12 = vadd.f32 %v8339_v35, %v8338_v52 }
 0x3bf   : > { %v8227_v37 = vpop.f32.mrb[19].mxu1 }
 0x3c0   : > { %6632 = vst [vmem:[%s11853_s23 + $0xb8] sm:$0xff] %v6600_v59  ;;  %v6386_v13 = vadd.f32 %v8225_v3, %v11827_v57  ;;  %v8228_v62 = vadd.f32 %v8227_v37, %v8226_v6 }
 0x3c2   : > { %v6547_v41 = vadd.f32 %v8337_v20, %v6386_v13  ;;  %v6389_v18 = vadd.f32 %v8228_v62, %v11830_v17  ;;  %v8341_v58 = vpop.f32.mrb[20].mxu0 }
 0x3c3   : > { %v8342_v60 = vpop.f32.mrb[21].mxu0 }
 0x3c4   : > { %v6601_v61 = vmax.f32 %v6547_v41, 0.0  ;;  %v6550_v39 = vadd.f32 %v8340_v12, %v6389_v18  ;;  %v8229_v45 = vpop.f32.mrb[20].mxu1  ;;  %v8343_v29 = vadd.f32 %v8342_v60, %v8341_v58  ;;  %v8344_v42 = vpop.f32.mrb[22].mxu0 }
 0x3c5   : > { %v8230_v49 = vpop.f32.mrb[21].mxu1  ;;  %v8345_v51 = vpop.f32.mrb[23].mxu0 }
 0x3c6   : > { %6633 = vst [vmem:[%s11853_s23 + $0xc0] sm:$0xff] %v6601_v61  ;;  %v6602_v48 = vmax.f32 %v6550_v39, 0.0  ;;  %v8231_v53 = vadd.f32 %v8230_v49, %v8229_v45  ;;  %v8232_v34 = vpop.f32.mrb[22].mxu1  ;;  %v8346_v9 = vadd.f32 %v8345_v51, %v8344_v42 }
 0x3c7   : > { %v8233_v57 = vpop.f32.mrb[23].mxu1 }
 0x3c8   : > { %6634 = vst [vmem:[%s11853_s23 + $0xc8] sm:$0xff] %v6602_v48  ;;  %v6394_v17 = vadd.f32 %v8231_v53, %v11833_v2  ;;  %v8234_v26 = vadd.f32 %v8233_v57, %v8232_v34 }
 0x3ca   : > { %v6555_v46 = vadd.f32 %v8343_v29, %v6394_v17  ;;  %v6397_v0 = vadd.f32 %v8234_v26, %v11836_v43  ;;  %v8347_v5 = vpop.f32.mrb[24].mxu0 }
 0x3cb   : > { %v8348_v21 = vpop.f32.mrb[25].mxu0 }
 0x3cc   : > { %v6603_v33 = vmax.f32 %v6555_v46, 0.0  ;;  %v6558_v16 = vadd.f32 %v8346_v9, %v6397_v0  ;;  %v8235_v47 = vpop.f32.mrb[24].mxu1  ;;  %v8349_v32 = vadd.f32 %v8348_v21, %v8347_v5  ;;  %v8350_v14 = vpop.f32.mrb[26].mxu0 }
 0x3cd   : > { %v8236_v24 = vpop.f32.mrb[25].mxu1  ;;  %v8351_v23 = vpop.f32.mrb[27].mxu0 }
 0x3ce   : > { %6635 = vst [vmem:[%s11853_s23 + $0xd0] sm:$0xff] %v6603_v33  ;;  %v6604_v54 = vmax.f32 %v6558_v16, 0.0  ;;  %v8237_v44 = vadd.f32 %v8236_v24, %v8235_v47  ;;  %v8238_v40 = vpop.f32.mrb[26].mxu1  ;;  %v8352_v11 = vadd.f32 %v8351_v23, %v8350_v14 }
 0x3cf   : > { %v8239_v2 = vpop.f32.mrb[27].mxu1 }
 0x3d0   : > { %6636 = vst [vmem:[%s11853_s23 + $0xd8] sm:$0xff] %v6604_v54  ;;  %v6402_v43 = vadd.f32 %v8237_v44, %v11839_v56  ;;  %v8240_v10 = vadd.f32 %v8239_v2, %v8238_v40 }
 0x3d2   : > { %v6563_v25 = vadd.f32 %v8349_v32, %v6402_v43  ;;  %v6405_v4 = vadd.f32 %v8240_v10, %v11842_v30  ;;  %v8353_v36 = vpop.f32.mrb[28].mxu0 }
 0x3d3   : > { %v8354_v7 = vpop.f32.mrb[29].mxu0 }
 0x3d4   : > { %v6605_v15 = vmax.f32 %v6563_v25, 0.0  ;;  %v6566_v50 = vadd.f32 %v8352_v11, %v6405_v4  ;;  %v8241_v27 = vpop.f32.mrb[28].mxu1  ;;  %v8355_v22 = vadd.f32 %v8354_v7, %v8353_v36  ;;  %v8356_v28 = vpop.f32.mrb[30].mxu0 }
 0x3d5   : > { %v8242_v31 = vpop.f32.mrb[29].mxu1  ;;  %v8357_v19 = vpop.f32.mrb[31].mxu0 }
 0x3d6   : > { %6637 = vst [vmem:[%s11853_s23 + $0xe0] sm:$0xff] %v6605_v15  ;;  %v6606_v63 = vmax.f32 %v6566_v50, 0.0  ;;  %v8243_v56 = vadd.f32 %v8242_v31, %v8241_v27  ;;  %v8244_v8 = vpop.f32.mrb[30].mxu1  ;;  %v8358_v20 = vadd.f32 %v8357_v19, %v8356_v28 }
 0x3d7   : > { %v8245_v30 = vpop.f32.mrb[31].mxu1 }
 0x3d8   : > { %6638 = vst [vmem:[%s11853_s23 + $0xe8] sm:$0xff] %v6606_v63  ;;  %v6410_v52 = vadd.f32 %v8243_v56, %v11845_v55  ;;  %v8246_v1 = vadd.f32 %v8245_v30, %v8244_v8 }
 0x3da   : > { %v6571_v35 = vadd.f32 %v8355_v22, %v6410_v52  ;;  %v6413_v59 = vadd.f32 %v8246_v1, %v11848_v38 }
 0x3dc   : > { %v6607_v3 = vmax.f32 %v6571_v35, 0.0  ;;  %v6574_v6 = vadd.f32 %v8358_v20, %v6413_v59 }
 0x3de   : > { %6639 = vst [vmem:[%s11853_s23 + $0xf0] sm:$0xff] %v6607_v3  ;;  %v6608_v55 = vmax.f32 %v6574_v6, 0.0 }
 0x3e0   : > { %6640 = vst [vmem:[%s11853_s23 + $0xf8] sm:$0xff] %v6608_v55 }
 0x3e1   : > { %8969 = shalt.err (!%p8966_p7)
}
 0x3e2   : > { %s8970_s9 = scalar_lea.hbm %s11920_s12, 4096  ;;  %s8974_s5 = scalar_lea.hbm %s11977_s4, 8192 }
 0x3e3   : > { %p8971_p11 = scmp.ne.s32.totalorder %s11920_s12, %s8970_s9  ;;  %p8975_p12 = scmp.lt.u32.totalorder %s11920_s12, %s11977_s4 }
 0x3e4   : > { %p8976_p13 = scmp.lt.u32.totalorder %s8974_s5, %s8970_s9  ;;  %p8978_p2 = scmp.lt.u32.totalorder %s8970_s9, %s11920_s12 }
 0x3e5   : > { %p8972_p1 = pnand %p8971_p11, %p12193_p6 }
 0x3e6   : > { %p8977_p0 = por %p8976_p13, %p8975_p12 }
 0x3e7   : > { %p8973_p8 = pneg %p8972_p1 }
 0x3e8   : > { %p8979_p10 = por %p8978_p2, %p8977_p0 }
 0x3ea   : > { %p8980_p3 = pnand %p8979_p10, %p8973_p8 }
 0x3ec   : > { %8983 = shalt.err (!%p8980_p3)
}
 0x3ed   : > { %s9060_s25 = smov 128   ;;  %s9061_s21 = smov 8  }
 0x3ee   : > { %8392 = dma.vmem_to_hbm [thread:$0]  (%p12193_p6), %s11922_s7, 4096, %s11920_s12, %s6642_s29, %s9060_s25, %s9060_s25, %s9061_s21  }
 0x3ef PF: > { %s6673_s23 = sand.u32 1, %s9030_s15   ;;  %p12194_p4 = scmp.ne.s32.totalorder %s12017_s24, 0 }
 0x3f0   : > { %p12195_p9 = scmp.ge.s32.totalorder %s9050_s20, 2  ;;  %s6674_s14 = scalar_lea.sflag [#allocation5], %s6673_s23 }
 0x3f2   : > { %p8409_p5 = pnand %p12195_p9, %p12194_p4 }
 0x3f4   : > { %9025 = dma.done.wait (!%p8409_p5), %s6674_s14, 4096  }
 0x3f5   : > { %9027 = vsyncadd (!%p8409_p5), %s6674_s14, 4294963200  ;;  %s24_s20 = sadd.s32 1, %s9050_s20   ;;  %s12196_s15 = smov %s9034_s16 }
 0x3f6   : > { %p21_p7 = scmp.ge.s32.totalorder %s24_s20, 4   ;;  %s12197_s16 = smov %s9038_s17 }
 0x3f7   : > { %s12198_s17 = smov %s9234_s8  ;;  %s12199_s18 = smov %s9046_s19 }
 0x3f8   : > { %s12200_s19 = smov %s12202_s26  ;;  %23 = sbr.rel (!%p21_p7) target bundleno = 13 (0xd), region = 108 }
 0x3ff   :  { %6679 = vsyncpa [#allocation4], 1 }
 0x400   :  { %6681 = vsyncpa [#allocation4 + $0x1], 1 }
 0x401   :  { %6682 = vsyncpa [#allocation7], 1 }
 0x402   :  { %6684 = vsyncpa [#allocation7 + $0x1], 1 }
 0x403   :  { %6685 = vsyncpa [#allocation10], 1 }
 0x404   :  { %6686 = vsyncpa [#allocation5], 1 }
 0x405   :  { %6688 = vsyncpa [#allocation5 + $0x1], 1 }

</bundles_post_ra>
